<compile_context>
chip_gen: v7x
topology: tpu7x:2x2x1
jax: 0.10.0
libtpu: 0.0.40
codegen_flags: <defaults>
</compile_context>

<pallas_src>
import functools

import jax
import jax.numpy as jnp
import numpy as np
from jax.experimental import pallas as pl
from jax.experimental.pallas import tpu as pltpu

# ---- shapes implied by the module (Linear(2848, ...) forces input length 730) ----
L_IN = 730            # input sequence length (B, 1, 730)
C1, K1 = 16, 7
L1 = L_IN - K1 + 1    # 724 after conv1
LP = L1 // 2          # 362 after AvgPool1d(2, 2)
C2, K2 = 8, 7
L2 = LP - K2 + 1      # 356 after conv2
FLAT = C2 * L2        # 2848, matches Linear(2848, 1024)
HID1 = 1024
HID2 = 128
TN = 512              # N-tile of Linear(2848,1024): 2 grid steps, W3 tile = 1.4 MB int8


# ----------------------------- fused Pallas kernel --------------------------------
def _fused_kernel(xcols_ref, w1_ref, b1_ref, w2_ref, b2_ref,
                  w3_ref, s3_ref, b3_ref, w4_ref, b4_ref, w5_ref, b5_ref,
                  o_ref, f_ref, z2_ref):
    j = pl.program_id(0)
    nb = xcols_ref.shape[0]          # batch size (static)

    # ---------- grid step 0: whole conv block, cached in VMEM scratch ----------
    @pl.when(j == 0)
    def _():
        z2_ref[...] = jnp.zeros_like(z2_ref)
        w1 = w1_ref[...]             # (16, 7)
        b1 = b1_ref[...]             # (16, 1)
        w2 = w2_ref[...]             # (7, 8, 16)  conv2 weight, [k, c_out, c_in]
        b2 = b2_ref[...]             # (8, 1)
        # TODO(synk): if batch grows, pack batch into lanes in the wrapper
        # ((2, K1, B*LP)) so conv1/conv2 are batch-wide dots instead of this unroll.
        for b in range(nb):
            # conv1 + ReLU, evaluated on even / odd output positions separately
            he = jnp.dot(w1, xcols_ref[b, 0], preferred_element_type=jnp.float32)
            ho = jnp.dot(w1, xcols_ref[b, 1], preferred_element_type=jnp.float32)
            he = jnp.maximum(he + b1, 0.0)
            ho = jnp.maximum(ho + b1, 0.0)
            # AvgPool1d(2, 2): pair-mean on the VPU; kept in registers (no scratch)
            pooled = 0.5 * (he + ho)                              # (16, 362)
            # conv2 + ReLU as 7 accumulated (8,16)@(16,356) dots (no im2col temp)
            h2 = jnp.dot(w2[0], pooled[:, 0:L2],
                         preferred_element_type=jnp.float32)
            for k in range(1, K2):
                h2 = h2 + jnp.dot(w2[k], pooled[:, k:k + L2],
                                  preferred_element_type=jnp.float32)
            h2 = jnp.maximum(h2 + b2, 0.0).astype(f_ref.dtype)    # (8, 356)
            # flattened layout: f[c, b, l] == h2[c, l]; ONE wide store per batch elem
            f_ref[:, b:b + 1, :] = h2[:, None, :]

    # ---------- every step: one N-tile of Linear1 + ReLU, accumulate Linear2 ----------
    # W3 tile is int8; dequantize per-channel slab to bf16 right before the dot
    # (VPU work, hidden under the next tile's DMA); per-column scale folded below.
    acc = jnp.dot(f_ref[0], w3_ref[0].astype(jnp.bfloat16),
                  preferred_element_type=jnp.float32)
    for c in range(1, C2):
        acc = acc + jnp.dot(f_ref[c], w3_ref[c].astype(jnp.bfloat16),
                            preferred_element_type=jnp.float32)
    h1 = jnp.maximum(acc * s3_ref[...] + b3_ref[...], 0.0)        # (B, TN) f32
    z2_ref[...] += jnp.dot(h1.astype(jnp.bfloat16), w4_ref[...],
                           preferred_element_type=jnp.float32)    # (B, 128)

    # ---------- last step: bias+ReLU and the final (lane-dense, padded) Linear ----------
    @pl.when(j == pl.num_programs(0) - 1)
    def _():
        a2 = jnp.maximum(z2_ref[...] + b4_ref[...], 0.0)          # (B, 128)
        o_ref[...] = jnp.dot(a2, w5_ref[...],
                             preferred_element_type=jnp.float32) + b5_ref[...]


# ------------------------------- wrappers -----------------------------------------
def _conv1_im2col(x):
    """(B, 1, 730) -> (B, 2, 7, 362) with out[b, r, k, j] = x[b, 0, 2*j + r + k]."""
    x2 = x[:, 0, :]
    groups = []
    for r in range(2):
        rows = [x2[:, r + k: r + k + 2 * LP - 1: 2] for k in range(K1)]  # each (B, 362)
        groups.append(jnp.stack(rows, axis=1))                           # (B, 7, 362)
    return jnp.stack(groups, axis=1)                                     # (B, 2, 7, 362)


def _fused_forward(xcols, prepared):
    (w1p, b1p, w2p, b2p, w3p, s3p, b3p, w4p, b4p, w5p, b5p) = prepared
    batch = xcols.shape[0]
    hid1 = w3p.shape[2]
    tn = TN if hid1 % TN == 0 else hid1
    npad = w5p.shape[1]
    grid = (hid1 // tn,)

    args = (xcols, w1p, b1p, w2p, b2p, w3p, s3p, b3p, w4p, b4p, w5p, b5p)
    bytes_accessed = sum(int(a.size) * a.dtype.itemsize for a in args) + batch * npad * 4
    flops = 2 * batch * (C1 * K1 * L1 + C2 * (C1 * K2) * L2
                         + FLAT * hid1 + hid1 * HID2 + HID2 * npad)

    return pl.pallas_call(
        _fused_kernel,
        out_shape=jax.ShapeDtypeStruct((batch, npad), jnp.float32),
        grid_spec=pltpu.PrefetchScalarGridSpec(
            num_scalar_prefetch=0,
            grid=grid,
            in_specs=[
                pl.BlockSpec((batch, 2, K1, LP), lambda j: (0, 0, 0, 0)),  # conv1 im2col
                pl.BlockSpec((C1, K1), lambda j: (0, 0)),                  # w1
                pl.BlockSpec((C1, 1), lambda j: (0, 0)),                   # b1
                pl.BlockSpec((K2, C2, C1), lambda j: (0, 0, 0)),           # w2 [k, co, ci]
                pl.BlockSpec((C2, 1), lambda j: (0, 0)),                   # b2
                pl.BlockSpec((C2, L2, tn), lambda j: (0, 0, j)),           # W3 (int8) N-tile
                pl.BlockSpec((1, tn), lambda j: (0, j)),                   # s3 scale tile
                pl.BlockSpec((1, tn), lambda j: (0, j)),                   # b3 tile
                pl.BlockSpec((tn, HID2), lambda j: (j, 0)),                # W4 (bf16) K-tile
                pl.BlockSpec((1, HID2), lambda j: (0, 0)),                 # b4
                pl.BlockSpec((HID2, npad), lambda j: (0, 0)),              # W5 (lane-padded)
                pl.BlockSpec((1, npad), lambda j: (0, 0)),                 # b5 (lane-padded)
            ],
            out_specs=pl.BlockSpec((batch, npad), lambda j: (0, 0)),
            scratch_shapes=[
                pltpu.VMEM((C2, batch, L2), jnp.bfloat16),   # conv features (flattened view)
                pltpu.VMEM((batch, HID2), jnp.float32),      # Linear2 pre-act accumulator
            ]),
        compiler_params=pltpu.CompilerParams(
            # single grid axis is a reduction (Linear2 accumulates across W3 N-tiles)
            dimension_semantics=("arbitrary",),
            vmem_limit_bytes=32 * 1024 * 1024),
        cost_estimate=pl.CostEstimate(flops=int(flops), transcendentals=0,
                                      bytes_accessed=int(bytes_accessed)),
    )(*args)


def prepare_params(params):
    """One-time weight packing: kernel layouts, int8 W3 + scales, bf16 W4, padding."""
    (w1, b1, w2, b2, W3, b3, W4, b4, W5, b5) = params
    ncls = W5.shape[1]
    npad = ((ncls + 127) // 128) * 128
    w1p = w1[:, 0, :]                                               # (16, 7)
    b1p = b1.reshape(C1, 1)
    w2p = jnp.transpose(w2, (2, 0, 1))                              # (7, 8, 16): [k, co, ci]
    b2p = b2.reshape(C2, 1)
    # int8 quantization of W3 with per-output-column scales (dominant HBM stream)
    s3 = jnp.maximum(jnp.max(jnp.abs(W3), axis=0), 1e-30) / 127.0   # (1024,)
    w3q = jnp.clip(jnp.round(W3 / s3[None, :]), -127.0, 127.0).astype(jnp.int8)
    w3p = w3q.reshape(C2, L2, HID1)                                 # (8, 356, 1024) int8
    s3p = s3.reshape(1, HID1).astype(jnp.float32)
    b3p = b3.reshape(1, HID1)
    w4p = W4.astype(jnp.bfloat16)                                   # (1024, 128)
    b4p = b4.reshape(1, HID2)
    w5p = jnp.zeros((HID2, npad), jnp.float32).at[:, :ncls].set(W5)
    b5p = jnp.zeros((1, npad), jnp.float32).at[0, :ncls].set(b5)
    return (w1p, b1p, w2p, b2p, w3p, s3p, b3p, w4p, b4p, w5p, b5p)


@functools.partial(jax.jit, static_argnames=("nr_of_classes",))
def prototype_fft_forward(x, prepared, *, nr_of_classes):
    xcols = _conv1_im2col(x)                 # tiny strided-gather layout op (~80 KB at B=2)
    out = _fused_forward(xcols, prepared)    # (B, 128) lane-dense
    return out[:, :nr_of_classes]


# --------------------------- pure-JAX reference ------------------------------------
def reference_forward(x, params):
    (w1, b1, w2, b2, W3, b3, W4, b4, W5, b5) = params

    def conv1d(h, w, b):
        K = w.shape[2]
        Lout = h.shape[2] - K + 1
        acc = jnp.zeros((h.shape[0], w.shape[0], Lout), jnp.float32)
        for k in range(K):
            acc = acc + jnp.einsum('oc,bcl->bol', w[:, :, k], h[:, :, k:k + Lout])
        return acc + b[None, :, None]

    h = jnp.maximum(conv1d(x, w1, b1), 0.0)
    h = h.reshape(h.shape[0], h.shape[1], -1, 2).mean(-1)   # AvgPool1d(2, 2)
    h = jnp.maximum(conv1d(h, w2, b2), 0.0)
    f = h.reshape(x.shape[0], -1)
    y = jnp.maximum(f @ W3 + b3, 0.0)
    y = jnp.maximum(y @ W4 + b4, 0.0)
    return y @ W5 + b5


# ------------------------------- init / main ---------------------------------------
def init_params(key, nr_of_classes):
    ks = jax.random.split(key, 10)

    def u(k, shape, fan_in):
        bound = 1.0 / np.sqrt(fan_in)
        return jax.random.uniform(k, shape, jnp.float32, -bound, bound)

    w1 = u(ks[0], (C1, 1, K1), 1 * K1)
    b1 = u(ks[1], (C1,), 1 * K1)
    w2 = u(ks[2], (C2, C1, K2), C1 * K2)
    b2 = u(ks[3], (C2,), C1 * K2)
    W3 = u(ks[4], (FLAT, HID1), FLAT)
    b3 = u(ks[5], (HID1,), FLAT)
    W4 = u(ks[6], (HID1, HID2), HID1)
    b4 = u(ks[7], (HID2,), HID1)
    W5 = u(ks[8], (HID2, nr_of_classes), HID2)
    b5 = u(ks[9], (nr_of_classes,), HID2)
    return (w1, b1, w2, b2, W3, b3, W4, b4, W5, b5)


if __name__ == "__main__":
    nr_of_classes = 10
    B = 2

    key = jax.random.PRNGKey(0)
    pkey, xkey = jax.random.split(key)
    params = init_params(pkey, nr_of_classes)
    prepared = prepare_params(params)        # one-time packing (int8/bf16 streams, padding)
    x = jax.random.normal(xkey, (B, 1, L_IN), dtype=jnp.float32)

    out = prototype_fft_forward(x, prepared, nr_of_classes=nr_of_classes)
    out = jax.block_until_ready(out)
    assert out.shape == (B, nr_of_classes)
    assert bool(jnp.all(jnp.isfinite(out)))

    ref = reference_forward(x, params)
    # int8 W3 (per-column scales) + bf16 activation/W4 streaming with f32 accumulation:
    # observed error is ~1e-3 absolute on O(0.1) outputs; 3e-2 gives ample margin.
    np.testing.assert_allclose(np.asarray(out), np.asarray(ref), rtol=3e-2, atol=3e-2)

    print("KERNEL_OK")
</pallas_src>

<mosaic_0001>
module attributes {stable_mosaic.version = 11 : i64} {
  func.func @_fused_kernel(%arg0: i32, %arg1: memref<2x2x7x362xf32, #tpu.memory_space<vmem>>, %arg2: memref<16x7xf32, #tpu.memory_space<vmem>>, %arg3: memref<16x1xf32, #tpu.memory_space<vmem>>, %arg4: memref<7x8x16xf32, #tpu.memory_space<vmem>>, %arg5: memref<8x1xf32, #tpu.memory_space<vmem>>, %arg6: memref<8x356x512xi8, #tpu.memory_space<vmem>>, %arg7: memref<1x512xf32, #tpu.memory_space<vmem>>, %arg8: memref<1x512xf32, #tpu.memory_space<vmem>>, %arg9: memref<512x128xbf16, #tpu.memory_space<vmem>>, %arg10: memref<1x128xf32, #tpu.memory_space<vmem>>, %arg11: memref<128x128xf32, #tpu.memory_space<vmem>>, %arg12: memref<1x128xf32, #tpu.memory_space<vmem>>, %arg13: memref<2x128xf32, #tpu.memory_space<vmem>>, %arg14: memref<8x2x356xbf16, #tpu.memory_space<vmem>>, %arg15: memref<2x128xf32, #tpu.memory_space<vmem>>) attributes {dimension_semantics = [#tpu.dimension_semantics<arbitrary>], iteration_bounds = array<i64: 2>, scalar_prefetch = 0 : i64, scratch_operands = 2 : i64, tpu.core_type = #tpu.core_type<tc>, window_params = [{pipeline_mode = #tpu.pipeline_mode<synchronous>, transform_indices = @transform_0, window_bounds = array<i64: 2, 2, 7, 362>}, {pipeline_mode = #tpu.pipeline_mode<synchronous>, transform_indices = @transform_1, window_bounds = array<i64: 16, 7>}, {pipeline_mode = #tpu.pipeline_mode<synchronous>, transform_indices = @transform_2, window_bounds = array<i64: 16, 1>}, {pipeline_mode = #tpu.pipeline_mode<synchronous>, transform_indices = @transform_3, window_bounds = array<i64: 7, 8, 16>}, {pipeline_mode = #tpu.pipeline_mode<synchronous>, transform_indices = @transform_4, window_bounds = array<i64: 8, 1>}, {transform_indices = @transform_5, window_bounds = array<i64: 8, 356, 512>}, {transform_indices = @transform_6, window_bounds = array<i64: 1, 512>}, {transform_indices = @transform_7, window_bounds = array<i64: 1, 512>}, {transform_indices = @transform_8, window_bounds = array<i64: 512, 128>}, {pipeline_mode = #tpu.pipeline_mode<synchronous>, transform_indices = @transform_9, window_bounds = array<i64: 1, 128>}, {pipeline_mode = #tpu.pipeline_mode<synchronous>, transform_indices = @transform_10, window_bounds = array<i64: 128, 128>}, {pipeline_mode = #tpu.pipeline_mode<synchronous>, transform_indices = @transform_11, window_bounds = array<i64: 1, 128>}, {pipeline_mode = #tpu.pipeline_mode<synchronous>, transform_indices = @transform_12, window_bounds = array<i64: 2, 128>}]} {
    %c0_i32 = arith.constant 0 : i32
    %0 = arith.cmpi eq, %arg0, %c0_i32 : i32
    %1 = arith.extui %0 : i1 to i32
    %c0_i32_0 = arith.constant 0 : i32
    %2 = arith.cmpi ne, %1, %c0_i32_0 : i32
    scf.if %2 {
      %cst_61 = arith.constant 0.000000e+00 : f32
      %75 = vector.broadcast %cst_61 : f32 to vector<2x128xf32>
      %c0_62 = arith.constant 0 : index
      %c0_63 = arith.constant 0 : index
      %76 = vector.load %arg15[%c0_62, %c0_63] : memref<2x128xf32, #tpu.memory_space<vmem>>, vector<2x128xf32>
      tpu.vector_store %arg15[%c0_62, %c0_63], %75 {strides = array<i32>} : memref<2x128xf32, #tpu.memory_space<vmem>>, vector<2x128xf32>,
      %c0_64 = arith.constant 0 : index
      %c0_65 = arith.constant 0 : index
      %77 = vector.load %arg2[%c0_64, %c0_65] : memref<16x7xf32, #tpu.memory_space<vmem>>, vector<16x7xf32>
      %c0_66 = arith.constant 0 : index
      %c0_67 = arith.constant 0 : index
      %78 = vector.load %arg3[%c0_66, %c0_67] : memref<16x1xf32, #tpu.memory_space<vmem>>, vector<16x1xf32>
      %c0_68 = arith.constant 0 : index
      %c0_69 = arith.constant 0 : index
      %c0_70 = arith.constant 0 : index
      %79 = vector.load %arg4[%c0_68, %c0_69, %c0_70] : memref<7x8x16xf32, #tpu.memory_space<vmem>>, vector<7x8x16xf32>
      %c0_71 = arith.constant 0 : index
      %c0_72 = arith.constant 0 : index
      %80 = vector.load %arg5[%c0_71, %c0_72] : memref<8x1xf32, #tpu.memory_space<vmem>>, vector<8x1xf32>
      %c0_73 = arith.constant 0 : index
      %c0_74 = arith.constant 0 : index
      %c0_75 = arith.constant 0 : index
      %c0_76 = arith.constant 0 : index
      %81 = vector.load %arg1[%c0_73, %c0_74, %c0_75, %c0_76] : memref<2x2x7x362xf32, #tpu.memory_space<vmem>>, vector<1x1x7x362xf32>
      %82 = vector.shape_cast %81 : vector<1x1x7x362xf32> to vector<7x362xf32>
      %cst_77 = arith.constant dense<0.000000e+00> : vector<16x362xf32>
      %83 = tpu.matmul %77, %82, %cst_77 {dimension_numbers = #tpu.dot_dimension_numbers<[1], [0], [0], [1], [0, 0, 1, 1], [], []>} : vector<16x7xf32>, vector<7x362xf32>, vector<16x362xf32> -> vector<16x362xf32>
      %c0_78 = arith.constant 0 : index
      %c1_79 = arith.constant 1 : index
      %c0_80 = arith.constant 0 : index
      %c0_81 = arith.constant 0 : index
      %84 = vector.load %arg1[%c0_78, %c1_79, %c0_80, %c0_81] : memref<2x2x7x362xf32, #tpu.memory_space<vmem>>, vector<1x1x7x362xf32>
      %85 = vector.shape_cast %84 : vector<1x1x7x362xf32> to vector<7x362xf32>
      %cst_82 = arith.constant dense<0.000000e+00> : vector<16x362xf32>
      %86 = tpu.matmul %77, %85, %cst_82 {dimension_numbers = #tpu.dot_dimension_numbers<[1], [0], [0], [1], [0, 0, 1, 1], [], []>} : vector<16x7xf32>, vector<7x362xf32>, vector<16x362xf32> -> vector<16x362xf32>
      %87 = vector.broadcast %78 : vector<16x1xf32> to vector<16x362xf32>
      %88 = arith.addf %83, %87 : vector<16x362xf32>
      %cst_83 = arith.constant 0.000000e+00 : f32
      %89 = vector.broadcast %cst_83 : f32 to vector<16x362xf32>
      %90 = arith.maximumf %88, %89 : vector<16x362xf32>
      %91 = vector.broadcast %78 : vector<16x1xf32> to vector<16x362xf32>
      %92 = arith.addf %86, %91 : vector<16x362xf32>
      %cst_84 = arith.constant 0.000000e+00 : f32
      %93 = vector.broadcast %cst_84 : f32 to vector<16x362xf32>
      %94 = arith.maximumf %92, %93 : vector<16x362xf32>
      %95 = arith.addf %90, %94 : vector<16x362xf32>
      %cst_85 = arith.constant 5.000000e-01 : f32
      %96 = vector.broadcast %cst_85 : f32 to vector<16x362xf32>
      %97 = arith.mulf %96, %95 : vector<16x362xf32>
      %98 = vector.extract_strided_slice %79 {offsets = [0, 0, 0], sizes = [1, 8, 16], strides = [1, 1, 1]} : vector<7x8x16xf32> to vector<1x8x16xf32>
      %99 = vector.shape_cast %98 : vector<1x8x16xf32> to vector<8x16xf32>
      %100 = vector.extract_strided_slice %97 {offsets = [0, 0], sizes = [16, 356], strides = [1, 1]} : vector<16x362xf32> to vector<16x356xf32>
      %cst_86 = arith.constant dense<0.000000e+00> : vector<8x356xf32>
      %101 = tpu.matmul %99, %100, %cst_86 {dimension_numbers = #tpu.dot_dimension_numbers<[1], [0], [0], [1], [0, 0, 1, 1], [], []>} : vector<8x16xf32>, vector<16x356xf32>, vector<8x356xf32> -> vector<8x356xf32>
      %102 = vector.extract_strided_slice %79 {offsets = [1, 0, 0], sizes = [1, 8, 16], strides = [1, 1, 1]} : vector<7x8x16xf32> to vector<1x8x16xf32>
      %103 = vector.shape_cast %102 : vector<1x8x16xf32> to vector<8x16xf32>
      %104 = vector.extract_strided_slice %97 {offsets = [0, 1], sizes = [16, 356], strides = [1, 1]} : vector<16x362xf32> to vector<16x356xf32>
      %cst_87 = arith.constant dense<0.000000e+00> : vector<8x356xf32>
      %105 = tpu.matmul %103, %104, %cst_87 {dimension_numbers = #tpu.dot_dimension_numbers<[1], [0], [0], [1], [0, 0, 1, 1], [], []>} : vector<8x16xf32>, vector<16x356xf32>, vector<8x356xf32> -> vector<8x356xf32>
      %106 = arith.addf %101, %105 : vector<8x356xf32>
      %107 = vector.extract_strided_slice %79 {offsets = [2, 0, 0], sizes = [1, 8, 16], strides = [1, 1, 1]} : vector<7x8x16xf32> to vector<1x8x16xf32>
      %108 = vector.shape_cast %107 : vector<1x8x16xf32> to vector<8x16xf32>
      %109 = vector.extract_strided_slice %97 {offsets = [0, 2], sizes = [16, 356], strides = [1, 1]} : vector<16x362xf32> to vector<16x356xf32>
      %cst_88 = arith.constant dense<0.000000e+00> : vector<8x356xf32>
      %110 = tpu.matmul %108, %109, %cst_88 {dimension_numbers = #tpu.dot_dimension_numbers<[1], [0], [0], [1], [0, 0, 1, 1], [], []>} : vector<8x16xf32>, vector<16x356xf32>, vector<8x356xf32> -> vector<8x356xf32>
      %111 = arith.addf %106, %110 : vector<8x356xf32>
      %112 = vector.extract_strided_slice %79 {offsets = [3, 0, 0], sizes = [1, 8, 16], strides = [1, 1, 1]} : vector<7x8x16xf32> to vector<1x8x16xf32>
      %113 = vector.shape_cast %112 : vector<1x8x16xf32> to vector<8x16xf32>
      %114 = vector.extract_strided_slice %97 {offsets = [0, 3], sizes = [16, 356], strides = [1, 1]} : vector<16x362xf32> to vector<16x356xf32>
      %cst_89 = arith.constant dense<0.000000e+00> : vector<8x356xf32>
      %115 = tpu.matmul %113, %114, %cst_89 {dimension_numbers = #tpu.dot_dimension_numbers<[1], [0], [0], [1], [0, 0, 1, 1], [], []>} : vector<8x16xf32>, vector<16x356xf32>, vector<8x356xf32> -> vector<8x356xf32>
      %116 = arith.addf %111, %115 : vector<8x356xf32>
      %117 = vector.extract_strided_slice %79 {offsets = [4, 0, 0], sizes = [1, 8, 16], strides = [1, 1, 1]} : vector<7x8x16xf32> to vector<1x8x16xf32>
      %118 = vector.shape_cast %117 : vector<1x8x16xf32> to vector<8x16xf32>
      %119 = vector.extract_strided_slice %97 {offsets = [0, 4], sizes = [16, 356], strides = [1, 1]} : vector<16x362xf32> to vector<16x356xf32>
      %cst_90 = arith.constant dense<0.000000e+00> : vector<8x356xf32>
      %120 = tpu.matmul %118, %119, %cst_90 {dimension_numbers = #tpu.dot_dimension_numbers<[1], [0], [0], [1], [0, 0, 1, 1], [], []>} : vector<8x16xf32>, vector<16x356xf32>, vector<8x356xf32> -> vector<8x356xf32>
      %121 = arith.addf %116, %120 : vector<8x356xf32>
      %122 = vector.extract_strided_slice %79 {offsets = [5, 0, 0], sizes = [1, 8, 16], strides = [1, 1, 1]} : vector<7x8x16xf32> to vector<1x8x16xf32>
      %123 = vector.shape_cast %122 : vector<1x8x16xf32> to vector<8x16xf32>
      %124 = vector.extract_strided_slice %97 {offsets = [0, 5], sizes = [16, 356], strides = [1, 1]} : vector<16x362xf32> to vector<16x356xf32>
      %cst_91 = arith.constant dense<0.000000e+00> : vector<8x356xf32>
      %125 = tpu.matmul %123, %124, %cst_91 {dimension_numbers = #tpu.dot_dimension_numbers<[1], [0], [0], [1], [0, 0, 1, 1], [], []>} : vector<8x16xf32>, vector<16x356xf32>, vector<8x356xf32> -> vector<8x356xf32>
      %126 = arith.addf %121, %125 : vector<8x356xf32>
      %127 = vector.extract_strided_slice %79 {offsets = [6, 0, 0], sizes = [1, 8, 16], strides = [1, 1, 1]} : vector<7x8x16xf32> to vector<1x8x16xf32>
      %128 = vector.shape_cast %127 : vector<1x8x16xf32> to vector<8x16xf32>
      %129 = vector.extract_strided_slice %97 {offsets = [0, 6], sizes = [16, 356], strides = [1, 1]} : vector<16x362xf32> to vector<16x356xf32>
      %cst_92 = arith.constant dense<0.000000e+00> : vector<8x356xf32>
      %130 = tpu.matmul %128, %129, %cst_92 {dimension_numbers = #tpu.dot_dimension_numbers<[1], [0], [0], [1], [0, 0, 1, 1], [], []>} : vector<8x16xf32>, vector<16x356xf32>, vector<8x356xf32> -> vector<8x356xf32>
      %131 = arith.addf %126, %130 : vector<8x356xf32>
      %132 = vector.broadcast %80 : vector<8x1xf32> to vector<8x356xf32>
      %133 = arith.addf %131, %132 : vector<8x356xf32>
      %cst_93 = arith.constant 0.000000e+00 : f32
      %134 = vector.broadcast %cst_93 : f32 to vector<8x356xf32>
      %135 = arith.maximumf %133, %134 : vector<8x356xf32>
      %136 = arith.truncf %135 : vector<8x356xf32> to vector<8x356xbf16>
      %137 = vector.shape_cast %136 : vector<8x356xbf16> to vector<8x1x356xbf16>
      %c0_94 = arith.constant 0 : index
      %c0_95 = arith.constant 0 : index
      %c0_96 = arith.constant 0 : index
      %138 = vector.load %arg14[%c0_94, %c0_95, %c0_96] : memref<8x2x356xbf16, #tpu.memory_space<vmem>>, vector<8x1x356xbf16>
      tpu.vector_store %arg14[%c0_94, %c0_95, %c0_96], %137 {strides = array<i32>} : memref<8x2x356xbf16, #tpu.memory_space<vmem>>, vector<8x1x356xbf16>,
      %c1_97 = arith.constant 1 : index
      %c0_98 = arith.constant 0 : index
      %c0_99 = arith.constant 0 : index
      %c0_100 = arith.constant 0 : index
      %139 = vector.load %arg1[%c1_97, %c0_98, %c0_99, %c0_100] : memref<2x2x7x362xf32, #tpu.memory_space<vmem>>, vector<1x1x7x362xf32>
      %140 = vector.shape_cast %139 : vector<1x1x7x362xf32> to vector<7x362xf32>
      %cst_101 = arith.constant dense<0.000000e+00> : vector<16x362xf32>
      %141 = tpu.matmul %77, %140, %cst_101 {dimension_numbers = #tpu.dot_dimension_numbers<[1], [0], [0], [1], [0, 0, 1, 1], [], []>} : vector<16x7xf32>, vector<7x362xf32>, vector<16x362xf32> -> vector<16x362xf32>
      %c1_102 = arith.constant 1 : index
      %c1_103 = arith.constant 1 : index
      %c0_104 = arith.constant 0 : index
      %c0_105 = arith.constant 0 : index
      %142 = vector.load %arg1[%c1_102, %c1_103, %c0_104, %c0_105] : memref<2x2x7x362xf32, #tpu.memory_space<vmem>>, vector<1x1x7x362xf32>
      %143 = vector.shape_cast %142 : vector<1x1x7x362xf32> to vector<7x362xf32>
      %cst_106 = arith.constant dense<0.000000e+00> : vector<16x362xf32>
      %144 = tpu.matmul %77, %143, %cst_106 {dimension_numbers = #tpu.dot_dimension_numbers<[1], [0], [0], [1], [0, 0, 1, 1], [], []>} : vector<16x7xf32>, vector<7x362xf32>, vector<16x362xf32> -> vector<16x362xf32>
      %145 = vector.broadcast %78 : vector<16x1xf32> to vector<16x362xf32>
      %146 = arith.addf %141, %145 : vector<16x362xf32>
      %cst_107 = arith.constant 0.000000e+00 : f32
      %147 = vector.broadcast %cst_107 : f32 to vector<16x362xf32>
      %148 = arith.maximumf %146, %147 : vector<16x362xf32>
      %149 = vector.broadcast %78 : vector<16x1xf32> to vector<16x362xf32>
      %150 = arith.addf %144, %149 : vector<16x362xf32>
      %cst_108 = arith.constant 0.000000e+00 : f32
      %151 = vector.broadcast %cst_108 : f32 to vector<16x362xf32>
      %152 = arith.maximumf %150, %151 : vector<16x362xf32>
      %153 = arith.addf %148, %152 : vector<16x362xf32>
      %cst_109 = arith.constant 5.000000e-01 : f32
      %154 = vector.broadcast %cst_109 : f32 to vector<16x362xf32>
      %155 = arith.mulf %154, %153 : vector<16x362xf32>
      %156 = vector.extract_strided_slice %79 {offsets = [0, 0, 0], sizes = [1, 8, 16], strides = [1, 1, 1]} : vector<7x8x16xf32> to vector<1x8x16xf32>
      %157 = vector.shape_cast %156 : vector<1x8x16xf32> to vector<8x16xf32>
      %158 = vector.extract_strided_slice %155 {offsets = [0, 0], sizes = [16, 356], strides = [1, 1]} : vector<16x362xf32> to vector<16x356xf32>
      %cst_110 = arith.constant dense<0.000000e+00> : vector<8x356xf32>
      %159 = tpu.matmul %157, %158, %cst_110 {dimension_numbers = #tpu.dot_dimension_numbers<[1], [0], [0], [1], [0, 0, 1, 1], [], []>} : vector<8x16xf32>, vector<16x356xf32>, vector<8x356xf32> -> vector<8x356xf32>
      %160 = vector.extract_strided_slice %79 {offsets = [1, 0, 0], sizes = [1, 8, 16], strides = [1, 1, 1]} : vector<7x8x16xf32> to vector<1x8x16xf32>
      %161 = vector.shape_cast %160 : vector<1x8x16xf32> to vector<8x16xf32>
      %162 = vector.extract_strided_slice %155 {offsets = [0, 1], sizes = [16, 356], strides = [1, 1]} : vector<16x362xf32> to vector<16x356xf32>
      %cst_111 = arith.constant dense<0.000000e+00> : vector<8x356xf32>
      %163 = tpu.matmul %161, %162, %cst_111 {dimension_numbers = #tpu.dot_dimension_numbers<[1], [0], [0], [1], [0, 0, 1, 1], [], []>} : vector<8x16xf32>, vector<16x356xf32>, vector<8x356xf32> -> vector<8x356xf32>
      %164 = arith.addf %159, %163 : vector<8x356xf32>
      %165 = vector.extract_strided_slice %79 {offsets = [2, 0, 0], sizes = [1, 8, 16], strides = [1, 1, 1]} : vector<7x8x16xf32> to vector<1x8x16xf32>
      %166 = vector.shape_cast %165 : vector<1x8x16xf32> to vector<8x16xf32>
      %167 = vector.extract_strided_slice %155 {offsets = [0, 2], sizes = [16, 356], strides = [1, 1]} : vector<16x362xf32> to vector<16x356xf32>
      %cst_112 = arith.constant dense<0.000000e+00> : vector<8x356xf32>
      %168 = tpu.matmul %166, %167, %cst_112 {dimension_numbers = #tpu.dot_dimension_numbers<[1], [0], [0], [1], [0, 0, 1, 1], [], []>} : vector<8x16xf32>, vector<16x356xf32>, vector<8x356xf32> -> vector<8x356xf32>
      %169 = arith.addf %164, %168 : vector<8x356xf32>
      %170 = vector.extract_strided_slice %79 {offsets = [3, 0, 0], sizes = [1, 8, 16], strides = [1, 1, 1]} : vector<7x8x16xf32> to vector<1x8x16xf32>
      %171 = vector.shape_cast %170 : vector<1x8x16xf32> to vector<8x16xf32>
      %172 = vector.extract_strided_slice %155 {offsets = [0, 3], sizes = [16, 356], strides = [1, 1]} : vector<16x362xf32> to vector<16x356xf32>
      %cst_113 = arith.constant dense<0.000000e+00> : vector<8x356xf32>
      %173 = tpu.matmul %171, %172, %cst_113 {dimension_numbers = #tpu.dot_dimension_numbers<[1], [0], [0], [1], [0, 0, 1, 1], [], []>} : vector<8x16xf32>, vector<16x356xf32>, vector<8x356xf32> -> vector<8x356xf32>
      %174 = arith.addf %169, %173 : vector<8x356xf32>
      %175 = vector.extract_strided_slice %79 {offsets = [4, 0, 0], sizes = [1, 8, 16], strides = [1, 1, 1]} : vector<7x8x16xf32> to vector<1x8x16xf32>
      %176 = vector.shape_cast %175 : vector<1x8x16xf32> to vector<8x16xf32>
      %177 = vector.extract_strided_slice %155 {offsets = [0, 4], sizes = [16, 356], strides = [1, 1]} : vector<16x362xf32> to vector<16x356xf32>
      %cst_114 = arith.constant dense<0.000000e+00> : vector<8x356xf32>
      %178 = tpu.matmul %176, %177, %cst_114 {dimension_numbers = #tpu.dot_dimension_numbers<[1], [0], [0], [1], [0, 0, 1, 1], [], []>} : vector<8x16xf32>, vector<16x356xf32>, vector<8x356xf32> -> vector<8x356xf32>
      %179 = arith.addf %174, %178 : vector<8x356xf32>
      %180 = vector.extract_strided_slice %79 {offsets = [5, 0, 0], sizes = [1, 8, 16], strides = [1, 1, 1]} : vector<7x8x16xf32> to vector<1x8x16xf32>
      %181 = vector.shape_cast %180 : vector<1x8x16xf32> to vector<8x16xf32>
      %182 = vector.extract_strided_slice %155 {offsets = [0, 5], sizes = [16, 356], strides = [1, 1]} : vector<16x362xf32> to vector<16x356xf32>
      %cst_115 = arith.constant dense<0.000000e+00> : vector<8x356xf32>
      %183 = tpu.matmul %181, %182, %cst_115 {dimension_numbers = #tpu.dot_dimension_numbers<[1], [0], [0], [1], [0, 0, 1, 1], [], []>} : vector<8x16xf32>, vector<16x356xf32>, vector<8x356xf32> -> vector<8x356xf32>
      %184 = arith.addf %179, %183 : vector<8x356xf32>
      %185 = vector.extract_strided_slice %79 {offsets = [6, 0, 0], sizes = [1, 8, 16], strides = [1, 1, 1]} : vector<7x8x16xf32> to vector<1x8x16xf32>
      %186 = vector.shape_cast %185 : vector<1x8x16xf32> to vector<8x16xf32>
      %187 = vector.extract_strided_slice %155 {offsets = [0, 6], sizes = [16, 356], strides = [1, 1]} : vector<16x362xf32> to vector<16x356xf32>
      %cst_116 = arith.constant dense<0.000000e+00> : vector<8x356xf32>
      %188 = tpu.matmul %186, %187, %cst_116 {dimension_numbers = #tpu.dot_dimension_numbers<[1], [0], [0], [1], [0, 0, 1, 1], [], []>} : vector<8x16xf32>, vector<16x356xf32>, vector<8x356xf32> -> vector<8x356xf32>
      %189 = arith.addf %184, %188 : vector<8x356xf32>
      %190 = vector.broadcast %80 : vector<8x1xf32> to vector<8x356xf32>
      %191 = arith.addf %189, %190 : vector<8x356xf32>
      %cst_117 = arith.constant 0.000000e+00 : f32
      %192 = vector.broadcast %cst_117 : f32 to vector<8x356xf32>
      %193 = arith.maximumf %191, %192 : vector<8x356xf32>
      %194 = arith.truncf %193 : vector<8x356xf32> to vector<8x356xbf16>
      %195 = vector.shape_cast %194 : vector<8x356xbf16> to vector<8x1x356xbf16>
      %c0_118 = arith.constant 0 : index
      %c1_119 = arith.constant 1 : index
      %c0_120 = arith.constant 0 : index
      %196 = vector.load %arg14[%c0_118, %c1_119, %c0_120] : memref<8x2x356xbf16, #tpu.memory_space<vmem>>, vector<8x1x356xbf16>
      tpu.vector_store %arg14[%c0_118, %c1_119, %c0_120], %195 {strides = array<i32>} : memref<8x2x356xbf16, #tpu.memory_space<vmem>>, vector<8x1x356xbf16>,
    } else {
    }
    %c0 = arith.constant 0 : index
    %c0_1 = arith.constant 0 : index
    %c0_2 = arith.constant 0 : index
    %3 = vector.load %arg14[%c0, %c0_1, %c0_2] : memref<8x2x356xbf16, #tpu.memory_space<vmem>>, vector<1x2x356xbf16>
    %4 = vector.shape_cast %3 : vector<1x2x356xbf16> to vector<2x356xbf16>
    %c0_3 = arith.constant 0 : index
    %c0_4 = arith.constant 0 : index
    %c0_5 = arith.constant 0 : index
    %5 = vector.load %arg6[%c0_3, %c0_4, %c0_5] : memref<8x356x512xi8, #tpu.memory_space<vmem>>, vector<1x356x512xi8>
    %6 = vector.shape_cast %5 : vector<1x356x512xi8> to vector<356x512xi8>
    %7 = arith.sitofp %6 : vector<356x512xi8> to vector<356x512xbf16>
    %cst = arith.constant dense<0.000000e+00> : vector<2x512xf32>
    %8 = tpu.matmul %4, %7, %cst {dimension_numbers = #tpu.dot_dimension_numbers<[1], [0], [0], [1], [0, 0, 1, 1], [], []>} : vector<2x356xbf16>, vector<356x512xbf16>, vector<2x512xf32> -> vector<2x512xf32>
    %c1 = arith.constant 1 : index
    %c0_6 = arith.constant 0 : index
    %c0_7 = arith.constant 0 : index
    %9 = vector.load %arg14[%c1, %c0_6, %c0_7] : memref<8x2x356xbf16, #tpu.memory_space<vmem>>, vector<1x2x356xbf16>
    %10 = vector.shape_cast %9 : vector<1x2x356xbf16> to vector<2x356xbf16>
    %c1_8 = arith.constant 1 : index
    %c0_9 = arith.constant 0 : index
    %c0_10 = arith.constant 0 : index
    %11 = vector.load %arg6[%c1_8, %c0_9, %c0_10] : memref<8x356x512xi8, #tpu.memory_space<vmem>>, vector<1x356x512xi8>
    %12 = vector.shape_cast %11 : vector<1x356x512xi8> to vector<356x512xi8>
    %13 = arith.sitofp %12 : vector<356x512xi8> to vector<356x512xbf16>
    %cst_11 = arith.constant dense<0.000000e+00> : vector<2x512xf32>
    %14 = tpu.matmul %10, %13, %cst_11 {dimension_numbers = #tpu.dot_dimension_numbers<[1], [0], [0], [1], [0, 0, 1, 1], [], []>} : vector<2x356xbf16>, vector<356x512xbf16>, vector<2x512xf32> -> vector<2x512xf32>
    %15 = arith.addf %8, %14 : vector<2x512xf32>
    %c2 = arith.constant 2 : index
    %c0_12 = arith.constant 0 : index
    %c0_13 = arith.constant 0 : index
    %16 = vector.load %arg14[%c2, %c0_12, %c0_13] : memref<8x2x356xbf16, #tpu.memory_space<vmem>>, vector<1x2x356xbf16>
    %17 = vector.shape_cast %16 : vector<1x2x356xbf16> to vector<2x356xbf16>
    %c2_14 = arith.constant 2 : index
    %c0_15 = arith.constant 0 : index
    %c0_16 = arith.constant 0 : index
    %18 = vector.load %arg6[%c2_14, %c0_15, %c0_16] : memref<8x356x512xi8, #tpu.memory_space<vmem>>, vector<1x356x512xi8>
    %19 = vector.shape_cast %18 : vector<1x356x512xi8> to vector<356x512xi8>
    %20 = arith.sitofp %19 : vector<356x512xi8> to vector<356x512xbf16>
    %cst_17 = arith.constant dense<0.000000e+00> : vector<2x512xf32>
    %21 = tpu.matmul %17, %20, %cst_17 {dimension_numbers = #tpu.dot_dimension_numbers<[1], [0], [0], [1], [0, 0, 1, 1], [], []>} : vector<2x356xbf16>, vector<356x512xbf16>, vector<2x512xf32> -> vector<2x512xf32>
    %22 = arith.addf %15, %21 : vector<2x512xf32>
    %c3 = arith.constant 3 : index
    %c0_18 = arith.constant 0 : index
    %c0_19 = arith.constant 0 : index
    %23 = vector.load %arg14[%c3, %c0_18, %c0_19] : memref<8x2x356xbf16, #tpu.memory_space<vmem>>, vector<1x2x356xbf16>
    %24 = vector.shape_cast %23 : vector<1x2x356xbf16> to vector<2x356xbf16>
    %c3_20 = arith.constant 3 : index
    %c0_21 = arith.constant 0 : index
    %c0_22 = arith.constant 0 : index
    %25 = vector.load %arg6[%c3_20, %c0_21, %c0_22] : memref<8x356x512xi8, #tpu.memory_space<vmem>>, vector<1x356x512xi8>
    %26 = vector.shape_cast %25 : vector<1x356x512xi8> to vector<356x512xi8>
    %27 = arith.sitofp %26 : vector<356x512xi8> to vector<356x512xbf16>
    %cst_23 = arith.constant dense<0.000000e+00> : vector<2x512xf32>
    %28 = tpu.matmul %24, %27, %cst_23 {dimension_numbers = #tpu.dot_dimension_numbers<[1], [0], [0], [1], [0, 0, 1, 1], [], []>} : vector<2x356xbf16>, vector<356x512xbf16>, vector<2x512xf32> -> vector<2x512xf32>
    %29 = arith.addf %22, %28 : vector<2x512xf32>
    %c4 = arith.constant 4 : index
    %c0_24 = arith.constant 0 : index
    %c0_25 = arith.constant 0 : index
    %30 = vector.load %arg14[%c4, %c0_24, %c0_25] : memref<8x2x356xbf16, #tpu.memory_space<vmem>>, vector<1x2x356xbf16>
    %31 = vector.shape_cast %30 : vector<1x2x356xbf16> to vector<2x356xbf16>
    %c4_26 = arith.constant 4 : index
    %c0_27 = arith.constant 0 : index
    %c0_28 = arith.constant 0 : index
    %32 = vector.load %arg6[%c4_26, %c0_27, %c0_28] : memref<8x356x512xi8, #tpu.memory_space<vmem>>, vector<1x356x512xi8>
    %33 = vector.shape_cast %32 : vector<1x356x512xi8> to vector<356x512xi8>
    %34 = arith.sitofp %33 : vector<356x512xi8> to vector<356x512xbf16>
    %cst_29 = arith.constant dense<0.000000e+00> : vector<2x512xf32>
    %35 = tpu.matmul %31, %34, %cst_29 {dimension_numbers = #tpu.dot_dimension_numbers<[1], [0], [0], [1], [0, 0, 1, 1], [], []>} : vector<2x356xbf16>, vector<356x512xbf16>, vector<2x512xf32> -> vector<2x512xf32>
    %36 = arith.addf %29, %35 : vector<2x512xf32>
    %c5 = arith.constant 5 : index
    %c0_30 = arith.constant 0 : index
    %c0_31 = arith.constant 0 : index
    %37 = vector.load %arg14[%c5, %c0_30, %c0_31] : memref<8x2x356xbf16, #tpu.memory_space<vmem>>, vector<1x2x356xbf16>
    %38 = vector.shape_cast %37 : vector<1x2x356xbf16> to vector<2x356xbf16>
    %c5_32 = arith.constant 5 : index
    %c0_33 = arith.constant 0 : index
    %c0_34 = arith.constant 0 : index
    %39 = vector.load %arg6[%c5_32, %c0_33, %c0_34] : memref<8x356x512xi8, #tpu.memory_space<vmem>>, vector<1x356x512xi8>
    %40 = vector.shape_cast %39 : vector<1x356x512xi8> to vector<356x512xi8>
    %41 = arith.sitofp %40 : vector<356x512xi8> to vector<356x512xbf16>
    %cst_35 = arith.constant dense<0.000000e+00> : vector<2x512xf32>
    %42 = tpu.matmul %38, %41, %cst_35 {dimension_numbers = #tpu.dot_dimension_numbers<[1], [0], [0], [1], [0, 0, 1, 1], [], []>} : vector<2x356xbf16>, vector<356x512xbf16>, vector<2x512xf32> -> vector<2x512xf32>
    %43 = arith.addf %36, %42 : vector<2x512xf32>
    %c6 = arith.constant 6 : index
    %c0_36 = arith.constant 0 : index
    %c0_37 = arith.constant 0 : index
    %44 = vector.load %arg14[%c6, %c0_36, %c0_37] : memref<8x2x356xbf16, #tpu.memory_space<vmem>>, vector<1x2x356xbf16>
    %45 = vector.shape_cast %44 : vector<1x2x356xbf16> to vector<2x356xbf16>
    %c6_38 = arith.constant 6 : index
    %c0_39 = arith.constant 0 : index
    %c0_40 = arith.constant 0 : index
    %46 = vector.load %arg6[%c6_38, %c0_39, %c0_40] : memref<8x356x512xi8, #tpu.memory_space<vmem>>, vector<1x356x512xi8>
    %47 = vector.shape_cast %46 : vector<1x356x512xi8> to vector<356x512xi8>
    %48 = arith.sitofp %47 : vector<356x512xi8> to vector<356x512xbf16>
    %cst_41 = arith.constant dense<0.000000e+00> : vector<2x512xf32>
    %49 = tpu.matmul %45, %48, %cst_41 {dimension_numbers = #tpu.dot_dimension_numbers<[1], [0], [0], [1], [0, 0, 1, 1], [], []>} : vector<2x356xbf16>, vector<356x512xbf16>, vector<2x512xf32> -> vector<2x512xf32>
    %50 = arith.addf %43, %49 : vector<2x512xf32>
    %c7 = arith.constant 7 : index
    %c0_42 = arith.constant 0 : index
    %c0_43 = arith.constant 0 : index
    %51 = vector.load %arg14[%c7, %c0_42, %c0_43] : memref<8x2x356xbf16, #tpu.memory_space<vmem>>, vector<1x2x356xbf16>
    %52 = vector.shape_cast %51 : vector<1x2x356xbf16> to vector<2x356xbf16>
    %c7_44 = arith.constant 7 : index
    %c0_45 = arith.constant 0 : index
    %c0_46 = arith.constant 0 : index
    %53 = vector.load %arg6[%c7_44, %c0_45, %c0_46] : memref<8x356x512xi8, #tpu.memory_space<vmem>>, vector<1x356x512xi8>
    %54 = vector.shape_cast %53 : vector<1x356x512xi8> to vector<356x512xi8>
    %55 = arith.sitofp %54 : vector<356x512xi8> to vector<356x512xbf16>
    %cst_47 = arith.constant dense<0.000000e+00> : vector<2x512xf32>
    %56 = tpu.matmul %52, %55, %cst_47 {dimension_numbers = #tpu.dot_dimension_numbers<[1], [0], [0], [1], [0, 0, 1, 1], [], []>} : vector<2x356xbf16>, vector<356x512xbf16>, vector<2x512xf32> -> vector<2x512xf32>
    %57 = arith.addf %50, %56 : vector<2x512xf32>
    %c0_48 = arith.constant 0 : index
    %c0_49 = arith.constant 0 : index
    %58 = vector.load %arg7[%c0_48, %c0_49] : memref<1x512xf32, #tpu.memory_space<vmem>>, vector<1x512xf32>
    %59 = vector.broadcast %58 : vector<1x512xf32> to vector<2x512xf32>
    %60 = arith.mulf %57, %59 : vector<2x512xf32>
    %c0_50 = arith.constant 0 : index
    %c0_51 = arith.constant 0 : index
    %61 = vector.load %arg8[%c0_50, %c0_51] : memref<1x512xf32, #tpu.memory_space<vmem>>, vector<1x512xf32>
    %62 = vector.broadcast %61 : vector<1x512xf32> to vector<2x512xf32>
    %63 = arith.addf %60, %62 : vector<2x512xf32>
    %cst_52 = arith.constant 0.000000e+00 : f32
    %64 = vector.broadcast %cst_52 : f32 to vector<2x512xf32>
    %65 = arith.maximumf %63, %64 : vector<2x512xf32>
    %c0_53 = arith.constant 0 : index
    %c0_54 = arith.constant 0 : index
    %66 = vector.load %arg15[%c0_53, %c0_54] : memref<2x128xf32, #tpu.memory_space<vmem>>, vector<2x128xf32>
    %67 = arith.truncf %65 : vector<2x512xf32> to vector<2x512xbf16>
    %c0_55 = arith.constant 0 : index
    %c0_56 = arith.constant 0 : index
    %68 = vector.load %arg9[%c0_55, %c0_56] : memref<512x128xbf16, #tpu.memory_space<vmem>>, vector<512x128xbf16>
    %cst_57 = arith.constant dense<0.000000e+00> : vector<2x128xf32>
    %69 = tpu.matmul %67, %68, %cst_57 {dimension_numbers = #tpu.dot_dimension_numbers<[1], [0], [0], [1], [0, 0, 1, 1], [], []>} : vector<2x512xbf16>, vector<512x128xbf16>, vector<2x128xf32> -> vector<2x128xf32>
    %70 = arith.addf %66, %69 : vector<2x128xf32>
    %c0_58 = arith.constant 0 : index
    %c0_59 = arith.constant 0 : index
    %71 = vector.load %arg15[%c0_58, %c0_59] : memref<2x128xf32, #tpu.memory_space<vmem>>, vector<2x128xf32>
    tpu.vector_store %arg15[%c0_58, %c0_59], %70 {strides = array<i32>} : memref<2x128xf32, #tpu.memory_space<vmem>>, vector<2x128xf32>,
    %c1_i32 = arith.constant 1 : i32
    %72 = arith.cmpi eq, %arg0, %c1_i32 : i32
    %73 = arith.extui %72 : i1 to i32
    %c0_i32_60 = arith.constant 0 : i32
    %74 = arith.cmpi ne, %73, %c0_i32_60 : i32
    scf.if %74 {
      %c0_61 = arith.constant 0 : index
      %c0_62 = arith.constant 0 : index
      %75 = vector.load %arg15[%c0_61, %c0_62] : memref<2x128xf32, #tpu.memory_space<vmem>>, vector<2x128xf32>
      %c0_63 = arith.constant 0 : index
      %c0_64 = arith.constant 0 : index
      %76 = vector.load %arg10[%c0_63, %c0_64] : memref<1x128xf32, #tpu.memory_space<vmem>>, vector<1x128xf32>
      %77 = vector.broadcast %76 : vector<1x128xf32> to vector<2x128xf32>
      %78 = arith.addf %75, %77 : vector<2x128xf32>
      %cst_65 = arith.constant 0.000000e+00 : f32
      %79 = vector.broadcast %cst_65 : f32 to vector<2x128xf32>
      %80 = arith.maximumf %78, %79 : vector<2x128xf32>
      %c0_66 = arith.constant 0 : index
      %c0_67 = arith.constant 0 : index
      %81 = vector.load %arg11[%c0_66, %c0_67] : memref<128x128xf32, #tpu.memory_space<vmem>>, vector<128x128xf32>
      %cst_68 = arith.constant dense<0.000000e+00> : vector<2x128xf32>
      %82 = tpu.matmul %80, %81, %cst_68 {dimension_numbers = #tpu.dot_dimension_numbers<[1], [0], [0], [1], [0, 0, 1, 1], [], []>} : vector<2x128xf32>, vector<128x128xf32>, vector<2x128xf32> -> vector<2x128xf32>
      %c0_69 = arith.constant 0 : index
      %c0_70 = arith.constant 0 : index
      %83 = vector.load %arg12[%c0_69, %c0_70] : memref<1x128xf32, #tpu.memory_space<vmem>>, vector<1x128xf32>
      %84 = vector.broadcast %83 : vector<1x128xf32> to vector<2x128xf32>
      %85 = arith.addf %82, %84 : vector<2x128xf32>
      %c0_71 = arith.constant 0 : index
      %c0_72 = arith.constant 0 : index
      %86 = vector.load %arg13[%c0_71, %c0_72] : memref<2x128xf32, #tpu.memory_space<vmem>>, vector<2x128xf32>
      tpu.vector_store %arg13[%c0_71, %c0_72], %85 {strides = array<i32>} : memref<2x128xf32, #tpu.memory_space<vmem>>, vector<2x128xf32>,
    } else {
    }
    return
  }
  func.func @transform_0(%arg0: i32) -> (i32, i32, i32, i32) {
    %c0_i32 = arith.constant 0 : i32
    %c0_i32_0 = arith.constant 0 : i32
    %c0_i32_1 = arith.constant 0 : i32
    %c0_i32_2 = arith.constant 0 : i32
    %c0_i32_3 = arith.constant 0 : i32
    return %c0_i32, %c0_i32_0, %c0_i32_1, %c0_i32_2 : i32, i32, i32, i32
  }
  func.func @transform_1(%arg0: i32) -> (i32, i32) {
    %c0_i32 = arith.constant 0 : i32
    %c0_i32_0 = arith.constant 0 : i32
    %c0_i32_1 = arith.constant 0 : i32
    return %c0_i32, %c0_i32_0 : i32, i32
  }
  func.func @transform_2(%arg0: i32) -> (i32, i32) {
    %c0_i32 = arith.constant 0 : i32
    %c0_i32_0 = arith.constant 0 : i32
    %c0_i32_1 = arith.constant 0 : i32
    return %c0_i32, %c0_i32_0 : i32, i32
  }
  func.func @transform_3(%arg0: i32) -> (i32, i32, i32) {
    %c0_i32 = arith.constant 0 : i32
    %c0_i32_0 = arith.constant 0 : i32
    %c0_i32_1 = arith.constant 0 : i32
    %c0_i32_2 = arith.constant 0 : i32
    return %c0_i32, %c0_i32_0, %c0_i32_1 : i32, i32, i32
  }
  func.func @transform_4(%arg0: i32) -> (i32, i32) {
    %c0_i32 = arith.constant 0 : i32
    %c0_i32_0 = arith.constant 0 : i32
    %c0_i32_1 = arith.constant 0 : i32
    return %c0_i32, %c0_i32_0 : i32, i32
  }
  func.func @transform_5(%arg0: i32) -> (i32, i32, i32) {
    %c0_i32 = arith.constant 0 : i32
    %c0_i32_0 = arith.constant 0 : i32
    %c0_i32_1 = arith.constant 0 : i32
    return %c0_i32, %c0_i32_0, %arg0 : i32, i32, i32
  }
  func.func @transform_6(%arg0: i32) -> (i32, i32) {
    %c0_i32 = arith.constant 0 : i32
    %c0_i32_0 = arith.constant 0 : i32
    return %c0_i32, %arg0 : i32, i32
  }
  func.func @transform_7(%arg0: i32) -> (i32, i32) {
    %c0_i32 = arith.constant 0 : i32
    %c0_i32_0 = arith.constant 0 : i32
    return %c0_i32, %arg0 : i32, i32
  }
  func.func @transform_8(%arg0: i32) -> (i32, i32) {
    %c0_i32 = arith.constant 0 : i32
    %c0_i32_0 = arith.constant 0 : i32
    return %arg0, %c0_i32 : i32, i32
  }
  func.func @transform_9(%arg0: i32) -> (i32, i32) {
    %c0_i32 = arith.constant 0 : i32
    %c0_i32_0 = arith.constant 0 : i32
    %c0_i32_1 = arith.constant 0 : i32
    return %c0_i32, %c0_i32_0 : i32, i32
  }
  func.func @transform_10(%arg0: i32) -> (i32, i32) {
    %c0_i32 = arith.constant 0 : i32
    %c0_i32_0 = arith.constant 0 : i32
    %c0_i32_1 = arith.constant 0 : i32
    return %c0_i32, %c0_i32_0 : i32, i32
  }
  func.func @transform_11(%arg0: i32) -> (i32, i32) {
    %c0_i32 = arith.constant 0 : i32
    %c0_i32_0 = arith.constant 0 : i32
    %c0_i32_1 = arith.constant 0 : i32
    return %c0_i32, %c0_i32_0 : i32, i32
  }
  func.func @transform_12(%arg0: i32) -> (i32, i32) {
    %c0_i32 = arith.constant 0 : i32
    %c0_i32_0 = arith.constant 0 : i32
    %c0_i32_1 = arith.constant 0 : i32
    return %c0_i32, %c0_i32_0 : i32, i32
  }
}

</mosaic_0001>

<bundles_post_ra>
// kernel: prototype_fft_forward.1
= control target key start
LH: loop header
LB: loop body
LE: loop exit
PB: predicated region body
PF: predicated region fallthrough
CT: control target
= control target key end

     0   :  { %s16281_s0 = inlined_call_operand.vmem [shape: f32[2,2,7,362], index: 0, kind: input, shape index: {}]   ;;  %s16282_s1 = inlined_call_operand.vmem [shape: f32[16,7], index: 1, kind: input, shape index: {}]   ;;  %s16283_s2 = inlined_call_operand.vmem [shape: f32[16,1], index: 2, kind: input, shape index: {}]   ;;  %s16284_s3 = inlined_call_operand.vmem [shape: f32[7,8,16], index: 3, kind: input, shape index: {}]   ;;  %s16285_s4 = inlined_call_operand.vmem [shape: f32[8,1], index: 4, kind: input, shape index: {}]   ;;  %s16286_s5 = inlined_call_operand.vmem [shape: s8[8,356,1024], index: 5, kind: input, shape index: {}]   ;;  %s16287_s6 = inlined_call_operand.vmem [shape: f32[1,1024], index: 6, kind: input, shape index: {}]   ;;  %s16288_s7 = inlined_call_operand.vmem [shape: f32[1,1024], index: 7, kind: input, shape index: {}]   ;;  %s16289_s8 = inlined_call_operand.vmem [shape: bf16[1024,128], index: 8, kind: input, shape index: {}]   ;;  %s16290_s9 = inlined_call_operand.vmem [shape: f32[1,128], index: 9, kind: input, shape index: {}]   ;;  %s16291_s10 = inlined_call_operand.vmem [shape: f32[128,128], index: 10, kind: input, shape index: {}]   ;;  %s16292_s11 = inlined_call_operand.vmem [shape: f32[1,128], index: 11, kind: input, shape index: {}]   ;;  %s16293_s12 = inlined_call_operand.hbm [shape: f32[2,128], index: 12, kind: output, shape index: {}]  }
   0x1   :  { %16294 = sst [smem:[#allocation9_spill]] %s16286_s5 }
   0x2   :  { %17 = vsyncpa [#allocation6], 0  ;;  %s14299_s21 = smov 0   ;;  %s14301_s22 = smov 0  }
   0x3   :  { %s14303_s23 = smov 0  }
   0x4 LB: > { %s14315_s24 = sadd.s32 4294967295, %s14215_s23   ;;  %s14318_s25 = sadd.s32 1, %s14215_s23   ;;  %s14215_s23 = sphi %s14303_s23, %s16311_s23   ;;  %s14211_s22 = sphi %s14301_s22, %s16310_s22   ;;  %s14207_s21 = sphi %s14299_s21, %s16309_s21  }
   0x5   : > { %s132_s26 = ssub.s32 %s14215_s23, %s14318_s25  ;;  %s135_s27 = sadd.s32 1, %s14211_s22 }
   0x6   : > { %p133_p0 = scmp.eq.s32.totalorder %s132_s26, 0  ;;  %p142_p1 = scmp.ne.s32.totalorder %s14211_s22, %s14207_s21 }
   0x7   : > { %p143_p2 = scmp.eq.s32.totalorder %s14215_s23, 0  ;;  %p12152_p4 = scmp.ge.s32.totalorder %s14215_s23, 2 }
   0x8   : > { %s14327_s28 = scalar_select %p133_p0, %s14211_s22, %s135_s27  }
   0x9   : > { %p144_p3 = por %p143_p2, %p142_p1  ;;  %354 = sbr.rel (%p12152_p4) target bundleno = 206 (0xce), region = 48 }
   0xa   : > { %16295 = sst [smem:[#allocation8_spill]] %s14327_s28 }
  0x10   : > { %357 = sbr.rel (!%p144_p3) target bundleno = 206 (0xce), region = 52  ;;  %s359_s29 = sand.u32 (%p144_p3), 1, %s14211_s22  }
  0x11   : > { %s13366_s30 = sshll.u32 (%p144_p3), %s14215_s23, 3  ;;  %s13901_s13 = smul.u32 (%p144_p3), 2880, %s359_s29 }
  0x12   : > { %s16296_s5 = sld [smem:[#allocation9_spill]] (%p144_p3) }
  0x13   : > { %s14343_s17 = scalar_lea.vmem (%p144_p3), [#allocation4], %s13901_s13 }
  0x18   : > { %s14335_s16 = scalar_lea.vmem %s16296_s5, %s13366_s30 }
  0x19   : > { %v1110_v0 = vld [vmem:[%s14335_s16] sm:$0xff]  ;;  %v1112_v1 = vld [vmem:[%s14335_s16 + $0x10] sm:$0xff] }
  0x1a   : > { %v1114_v2 = vld [vmem:[%s14335_s16 + $0x20] sm:$0xff]  ;;  %v1116_v3 = vld [vmem:[%s14335_s16 + $0x30] sm:$0xff]  ;;  %1111 = vst [vmem:[%s14343_s17] sm:$0xff] %v1110_v0  ;;  %1113 = vst [vmem:[%s14343_s17 + $0x8] sm:$0xff] %v1112_v1 }
  0x1b   : > { %v1118_v4 = vld [vmem:[%s14335_s16 + $0x40] sm:$0xff]  ;;  %v1120_v5 = vld [vmem:[%s14335_s16 + $0x50] sm:$0xff]  ;;  %1115 = vst [vmem:[%s14343_s17 + $0x10] sm:$0xff] %v1114_v2  ;;  %1117 = vst [vmem:[%s14343_s17 + $0x18] sm:$0xff] %v1116_v3 }
  0x1c   : > { %1119 = vst [vmem:[%s14343_s17 + $0x20] sm:$0xff] %v1118_v4  ;;  %1121 = vst [vmem:[%s14343_s17 + $0x28] sm:$0xff] %v1120_v5  ;;  %v1122_v6 = vld [vmem:[%s14335_s16 + $0x60] sm:$0xff]  ;;  %v1124_v7 = vld [vmem:[%s14335_s16 + $0x70] sm:$0xff] }
  0x1d   : > { %v1126_v8 = vld [vmem:[%s14335_s16 + $0x80] sm:$0xff]  ;;  %1123 = vst [vmem:[%s14343_s17 + $0x30] sm:$0xff] %v1122_v6  ;;  %1125 = vst [vmem:[%s14343_s17 + $0x38] sm:$0xff] %v1124_v7  ;;  %v1128_v9 = vld [vmem:[%s14335_s16 + $0x90] sm:$0xff] }
  0x1e   : > { %1127 = vst [vmem:[%s14343_s17 + $0x40] sm:$0xff] %v1126_v8  ;;  %v1130_v10 = vld [vmem:[%s14335_s16 + $0xa0] sm:$0xff]  ;;  %v1132_v11 = vld [vmem:[%s14335_s16 + $0xb0] sm:$0xff]  ;;  %1129 = vst [vmem:[%s14343_s17 + $0x48] sm:$0xff] %v1128_v9 }
  0x1f   : > { %1131 = vst [vmem:[%s14343_s17 + $0x50] sm:$0xff] %v1130_v10  ;;  %1133 = vst [vmem:[%s14343_s17 + $0x58] sm:$0xff] %v1132_v11  ;;  %v1134_v12 = vld [vmem:[%s14335_s16 + $0xc0] sm:$0xff]  ;;  %v1136_v13 = vld [vmem:[%s14335_s16 + $0xd0] sm:$0xff] }
  0x20   : > { %v1138_v14 = vld [vmem:[%s14335_s16 + $0xe0] sm:$0xff]  ;;  %1135 = vst [vmem:[%s14343_s17 + $0x60] sm:$0xff] %v1134_v12  ;;  %1137 = vst [vmem:[%s14343_s17 + $0x68] sm:$0xff] %v1136_v13  ;;  %v1140_v15 = vld [vmem:[%s14335_s16 + $0xf0] sm:$0xff] }
  0x21   : > { %1139 = vst [vmem:[%s14343_s17 + $0x70] sm:$0xff] %v1138_v14  ;;  %v1142_v16 = vld [vmem:[%s14335_s16 + $0x100] sm:$0xff]  ;;  %v1144_v17 = vld [vmem:[%s14335_s16 + $0x110] sm:$0xff]  ;;  %1141 = vst [vmem:[%s14343_s17 + $0x78] sm:$0xff] %v1140_v15 }
  0x22   : > { %1143 = vst [vmem:[%s14343_s17 + $0x80] sm:$0xff] %v1142_v16  ;;  %1145 = vst [vmem:[%s14343_s17 + $0x88] sm:$0xff] %v1144_v17  ;;  %v1146_v18 = vld [vmem:[%s14335_s16 + $0x120] sm:$0xff]  ;;  %v1148_v19 = vld [vmem:[%s14335_s16 + $0x130] sm:$0xff] }
  0x23   : > { %v1150_v20 = vld [vmem:[%s14335_s16 + $0x140] sm:$0xff]  ;;  %1147 = vst [vmem:[%s14343_s17 + $0x90] sm:$0xff] %v1146_v18  ;;  %1149 = vst [vmem:[%s14343_s17 + $0x98] sm:$0xff] %v1148_v19  ;;  %v1152_v21 = vld [vmem:[%s14335_s16 + $0x150] sm:$0xff] }
  0x24   : > { %1151 = vst [vmem:[%s14343_s17 + $0xa0] sm:$0xff] %v1150_v20  ;;  %v1154_v22 = vld [vmem:[%s14335_s16 + $0x160] sm:$0xff]  ;;  %v1156_v23 = vld [vmem:[%s14335_s16 + $0x170] sm:$0xff]  ;;  %1153 = vst [vmem:[%s14343_s17 + $0xa8] sm:$0xff] %v1152_v21 }
  0x25   : > { %1155 = vst [vmem:[%s14343_s17 + $0xb0] sm:$0xff] %v1154_v22  ;;  %1157 = vst [vmem:[%s14343_s17 + $0xb8] sm:$0xff] %v1156_v23  ;;  %v1158_v24 = vld [vmem:[%s14335_s16 + $0x180] sm:$0xff]  ;;  %v1160_v25 = vld [vmem:[%s14335_s16 + $0x190] sm:$0xff] }
  0x26   : > { %v1162_v26 = vld [vmem:[%s14335_s16 + $0x1a0] sm:$0xff]  ;;  %1159 = vst [vmem:[%s14343_s17 + $0xc0] sm:$0xff] %v1158_v24  ;;  %1161 = vst [vmem:[%s14343_s17 + $0xc8] sm:$0xff] %v1160_v25  ;;  %v1164_v27 = vld [vmem:[%s14335_s16 + $0x1b0] sm:$0xff] }
  0x27   : > { %1163 = vst [vmem:[%s14343_s17 + $0xd0] sm:$0xff] %v1162_v26  ;;  %v1166_v28 = vld [vmem:[%s14335_s16 + $0x1c0] sm:$0xff]  ;;  %v1168_v29 = vld [vmem:[%s14335_s16 + $0x1d0] sm:$0xff]  ;;  %1165 = vst [vmem:[%s14343_s17 + $0xd8] sm:$0xff] %v1164_v27 }
  0x28   : > { %1167 = vst [vmem:[%s14343_s17 + $0xe0] sm:$0xff] %v1166_v28  ;;  %1169 = vst [vmem:[%s14343_s17 + $0xe8] sm:$0xff] %v1168_v29  ;;  %v1170_v30 = vld [vmem:[%s14335_s16 + $0x1e0] sm:$0xff]  ;;  %v1172_v31 = vld [vmem:[%s14335_s16 + $0x1f0] sm:$0xff] }
  0x29   : > { %v1174_v32 = vld [vmem:[%s14335_s16 + $0x200] sm:$0xff]  ;;  %1171 = vst [vmem:[%s14343_s17 + $0xf0] sm:$0xff] %v1170_v30  ;;  %1173 = vst [vmem:[%s14343_s17 + $0xf8] sm:$0xff] %v1172_v31  ;;  %v1176_v33 = vld [vmem:[%s14335_s16 + $0x210] sm:$0xff] }
  0x2a   : > { %1175 = vst [vmem:[%s14343_s17 + $0x100] sm:$0xff] %v1174_v32  ;;  %v1178_v34 = vld [vmem:[%s14335_s16 + $0x220] sm:$0xff]  ;;  %v1180_v35 = vld [vmem:[%s14335_s16 + $0x230] sm:$0xff]  ;;  %1177 = vst [vmem:[%s14343_s17 + $0x108] sm:$0xff] %v1176_v33 }
  0x2b   : > { %1179 = vst [vmem:[%s14343_s17 + $0x110] sm:$0xff] %v1178_v34  ;;  %1181 = vst [vmem:[%s14343_s17 + $0x118] sm:$0xff] %v1180_v35  ;;  %v1182_v36 = vld [vmem:[%s14335_s16 + $0x240] sm:$0xff]  ;;  %v1184_v37 = vld [vmem:[%s14335_s16 + $0x250] sm:$0xff] }
  0x2c   : > { %v1186_v38 = vld [vmem:[%s14335_s16 + $0x260] sm:$0xff]  ;;  %1183 = vst [vmem:[%s14343_s17 + $0x120] sm:$0xff] %v1182_v36  ;;  %1185 = vst [vmem:[%s14343_s17 + $0x128] sm:$0xff] %v1184_v37  ;;  %v1188_v39 = vld [vmem:[%s14335_s16 + $0x270] sm:$0xff] }
  0x2d   : > { %1187 = vst [vmem:[%s14343_s17 + $0x130] sm:$0xff] %v1186_v38  ;;  %v1190_v40 = vld [vmem:[%s14335_s16 + $0x280] sm:$0xff]  ;;  %v1192_v41 = vld [vmem:[%s14335_s16 + $0x290] sm:$0xff]  ;;  %1189 = vst [vmem:[%s14343_s17 + $0x138] sm:$0xff] %v1188_v39 }
  0x2e   : > { %1191 = vst [vmem:[%s14343_s17 + $0x140] sm:$0xff] %v1190_v40  ;;  %1193 = vst [vmem:[%s14343_s17 + $0x148] sm:$0xff] %v1192_v41  ;;  %v1194_v42 = vld [vmem:[%s14335_s16 + $0x2a0] sm:$0xff]  ;;  %v1196_v43 = vld [vmem:[%s14335_s16 + $0x2b0] sm:$0xff] }
  0x2f   : > { %v1198_v44 = vld [vmem:[%s14335_s16 + $0x2c0] sm:$0xff]  ;;  %1195 = vst [vmem:[%s14343_s17 + $0x150] sm:$0xff] %v1194_v42  ;;  %1197 = vst [vmem:[%s14343_s17 + $0x158] sm:$0xff] %v1196_v43  ;;  %v1200_v45 = vld [vmem:[%s14335_s16 + $0x2d0] sm:$0xff] }
  0x30   : > { %1199 = vst [vmem:[%s14343_s17 + $0x160] sm:$0xff] %v1198_v44  ;;  %v1202_v46 = vld [vmem:[%s14335_s16 + $0x2e0] sm:$0xff]  ;;  %v1204_v47 = vld [vmem:[%s14335_s16 + $0x2f0] sm:$0xff]  ;;  %1201 = vst [vmem:[%s14343_s17 + $0x168] sm:$0xff] %v1200_v45 }
  0x31   : > { %1203 = vst [vmem:[%s14343_s17 + $0x170] sm:$0xff] %v1202_v46  ;;  %1205 = vst [vmem:[%s14343_s17 + $0x178] sm:$0xff] %v1204_v47  ;;  %v1206_v48 = vld [vmem:[%s14335_s16 + $0x300] sm:$0xff]  ;;  %v1208_v49 = vld [vmem:[%s14335_s16 + $0x310] sm:$0xff] }
  0x32   : > { %v1210_v50 = vld [vmem:[%s14335_s16 + $0x320] sm:$0xff]  ;;  %1207 = vst [vmem:[%s14343_s17 + $0x180] sm:$0xff] %v1206_v48  ;;  %1209 = vst [vmem:[%s14343_s17 + $0x188] sm:$0xff] %v1208_v49  ;;  %v1212_v51 = vld [vmem:[%s14335_s16 + $0x330] sm:$0xff] }
  0x33   : > { %1211 = vst [vmem:[%s14343_s17 + $0x190] sm:$0xff] %v1210_v50  ;;  %v1214_v52 = vld [vmem:[%s14335_s16 + $0x340] sm:$0xff]  ;;  %v1216_v53 = vld [vmem:[%s14335_s16 + $0x350] sm:$0xff]  ;;  %1213 = vst [vmem:[%s14343_s17 + $0x198] sm:$0xff] %v1212_v51 }
  0x34   : > { %1215 = vst [vmem:[%s14343_s17 + $0x1a0] sm:$0xff] %v1214_v52  ;;  %1217 = vst [vmem:[%s14343_s17 + $0x1a8] sm:$0xff] %v1216_v53  ;;  %v1218_v54 = vld [vmem:[%s14335_s16 + $0x360] sm:$0xff]  ;;  %v1220_v55 = vld [vmem:[%s14335_s16 + $0x370] sm:$0xff] }
  0x35   : > { %v1222_v56 = vld [vmem:[%s14335_s16 + $0x380] sm:$0xff]  ;;  %1219 = vst [vmem:[%s14343_s17 + $0x1b0] sm:$0xff] %v1218_v54  ;;  %1221 = vst [vmem:[%s14343_s17 + $0x1b8] sm:$0xff] %v1220_v55  ;;  %v1224_v57 = vld [vmem:[%s14335_s16 + $0x390] sm:$0xff] }
  0x36   : > { %1223 = vst [vmem:[%s14343_s17 + $0x1c0] sm:$0xff] %v1222_v56  ;;  %v1226_v58 = vld [vmem:[%s14335_s16 + $0x3a0] sm:$0xff]  ;;  %v1228_v59 = vld [vmem:[%s14335_s16 + $0x3b0] sm:$0xff]  ;;  %1225 = vst [vmem:[%s14343_s17 + $0x1c8] sm:$0xff] %v1224_v57 }
  0x37   : > { %1227 = vst [vmem:[%s14343_s17 + $0x1d0] sm:$0xff] %v1226_v58  ;;  %1229 = vst [vmem:[%s14343_s17 + $0x1d8] sm:$0xff] %v1228_v59  ;;  %v1230_v60 = vld [vmem:[%s14335_s16 + $0x3c0] sm:$0xff]  ;;  %v1232_v61 = vld [vmem:[%s14335_s16 + $0x3d0] sm:$0xff] }
  0x38   : > { %v1234_v62 = vld [vmem:[%s14335_s16 + $0x3e0] sm:$0xff]  ;;  %1231 = vst [vmem:[%s14343_s17 + $0x1e0] sm:$0xff] %v1230_v60  ;;  %1233 = vst [vmem:[%s14343_s17 + $0x1e8] sm:$0xff] %v1232_v61  ;;  %v1236_v63 = vld [vmem:[%s14335_s16 + $0x3f0] sm:$0xff] }
  0x39   : > { %1235 = vst [vmem:[%s14343_s17 + $0x1f0] sm:$0xff] %v1234_v62  ;;  %v1238_v0 = vld [vmem:[%s14335_s16 + $0x400] sm:$0xff]  ;;  %v1240_v1 = vld [vmem:[%s14335_s16 + $0x410] sm:$0xff]  ;;  %1237 = vst [vmem:[%s14343_s17 + $0x1f8] sm:$0xff] %v1236_v63 }
  0x3a   : > { %1239 = vst [vmem:[%s14343_s17 + $0x200] sm:$0xff] %v1238_v0  ;;  %1241 = vst [vmem:[%s14343_s17 + $0x208] sm:$0xff] %v1240_v1  ;;  %v1242_v2 = vld [vmem:[%s14335_s16 + $0x420] sm:$0xff]  ;;  %v1244_v3 = vld [vmem:[%s14335_s16 + $0x430] sm:$0xff] }
  0x3b   : > { %v1246_v4 = vld [vmem:[%s14335_s16 + $0x440] sm:$0xff]  ;;  %1243 = vst [vmem:[%s14343_s17 + $0x210] sm:$0xff] %v1242_v2  ;;  %1245 = vst [vmem:[%s14343_s17 + $0x218] sm:$0xff] %v1244_v3  ;;  %v1248_v5 = vld [vmem:[%s14335_s16 + $0x450] sm:$0xff] }
  0x3c   : > { %1247 = vst [vmem:[%s14343_s17 + $0x220] sm:$0xff] %v1246_v4  ;;  %v1250_v6 = vld [vmem:[%s14335_s16 + $0x460] sm:$0xff]  ;;  %v1252_v7 = vld [vmem:[%s14335_s16 + $0x470] sm:$0xff]  ;;  %1249 = vst [vmem:[%s14343_s17 + $0x228] sm:$0xff] %v1248_v5 }
  0x3d   : > { %1251 = vst [vmem:[%s14343_s17 + $0x230] sm:$0xff] %v1250_v6  ;;  %1253 = vst [vmem:[%s14343_s17 + $0x238] sm:$0xff] %v1252_v7  ;;  %v1254_v8 = vld [vmem:[%s14335_s16 + $0x480] sm:$0xff]  ;;  %v1256_v9 = vld [vmem:[%s14335_s16 + $0x490] sm:$0xff] }
  0x3e   : > { %v1258_v10 = vld [vmem:[%s14335_s16 + $0x4a0] sm:$0xff]  ;;  %1255 = vst [vmem:[%s14343_s17 + $0x240] sm:$0xff] %v1254_v8  ;;  %1257 = vst [vmem:[%s14343_s17 + $0x248] sm:$0xff] %v1256_v9  ;;  %v1260_v11 = vld [vmem:[%s14335_s16 + $0x4b0] sm:$0xff] }
  0x3f   : > { %1259 = vst [vmem:[%s14343_s17 + $0x250] sm:$0xff] %v1258_v10  ;;  %v1262_v12 = vld [vmem:[%s14335_s16 + $0x4c0] sm:$0xff]  ;;  %v1264_v13 = vld [vmem:[%s14335_s16 + $0x4d0] sm:$0xff]  ;;  %1261 = vst [vmem:[%s14343_s17 + $0x258] sm:$0xff] %v1260_v11 }
  0x40   : > { %1263 = vst [vmem:[%s14343_s17 + $0x260] sm:$0xff] %v1262_v12  ;;  %1265 = vst [vmem:[%s14343_s17 + $0x268] sm:$0xff] %v1264_v13  ;;  %v1266_v14 = vld [vmem:[%s14335_s16 + $0x4e0] sm:$0xff]  ;;  %v1268_v15 = vld [vmem:[%s14335_s16 + $0x4f0] sm:$0xff] }
  0x41   : > { %v1270_v16 = vld [vmem:[%s14335_s16 + $0x500] sm:$0xff]  ;;  %1267 = vst [vmem:[%s14343_s17 + $0x270] sm:$0xff] %v1266_v14  ;;  %1269 = vst [vmem:[%s14343_s17 + $0x278] sm:$0xff] %v1268_v15  ;;  %v1272_v17 = vld [vmem:[%s14335_s16 + $0x510] sm:$0xff] }
  0x42   : > { %1271 = vst [vmem:[%s14343_s17 + $0x280] sm:$0xff] %v1270_v16  ;;  %v1274_v18 = vld [vmem:[%s14335_s16 + $0x520] sm:$0xff]  ;;  %v1276_v19 = vld [vmem:[%s14335_s16 + $0x530] sm:$0xff]  ;;  %1273 = vst [vmem:[%s14343_s17 + $0x288] sm:$0xff] %v1272_v17 }
  0x43   : > { %1275 = vst [vmem:[%s14343_s17 + $0x290] sm:$0xff] %v1274_v18  ;;  %1277 = vst [vmem:[%s14343_s17 + $0x298] sm:$0xff] %v1276_v19  ;;  %v1278_v20 = vld [vmem:[%s14335_s16 + $0x540] sm:$0xff]  ;;  %v1280_v21 = vld [vmem:[%s14335_s16 + $0x550] sm:$0xff] }
  0x44   : > { %v1282_v22 = vld [vmem:[%s14335_s16 + $0x560] sm:$0xff]  ;;  %1279 = vst [vmem:[%s14343_s17 + $0x2a0] sm:$0xff] %v1278_v20  ;;  %1281 = vst [vmem:[%s14343_s17 + $0x2a8] sm:$0xff] %v1280_v21  ;;  %v1284_v23 = vld [vmem:[%s14335_s16 + $0x570] sm:$0xff] }
  0x45   : > { %1283 = vst [vmem:[%s14343_s17 + $0x2b0] sm:$0xff] %v1282_v22  ;;  %v1286_v24 = vld [vmem:[%s14335_s16 + $0x580] sm:$0xff]  ;;  %v1288_v25 = vld [vmem:[%s14335_s16 + $0x590] sm:$0xff]  ;;  %1285 = vst [vmem:[%s14343_s17 + $0x2b8] sm:$0xff] %v1284_v23 }
  0x46   : > { %1287 = vst [vmem:[%s14343_s17 + $0x2c0] sm:$0xff] %v1286_v24  ;;  %1289 = vst [vmem:[%s14343_s17 + $0x2c8] sm:$0xff] %v1288_v25  ;;  %v1290_v26 = vld [vmem:[%s14335_s16 + $0x5a0] sm:$0xff]  ;;  %v1292_v27 = vld [vmem:[%s14335_s16 + $0x5b0] sm:$0xff] }
  0x47   : > { %v1294_v28 = vld [vmem:[%s14335_s16 + $0x5c0] sm:$0xff]  ;;  %1291 = vst [vmem:[%s14343_s17 + $0x2d0] sm:$0xff] %v1290_v26  ;;  %1293 = vst [vmem:[%s14343_s17 + $0x2d8] sm:$0xff] %v1292_v27  ;;  %v1296_v29 = vld [vmem:[%s14335_s16 + $0x5d0] sm:$0xff] }
  0x48   : > { %1295 = vst [vmem:[%s14343_s17 + $0x2e0] sm:$0xff] %v1294_v28  ;;  %v1298_v30 = vld [vmem:[%s14335_s16 + $0x5e0] sm:$0xff]  ;;  %v1300_v31 = vld [vmem:[%s14335_s16 + $0x5f0] sm:$0xff]  ;;  %1297 = vst [vmem:[%s14343_s17 + $0x2e8] sm:$0xff] %v1296_v29 }
  0x49   : > { %1299 = vst [vmem:[%s14343_s17 + $0x2f0] sm:$0xff] %v1298_v30  ;;  %1301 = vst [vmem:[%s14343_s17 + $0x2f8] sm:$0xff] %v1300_v31  ;;  %v1302_v32 = vld [vmem:[%s14335_s16 + $0x600] sm:$0xff]  ;;  %v1304_v33 = vld [vmem:[%s14335_s16 + $0x610] sm:$0xff] }
  0x4a   : > { %v1306_v34 = vld [vmem:[%s14335_s16 + $0x620] sm:$0xff]  ;;  %1303 = vst [vmem:[%s14343_s17 + $0x300] sm:$0xff] %v1302_v32  ;;  %1305 = vst [vmem:[%s14343_s17 + $0x308] sm:$0xff] %v1304_v33  ;;  %v1308_v35 = vld [vmem:[%s14335_s16 + $0x630] sm:$0xff] }
  0x4b   : > { %1307 = vst [vmem:[%s14343_s17 + $0x310] sm:$0xff] %v1306_v34  ;;  %v1310_v36 = vld [vmem:[%s14335_s16 + $0x640] sm:$0xff]  ;;  %v1312_v37 = vld [vmem:[%s14335_s16 + $0x650] sm:$0xff]  ;;  %1309 = vst [vmem:[%s14343_s17 + $0x318] sm:$0xff] %v1308_v35 }
  0x4c   : > { %1311 = vst [vmem:[%s14343_s17 + $0x320] sm:$0xff] %v1310_v36  ;;  %1313 = vst [vmem:[%s14343_s17 + $0x328] sm:$0xff] %v1312_v37  ;;  %v1314_v38 = vld [vmem:[%s14335_s16 + $0x660] sm:$0xff]  ;;  %v1316_v39 = vld [vmem:[%s14335_s16 + $0x670] sm:$0xff] }
  0x4d   : > { %v1318_v40 = vld [vmem:[%s14335_s16 + $0x680] sm:$0xff]  ;;  %1315 = vst [vmem:[%s14343_s17 + $0x330] sm:$0xff] %v1314_v38  ;;  %1317 = vst [vmem:[%s14343_s17 + $0x338] sm:$0xff] %v1316_v39  ;;  %v1320_v41 = vld [vmem:[%s14335_s16 + $0x690] sm:$0xff] }
  0x4e   : > { %1319 = vst [vmem:[%s14343_s17 + $0x340] sm:$0xff] %v1318_v40  ;;  %v1322_v42 = vld [vmem:[%s14335_s16 + $0x6a0] sm:$0xff]  ;;  %v1324_v43 = vld [vmem:[%s14335_s16 + $0x6b0] sm:$0xff]  ;;  %1321 = vst [vmem:[%s14343_s17 + $0x348] sm:$0xff] %v1320_v41 }
  0x4f   : > { %1323 = vst [vmem:[%s14343_s17 + $0x350] sm:$0xff] %v1322_v42  ;;  %1325 = vst [vmem:[%s14343_s17 + $0x358] sm:$0xff] %v1324_v43  ;;  %v1326_v44 = vld [vmem:[%s14335_s16 + $0x6c0] sm:$0xff]  ;;  %v1328_v45 = vld [vmem:[%s14335_s16 + $0x6d0] sm:$0xff] }
  0x50   : > { %v1330_v46 = vld [vmem:[%s14335_s16 + $0x6e0] sm:$0xff]  ;;  %1327 = vst [vmem:[%s14343_s17 + $0x360] sm:$0xff] %v1326_v44  ;;  %1329 = vst [vmem:[%s14343_s17 + $0x368] sm:$0xff] %v1328_v45  ;;  %v1332_v47 = vld [vmem:[%s14335_s16 + $0x6f0] sm:$0xff] }
  0x51   : > { %1331 = vst [vmem:[%s14343_s17 + $0x370] sm:$0xff] %v1330_v46  ;;  %v1334_v48 = vld [vmem:[%s14335_s16 + $0x700] sm:$0xff]  ;;  %v1336_v49 = vld [vmem:[%s14335_s16 + $0x710] sm:$0xff]  ;;  %1333 = vst [vmem:[%s14343_s17 + $0x378] sm:$0xff] %v1332_v47 }
  0x52   : > { %1335 = vst [vmem:[%s14343_s17 + $0x380] sm:$0xff] %v1334_v48  ;;  %1337 = vst [vmem:[%s14343_s17 + $0x388] sm:$0xff] %v1336_v49  ;;  %v1338_v50 = vld [vmem:[%s14335_s16 + $0x720] sm:$0xff]  ;;  %v1340_v51 = vld [vmem:[%s14335_s16 + $0x730] sm:$0xff] }
  0x53   : > { %v1342_v52 = vld [vmem:[%s14335_s16 + $0x740] sm:$0xff]  ;;  %1339 = vst [vmem:[%s14343_s17 + $0x390] sm:$0xff] %v1338_v50  ;;  %1341 = vst [vmem:[%s14343_s17 + $0x398] sm:$0xff] %v1340_v51  ;;  %v1344_v53 = vld [vmem:[%s14335_s16 + $0x750] sm:$0xff] }
  0x54   : > { %1343 = vst [vmem:[%s14343_s17 + $0x3a0] sm:$0xff] %v1342_v52  ;;  %v1346_v54 = vld [vmem:[%s14335_s16 + $0x760] sm:$0xff]  ;;  %v1348_v55 = vld [vmem:[%s14335_s16 + $0x770] sm:$0xff]  ;;  %1345 = vst [vmem:[%s14343_s17 + $0x3a8] sm:$0xff] %v1344_v53 }
  0x55   : > { %1347 = vst [vmem:[%s14343_s17 + $0x3b0] sm:$0xff] %v1346_v54  ;;  %1349 = vst [vmem:[%s14343_s17 + $0x3b8] sm:$0xff] %v1348_v55  ;;  %v1350_v56 = vld [vmem:[%s14335_s16 + $0x780] sm:$0xff]  ;;  %v1352_v57 = vld [vmem:[%s14335_s16 + $0x790] sm:$0xff] }
  0x56   : > { %v1354_v58 = vld [vmem:[%s14335_s16 + $0x7a0] sm:$0xff]  ;;  %1351 = vst [vmem:[%s14343_s17 + $0x3c0] sm:$0xff] %v1350_v56  ;;  %1353 = vst [vmem:[%s14343_s17 + $0x3c8] sm:$0xff] %v1352_v57  ;;  %v1356_v59 = vld [vmem:[%s14335_s16 + $0x7b0] sm:$0xff] }
  0x57   : > { %1355 = vst [vmem:[%s14343_s17 + $0x3d0] sm:$0xff] %v1354_v58  ;;  %v1358_v60 = vld [vmem:[%s14335_s16 + $0x7c0] sm:$0xff]  ;;  %v1360_v61 = vld [vmem:[%s14335_s16 + $0x7d0] sm:$0xff]  ;;  %1357 = vst [vmem:[%s14343_s17 + $0x3d8] sm:$0xff] %v1356_v59 }
  0x58   : > { %1359 = vst [vmem:[%s14343_s17 + $0x3e0] sm:$0xff] %v1358_v60  ;;  %1361 = vst [vmem:[%s14343_s17 + $0x3e8] sm:$0xff] %v1360_v61  ;;  %v1362_v62 = vld [vmem:[%s14335_s16 + $0x7e0] sm:$0xff]  ;;  %v1364_v63 = vld [vmem:[%s14335_s16 + $0x7f0] sm:$0xff] }
  0x59   : > { %v1366_v0 = vld [vmem:[%s14335_s16 + $0x800] sm:$0xff]  ;;  %1363 = vst [vmem:[%s14343_s17 + $0x3f0] sm:$0xff] %v1362_v62  ;;  %1365 = vst [vmem:[%s14343_s17 + $0x3f8] sm:$0xff] %v1364_v63  ;;  %v1368_v1 = vld [vmem:[%s14335_s16 + $0x810] sm:$0xff] }
  0x5a   : > { %1367 = vst [vmem:[%s14343_s17 + $0x400] sm:$0xff] %v1366_v0  ;;  %v1370_v2 = vld [vmem:[%s14335_s16 + $0x820] sm:$0xff]  ;;  %v1372_v3 = vld [vmem:[%s14335_s16 + $0x830] sm:$0xff]  ;;  %1369 = vst [vmem:[%s14343_s17 + $0x408] sm:$0xff] %v1368_v1 }
  0x5b   : > { %1371 = vst [vmem:[%s14343_s17 + $0x410] sm:$0xff] %v1370_v2  ;;  %1373 = vst [vmem:[%s14343_s17 + $0x418] sm:$0xff] %v1372_v3  ;;  %v1374_v4 = vld [vmem:[%s14335_s16 + $0x840] sm:$0xff]  ;;  %v1376_v5 = vld [vmem:[%s14335_s16 + $0x850] sm:$0xff] }
  0x5c   : > { %v1378_v6 = vld [vmem:[%s14335_s16 + $0x860] sm:$0xff]  ;;  %1375 = vst [vmem:[%s14343_s17 + $0x420] sm:$0xff] %v1374_v4  ;;  %1377 = vst [vmem:[%s14343_s17 + $0x428] sm:$0xff] %v1376_v5  ;;  %v1380_v7 = vld [vmem:[%s14335_s16 + $0x870] sm:$0xff] }
  0x5d   : > { %1379 = vst [vmem:[%s14343_s17 + $0x430] sm:$0xff] %v1378_v6  ;;  %v1382_v8 = vld [vmem:[%s14335_s16 + $0x880] sm:$0xff]  ;;  %v1384_v9 = vld [vmem:[%s14335_s16 + $0x890] sm:$0xff]  ;;  %1381 = vst [vmem:[%s14343_s17 + $0x438] sm:$0xff] %v1380_v7 }
  0x5e   : > { %1383 = vst [vmem:[%s14343_s17 + $0x440] sm:$0xff] %v1382_v8  ;;  %1385 = vst [vmem:[%s14343_s17 + $0x448] sm:$0xff] %v1384_v9  ;;  %v1386_v10 = vld [vmem:[%s14335_s16 + $0x8a0] sm:$0xff]  ;;  %v1388_v11 = vld [vmem:[%s14335_s16 + $0x8b0] sm:$0xff] }
  0x5f   : > { %v1390_v12 = vld [vmem:[%s14335_s16 + $0x8c0] sm:$0xff]  ;;  %1387 = vst [vmem:[%s14343_s17 + $0x450] sm:$0xff] %v1386_v10  ;;  %1389 = vst [vmem:[%s14343_s17 + $0x458] sm:$0xff] %v1388_v11  ;;  %v1392_v13 = vld [vmem:[%s14335_s16 + $0x8d0] sm:$0xff] }
  0x60   : > { %1391 = vst [vmem:[%s14343_s17 + $0x460] sm:$0xff] %v1390_v12  ;;  %v1394_v14 = vld [vmem:[%s14335_s16 + $0x8e0] sm:$0xff]  ;;  %v1396_v15 = vld [vmem:[%s14335_s16 + $0x8f0] sm:$0xff]  ;;  %1393 = vst [vmem:[%s14343_s17 + $0x468] sm:$0xff] %v1392_v13 }
  0x61   : > { %1395 = vst [vmem:[%s14343_s17 + $0x470] sm:$0xff] %v1394_v14  ;;  %1397 = vst [vmem:[%s14343_s17 + $0x478] sm:$0xff] %v1396_v15  ;;  %v1398_v16 = vld [vmem:[%s14335_s16 + $0x900] sm:$0xff]  ;;  %v1400_v17 = vld [vmem:[%s14335_s16 + $0x910] sm:$0xff] }
  0x62   : > { %v1402_v18 = vld [vmem:[%s14335_s16 + $0x920] sm:$0xff]  ;;  %1399 = vst [vmem:[%s14343_s17 + $0x480] sm:$0xff] %v1398_v16  ;;  %1401 = vst [vmem:[%s14343_s17 + $0x488] sm:$0xff] %v1400_v17  ;;  %v1404_v19 = vld [vmem:[%s14335_s16 + $0x930] sm:$0xff] }
  0x63   : > { %1403 = vst [vmem:[%s14343_s17 + $0x490] sm:$0xff] %v1402_v18  ;;  %v1406_v20 = vld [vmem:[%s14335_s16 + $0x940] sm:$0xff]  ;;  %v1408_v21 = vld [vmem:[%s14335_s16 + $0x950] sm:$0xff]  ;;  %1405 = vst [vmem:[%s14343_s17 + $0x498] sm:$0xff] %v1404_v19 }
  0x64   : > { %1407 = vst [vmem:[%s14343_s17 + $0x4a0] sm:$0xff] %v1406_v20  ;;  %1409 = vst [vmem:[%s14343_s17 + $0x4a8] sm:$0xff] %v1408_v21  ;;  %v1410_v22 = vld [vmem:[%s14335_s16 + $0x960] sm:$0xff]  ;;  %v1412_v23 = vld [vmem:[%s14335_s16 + $0x970] sm:$0xff] }
  0x65   : > { %v1414_v24 = vld [vmem:[%s14335_s16 + $0x980] sm:$0xff]  ;;  %1411 = vst [vmem:[%s14343_s17 + $0x4b0] sm:$0xff] %v1410_v22  ;;  %1413 = vst [vmem:[%s14343_s17 + $0x4b8] sm:$0xff] %v1412_v23  ;;  %v1416_v25 = vld [vmem:[%s14335_s16 + $0x990] sm:$0xff] }
  0x66   : > { %1415 = vst [vmem:[%s14343_s17 + $0x4c0] sm:$0xff] %v1414_v24  ;;  %v1418_v26 = vld [vmem:[%s14335_s16 + $0x9a0] sm:$0xff]  ;;  %v1420_v27 = vld [vmem:[%s14335_s16 + $0x9b0] sm:$0xff]  ;;  %1417 = vst [vmem:[%s14343_s17 + $0x4c8] sm:$0xff] %v1416_v25 }
  0x67   : > { %1419 = vst [vmem:[%s14343_s17 + $0x4d0] sm:$0xff] %v1418_v26  ;;  %1421 = vst [vmem:[%s14343_s17 + $0x4d8] sm:$0xff] %v1420_v27  ;;  %v1422_v28 = vld [vmem:[%s14335_s16 + $0x9c0] sm:$0xff]  ;;  %v1424_v29 = vld [vmem:[%s14335_s16 + $0x9d0] sm:$0xff] }
  0x68   : > { %v1426_v30 = vld [vmem:[%s14335_s16 + $0x9e0] sm:$0xff]  ;;  %1423 = vst [vmem:[%s14343_s17 + $0x4e0] sm:$0xff] %v1422_v28  ;;  %1425 = vst [vmem:[%s14343_s17 + $0x4e8] sm:$0xff] %v1424_v29  ;;  %v1428_v31 = vld [vmem:[%s14335_s16 + $0x9f0] sm:$0xff] }
  0x69   : > { %1427 = vst [vmem:[%s14343_s17 + $0x4f0] sm:$0xff] %v1426_v30  ;;  %v1430_v32 = vld [vmem:[%s14335_s16 + $0xa00] sm:$0xff]  ;;  %v1432_v33 = vld [vmem:[%s14335_s16 + $0xa10] sm:$0xff]  ;;  %1429 = vst [vmem:[%s14343_s17 + $0x4f8] sm:$0xff] %v1428_v31 }
  0x6a   : > { %1431 = vst [vmem:[%s14343_s17 + $0x500] sm:$0xff] %v1430_v32  ;;  %1433 = vst [vmem:[%s14343_s17 + $0x508] sm:$0xff] %v1432_v33  ;;  %v1434_v34 = vld [vmem:[%s14335_s16 + $0xa20] sm:$0xff]  ;;  %v1436_v35 = vld [vmem:[%s14335_s16 + $0xa30] sm:$0xff] }
  0x6b   : > { %v1438_v36 = vld [vmem:[%s14335_s16 + $0xa40] sm:$0xff]  ;;  %1435 = vst [vmem:[%s14343_s17 + $0x510] sm:$0xff] %v1434_v34  ;;  %1437 = vst [vmem:[%s14343_s17 + $0x518] sm:$0xff] %v1436_v35  ;;  %v1440_v37 = vld [vmem:[%s14335_s16 + $0xa50] sm:$0xff] }
  0x6c   : > { %1439 = vst [vmem:[%s14343_s17 + $0x520] sm:$0xff] %v1438_v36  ;;  %v1442_v38 = vld [vmem:[%s14335_s16 + $0xa60] sm:$0xff]  ;;  %v1444_v39 = vld [vmem:[%s14335_s16 + $0xa70] sm:$0xff]  ;;  %1441 = vst [vmem:[%s14343_s17 + $0x528] sm:$0xff] %v1440_v37 }
  0x6d   : > { %1443 = vst [vmem:[%s14343_s17 + $0x530] sm:$0xff] %v1442_v38  ;;  %1445 = vst [vmem:[%s14343_s17 + $0x538] sm:$0xff] %v1444_v39  ;;  %v1446_v40 = vld [vmem:[%s14335_s16 + $0xa80] sm:$0xff]  ;;  %v1448_v41 = vld [vmem:[%s14335_s16 + $0xa90] sm:$0xff] }
  0x6e   : > { %v1450_v42 = vld [vmem:[%s14335_s16 + $0xaa0] sm:$0xff]  ;;  %1447 = vst [vmem:[%s14343_s17 + $0x540] sm:$0xff] %v1446_v40  ;;  %1449 = vst [vmem:[%s14343_s17 + $0x548] sm:$0xff] %v1448_v41  ;;  %v1452_v43 = vld [vmem:[%s14335_s16 + $0xab0] sm:$0xff] }
  0x6f   : > { %1451 = vst [vmem:[%s14343_s17 + $0x550] sm:$0xff] %v1450_v42  ;;  %v1454_v44 = vld [vmem:[%s14335_s16 + $0xac0] sm:$0xff]  ;;  %v1456_v45 = vld [vmem:[%s14335_s16 + $0xad0] sm:$0xff]  ;;  %1453 = vst [vmem:[%s14343_s17 + $0x558] sm:$0xff] %v1452_v43 }
  0x70   : > { %1455 = vst [vmem:[%s14343_s17 + $0x560] sm:$0xff] %v1454_v44  ;;  %1457 = vst [vmem:[%s14343_s17 + $0x568] sm:$0xff] %v1456_v45  ;;  %v1458_v46 = vld [vmem:[%s14335_s16 + $0xae0] sm:$0xff]  ;;  %v1460_v47 = vld [vmem:[%s14335_s16 + $0xaf0] sm:$0xff] }
  0x71   : > { %v1462_v48 = vld [vmem:[%s14335_s16 + $0xb00] sm:$0xff]  ;;  %1459 = vst [vmem:[%s14343_s17 + $0x570] sm:$0xff] %v1458_v46  ;;  %1461 = vst [vmem:[%s14343_s17 + $0x578] sm:$0xff] %v1460_v47  ;;  %v1464_v49 = vld [vmem:[%s14335_s16 + $0xb10] sm:$0xff] }
  0x72   : > { %1463 = vst [vmem:[%s14343_s17 + $0x580] sm:$0xff] %v1462_v48  ;;  %v1466_v50 = vld [vmem:[%s14335_s16 + $0xb20] sm:$0xff]  ;;  %v1468_v51 = vld [vmem:[%s14335_s16 + $0xb30] sm:$0xff]  ;;  %1465 = vst [vmem:[%s14343_s17 + $0x588] sm:$0xff] %v1464_v49 }
  0x73   : > { %1467 = vst [vmem:[%s14343_s17 + $0x590] sm:$0xff] %v1466_v50  ;;  %1469 = vst [vmem:[%s14343_s17 + $0x598] sm:$0xff] %v1468_v51  ;;  %v1470_v52 = vld [vmem:[%s14335_s16 + $0xb40] sm:$0xff]  ;;  %v1472_v53 = vld [vmem:[%s14335_s16 + $0xb50] sm:$0xff] }
  0x74   : > { %v1474_v54 = vld [vmem:[%s14335_s16 + $0xb60] sm:$0xff]  ;;  %1471 = vst [vmem:[%s14343_s17 + $0x5a0] sm:$0xff] %v1470_v52  ;;  %1473 = vst [vmem:[%s14343_s17 + $0x5a8] sm:$0xff] %v1472_v53  ;;  %v1476_v55 = vld [vmem:[%s14335_s16 + $0xb70] sm:$0xff] }
  0x75   : > { %1475 = vst [vmem:[%s14343_s17 + $0x5b0] sm:$0xff] %v1474_v54  ;;  %v1478_v56 = vld [vmem:[%s14335_s16 + $0xb80] sm:$0xff]  ;;  %v1480_v57 = vld [vmem:[%s14335_s16 + $0xb90] sm:$0xff]  ;;  %1477 = vst [vmem:[%s14343_s17 + $0x5b8] sm:$0xff] %v1476_v55 }
  0x76   : > { %1479 = vst [vmem:[%s14343_s17 + $0x5c0] sm:$0xff] %v1478_v56  ;;  %1481 = vst [vmem:[%s14343_s17 + $0x5c8] sm:$0xff] %v1480_v57  ;;  %v1482_v58 = vld [vmem:[%s14335_s16 + $0xba0] sm:$0xff]  ;;  %v1484_v59 = vld [vmem:[%s14335_s16 + $0xbb0] sm:$0xff] }
  0x77   : > { %v1486_v60 = vld [vmem:[%s14335_s16 + $0xbc0] sm:$0xff]  ;;  %1483 = vst [vmem:[%s14343_s17 + $0x5d0] sm:$0xff] %v1482_v58  ;;  %1485 = vst [vmem:[%s14343_s17 + $0x5d8] sm:$0xff] %v1484_v59  ;;  %v1488_v61 = vld [vmem:[%s14335_s16 + $0xbd0] sm:$0xff] }
  0x78   : > { %1487 = vst [vmem:[%s14343_s17 + $0x5e0] sm:$0xff] %v1486_v60  ;;  %v1490_v62 = vld [vmem:[%s14335_s16 + $0xbe0] sm:$0xff]  ;;  %v1492_v63 = vld [vmem:[%s14335_s16 + $0xbf0] sm:$0xff]  ;;  %1489 = vst [vmem:[%s14343_s17 + $0x5e8] sm:$0xff] %v1488_v61 }
  0x79   : > { %1491 = vst [vmem:[%s14343_s17 + $0x5f0] sm:$0xff] %v1490_v62  ;;  %1493 = vst [vmem:[%s14343_s17 + $0x5f8] sm:$0xff] %v1492_v63  ;;  %v1494_v0 = vld [vmem:[%s14335_s16 + $0xc00] sm:$0xff]  ;;  %v1496_v1 = vld [vmem:[%s14335_s16 + $0xc10] sm:$0xff] }
  0x7a   : > { %v1498_v2 = vld [vmem:[%s14335_s16 + $0xc20] sm:$0xff]  ;;  %1495 = vst [vmem:[%s14343_s17 + $0x600] sm:$0xff] %v1494_v0  ;;  %1497 = vst [vmem:[%s14343_s17 + $0x608] sm:$0xff] %v1496_v1  ;;  %v1500_v3 = vld [vmem:[%s14335_s16 + $0xc30] sm:$0xff] }
  0x7b   : > { %1499 = vst [vmem:[%s14343_s17 + $0x610] sm:$0xff] %v1498_v2  ;;  %v1502_v4 = vld [vmem:[%s14335_s16 + $0xc40] sm:$0xff]  ;;  %v1504_v5 = vld [vmem:[%s14335_s16 + $0xc50] sm:$0xff]  ;;  %1501 = vst [vmem:[%s14343_s17 + $0x618] sm:$0xff] %v1500_v3 }
  0x7c   : > { %1503 = vst [vmem:[%s14343_s17 + $0x620] sm:$0xff] %v1502_v4  ;;  %1505 = vst [vmem:[%s14343_s17 + $0x628] sm:$0xff] %v1504_v5  ;;  %v1506_v6 = vld [vmem:[%s14335_s16 + $0xc60] sm:$0xff]  ;;  %v1508_v7 = vld [vmem:[%s14335_s16 + $0xc70] sm:$0xff] }
  0x7d   : > { %v1510_v8 = vld [vmem:[%s14335_s16 + $0xc80] sm:$0xff]  ;;  %1507 = vst [vmem:[%s14343_s17 + $0x630] sm:$0xff] %v1506_v6  ;;  %1509 = vst [vmem:[%s14343_s17 + $0x638] sm:$0xff] %v1508_v7  ;;  %v1512_v9 = vld [vmem:[%s14335_s16 + $0xc90] sm:$0xff] }
  0x7e   : > { %1511 = vst [vmem:[%s14343_s17 + $0x640] sm:$0xff] %v1510_v8  ;;  %v1514_v10 = vld [vmem:[%s14335_s16 + $0xca0] sm:$0xff]  ;;  %v1516_v11 = vld [vmem:[%s14335_s16 + $0xcb0] sm:$0xff]  ;;  %1513 = vst [vmem:[%s14343_s17 + $0x648] sm:$0xff] %v1512_v9 }
  0x7f   : > { %1515 = vst [vmem:[%s14343_s17 + $0x650] sm:$0xff] %v1514_v10  ;;  %1517 = vst [vmem:[%s14343_s17 + $0x658] sm:$0xff] %v1516_v11  ;;  %v1518_v12 = vld [vmem:[%s14335_s16 + $0xcc0] sm:$0xff]  ;;  %v1520_v13 = vld [vmem:[%s14335_s16 + $0xcd0] sm:$0xff] }
  0x80   : > { %v1522_v14 = vld [vmem:[%s14335_s16 + $0xce0] sm:$0xff]  ;;  %1519 = vst [vmem:[%s14343_s17 + $0x660] sm:$0xff] %v1518_v12  ;;  %1521 = vst [vmem:[%s14343_s17 + $0x668] sm:$0xff] %v1520_v13  ;;  %v1524_v15 = vld [vmem:[%s14335_s16 + $0xcf0] sm:$0xff] }
  0x81   : > { %1523 = vst [vmem:[%s14343_s17 + $0x670] sm:$0xff] %v1522_v14  ;;  %v1526_v16 = vld [vmem:[%s14335_s16 + $0xd00] sm:$0xff]  ;;  %v1528_v17 = vld [vmem:[%s14335_s16 + $0xd10] sm:$0xff]  ;;  %1525 = vst [vmem:[%s14343_s17 + $0x678] sm:$0xff] %v1524_v15 }
  0x82   : > { %1527 = vst [vmem:[%s14343_s17 + $0x680] sm:$0xff] %v1526_v16  ;;  %1529 = vst [vmem:[%s14343_s17 + $0x688] sm:$0xff] %v1528_v17  ;;  %v1530_v18 = vld [vmem:[%s14335_s16 + $0xd20] sm:$0xff]  ;;  %v1532_v19 = vld [vmem:[%s14335_s16 + $0xd30] sm:$0xff] }
  0x83   : > { %v1534_v20 = vld [vmem:[%s14335_s16 + $0xd40] sm:$0xff]  ;;  %1531 = vst [vmem:[%s14343_s17 + $0x690] sm:$0xff] %v1530_v18  ;;  %1533 = vst [vmem:[%s14343_s17 + $0x698] sm:$0xff] %v1532_v19  ;;  %v1536_v21 = vld [vmem:[%s14335_s16 + $0xd50] sm:$0xff] }
  0x84   : > { %1535 = vst [vmem:[%s14343_s17 + $0x6a0] sm:$0xff] %v1534_v20  ;;  %v1538_v22 = vld [vmem:[%s14335_s16 + $0xd60] sm:$0xff]  ;;  %v1540_v23 = vld [vmem:[%s14335_s16 + $0xd70] sm:$0xff]  ;;  %1537 = vst [vmem:[%s14343_s17 + $0x6a8] sm:$0xff] %v1536_v21 }
  0x85   : > { %1539 = vst [vmem:[%s14343_s17 + $0x6b0] sm:$0xff] %v1538_v22  ;;  %1541 = vst [vmem:[%s14343_s17 + $0x6b8] sm:$0xff] %v1540_v23  ;;  %v1542_v24 = vld [vmem:[%s14335_s16 + $0xd80] sm:$0xff]  ;;  %v1544_v25 = vld [vmem:[%s14335_s16 + $0xd90] sm:$0xff] }
  0x86   : > { %v1546_v26 = vld [vmem:[%s14335_s16 + $0xda0] sm:$0xff]  ;;  %1543 = vst [vmem:[%s14343_s17 + $0x6c0] sm:$0xff] %v1542_v24  ;;  %1545 = vst [vmem:[%s14343_s17 + $0x6c8] sm:$0xff] %v1544_v25  ;;  %v1548_v27 = vld [vmem:[%s14335_s16 + $0xdb0] sm:$0xff] }
  0x87   : > { %1547 = vst [vmem:[%s14343_s17 + $0x6d0] sm:$0xff] %v1546_v26  ;;  %v1550_v28 = vld [vmem:[%s14335_s16 + $0xdc0] sm:$0xff]  ;;  %v1552_v29 = vld [vmem:[%s14335_s16 + $0xdd0] sm:$0xff]  ;;  %1549 = vst [vmem:[%s14343_s17 + $0x6d8] sm:$0xff] %v1548_v27 }
  0x88   : > { %1551 = vst [vmem:[%s14343_s17 + $0x6e0] sm:$0xff] %v1550_v28  ;;  %1553 = vst [vmem:[%s14343_s17 + $0x6e8] sm:$0xff] %v1552_v29  ;;  %v1554_v30 = vld [vmem:[%s14335_s16 + $0xde0] sm:$0xff]  ;;  %v1556_v31 = vld [vmem:[%s14335_s16 + $0xdf0] sm:$0xff] }
  0x89   : > { %v1558_v32 = vld [vmem:[%s14335_s16 + $0xe00] sm:$0xff]  ;;  %1555 = vst [vmem:[%s14343_s17 + $0x6f0] sm:$0xff] %v1554_v30  ;;  %1557 = vst [vmem:[%s14343_s17 + $0x6f8] sm:$0xff] %v1556_v31  ;;  %v1560_v33 = vld [vmem:[%s14335_s16 + $0xe10] sm:$0xff] }
  0x8a   : > { %1559 = vst [vmem:[%s14343_s17 + $0x700] sm:$0xff] %v1558_v32  ;;  %v1562_v34 = vld [vmem:[%s14335_s16 + $0xe20] sm:$0xff]  ;;  %v1564_v35 = vld [vmem:[%s14335_s16 + $0xe30] sm:$0xff]  ;;  %1561 = vst [vmem:[%s14343_s17 + $0x708] sm:$0xff] %v1560_v33 }
  0x8b   : > { %1563 = vst [vmem:[%s14343_s17 + $0x710] sm:$0xff] %v1562_v34  ;;  %1565 = vst [vmem:[%s14343_s17 + $0x718] sm:$0xff] %v1564_v35  ;;  %v1566_v36 = vld [vmem:[%s14335_s16 + $0xe40] sm:$0xff]  ;;  %v1568_v37 = vld [vmem:[%s14335_s16 + $0xe50] sm:$0xff] }
  0x8c   : > { %v1570_v38 = vld [vmem:[%s14335_s16 + $0xe60] sm:$0xff]  ;;  %1567 = vst [vmem:[%s14343_s17 + $0x720] sm:$0xff] %v1566_v36  ;;  %1569 = vst [vmem:[%s14343_s17 + $0x728] sm:$0xff] %v1568_v37  ;;  %v1572_v39 = vld [vmem:[%s14335_s16 + $0xe70] sm:$0xff] }
  0x8d   : > { %1571 = vst [vmem:[%s14343_s17 + $0x730] sm:$0xff] %v1570_v38  ;;  %v1574_v40 = vld [vmem:[%s14335_s16 + $0xe80] sm:$0xff]  ;;  %v1576_v41 = vld [vmem:[%s14335_s16 + $0xe90] sm:$0xff]  ;;  %1573 = vst [vmem:[%s14343_s17 + $0x738] sm:$0xff] %v1572_v39 }
  0x8e   : > { %1575 = vst [vmem:[%s14343_s17 + $0x740] sm:$0xff] %v1574_v40  ;;  %1577 = vst [vmem:[%s14343_s17 + $0x748] sm:$0xff] %v1576_v41  ;;  %v1578_v42 = vld [vmem:[%s14335_s16 + $0xea0] sm:$0xff]  ;;  %v1580_v43 = vld [vmem:[%s14335_s16 + $0xeb0] sm:$0xff] }
  0x8f   : > { %v1582_v44 = vld [vmem:[%s14335_s16 + $0xec0] sm:$0xff]  ;;  %1579 = vst [vmem:[%s14343_s17 + $0x750] sm:$0xff] %v1578_v42  ;;  %1581 = vst [vmem:[%s14343_s17 + $0x758] sm:$0xff] %v1580_v43  ;;  %v1584_v45 = vld [vmem:[%s14335_s16 + $0xed0] sm:$0xff] }
  0x90   : > { %1583 = vst [vmem:[%s14343_s17 + $0x760] sm:$0xff] %v1582_v44  ;;  %v1586_v46 = vld [vmem:[%s14335_s16 + $0xee0] sm:$0xff]  ;;  %v1588_v47 = vld [vmem:[%s14335_s16 + $0xef0] sm:$0xff]  ;;  %1585 = vst [vmem:[%s14343_s17 + $0x768] sm:$0xff] %v1584_v45 }
  0x91   : > { %1587 = vst [vmem:[%s14343_s17 + $0x770] sm:$0xff] %v1586_v46  ;;  %1589 = vst [vmem:[%s14343_s17 + $0x778] sm:$0xff] %v1588_v47  ;;  %v1590_v48 = vld [vmem:[%s14335_s16 + $0xf00] sm:$0xff]  ;;  %v1592_v49 = vld [vmem:[%s14335_s16 + $0xf10] sm:$0xff] }
  0x92   : > { %v1594_v50 = vld [vmem:[%s14335_s16 + $0xf20] sm:$0xff]  ;;  %1591 = vst [vmem:[%s14343_s17 + $0x780] sm:$0xff] %v1590_v48  ;;  %1593 = vst [vmem:[%s14343_s17 + $0x788] sm:$0xff] %v1592_v49  ;;  %v1596_v51 = vld [vmem:[%s14335_s16 + $0xf30] sm:$0xff] }
  0x93   : > { %1595 = vst [vmem:[%s14343_s17 + $0x790] sm:$0xff] %v1594_v50  ;;  %v1598_v52 = vld [vmem:[%s14335_s16 + $0xf40] sm:$0xff]  ;;  %v1600_v53 = vld [vmem:[%s14335_s16 + $0xf50] sm:$0xff]  ;;  %1597 = vst [vmem:[%s14343_s17 + $0x798] sm:$0xff] %v1596_v51 }
  0x94   : > { %1599 = vst [vmem:[%s14343_s17 + $0x7a0] sm:$0xff] %v1598_v52  ;;  %1601 = vst [vmem:[%s14343_s17 + $0x7a8] sm:$0xff] %v1600_v53  ;;  %v1602_v54 = vld [vmem:[%s14335_s16 + $0xf60] sm:$0xff]  ;;  %v1604_v55 = vld [vmem:[%s14335_s16 + $0xf70] sm:$0xff] }
  0x95   : > { %v1606_v56 = vld [vmem:[%s14335_s16 + $0xf80] sm:$0xff]  ;;  %1603 = vst [vmem:[%s14343_s17 + $0x7b0] sm:$0xff] %v1602_v54  ;;  %1605 = vst [vmem:[%s14343_s17 + $0x7b8] sm:$0xff] %v1604_v55  ;;  %v1608_v57 = vld [vmem:[%s14335_s16 + $0xf90] sm:$0xff] }
  0x96   : > { %1607 = vst [vmem:[%s14343_s17 + $0x7c0] sm:$0xff] %v1606_v56  ;;  %v1610_v58 = vld [vmem:[%s14335_s16 + $0xfa0] sm:$0xff]  ;;  %v1612_v59 = vld [vmem:[%s14335_s16 + $0xfb0] sm:$0xff]  ;;  %1609 = vst [vmem:[%s14343_s17 + $0x7c8] sm:$0xff] %v1608_v57 }
  0x97   : > { %1611 = vst [vmem:[%s14343_s17 + $0x7d0] sm:$0xff] %v1610_v58  ;;  %1613 = vst [vmem:[%s14343_s17 + $0x7d8] sm:$0xff] %v1612_v59  ;;  %v1614_v60 = vld [vmem:[%s14335_s16 + $0xfc0] sm:$0xff]  ;;  %v1616_v61 = vld [vmem:[%s14335_s16 + $0xfd0] sm:$0xff] }
  0x98   : > { %v1618_v62 = vld [vmem:[%s14335_s16 + $0xfe0] sm:$0xff]  ;;  %1615 = vst [vmem:[%s14343_s17 + $0x7e0] sm:$0xff] %v1614_v60  ;;  %1617 = vst [vmem:[%s14343_s17 + $0x7e8] sm:$0xff] %v1616_v61  ;;  %v1620_v63 = vld [vmem:[%s14335_s16 + $0xff0] sm:$0xff] }
  0x99   : > { %1619 = vst [vmem:[%s14343_s17 + $0x7f0] sm:$0xff] %v1618_v62  ;;  %v1622_v0 = vld [vmem:[%s14335_s16 + $0x1000] sm:$0xff]  ;;  %v1624_v1 = vld [vmem:[%s14335_s16 + $0x1010] sm:$0xff]  ;;  %1621 = vst [vmem:[%s14343_s17 + $0x7f8] sm:$0xff] %v1620_v63 }
  0x9a   : > { %1623 = vst [vmem:[%s14343_s17 + $0x800] sm:$0xff] %v1622_v0  ;;  %1625 = vst [vmem:[%s14343_s17 + $0x808] sm:$0xff] %v1624_v1  ;;  %v1626_v2 = vld [vmem:[%s14335_s16 + $0x1020] sm:$0xff]  ;;  %v1628_v3 = vld [vmem:[%s14335_s16 + $0x1030] sm:$0xff] }
  0x9b   : > { %v1630_v4 = vld [vmem:[%s14335_s16 + $0x1040] sm:$0xff]  ;;  %1627 = vst [vmem:[%s14343_s17 + $0x810] sm:$0xff] %v1626_v2  ;;  %1629 = vst [vmem:[%s14343_s17 + $0x818] sm:$0xff] %v1628_v3  ;;  %v1632_v5 = vld [vmem:[%s14335_s16 + $0x1050] sm:$0xff] }
  0x9c   : > { %1631 = vst [vmem:[%s14343_s17 + $0x820] sm:$0xff] %v1630_v4  ;;  %v1634_v6 = vld [vmem:[%s14335_s16 + $0x1060] sm:$0xff]  ;;  %v1636_v7 = vld [vmem:[%s14335_s16 + $0x1070] sm:$0xff]  ;;  %1633 = vst [vmem:[%s14343_s17 + $0x828] sm:$0xff] %v1632_v5 }
  0x9d   : > { %1635 = vst [vmem:[%s14343_s17 + $0x830] sm:$0xff] %v1634_v6  ;;  %1637 = vst [vmem:[%s14343_s17 + $0x838] sm:$0xff] %v1636_v7  ;;  %v1638_v8 = vld [vmem:[%s14335_s16 + $0x1080] sm:$0xff]  ;;  %v1640_v9 = vld [vmem:[%s14335_s16 + $0x1090] sm:$0xff] }
  0x9e   : > { %v1642_v10 = vld [vmem:[%s14335_s16 + $0x10a0] sm:$0xff]  ;;  %1639 = vst [vmem:[%s14343_s17 + $0x840] sm:$0xff] %v1638_v8  ;;  %1641 = vst [vmem:[%s14343_s17 + $0x848] sm:$0xff] %v1640_v9  ;;  %v1644_v11 = vld [vmem:[%s14335_s16 + $0x10b0] sm:$0xff] }
  0x9f   : > { %1643 = vst [vmem:[%s14343_s17 + $0x850] sm:$0xff] %v1642_v10  ;;  %v1646_v12 = vld [vmem:[%s14335_s16 + $0x10c0] sm:$0xff]  ;;  %v1648_v13 = vld [vmem:[%s14335_s16 + $0x10d0] sm:$0xff]  ;;  %1645 = vst [vmem:[%s14343_s17 + $0x858] sm:$0xff] %v1644_v11 }
  0xa0   : > { %1647 = vst [vmem:[%s14343_s17 + $0x860] sm:$0xff] %v1646_v12  ;;  %1649 = vst [vmem:[%s14343_s17 + $0x868] sm:$0xff] %v1648_v13  ;;  %v1650_v14 = vld [vmem:[%s14335_s16 + $0x10e0] sm:$0xff]  ;;  %v1652_v15 = vld [vmem:[%s14335_s16 + $0x10f0] sm:$0xff] }
  0xa1   : > { %v1654_v16 = vld [vmem:[%s14335_s16 + $0x1100] sm:$0xff]  ;;  %1651 = vst [vmem:[%s14343_s17 + $0x870] sm:$0xff] %v1650_v14  ;;  %1653 = vst [vmem:[%s14343_s17 + $0x878] sm:$0xff] %v1652_v15  ;;  %v1656_v17 = vld [vmem:[%s14335_s16 + $0x1110] sm:$0xff] }
  0xa2   : > { %1655 = vst [vmem:[%s14343_s17 + $0x880] sm:$0xff] %v1654_v16  ;;  %v1658_v18 = vld [vmem:[%s14335_s16 + $0x1120] sm:$0xff]  ;;  %v1660_v19 = vld [vmem:[%s14335_s16 + $0x1130] sm:$0xff]  ;;  %1657 = vst [vmem:[%s14343_s17 + $0x888] sm:$0xff] %v1656_v17 }
  0xa3   : > { %1659 = vst [vmem:[%s14343_s17 + $0x890] sm:$0xff] %v1658_v18  ;;  %1661 = vst [vmem:[%s14343_s17 + $0x898] sm:$0xff] %v1660_v19  ;;  %v1662_v20 = vld [vmem:[%s14335_s16 + $0x1140] sm:$0xff]  ;;  %v1664_v21 = vld [vmem:[%s14335_s16 + $0x1150] sm:$0xff] }
  0xa4   : > { %v1666_v22 = vld [vmem:[%s14335_s16 + $0x1160] sm:$0xff]  ;;  %1663 = vst [vmem:[%s14343_s17 + $0x8a0] sm:$0xff] %v1662_v20  ;;  %1665 = vst [vmem:[%s14343_s17 + $0x8a8] sm:$0xff] %v1664_v21  ;;  %v1668_v23 = vld [vmem:[%s14335_s16 + $0x1170] sm:$0xff] }
  0xa5   : > { %1667 = vst [vmem:[%s14343_s17 + $0x8b0] sm:$0xff] %v1666_v22  ;;  %v1670_v24 = vld [vmem:[%s14335_s16 + $0x1180] sm:$0xff]  ;;  %v1672_v25 = vld [vmem:[%s14335_s16 + $0x1190] sm:$0xff]  ;;  %1669 = vst [vmem:[%s14343_s17 + $0x8b8] sm:$0xff] %v1668_v23 }
  0xa6   : > { %1671 = vst [vmem:[%s14343_s17 + $0x8c0] sm:$0xff] %v1670_v24  ;;  %1673 = vst [vmem:[%s14343_s17 + $0x8c8] sm:$0xff] %v1672_v25  ;;  %v1674_v26 = vld [vmem:[%s14335_s16 + $0x11a0] sm:$0xff]  ;;  %v1676_v27 = vld [vmem:[%s14335_s16 + $0x11b0] sm:$0xff] }
  0xa7   : > { %v1678_v28 = vld [vmem:[%s14335_s16 + $0x11c0] sm:$0xff]  ;;  %1675 = vst [vmem:[%s14343_s17 + $0x8d0] sm:$0xff] %v1674_v26  ;;  %1677 = vst [vmem:[%s14343_s17 + $0x8d8] sm:$0xff] %v1676_v27  ;;  %v1680_v29 = vld [vmem:[%s14335_s16 + $0x11d0] sm:$0xff] }
  0xa8   : > { %1679 = vst [vmem:[%s14343_s17 + $0x8e0] sm:$0xff] %v1678_v28  ;;  %v1682_v30 = vld [vmem:[%s14335_s16 + $0x11e0] sm:$0xff]  ;;  %v1684_v31 = vld [vmem:[%s14335_s16 + $0x11f0] sm:$0xff]  ;;  %1681 = vst [vmem:[%s14343_s17 + $0x8e8] sm:$0xff] %v1680_v29 }
  0xa9   : > { %1683 = vst [vmem:[%s14343_s17 + $0x8f0] sm:$0xff] %v1682_v30  ;;  %1685 = vst [vmem:[%s14343_s17 + $0x8f8] sm:$0xff] %v1684_v31  ;;  %v1686_v32 = vld [vmem:[%s14335_s16 + $0x1200] sm:$0xff]  ;;  %v1688_v33 = vld [vmem:[%s14335_s16 + $0x1210] sm:$0xff] }
  0xaa   : > { %v1690_v34 = vld [vmem:[%s14335_s16 + $0x1220] sm:$0xff]  ;;  %1687 = vst [vmem:[%s14343_s17 + $0x900] sm:$0xff] %v1686_v32  ;;  %1689 = vst [vmem:[%s14343_s17 + $0x908] sm:$0xff] %v1688_v33  ;;  %v1692_v35 = vld [vmem:[%s14335_s16 + $0x1230] sm:$0xff] }
  0xab   : > { %1691 = vst [vmem:[%s14343_s17 + $0x910] sm:$0xff] %v1690_v34  ;;  %v1694_v36 = vld [vmem:[%s14335_s16 + $0x1240] sm:$0xff]  ;;  %v1696_v37 = vld [vmem:[%s14335_s16 + $0x1250] sm:$0xff]  ;;  %1693 = vst [vmem:[%s14343_s17 + $0x918] sm:$0xff] %v1692_v35 }
  0xac   : > { %1695 = vst [vmem:[%s14343_s17 + $0x920] sm:$0xff] %v1694_v36  ;;  %1697 = vst [vmem:[%s14343_s17 + $0x928] sm:$0xff] %v1696_v37  ;;  %v1698_v38 = vld [vmem:[%s14335_s16 + $0x1260] sm:$0xff]  ;;  %v1700_v39 = vld [vmem:[%s14335_s16 + $0x1270] sm:$0xff] }
  0xad   : > { %v1702_v40 = vld [vmem:[%s14335_s16 + $0x1280] sm:$0xff]  ;;  %1699 = vst [vmem:[%s14343_s17 + $0x930] sm:$0xff] %v1698_v38  ;;  %1701 = vst [vmem:[%s14343_s17 + $0x938] sm:$0xff] %v1700_v39  ;;  %v1704_v41 = vld [vmem:[%s14335_s16 + $0x1290] sm:$0xff] }
  0xae   : > { %1703 = vst [vmem:[%s14343_s17 + $0x940] sm:$0xff] %v1702_v40  ;;  %v1706_v42 = vld [vmem:[%s14335_s16 + $0x12a0] sm:$0xff]  ;;  %v1708_v43 = vld [vmem:[%s14335_s16 + $0x12b0] sm:$0xff]  ;;  %1705 = vst [vmem:[%s14343_s17 + $0x948] sm:$0xff] %v1704_v41 }
  0xaf   : > { %1707 = vst [vmem:[%s14343_s17 + $0x950] sm:$0xff] %v1706_v42  ;;  %1709 = vst [vmem:[%s14343_s17 + $0x958] sm:$0xff] %v1708_v43  ;;  %v1710_v44 = vld [vmem:[%s14335_s16 + $0x12c0] sm:$0xff]  ;;  %v1712_v45 = vld [vmem:[%s14335_s16 + $0x12d0] sm:$0xff] }
  0xb0   : > { %v1714_v46 = vld [vmem:[%s14335_s16 + $0x12e0] sm:$0xff]  ;;  %1711 = vst [vmem:[%s14343_s17 + $0x960] sm:$0xff] %v1710_v44  ;;  %1713 = vst [vmem:[%s14343_s17 + $0x968] sm:$0xff] %v1712_v45  ;;  %v1716_v47 = vld [vmem:[%s14335_s16 + $0x12f0] sm:$0xff] }
  0xb1   : > { %1715 = vst [vmem:[%s14343_s17 + $0x970] sm:$0xff] %v1714_v46  ;;  %v1718_v48 = vld [vmem:[%s14335_s16 + $0x1300] sm:$0xff]  ;;  %v1720_v49 = vld [vmem:[%s14335_s16 + $0x1310] sm:$0xff]  ;;  %1717 = vst [vmem:[%s14343_s17 + $0x978] sm:$0xff] %v1716_v47 }
  0xb2   : > { %1719 = vst [vmem:[%s14343_s17 + $0x980] sm:$0xff] %v1718_v48  ;;  %1721 = vst [vmem:[%s14343_s17 + $0x988] sm:$0xff] %v1720_v49  ;;  %v1722_v50 = vld [vmem:[%s14335_s16 + $0x1320] sm:$0xff]  ;;  %v1724_v51 = vld [vmem:[%s14335_s16 + $0x1330] sm:$0xff] }
  0xb3   : > { %v1726_v52 = vld [vmem:[%s14335_s16 + $0x1340] sm:$0xff]  ;;  %1723 = vst [vmem:[%s14343_s17 + $0x990] sm:$0xff] %v1722_v50  ;;  %1725 = vst [vmem:[%s14343_s17 + $0x998] sm:$0xff] %v1724_v51  ;;  %v1728_v53 = vld [vmem:[%s14335_s16 + $0x1350] sm:$0xff] }
  0xb4   : > { %1727 = vst [vmem:[%s14343_s17 + $0x9a0] sm:$0xff] %v1726_v52  ;;  %v1730_v54 = vld [vmem:[%s14335_s16 + $0x1360] sm:$0xff]  ;;  %v1732_v55 = vld [vmem:[%s14335_s16 + $0x1370] sm:$0xff]  ;;  %1729 = vst [vmem:[%s14343_s17 + $0x9a8] sm:$0xff] %v1728_v53 }
  0xb5   : > { %1731 = vst [vmem:[%s14343_s17 + $0x9b0] sm:$0xff] %v1730_v54  ;;  %1733 = vst [vmem:[%s14343_s17 + $0x9b8] sm:$0xff] %v1732_v55  ;;  %v1734_v56 = vld [vmem:[%s14335_s16 + $0x1380] sm:$0xff]  ;;  %v1736_v57 = vld [vmem:[%s14335_s16 + $0x1390] sm:$0xff] }
  0xb6   : > { %v1738_v58 = vld [vmem:[%s14335_s16 + $0x13a0] sm:$0xff]  ;;  %1735 = vst [vmem:[%s14343_s17 + $0x9c0] sm:$0xff] %v1734_v56  ;;  %1737 = vst [vmem:[%s14343_s17 + $0x9c8] sm:$0xff] %v1736_v57  ;;  %v1740_v59 = vld [vmem:[%s14335_s16 + $0x13b0] sm:$0xff] }
  0xb7   : > { %1739 = vst [vmem:[%s14343_s17 + $0x9d0] sm:$0xff] %v1738_v58  ;;  %v1742_v60 = vld [vmem:[%s14335_s16 + $0x13c0] sm:$0xff]  ;;  %v1744_v61 = vld [vmem:[%s14335_s16 + $0x13d0] sm:$0xff]  ;;  %1741 = vst [vmem:[%s14343_s17 + $0x9d8] sm:$0xff] %v1740_v59 }
  0xb8   : > { %1743 = vst [vmem:[%s14343_s17 + $0x9e0] sm:$0xff] %v1742_v60  ;;  %1745 = vst [vmem:[%s14343_s17 + $0x9e8] sm:$0xff] %v1744_v61  ;;  %v1746_v62 = vld [vmem:[%s14335_s16 + $0x13e0] sm:$0xff]  ;;  %v1748_v63 = vld [vmem:[%s14335_s16 + $0x13f0] sm:$0xff] }
  0xb9   : > { %v1750_v0 = vld [vmem:[%s14335_s16 + $0x1400] sm:$0xff]  ;;  %1747 = vst [vmem:[%s14343_s17 + $0x9f0] sm:$0xff] %v1746_v62  ;;  %1749 = vst [vmem:[%s14343_s17 + $0x9f8] sm:$0xff] %v1748_v63  ;;  %v1752_v1 = vld [vmem:[%s14335_s16 + $0x1410] sm:$0xff] }
  0xba   : > { %1751 = vst [vmem:[%s14343_s17 + $0xa00] sm:$0xff] %v1750_v0  ;;  %v1754_v2 = vld [vmem:[%s14335_s16 + $0x1420] sm:$0xff]  ;;  %v1756_v3 = vld [vmem:[%s14335_s16 + $0x1430] sm:$0xff]  ;;  %1753 = vst [vmem:[%s14343_s17 + $0xa08] sm:$0xff] %v1752_v1 }
  0xbb   : > { %1755 = vst [vmem:[%s14343_s17 + $0xa10] sm:$0xff] %v1754_v2  ;;  %1757 = vst [vmem:[%s14343_s17 + $0xa18] sm:$0xff] %v1756_v3  ;;  %v1758_v4 = vld [vmem:[%s14335_s16 + $0x1440] sm:$0xff]  ;;  %v1760_v5 = vld [vmem:[%s14335_s16 + $0x1450] sm:$0xff] }
  0xbc   : > { %v1762_v6 = vld [vmem:[%s14335_s16 + $0x1460] sm:$0xff]  ;;  %1759 = vst [vmem:[%s14343_s17 + $0xa20] sm:$0xff] %v1758_v4  ;;  %1761 = vst [vmem:[%s14343_s17 + $0xa28] sm:$0xff] %v1760_v5  ;;  %v1764_v7 = vld [vmem:[%s14335_s16 + $0x1470] sm:$0xff] }
  0xbd   : > { %1763 = vst [vmem:[%s14343_s17 + $0xa30] sm:$0xff] %v1762_v6  ;;  %v1766_v8 = vld [vmem:[%s14335_s16 + $0x1480] sm:$0xff]  ;;  %v1768_v9 = vld [vmem:[%s14335_s16 + $0x1490] sm:$0xff]  ;;  %1765 = vst [vmem:[%s14343_s17 + $0xa38] sm:$0xff] %v1764_v7 }
  0xbe   : > { %1767 = vst [vmem:[%s14343_s17 + $0xa40] sm:$0xff] %v1766_v8  ;;  %1769 = vst [vmem:[%s14343_s17 + $0xa48] sm:$0xff] %v1768_v9  ;;  %v1770_v10 = vld [vmem:[%s14335_s16 + $0x14a0] sm:$0xff]  ;;  %v1772_v11 = vld [vmem:[%s14335_s16 + $0x14b0] sm:$0xff] }
  0xbf   : > { %v1774_v12 = vld [vmem:[%s14335_s16 + $0x14c0] sm:$0xff]  ;;  %1771 = vst [vmem:[%s14343_s17 + $0xa50] sm:$0xff] %v1770_v10  ;;  %1773 = vst [vmem:[%s14343_s17 + $0xa58] sm:$0xff] %v1772_v11  ;;  %v1776_v13 = vld [vmem:[%s14335_s16 + $0x14d0] sm:$0xff] }
  0xc0   : > { %1775 = vst [vmem:[%s14343_s17 + $0xa60] sm:$0xff] %v1774_v12  ;;  %v1778_v14 = vld [vmem:[%s14335_s16 + $0x14e0] sm:$0xff]  ;;  %v1780_v15 = vld [vmem:[%s14335_s16 + $0x14f0] sm:$0xff]  ;;  %1777 = vst [vmem:[%s14343_s17 + $0xa68] sm:$0xff] %v1776_v13 }
  0xc1   : > { %1779 = vst [vmem:[%s14343_s17 + $0xa70] sm:$0xff] %v1778_v14  ;;  %1781 = vst [vmem:[%s14343_s17 + $0xa78] sm:$0xff] %v1780_v15  ;;  %v1782_v16 = vld [vmem:[%s14335_s16 + $0x1500] sm:$0xff]  ;;  %v1784_v17 = vld [vmem:[%s14335_s16 + $0x1510] sm:$0xff] }
  0xc2   : > { %v1786_v18 = vld [vmem:[%s14335_s16 + $0x1520] sm:$0xff]  ;;  %1783 = vst [vmem:[%s14343_s17 + $0xa80] sm:$0xff] %v1782_v16  ;;  %1785 = vst [vmem:[%s14343_s17 + $0xa88] sm:$0xff] %v1784_v17  ;;  %v1788_v19 = vld [vmem:[%s14335_s16 + $0x1530] sm:$0xff] }
  0xc3   : > { %1787 = vst [vmem:[%s14343_s17 + $0xa90] sm:$0xff] %v1786_v18  ;;  %v1790_v20 = vld [vmem:[%s14335_s16 + $0x1540] sm:$0xff]  ;;  %v1792_v21 = vld [vmem:[%s14335_s16 + $0x1550] sm:$0xff]  ;;  %1789 = vst [vmem:[%s14343_s17 + $0xa98] sm:$0xff] %v1788_v19 }
  0xc4   : > { %1791 = vst [vmem:[%s14343_s17 + $0xaa0] sm:$0xff] %v1790_v20  ;;  %1793 = vst [vmem:[%s14343_s17 + $0xaa8] sm:$0xff] %v1792_v21  ;;  %v1794_v22 = vld [vmem:[%s14335_s16 + $0x1560] sm:$0xff]  ;;  %v1796_v23 = vld [vmem:[%s14335_s16 + $0x1570] sm:$0xff] }
  0xc5   : > { %v1798_v24 = vld [vmem:[%s14335_s16 + $0x1580] sm:$0xff]  ;;  %1795 = vst [vmem:[%s14343_s17 + $0xab0] sm:$0xff] %v1794_v22  ;;  %1797 = vst [vmem:[%s14343_s17 + $0xab8] sm:$0xff] %v1796_v23  ;;  %v1800_v25 = vld [vmem:[%s14335_s16 + $0x1590] sm:$0xff] }
  0xc6   : > { %1799 = vst [vmem:[%s14343_s17 + $0xac0] sm:$0xff] %v1798_v24  ;;  %v1802_v26 = vld [vmem:[%s14335_s16 + $0x15a0] sm:$0xff]  ;;  %v1804_v27 = vld [vmem:[%s14335_s16 + $0x15b0] sm:$0xff]  ;;  %1801 = vst [vmem:[%s14343_s17 + $0xac8] sm:$0xff] %v1800_v25 }
  0xc7   : > { %1803 = vst [vmem:[%s14343_s17 + $0xad0] sm:$0xff] %v1802_v26  ;;  %1805 = vst [vmem:[%s14343_s17 + $0xad8] sm:$0xff] %v1804_v27  ;;  %v1806_v28 = vld [vmem:[%s14335_s16 + $0x15c0] sm:$0xff]  ;;  %v1808_v29 = vld [vmem:[%s14335_s16 + $0x15d0] sm:$0xff] }
  0xc8   : > { %v1810_v30 = vld [vmem:[%s14335_s16 + $0x15e0] sm:$0xff]  ;;  %1807 = vst [vmem:[%s14343_s17 + $0xae0] sm:$0xff] %v1806_v28  ;;  %1809 = vst [vmem:[%s14343_s17 + $0xae8] sm:$0xff] %v1808_v29  ;;  %v1812_v31 = vld [vmem:[%s14335_s16 + $0x15f0] sm:$0xff] }
  0xc9   : > { %1811 = vst [vmem:[%s14343_s17 + $0xaf0] sm:$0xff] %v1810_v30  ;;  %v1814_v32 = vld [vmem:[%s14335_s16 + $0x1600] sm:$0xff]  ;;  %v1816_v33 = vld [vmem:[%s14335_s16 + $0x1610] sm:$0xff]  ;;  %1813 = vst [vmem:[%s14343_s17 + $0xaf8] sm:$0xff] %v1812_v31 }
  0xca   : > { %1815 = vst [vmem:[%s14343_s17 + $0xb00] sm:$0xff] %v1814_v32  ;;  %1817 = vst [vmem:[%s14343_s17 + $0xb08] sm:$0xff] %v1816_v33  ;;  %v1818_v34 = vld [vmem:[%s14335_s16 + $0x1620] sm:$0xff]  ;;  %v1820_v35 = vld [vmem:[%s14335_s16 + $0x1630] sm:$0xff] }
  0xcb   : > { %v1822_v36 = vld [vmem:[%s14335_s16 + $0x1640] sm:$0xff]  ;;  %1819 = vst [vmem:[%s14343_s17 + $0xb10] sm:$0xff] %v1818_v34  ;;  %1821 = vst [vmem:[%s14343_s17 + $0xb18] sm:$0xff] %v1820_v35  ;;  %v1824_v37 = vld [vmem:[%s14335_s16 + $0x1650] sm:$0xff] }
  0xcc   : > { %1823 = vst [vmem:[%s14343_s17 + $0xb20] sm:$0xff] %v1822_v36  ;;  %v1826_v38 = vld [vmem:[%s14335_s16 + $0x1660] sm:$0xff]  ;;  %v1828_v39 = vld [vmem:[%s14335_s16 + $0x1670] sm:$0xff]  ;;  %1825 = vst [vmem:[%s14343_s17 + $0xb28] sm:$0xff] %v1824_v37 }
  0xcd   : > { %1827 = vst [vmem:[%s14343_s17 + $0xb30] sm:$0xff] %v1826_v38  ;;  %1829 = vst [vmem:[%s14343_s17 + $0xb38] sm:$0xff] %v1828_v39 }
  0xce PF: > { %p12155_p5 = scmp.ge.s32.totalorder %s14215_s23, 1  ;;  %p1859_p6 = scmp.lt.s32.totalorder %s14215_s23, 3 }
  0xd0   : > { %p1860_p7 = pnand %p12155_p5, %p1859_p6 }
  0xd1   : > { %s1866_s18 = sand.u32 (!%p1860_p7), 1, %s14207_s21   ;;  %s12156_s19 = sshll.u32 (!%p1860_p7), %s14315_s24, 2 }
  0xd2   : > { %1863 = sbr.rel (%p1860_p7) target bundleno = 2707 (0xa93), region = 102  ;;  %p1917_p8 = scmp.lt.s32.totalorder (!%p1860_p7), %s12156_s19, 7 }
  0xd3   : > { %s13902_s20 = smul.u32 (!%p1860_p7), 2880, %s1866_s18  ;;  %s12158_s26 = sshll.u32 (!%p1860_p7), %s14315_s24, 6 }
  0xd4   : > { %p1927_p9 = scmp.lt.s32.totalorder (!%p1860_p7), %s12158_s26, 127  ;;  %p12160_p10 = scmp.ne.s32.totalorder (!%p1860_p7), %s14315_s24, 0 }
  0xd5   : > { %s15079_s18 = scalar_lea.vmem (!%p1860_p7), [#allocation4], %s13902_s20 }
  0xd9   : > { %s16313_s19 = smov (!%p1917_p8, %s12156_s19), 7  ;;  %s16315_s26 = smov (!%p1927_p9, %s12158_s26), 127 }
  0xda   : > { %s1919_s23 = scalar_lea.vmem %s16287_s6, %s16313_s19  ;;  %s12159_s15 = sshll.u32 %s16315_s26, 2  ;;  %v1951_v40 = vld [vmem:[%s16281_s0 + $0x8] sm:$0x7f] (!%p12160_p10)  ;;  %vm1974_vm0 = vcmask (!%p12160_p10), 1046528   ;;  %v1952_v41 = vld [vmem:[%s16281_s0 + $0x10] sm:$0x7f] (!%p12160_p10) }
  0xdb   : > { %s15077_s17 = scalar_lea.vmem %s16289_s8, %s12159_s15  ;;  %1936 = sbr.rel (%p12160_p10) target bundleno = 1273 (0x4f9), region = 110  ;;  %12164 = vmatprep.subr.msk.mxu0 (!%p12160_p10), %vm1974_vm0, %v1951_v40  ;;  %13482 = vmatprep.subr.msk.mxu1 (!%p12160_p10), %vm1974_vm0, %v1952_v41  ;;  %v1950_v42 = vld [vmem:[%s16281_s0] sm:$0x7f] (!%p12160_p10)  ;;  %v14217_v43 = vmov (!%p12160_p10), 0.0   ;;  %vm1967_vm1 = vcmask (!%p12160_p10), 56320   ;;  %v15102_v45 = vld [vmem:[%s16282_s1 + $0x8] sm:$0xff] (!%p12160_p10) }
  0xdc   : > { %1937 = vst [vmem:[#allocation3] sm:$0x3] (!%p12160_p10), %v14217_v43  ;;  %v15097_v44 = vld [vmem:[%s16282_s1] sm:$0xff] (!%p12160_p10)  ;;  %12165 = vmatpush1.msk.msra.mxu0 (!%p12160_p10), %vm1974_vm0, %v1950_v42  ;;  %2048 = vmatprep.mubr.f32.mxu0 (!%p12160_p10), %v14217_v43  ;;  %v12163_v46 = vld [vmem:[%s16281_s0 + $0x28] sm:$0x7f] (!%p12160_p10)  ;;  %v14218_v50 = vmov (!%p12160_p10), 0  }
  0xdd   : > { %v12162_v47 = vld [vmem:[%s16281_s0 + $0x20] sm:$0x7f] (!%p12160_p10)  ;;  %13483 = vmatpush3.msk.msra.mxu1 (!%p12160_p10), %vm1974_vm0, %v1952_v41  ;;  %13484 = vmatprep.mubr.msk.f32.mxu1 (!%p12160_p10), %vm1967_vm1, %v15097_v44  ;;  %v12161_v48 = vld [vmem:[%s16281_s0 + $0x18] sm:$0x7f] (!%p12160_p10)  ;;  %v1941_v51 = vld [vmem:[%s16283_s2 + $0x8] sm:$0xff] (!%p12160_p10)  ;;  %v14219_v35 = vmov (!%p12160_p10), 0.0|0.0  }
  0xde   : > { %12166 = vmatmul.mubr.msk.f32.vlgmr.msra.gmra.mrb[0].mxu0 (!%p12160_p10), %vm1967_vm1, %v15097_v44  ;;  %13485 = vmatmul.mubr.msk.f32.vlgmr.msra.gmra.mrb[0].mxu1 (!%p12160_p10), %vm1967_vm1, %v15102_v45  ;;  %v1940_v49 = vld [vmem:[%s16283_s2] sm:$0xff] (!%p12160_p10)  ;;  %s14220_s28 = smov (!%p12160_p10), 127   ;;  %vm14221_vm2 = vmmov (!%p12160_p10), 0   ;;  %s14222_s15 = smov (!%p12160_p10), 126   ;;  %vm2339_vm3 = vcmask (!%p12160_p10), 1039360   ;;  %vm2350_vm4 = vcmask (!%p12160_p10), 130048  }
  0xdf   : > { %13487 = vmatprep.subr.msk.mxu0 (!%p12160_p10), %vm1974_vm0, %v12163_v46  ;;  %12171 = vmatprep.subr.msk.mxu1 (!%p12160_p10), %vm1974_vm0, %v12162_v47  ;;  %s14223_s21 = smov (!%p12160_p10), 125   ;;  %s14224_s16 = smov (!%p12160_p10), 124   ;;  %vm2651_vm5 = vcmask (!%p12160_p10), 1031168   ;;  %vm2821_vm6 = vcmask (!%p12160_p10), 1022976   ;;  %vm2991_vm7 = vcmask (!%p12160_p10), 1014784   ;;  %vm3161_vm8 = vcmask (!%p12160_p10), 1006592  }
  0xe0   : > { %13488 = vmatpush3.msk.msra.mxu0 (!%p12160_p10), %vm1974_vm0, %v12163_v46  ;;  %2054 = vmatprep.mubr.f32.mxu0 (!%p12160_p10), %v14217_v43  ;;  %s14225_s27 = smov (!%p12160_p10), 123   ;;  %s14226_s29 = smov (!%p12160_p10), 122   ;;  %vm3331_vm9 = vcmask (!%p12160_p10), 998400   ;;  %vm3563_vm10 = vcmask (!%p12160_p10), 1040384   ;;  %vm3564_vm11 = vsmask.f32 (!%p12160_p10), 256 }
  0xe1   : > { %12172 = vmatpush1.msk.msra.mxu1 (!%p12160_p10), %vm1974_vm0, %v12161_v48  ;;  %2215 = vmatprep.mubr.f32.mxu1 (!%p12160_p10), %v14217_v43  ;;  %vm3566_vm12 = vcmask (!%p12160_p10), 1041409   ;;  %vm3567_vm13 = vsmask.f32 (!%p12160_p10), 1280  ;;  %vm15537_vm14 = vmand (!%p12160_p10), %vm3563_vm10, %vm3564_vm11 }
  0xe2   : > { %12167 = vmatmul.mubr.msk.f32.gmra.mrb[2].mxu0 %vm1967_vm1, %v15102_v45  ;;  %12173 = vmatmul.mubr.msk.f32.vlgmr.msra.gmra.mrb[2].mxu1 %vm1967_vm1, %v15097_v44  ;;  %vm3568_vm15 = vmand %vm3566_vm12, %vm3567_vm13 }
  0xe3   : > { %2221 = vmatprep.mubr.f32.mxu1 %v14217_v43  ;;  %13489 = vmatprep.mubr.msk.f32.mxu0 %vm1967_vm1, %v15097_v44 }
  0xe4   : > { %13950 = vset.pattern.permute.xlu0 %v14218_v50  ;;  %13639 = vmatprep.subr.bf16.mxu1 %v14219_v35 }
  0xe5   : > { %1959 = vperm.xlu0 %13950, %v1940_v49  }
  0xe6   : > { %12174 = vmatmul.mubr.msk.f32.gmra.mrb[4].mxu1 %vm1967_vm1, %v15102_v45  ;;  %13490 = vmatmul.mubr.msk.f32.vlgmr.msra.gmra.mrb[4].mxu0 %vm1967_vm1, %v15102_v45 }
  0xe7   : > { %2418 = vmatprep.mubr.f32.mxu0 %v14217_v43  ;;  %13496 = vmatprep.mubr.msk.f32.mxu1 %vm14221_vm2, %v14217_v43 }
  0xe9   : > { %1964 = vperm.xlu0 %13950, %v1941_v51  }
 0x164   : > { %v15146_v52 = vpop.permute.xlu0 %1959 }
 0x168   : > { %v15149_v58 = vpop.permute.xlu0 %1964 }
 0x1b1   : > { %v2050_v53 = vpop.f32.mrb[0].mxu0  ;;  %v13486_v54 = vpop.f32.mrb[0].mxu1 }
 0x1b2   : > { %v2052_v55 = vpop.f32.mrb[1].mxu0  ;;  %v2127_v56 = vpop.f32.mrb[1].mxu1  ;;  %v2051_v57 = vadd.f32 %v2050_v53, %v15146_v52  ;;  %v2133_v5 = vadd.f32 %v13486_v54, %v15149_v58 }
 0x1b3   : > { %v2053_v59 = vadd.f32 %v2052_v55, %v15146_v52  ;;  %v2128_v7 = vadd.f32 %v2127_v56, %v15146_v52 }
 0x1b4   : > { %v2136_v2 = vmax.f32 %v2051_v57, 0.0  ;;  %v2141_v22 = vmax.f32 %v2133_v5, 0.0 }
 0x1b5   : > { %v2056_v60 = vpop.f32.mrb[2].mxu0  ;;  %v2217_v61 = vpop.f32.mrb[2].mxu1  ;;  %v2137_v6 = vmax.f32 %v2053_v59, 0.0  ;;  %v2138_v24 = vmax.f32 %v2128_v7, 0.0 }
 0x1b6   : > { %v2218_v62 = vadd.f32 %v2217_v61, %v15146_v52  ;;  %v2058_v63 = vpop.f32.mrb[3].mxu0  ;;  %v2219_v0 = vpop.f32.mrb[3].mxu1  ;;  %v2057_v3 = vadd.f32 %v2056_v60, %v15149_v58 }
 0x1b7   : > { %v2220_v1 = vadd.f32 %v2219_v0, %v15146_v52  ;;  %v2059_v8 = vadd.f32 %v2058_v63, %v15149_v58 }
 0x1b8   : > { %v2303_v4 = vmax.f32 %v2218_v62, 0.0  ;;  %v2139_v20 = vmax.f32 %v2057_v3, 0.0 }
 0x1b9   : > { %v2304_v9 = vmax.f32 %v2220_v1, 0.0  ;;  %v2223_v10 = vpop.f32.mrb[4].mxu1  ;;  %v13491_v11 = vpop.f32.mrb[4].mxu0  ;;  %v2140_v25 = vmax.f32 %v2059_v8, 0.0 }
 0x1ba   : > { %v2309_v12 = vadd.f32 %v2303_v4, %v2136_v2  ;;  %v2224_v13 = vadd.f32 %v2223_v10, %v15149_v58  ;;  %v2300_v14 = vadd.f32 %v13491_v11, %v15149_v58  ;;  %v2225_v15 = vpop.f32.mrb[5].mxu1  ;;  %v2294_v16 = vpop.f32.mrb[5].mxu0 }
 0x1bb   : > { %v2310_v17 = vadd.f32 %v2304_v9, %v2137_v6  ;;  %v2226_v18 = vadd.f32 %v2225_v15, %v15149_v58  ;;  %v2295_v19 = vadd.f32 %v2294_v16, %v15146_v52  ;;  %v15216_v9 = vld [vmem:[%s16284_s3 + $0x8] sm:$0xff] }
 0x1bc   : > { %v2306_v21 = vmax.f32 %v2224_v13, 0.0  ;;  %v2308_v23 = vmax.f32 %v2300_v14, 0.0  ;;  %v15162_v32 = vmul.f32 0.5, %v2309_v12  ;;  %v15230_v14 = vld [vmem:[%s16284_s3] sm:$0xff] }
 0x1bd   : > { %v2307_v26 = vmax.f32 %v2226_v18, 0.0  ;;  %v2305_v27 = vmax.f32 %v2295_v19, 0.0  ;;  %v15169_v36 = vmul.f32 0.5, %v2310_v17 }
 0x1be   : > { %v2312_v28 = vadd.f32 %v2306_v21, %v2139_v20  ;;  %v2314_v29 = vadd.f32 %v2308_v23, %v2141_v22 }
 0x1bf   : > { %v2313_v30 = vadd.f32 %v2307_v26, %v2140_v25  ;;  %v2311_v31 = vadd.f32 %v2305_v27, %v2138_v24  ;;  %v15250_v25 = vld [vmem:[%s16284_s3 + $0x10] sm:$0xff] }
 0x1c0   : > { %v15164_v33 = vmul.f32 0.5, %v2312_v28  ;;  %v15166_v34 = vmul.f32 0.5, %v2314_v29 }
 0x1c1   : > { %v15171_v37 = vmul.f32 0.5, %v2313_v30  ;;  %v15173_v38 = vmul.f32 0.5, %v2311_v31 }
 0x1c2   : > { %v13961_v39 = vpack.i.bf16 %v15164_v33, %v15162_v32  ;;  %v13644_v47 = vpack.c.bf16 %v15164_v33, %v15162_v32 }
 0x1c3   : > { %v13951_v40 = vpack.i.bf16 %v15173_v38, %v15169_v36  ;;  %v13971_v41 = vpack.i.bf16 %v15166_v34, %v15171_v37  ;;  %v13642_v42 = vpack.c.bf16 %v15171_v37, %v15169_v36  ;;  %v13647_v46 = vpack.c.bf16 %v15166_v34, %v15173_v38  ;;  %v15267_v38 = vld [vmem:[%s16284_s3 + $0x18] sm:$0xff] }
 0x1c4   : > { %13962 = vrot.lane.b32.xlu0 %v13961_v39, %s14220_s28 }
 0x1c5   : > { %13952 = vrot.lane.b32.xlu1 %v13951_v40, %s14220_s28 }
 0x1c8   : > { %13972 = vrot.lane.b32.xlu0 %v13971_v41, %s14222_s15 }
 0x1c9   : > { %13957 = vrot.lane.b32.xlu1 %v13971_v41, %s14220_s28 }
 0x1cc   : > { %13982 = vrot.lane.b32.xlu0 %v13951_v40, %s14223_s21 }
 0x1cd   : > { %13967 = vrot.lane.b32.xlu1 %v13951_v40, %s14222_s15 }
 0x1d0   : > { %13992 = vrot.lane.b32.xlu0 %v13961_v39, %s14223_s21 }
 0x1d1   : > { %13977 = vrot.lane.b32.xlu1 %v13961_v39, %s14222_s15 }
 0x1d4   : > { %14002 = vrot.lane.b32.xlu0 %v13971_v41, %s14224_s16 }
 0x1d5   : > { %13987 = vrot.lane.b32.xlu1 %v13971_v41, %s14223_s21 }
 0x1d8   : > { %14012 = vrot.lane.b32.xlu0 %v13951_v40, %s14225_s27 }
 0x1d9   : > { %13997 = vrot.lane.b32.xlu1 %v13951_v40, %s14224_s16 }
 0x1dc   : > { %14022 = vrot.lane.b32.xlu0 %v13961_v39, %s14225_s27 }
 0x1dd   : > { %14007 = vrot.lane.b32.xlu1 %v13961_v39, %s14224_s16 }
 0x1e0   : > { %14032 = vrot.lane.b32.xlu0 %v13971_v41, %s14226_s29 }
 0x1e1   : > { %14017 = vrot.lane.b32.xlu1 %v13971_v41, %s14225_s27 }
 0x1e5   : > { %14027 = vrot.lane.b32.xlu1 %v13951_v40, %s14226_s29 }
 0x1e9   : > { %14037 = vrot.lane.b32.xlu1 %v13961_v39, %s14226_s29 }
 0x236   : > { %v13963_v48 = vpop.permute.xlu0 %13962 }
 0x237   : > { %v13953_v49 = vpop.permute.xlu1 %13952  ;;  %v13964_v50 = vunpack.i.l.bf16 %v13963_v48  ;;  %v13965_v56 = vunpack.i.h.bf16 %v13963_v48 }
 0x238   : > { %v13954_v51 = vunpack.i.l.bf16 %v13953_v49  ;;  %v13955_v53 = vunpack.i.h.bf16 %v13953_v49  ;;  %v15285_v49 = vld [vmem:[%s16284_s3 + $0x20] sm:$0xff] }
 0x23a   : > { %v13973_v54 = vpop.permute.xlu0 %13972  ;;  %v2340_v60 = vsel %vm2339_vm3, %v13964_v50, %v13954_v51  ;;  %v2341_v0 = vsel %vm2339_vm3, %v13954_v51, %v13955_v53 }
 0x23b   : > { %v13958_v55 = vpop.permute.xlu1 %13957  ;;  %v13975_v5 = vunpack.i.h.bf16 %v13973_v54  ;;  %v13974_v6 = vunpack.i.l.bf16 %v13973_v54 }
 0x23c   : > { %v13960_v57 = vunpack.i.h.bf16 %v13958_v55  ;;  %v13959_v59 = vunpack.i.l.bf16 %v13958_v55 }
 0x23d   : > { %v2655_v13 = vsel %vm2651_vm5, %v13974_v6, %v13975_v5 }
 0x23e   : > { %v2342_v61 = vsel %vm2339_vm3, %v13965_v56, %v13959_v59  ;;  %v13640_v62 = vpack.c.bf16 %v13960_v57, %v13955_v53  ;;  %v15209_v63 = vpop.permute.xlu0 %13982  ;;  %v2343_v1 = vsel %vm2339_vm3, %v13959_v59, %v13960_v57 }
 0x23f   : > { %v13637_v2 = vpack.c.bf16 %v2342_v61, %v2340_v60  ;;  %v13968_v3 = vpop.permute.xlu1 %13967  ;;  %v13635_v4 = vpack.c.bf16 %v2343_v1, %v2341_v0  ;;  %v13985_v18 = vunpack.i.h.bf16 %v15209_v63  ;;  %v13984_v19 = vunpack.i.l.bf16 %v15209_v63 }
 0x240   : > { %v13970_v7 = vunpack.i.h.bf16 %v13968_v3  ;;  %v13969_v8 = vunpack.i.l.bf16 %v13968_v3  ;;  %13641 = vmatpush3.bf16.msra.mxu1 %v13640_v62 }
 0x241   : > { %13636 = vmatprep.subr.bf16.mxu0 %v13635_v4  ;;  %13646 = vmatprep.subr.bf16.mxu1 %v14219_v35  ;;  %v2823_v30 = vsel %vm2821_vm6, %v13984_v19, %v13985_v18 }
 0x242   : > { %v15219_v10 = vpop.permute.xlu0 %13992  ;;  %13638 = vmatpush1.bf16.msra.mxu0 %v13637_v2  ;;  %v2653_v11 = vsel %vm2651_vm5, %v13969_v8, %v13970_v7  ;;  %v13654_v20 = vpack.c.bf16 %v13975_v5, %v13970_v7 }
 0x243   : > { %v13978_v12 = vpop.permute.xlu1 %13977  ;;  %13643 = vmatprep.subr.bf16.mxu0 %v13642_v42  ;;  %13497 = vmatmul.mubr.msk.f32.vlgmr.msra.gmra.mrb[6].mxu1 %vm2350_vm4, %v15216_v9  ;;  %v13649_v17 = vpack.c.bf16 %v2655_v13, %v2653_v11  ;;  %v13995_v41 = vunpack.i.h.bf16 %v15219_v10  ;;  %v13994_v42 = vunpack.i.l.bf16 %v15219_v10 }
 0x244   : > { %13648 = vmatpush3.bf16.msra.mxu1 %v13647_v46  ;;  %13503 = vmatprep.mubr.msk.f32.mxu1 %vm14221_vm2, %v14217_v43  ;;  %v13980_v15 = vunpack.i.h.bf16 %v13978_v12  ;;  %v13979_v16 = vunpack.i.l.bf16 %v13978_v12  ;;  %v12199_v12 = vld [vmem:[%s16281_s0 + $0x40] sm:$0x7f] }
 0x245   : > { %12178 = vmatmul.mubr.msk.f32.vlgmr.msra.gmra.mrb[6].mxu0 %vm2350_vm4, %v15216_v9  ;;  %13653 = vmatprep.subr.bf16.mxu1 %v14219_v35  ;;  %v2822_v53 = vsel %vm2821_vm6, %v13994_v42, %v13984_v19  ;;  %v12201_v19 = vld [vmem:[%s16281_s0 + $0x50] sm:$0x7f] }
 0x246   : > { %v15237_v21 = vpop.permute.xlu0 %14002  ;;  %13645 = vmatpush1.bf16.msra.mxu0 %v13644_v47  ;;  %2562 = vmatprep.mubr.f32.mxu0 %v14217_v43  ;;  %v2652_v26 = vsel %vm2651_vm5, %v13979_v16, %v13969_v8  ;;  %v2654_v27 = vsel %vm2651_vm5, %v13980_v15, %v13974_v6  ;;  %v15307_v6 = vld [vmem:[%s16284_s3 + $0x28] sm:$0xff]  ;;  %v15324_v16 = vld [vmem:[%s16284_s3 + $0x30] sm:$0xff] }
 0x247   : > { %v13988_v22 = vpop.permute.xlu1 %13987  ;;  %13650 = vmatprep.subr.bf16.mxu0 %v13649_v17  ;;  %13504 = vmatmul.mubr.msk.f32.vlgmr.msra.gmra.mrb[8].mxu1 %vm2350_vm4, %v15230_v14  ;;  %v13651_v34 = vpack.c.bf16 %v2654_v27, %v2652_v26  ;;  %v14005_v36 = vunpack.i.h.bf16 %v15237_v21  ;;  %v14004_v48 = vunpack.i.l.bf16 %v15237_v21 }
 0x248   : > { %v13990_v23 = vunpack.i.h.bf16 %v13988_v22  ;;  %v13989_v24 = vunpack.i.l.bf16 %v13988_v22  ;;  %13655 = vmatpush3.bf16.msra.mxu1 %v13654_v20  ;;  %13510 = vmatprep.mubr.msk.f32.mxu1 %vm14221_vm2, %v14217_v43 }
 0x249   : > { %13660 = vmatprep.subr.bf16.mxu1 %v14219_v35  ;;  %v2995_v59 = vsel %vm2991_vm7, %v14004_v48, %v14005_v36 }
 0x24a   : > { %v13661_v28 = vpack.c.bf16 %v13990_v23, %v13985_v18  ;;  %v15255_v29 = vpop.permute.xlu0 %14012  ;;  %v2825_v31 = vsel %vm2821_vm6, %v13989_v24, %v13990_v23  ;;  %v2824_v50 = vsel %vm2821_vm6, %v13995_v41, %v13989_v24  ;;  %v12200_v24 = vld [vmem:[%s16281_s0 + $0x48] sm:$0x7f]  ;;  %v12202_v41 = vld [vmem:[%s16281_s0 + $0x58] sm:$0x7f] }
 0x24b   : > { %v13998_v32 = vpop.permute.xlu1 %13997  ;;  %13511 = vmatmul.mubr.msk.f32.vlgmr.msra.gmra.mrb[10].mxu1 %vm2350_vm4, %v15250_v25  ;;  %v13656_v33 = vpack.c.bf16 %v2825_v31, %v2823_v30  ;;  %v13658_v55 = vpack.c.bf16 %v2824_v50, %v2822_v53  ;;  %v14015_v56 = vunpack.i.h.bf16 %v15255_v29  ;;  %v14014_v3 = vunpack.i.l.bf16 %v15255_v29 }
 0x24c   : > { %v14000_v37 = vunpack.i.h.bf16 %v13998_v32  ;;  %13662 = vmatpush3.bf16.msra.mxu1 %v13661_v28  ;;  %13517 = vmatprep.mubr.msk.f32.mxu1 %vm14221_vm2, %v14217_v43  ;;  %v13999_v39 = vunpack.i.l.bf16 %v13998_v32 }
 0x24d   : > { %12180 = vmatmul.mubr.msk.f32.vlgmr.msra.gmra.mrb[6].mxu0 %vm2350_vm4, %v15230_v14  ;;  %13667 = vmatprep.subr.bf16.mxu1 %v14219_v35  ;;  %v3163_v15 = vsel %vm3161_vm8, %v14014_v3, %v14015_v56 }
 0x24e   : > { %v13668_v40 = vpack.c.bf16 %v14005_v36, %v14000_v37  ;;  %13652 = vmatpush1.bf16.msra.mxu0 %v13651_v34  ;;  %2729 = vmatprep.mubr.f32.mxu0 %v14217_v43  ;;  %v15275_v46 = vpop.permute.xlu0 %14022  ;;  %v2993_v51 = vsel %vm2991_vm7, %v13999_v39, %v14000_v37 }
 0x24f   : > { %13657 = vmatprep.subr.bf16.mxu0 %v13656_v33  ;;  %v14008_v47 = vpop.permute.xlu1 %14007  ;;  %13518 = vmatmul.mubr.msk.f32.vlgmr.msra.gmra.mrb[12].mxu1 %vm2350_vm4, %v15267_v38  ;;  %v13663_v63 = vpack.c.bf16 %v2995_v59, %v2993_v51  ;;  %v14025_v20 = vunpack.i.h.bf16 %v15275_v46  ;;  %v14024_v21 = vunpack.i.l.bf16 %v15275_v46 }
 0x250   : > { %13669 = vmatpush3.bf16.msra.mxu1 %v13668_v40  ;;  %13524 = vmatprep.mubr.msk.f32.mxu1 %vm14221_vm2, %v14217_v43  ;;  %v14010_v60 = vunpack.i.h.bf16 %v14008_v47  ;;  %v14009_v61 = vunpack.i.l.bf16 %v14008_v47  ;;  %v12197_v40 = vld [vmem:[%s16281_s0 + $0x30] sm:$0x7f] }
 0x251   : > { %13674 = vmatprep.subr.bf16.mxu1 %v14219_v35  ;;  %v3162_v28 = vsel %vm3161_vm8, %v14024_v21, %v14014_v3 }
 0x252   : > { %v15297_v62 = vpop.permute.xlu0 %14032  ;;  %v2992_v7 = vsel %vm2991_vm7, %v14009_v61, %v13999_v39  ;;  %v2994_v8 = vsel %vm2991_vm7, %v14010_v60, %v14004_v48  ;;  %v12198_v39 = vld [vmem:[%s16281_s0 + $0x38] sm:$0x7f] }
 0x253   : > { %v14018_v54 = vpop.permute.xlu1 %14017  ;;  %13525 = vmatmul.mubr.msk.f32.vlgmr.msra.gmra.mrb[14].mxu1 %vm2350_vm4, %v15285_v49  ;;  %v14035_v4 = vunpack.i.h.bf16 %v15297_v62  ;;  %v13665_v13 = vpack.c.bf16 %v2994_v8, %v2992_v7  ;;  %v14034_v22 = vunpack.i.l.bf16 %v15297_v62 }
 0x254   : > { %v14020_v57 = vunpack.i.h.bf16 %v14018_v54  ;;  %13531 = vmatprep.mubr.msk.f32.mxu1 %vm14221_vm2, %v14217_v43  ;;  %v14019_v0 = vunpack.i.l.bf16 %v14018_v54 }
 0x255   : > { %12182 = vmatmul.mubr.msk.f32.vlgmr.msra.gmra.mrb[6].mxu0 %vm2350_vm4, %v15250_v25  ;;  %v3335_v30 = vsel %vm3331_vm9, %v14034_v22, %v14035_v4 }
 0x256   : > { %v13675_v1 = vpack.c.bf16 %v14020_v57, %v14015_v56  ;;  %13659 = vmatpush1.bf16.msra.mxu0 %v13658_v55  ;;  %2899 = vmatprep.mubr.f32.mxu0 %v14217_v43  ;;  %v3165_v11 = vsel %vm3161_vm8, %v14019_v0, %v14020_v57  ;;  %v3164_v23 = vsel %vm3161_vm8, %v14025_v20, %v14019_v0 }
 0x257   : > { %13664 = vmatprep.subr.bf16.mxu0 %v13663_v63  ;;  %v14028_v2 = vpop.permute.xlu1 %14027  ;;  %v13670_v17 = vpack.c.bf16 %v3165_v11, %v3163_v15  ;;  %v13672_v29 = vpack.c.bf16 %v3164_v23, %v3162_v28 }
 0x258   : > { %v14030_v5 = vunpack.i.h.bf16 %v14028_v2  ;;  %13676 = vmatpush3.bf16.msra.mxu1 %v13675_v1  ;;  %v14029_v18 = vunpack.i.l.bf16 %v14028_v2 }
 0x259   : > { %13681 = vmatprep.subr.bf16.mxu1 %v14219_v35 }
 0x25a   : > { %v13682_v10 = vpack.c.bf16 %v14035_v4, %v14030_v5  ;;  %v3333_v27 = vsel %vm3331_vm9, %v14029_v18, %v14030_v5 }
 0x25b   : > { %13532 = vmatmul.mubr.msk.f32.vlgmr.msra.gmra.mrb[16].mxu1 %vm2350_vm4, %v15307_v6  ;;  %v14038_v26 = vpop.permute.xlu1 %14037  ;;  %v13677_v33 = vpack.c.bf16 %v3335_v30, %v3333_v27 }
 0x25c   : > { %13683 = vmatpush3.bf16.msra.mxu1 %v13682_v10  ;;  %13538 = vmatprep.mubr.msk.f32.mxu1 %vm14221_vm2, %v14217_v43  ;;  %v14040_v31 = vunpack.i.h.bf16 %v14038_v26  ;;  %v14039_v32 = vunpack.i.l.bf16 %v14038_v26 }
 0x25d   : > { %12184 = vmatmul.mubr.msk.f32.vlgmr.msra.gmra.mrb[6].mxu0 %vm2350_vm4, %v15267_v38  ;;  %13541 = vmatprep.subr.msk.mxu1 %vm1974_vm0, %v12199_v12 }
 0x25e   : > { %13666 = vmatpush1.bf16.msra.mxu0 %v13665_v13  ;;  %3069 = vmatprep.mubr.f32.mxu0 %v14217_v43  ;;  %v3332_v34 = vsel %vm3331_vm9, %v14039_v32, %v14029_v18  ;;  %v3334_v36 = vsel %vm3331_vm9, %v14040_v31, %v14034_v22 }
 0x25f   : > { %13671 = vmatprep.subr.bf16.mxu0 %v13670_v17  ;;  %13539 = vmatmul.mubr.msk.f32.vlgmr.msra.gmra.mrb[18].mxu1 %vm2350_vm4, %v15324_v16  ;;  %v13679_v37 = vpack.c.bf16 %v3334_v36, %v3332_v34 }
 0x260   : > { %13542 = vmatpush3.msk.msra.mxu1 %vm1974_vm0, %v12199_v12  ;;  %13543 = vmatprep.mubr.msk.f32.mxu1 %vm1967_vm1, %v15097_v44 }
 0x261   : > { %12210 = vmatprep.subr.msk.mxu1 %vm1974_vm0, %v12201_v19 }
 0x263   : > { %13544 = vmatmul.mubr.msk.f32.vlgmr.msra.gmra.mrb[20].mxu1 %vm1967_vm1, %v15102_v45 }
 0x264   : > { %12211 = vmatpush1.msk.msra.mxu1 %vm1974_vm0, %v12200_v24  ;;  %3846 = vmatprep.mubr.f32.mxu1 %v14217_v43 }
 0x265   : > { %12186 = vmatmul.mubr.msk.f32.vlgmr.msra.gmra.mrb[6].mxu0 %vm2350_vm4, %v15285_v49  ;;  %13688 = vmatprep.subr.bf16.mxu1 %v14219_v35 }
 0x266   : > { %13673 = vmatpush1.bf16.msra.mxu0 %v13672_v29  ;;  %3239 = vmatprep.mubr.f32.mxu0 %v14217_v43 }
 0x267   : > { %13678 = vmatprep.subr.bf16.mxu0 %v13677_v33  ;;  %12212 = vmatmul.mubr.msk.f32.vlgmr.msra.gmra.mrb[22].mxu1 %vm1967_vm1, %v15097_v44 }
 0x268   : > { %3852 = vmatprep.mubr.f32.mxu1 %v14217_v43 }
 0x26b   : > { %12213 = vmatmul.mubr.msk.f32.gmra.mrb[24].mxu1 %vm1967_vm1, %v15102_v45 }
 0x26c   : > { %13555 = vmatprep.mubr.msk.f32.mxu1 %vm14221_vm2, %v14217_v43 }
 0x26d   : > { %12188 = vmatmul.mubr.msk.f32.vlgmr.msra.gmra.mrb[6].mxu0 %vm2350_vm4, %v15307_v6 }
 0x26e   : > { %13680 = vmatpush1.bf16.msra.mxu0 %v13679_v37  ;;  %3409 = vmatprep.mubr.f32.mxu0 %v14217_v43 }
 0x26f   : > { %12203 = vmatprep.subr.msk.mxu0 %vm1974_vm0, %v12198_v39 }
 0x275   : > { %12190 = vmatmul.mubr.msk.f32.vlgmr.msra.gmra.mrb[6].mxu0 %vm2350_vm4, %v15324_v16 }
 0x276   : > { %12204 = vmatpush1.msk.msra.mxu0 %vm1974_vm0, %v12197_v40  ;;  %3679 = vmatprep.mubr.f32.mxu0 %v14217_v43 }
 0x277   : > { %13546 = vmatprep.subr.msk.mxu0 %vm1974_vm0, %v12202_v41 }
 0x279   : > { %12205 = vmatmul.mubr.msk.f32.vlgmr.msra.gmra.mrb[8].mxu0 %vm1967_vm1, %v15097_v44 }
 0x27a   : > { %13547 = vmatpush3.msk.msra.mxu0 %vm1974_vm0, %v12202_v41  ;;  %3685 = vmatprep.mubr.f32.mxu0 %v14217_v43  ;;  %vm3570_vm0 = vcmask 813058  }
 0x27d   : > { %12206 = vmatmul.mubr.msk.f32.gmra.mrb[10].mxu0 %vm1967_vm1, %v15102_v45 }
 0x27e   : > { %13548 = vmatprep.mubr.msk.f32.mxu0 %vm1967_vm1, %v15097_v44 }
 0x281   : > { %13549 = vmatmul.mubr.msk.f32.vlgmr.msra.gmra.mrb[12].mxu0 %vm1967_vm1, %v15102_v45  ;;  %vm3571_vm1 = vsmask.f32 2304 }
 0x282   : > { %4044 = vmatprep.mubr.f32.mxu0 %v14217_v43 }
 0x316   : > { %v2491_v42 = vpop.f32.mrb[6].mxu1 }
 0x317   : > { %v13498_v46 = vpop.f32.mrb[7].mxu1 }
 0x31a   : > { %v2635_v47 = vpop.f32.mrb[8].mxu1 }
 0x31b   : > { %v2636_v48 = vadd.f32 %v2635_v47, %v2491_v42  ;;  %v13505_v50 = vpop.f32.mrb[9].mxu1 }
 0x31e   : > { %v2802_v51 = vpop.f32.mrb[10].mxu1 }
 0x31f   : > { %v2808_v53 = vadd.f32 %v2802_v51, %v2636_v48  ;;  %v13512_v54 = vpop.f32.mrb[11].mxu1 }
 0x322   : > { %v2972_v55 = vpop.f32.mrb[12].mxu1 }
 0x323   : > { %v2978_v56 = vadd.f32 %v2972_v55, %v2808_v53  ;;  %v13519_v57 = vpop.f32.mrb[13].mxu1 }
 0x326   : > { %v3142_v59 = vpop.f32.mrb[14].mxu1 }
 0x327   : > { %v3148_v60 = vadd.f32 %v3142_v59, %v2978_v56  ;;  %v13526_v61 = vpop.f32.mrb[15].mxu1 }
 0x32e   : > { %v3312_v44 = vpop.f32.mrb[16].mxu1 }
 0x32f   : > { %v3318_v62 = vadd.f32 %v3312_v44, %v3148_v60  ;;  %v13533_v63 = vpop.f32.mrb[17].mxu1 }
 0x332   : > { %v3482_v45 = vpop.f32.mrb[18].mxu1 }
 0x333   : > { %v15395_v0 = vadd.f32 %v3482_v45, %v3318_v62  ;;  %v13540_v1 = vpop.f32.mrb[19].mxu1 }
 0x336   : > { %v13545_v2 = vpop.f32.mrb[20].mxu1 }
 0x337   : > { %v3758_v3 = vpop.f32.mrb[21].mxu1  ;;  %v3764_v33 = vadd.f32 %v13545_v2, %v15149_v58 }
 0x338   : > { %v3759_v37 = vadd.f32 %v3758_v3, %v15146_v52 }
 0x339   : > { %v3772_v51 = vmax.f32 %v3764_v33, 0.0 }
 0x33a   : > { %v3848_v4 = vpop.f32.mrb[22].mxu1  ;;  %v3769_v56 = vmax.f32 %v3759_v37, 0.0 }
 0x33b   : > { %v3850_v5 = vpop.f32.mrb[23].mxu1  ;;  %v3849_v12 = vadd.f32 %v3848_v4, %v15146_v52  ;;  %v1949_v4 = vld [vmem:[%s16285_s4] sm:$0xff] }
 0x33c   : > { %v3851_v13 = vadd.f32 %v3850_v5, %v15146_v52 }
 0x33d   : > { %v3934_v20 = vmax.f32 %v3849_v12, 0.0 }
 0x33e   : > { %v3854_v7 = vpop.f32.mrb[24].mxu1  ;;  %v3935_v23 = vmax.f32 %v3851_v13, 0.0 }
 0x33f   : > { %v3856_v8 = vpop.f32.mrb[25].mxu1  ;;  %v3855_v21 = vadd.f32 %v3854_v7, %v15149_v58 }
 0x340   : > { %v3857_v24 = vadd.f32 %v3856_v8, %v15149_v58 }
 0x341   : > { %v3937_v34 = vmax.f32 %v3855_v21, 0.0 }
 0x342   : > { %v3938_v39 = vmax.f32 %v3857_v24, 0.0 }
 0x348   : > { %v15397_v10 = vpop.f32.mrb[6].mxu0 }
 0x349   : > { %v15399_v11 = vpop.f32.mrb[7].mxu0 }
 0x34c   : > { %v3681_v15 = vpop.f32.mrb[8].mxu0 }
 0x34d   : > { %v3682_v17 = vadd.f32 %v3681_v15, %v15146_v52  ;;  %v3683_v18 = vpop.f32.mrb[9].mxu0 }
 0x34e   : > { %v3684_v19 = vadd.f32 %v3683_v18, %v15146_v52 }
 0x34f   : > { %v3767_v22 = vmax.f32 %v3682_v17, 0.0 }
 0x350   : > { %v3768_v26 = vmax.f32 %v3684_v19, 0.0  ;;  %v3687_v27 = vpop.f32.mrb[10].mxu0 }
 0x351   : > { %v3940_v28 = vadd.f32 %v3934_v20, %v3767_v22  ;;  %v3688_v29 = vadd.f32 %v3687_v27, %v15149_v58  ;;  %v3689_v30 = vpop.f32.mrb[11].mxu0 }
 0x352   : > { %v3941_v31 = vadd.f32 %v3935_v23, %v3768_v26  ;;  %v3690_v32 = vadd.f32 %v3689_v30, %v15149_v58 }
 0x353   : > { %v3770_v36 = vmax.f32 %v3688_v29, 0.0  ;;  %v15413_v53 = vmul.f32 0.5, %v3940_v28 }
 0x354   : > { %v3771_v40 = vmax.f32 %v3690_v32, 0.0  ;;  %v13550_v41 = vpop.f32.mrb[12].mxu0  ;;  %v15417_v57 = vmul.f32 0.5, %v3941_v31 }
 0x355   : > { %v3943_v42 = vadd.f32 %v3937_v34, %v3770_v36  ;;  %v3931_v46 = vadd.f32 %v13550_v41, %v15149_v58  ;;  %v3925_v47 = vpop.f32.mrb[13].mxu0 }
 0x356   : > { %v3944_v48 = vadd.f32 %v3938_v39, %v3771_v40  ;;  %v3926_v50 = vadd.f32 %v3925_v47, %v15146_v52 }
 0x357   : > { %v15415_v54 = vmul.f32 0.5, %v3943_v42  ;;  %v3939_v55 = vmax.f32 %v3931_v46, 0.0 }
 0x358   : > { %v15419_v59 = vmul.f32 0.5, %v3944_v48  ;;  %v3936_v60 = vmax.f32 %v3926_v50, 0.0 }
 0x359   : > { %v3945_v61 = vadd.f32 %v3939_v55, %v3772_v51  ;;  %v14051_v58 = vpack.i.bf16 %v15415_v54, %v15413_v53  ;;  %v13693_v63 = vpack.c.bf16 %v15415_v54, %v15413_v53 }
 0x35a   : > { %v3942_v44 = vadd.f32 %v3936_v60, %v3769_v56  ;;  %v13691_v52 = vpack.c.bf16 %v15419_v59, %v15417_v57 }
 0x35b   : > { %v3951_v62 = vmul.f32 0.5, %v3945_v61 }
 0x35c   : > { %v3948_v45 = vmul.f32 0.5, %v3942_v44 }
 0x35d   : > { %v14041_v1 = vpack.i.bf16 %v3951_v62, %v15419_v59 }
 0x35e   : > { %v14046_v2 = vpack.i.bf16 %v3948_v45, %v15417_v57  ;;  %v13696_v3 = vpack.c.bf16 %v3951_v62, %v3948_v45 }
 0x35f   : > { %14042 = vrot.lane.b32.xlu1 %v14041_v1, %s14220_s28 }
 0x360   : > { %14047 = vrot.lane.b32.xlu0 %v14046_v2, %s14220_s28 }
 0x363   : > { %14062 = vrot.lane.b32.xlu1 %v14046_v2, %s14222_s15 }
 0x364   : > { %14052 = vrot.lane.b32.xlu0 %v14051_v58, %s14220_s28 }
 0x367   : > { %14067 = vrot.lane.b32.xlu1 %v14051_v58, %s14222_s15 }
 0x368   : > { %14057 = vrot.lane.b32.xlu0 %v14041_v1, %s14222_s15 }
 0x36b   : > { %14072 = vrot.lane.b32.xlu1 %v14041_v1, %s14223_s21 }
 0x36c   : > { %14077 = vrot.lane.b32.xlu0 %v14046_v2, %s14223_s21 }
 0x36f   : > { %14092 = vrot.lane.b32.xlu1 %v14046_v2, %s14224_s16 }
 0x370   : > { %14082 = vrot.lane.b32.xlu0 %v14051_v58, %s14223_s21 }
 0x373   : > { %14097 = vrot.lane.b32.xlu1 %v14051_v58, %s14224_s16 }
 0x374   : > { %14087 = vrot.lane.b32.xlu0 %v14041_v1, %s14224_s16 }
 0x377   : > { %14102 = vrot.lane.b32.xlu1 %v14041_v1, %s14225_s27 }
 0x378   : > { %14107 = vrot.lane.b32.xlu0 %v14046_v2, %s14225_s27 }
 0x37b   : > { %14122 = vrot.lane.b32.xlu1 %v14046_v2, %s14226_s29 }
 0x37c   : > { %14112 = vrot.lane.b32.xlu0 %v14051_v58, %s14225_s27 }
 0x37f   : > { %14127 = vrot.lane.b32.xlu1 %v14051_v58, %s14226_s29 }
 0x380   : > { %14117 = vrot.lane.b32.xlu0 %v14041_v1, %s14226_s29 }
 0x384   : > { %3491 = vperm.xlu0 %13950, %v1949_v4  }
 0x3d1   : > { %v14043_v5 = vpop.permute.xlu1 %14042 }
 0x3d2   : > { %v14045_v7 = vunpack.i.h.bf16 %v14043_v5  ;;  %v14044_v8 = vunpack.i.l.bf16 %v14043_v5  ;;  %v14048_v12 = vpop.permute.xlu0 %14047 }
 0x3d3   : > { %v14050_v13 = vunpack.i.h.bf16 %v14048_v12  ;;  %v14049_v15 = vunpack.i.l.bf16 %v14048_v12 }
 0x3d4   : > { %v3973_v17 = vsel %vm2339_vm3, %v14044_v8, %v14045_v7 }
 0x3d5   : > { %v13689_v18 = vpack.c.bf16 %v14045_v7, %v14050_v13  ;;  %v14063_v19 = vpop.permute.xlu1 %14062  ;;  %v3971_v20 = vsel %vm2339_vm3, %v14049_v15, %v14050_v13 }
 0x3d6   : > { %v14053_v21 = vpop.permute.xlu0 %14052  ;;  %v13684_v22 = vpack.c.bf16 %v3973_v17, %v3971_v20  ;;  %v14065_v26 = vunpack.i.h.bf16 %v14063_v19  ;;  %v14064_v27 = vunpack.i.l.bf16 %v14063_v19 }
 0x3d7   : > { %v14055_v23 = vunpack.i.h.bf16 %v14053_v21  ;;  %v14054_v24 = vunpack.i.l.bf16 %v14053_v21  ;;  %13690 = vmatpush3.bf16.msra.mxu1 %v13689_v18 }
 0x3d8   : > { %13685 = vmatprep.subr.bf16.mxu0 %v13684_v22  ;;  %13695 = vmatprep.subr.bf16.mxu1 %v14219_v35  ;;  %v4275_v39 = vsel %vm2651_vm5, %v14064_v27, %v14065_v26 }
 0x3d9   : > { %v3972_v28 = vsel %vm2339_vm3, %v14055_v23, %v14044_v8  ;;  %v3970_v29 = vsel %vm2339_vm3, %v14054_v24, %v14049_v15  ;;  %v14068_v30 = vpop.permute.xlu1 %14067  ;;  %vm3572_vm3 = vmand %vm3570_vm0, %vm3571_vm1 }
 0x3da   : > { %v13686_v31 = vpack.c.bf16 %v3972_v28, %v3970_v29  ;;  %v14058_v32 = vpop.permute.xlu0 %14057  ;;  %13556 = vmatmul.mubr.msk.f32.vlgmr.msra.gmra.mrb[26].mxu1 %vm2350_vm4, %v15216_v9  ;;  %v14070_v47 = vunpack.i.h.bf16 %v14068_v30  ;;  %v14069_v48 = vunpack.i.l.bf16 %v14068_v30 }
 0x3db   : > { %v14060_v33 = vunpack.i.h.bf16 %v14058_v32  ;;  %v14059_v34 = vunpack.i.l.bf16 %v14058_v32  ;;  %13697 = vmatpush3.bf16.msra.mxu1 %v13696_v3  ;;  %13562 = vmatprep.mubr.msk.f32.mxu1 %vm14221_vm2, %v14217_v43 }
 0x3dc   : > { %13687 = vmatpush1.bf16.msra.mxu0 %v13686_v31  ;;  %13702 = vmatprep.subr.bf16.mxu1 %v14219_v35 }
 0x3dd   : > { %v13703_v36 = vpack.c.bf16 %v14060_v33, %v14065_v26  ;;  %v14073_v37 = vpop.permute.xlu1 %14072  ;;  %13692 = vmatprep.subr.bf16.mxu0 %v13691_v52  ;;  %v4277_v40 = vsel %vm2651_vm5, %v14059_v34, %v14060_v33  ;;  %v4276_v60 = vsel %vm2651_vm5, %v14070_v47, %v14059_v34 }
 0x3de   : > { %v14075_v41 = vunpack.i.h.bf16 %v14073_v37  ;;  %v14078_v42 = vpop.permute.xlu0 %14077  ;;  %13563 = vmatmul.mubr.msk.f32.vlgmr.msra.gmra.mrb[28].mxu1 %vm2350_vm4, %v15230_v14  ;;  %v13698_v46 = vpack.c.bf16 %v4277_v40, %v4275_v39  ;;  %v14074_v51 = vunpack.i.l.bf16 %v14073_v37 }
 0x3df   : > { %v14080_v50 = vunpack.i.h.bf16 %v14078_v42  ;;  %12217 = vmatmul.mubr.msk.f32.vlgmr.msra.gmra.mrb[14].mxu0 %vm2350_vm4, %v15216_v9  ;;  %13704 = vmatpush3.bf16.msra.mxu1 %v13703_v36  ;;  %v14079_v55 = vunpack.i.l.bf16 %v14078_v42  ;;  %v4274_v9 = vsel %vm2651_vm5, %v14069_v48, %v14064_v27 }
 0x3e0   : > { %13694 = vmatpush1.bf16.msra.mxu0 %v13693_v63  ;;  %13569 = vmatprep.mubr.msk.f32.mxu1 %vm14221_vm2, %v14217_v43  ;;  %v4443_v54 = vsel %vm2821_vm6, %v14074_v51, %v14075_v41  ;;  %v13700_v58 = vpack.c.bf16 %v4276_v60, %v4274_v9 }
 0x3e1   : > { %v13710_v56 = vpack.c.bf16 %v14075_v41, %v14080_v50  ;;  %v14093_v57 = vpop.permute.xlu1 %14092  ;;  %13699 = vmatprep.subr.bf16.mxu0 %v13698_v46  ;;  %13709 = vmatprep.subr.bf16.mxu1 %v14219_v35  ;;  %v4441_v53 = vsel %vm2821_vm6, %v14079_v55, %v14080_v50  ;;  %v14227_v50 = vmov 1966171168  }
 0x3e2   : > { %v14083_v59 = vpop.permute.xlu0 %14082  ;;  %13570 = vmatmul.mubr.msk.f32.vlgmr.msra.gmra.mrb[30].mxu1 %vm2350_vm4, %v15250_v25  ;;  %4185 = vmatprep.mubr.f32.mxu0 %v14217_v43  ;;  %v14095_v44 = vunpack.i.h.bf16 %v14093_v57  ;;  %v13705_v1 = vpack.c.bf16 %v4443_v54, %v4441_v53  ;;  %v14094_v5 = vunpack.i.l.bf16 %v14093_v57 }
 0x3e3   : > { %13711 = vmatpush3.bf16.msra.mxu1 %v13710_v56  ;;  %13576 = vmatprep.mubr.msk.f32.mxu1 %vm14221_vm2, %v14217_v43  ;;  %v14085_v52 = vunpack.i.h.bf16 %v14083_v59  ;;  %v14084_v63 = vunpack.i.l.bf16 %v14083_v59 }
 0x3e4   : > { %13716 = vmatprep.subr.bf16.mxu1 %v14219_v35  ;;  %v4607_v20 = vsel %vm2991_vm7, %v14094_v5, %v14095_v44 }
 0x3e5   : > { %v14098_v61 = vpop.permute.xlu1 %14097  ;;  %v4442_v12 = vsel %vm2821_vm6, %v14085_v52, %v14074_v51  ;;  %v4440_v13 = vsel %vm2821_vm6, %v14084_v63, %v14079_v55  ;;  %v3510_v51 = vlaneseq  ;;  %vm5163_vm6 = vsmask.f32 7942 }
 0x3e6   : > { %v14088_v62 = vpop.permute.xlu0 %14087  ;;  %13577 = vmatmul.mubr.msk.f32.vlgmr.msra.gmra.mrb[32].mxu1 %vm2350_vm4, %v15267_v38  ;;  %v13707_v18 = vpack.c.bf16 %v4442_v12, %v4440_v13  ;;  %v14100_v21 = vunpack.i.h.bf16 %v14098_v61  ;;  %v14099_v22 = vunpack.i.l.bf16 %v14098_v61  ;;  %v3574_v12 = vld [vmem:[#allocation2] sm:$0x7]  ;;  %v3580_v13 = vld [vmem:[#allocation2 + $0x6] sm:$0x7] }
 0x3e7   : > { %v14090_v45 = vunpack.i.h.bf16 %v14088_v62  ;;  %12219 = vmatmul.mubr.msk.f32.vlgmr.msra.gmra.mrb[14].mxu0 %vm2350_vm4, %v15230_v14  ;;  %13583 = vmatprep.mubr.msk.f32.mxu1 %vm14221_vm2, %v14217_v43  ;;  %v14089_v2 = vunpack.i.l.bf16 %v14088_v62  ;;  %v3511_v53 = vshrl.u32 %v3510_v51, 7 }
 0x3e8   : > { %13701 = vmatpush1.bf16.msra.mxu0 %v13700_v58  ;;  %4348 = vmatprep.mubr.f32.mxu0 %v14217_v43 }
 0x3e9   : > { %v13717_v3 = vpack.c.bf16 %v14090_v45, %v14095_v44  ;;  %13706 = vmatprep.subr.bf16.mxu0 %v13705_v1  ;;  %v14103_v4 = vpop.permute.xlu1 %14102  ;;  %v4609_v14 = vsel %vm2991_vm7, %v14089_v2, %v14090_v45  ;;  %v4608_v29 = vsel %vm2991_vm7, %v14100_v21, %v14089_v2 }
 0x3ea   : > { %v14105_v7 = vunpack.i.h.bf16 %v14103_v4  ;;  %v14108_v8 = vpop.permute.xlu0 %14107  ;;  %v13712_v23 = vpack.c.bf16 %v4609_v14, %v4607_v20  ;;  %v14104_v24 = vunpack.i.l.bf16 %v14103_v4  ;;  %v3583_v20 = vld [vmem:[#allocation2 + $0x9] sm:$0x7] }
 0x3eb   : > { %v14110_v15 = vunpack.i.h.bf16 %v14108_v8  ;;  %13718 = vmatpush3.bf16.msra.mxu1 %v13717_v3  ;;  %v14109_v26 = vunpack.i.l.bf16 %v14108_v8 }
 0x3ec   : > { %13723 = vmatprep.subr.bf16.mxu1 %v14219_v35  ;;  %v4775_v33 = vsel %vm3161_vm8, %v14104_v24, %v14105_v7 }
 0x3ed   : > { %v13724_v17 = vpack.c.bf16 %v14105_v7, %v14110_v15  ;;  %v14123_v27 = vpop.permute.xlu1 %14122  ;;  %v4773_v32 = vsel %vm3161_vm8, %v14109_v26, %v14110_v15 }
 0x3ee   : > { %v14113_v19 = vpop.permute.xlu0 %14112  ;;  %13584 = vmatmul.mubr.msk.f32.vlgmr.msra.gmra.mrb[34].mxu1 %vm2350_vm4, %v15285_v49  ;;  %v14125_v30 = vunpack.i.h.bf16 %v14123_v27  ;;  %v14124_v41 = vunpack.i.l.bf16 %v14123_v27 }
 0x3ef   : > { %12221 = vmatmul.mubr.msk.f32.vlgmr.msra.gmra.mrb[14].mxu0 %vm2350_vm4, %v15250_v25  ;;  %13725 = vmatpush3.bf16.msra.mxu1 %v13724_v17  ;;  %v4606_v25 = vsel %vm2991_vm7, %v14099_v22, %v14094_v5  ;;  %v14115_v37 = vunpack.i.h.bf16 %v14113_v19  ;;  %v14114_v39 = vunpack.i.l.bf16 %v14113_v19  ;;  %v3577_v19 = vld [vmem:[#allocation2 + $0x3] sm:$0x7] }
 0x3f0   : > { %13708 = vmatpush1.bf16.msra.mxu0 %v13707_v18  ;;  %13590 = vmatprep.mubr.msk.f32.mxu1 %vm14221_vm2, %v14217_v43  ;;  %v13714_v36 = vpack.c.bf16 %v4608_v29, %v4606_v25  ;;  %v4939_v56 = vsel %vm3331_vm9, %v14124_v41, %v14125_v30  ;;  %v3589_v25 = vld [vmem:[#allocation2 + $0xf] sm:$0x7]  ;;  %v3595_v29 = vld [vmem:[#allocation2 + $0x15] sm:$0x7] }
 0x3f1   : > { %13713 = vmatprep.subr.bf16.mxu0 %v13712_v23  ;;  %4514 = vmatprep.mubr.f32.mxu0 %v14217_v43  ;;  %v4774_v42 = vsel %vm3161_vm8, %v14115_v37, %v14104_v24  ;;  %v4772_v46 = vsel %vm3161_vm8, %v14114_v39, %v14109_v26  ;;  %v14128_v47 = vpop.permute.xlu1 %14127  ;;  %v3586_v23 = vld [vmem:[#allocation2 + $0xc] sm:$0x7]  ;;  %v3592_v24 = vld [vmem:[#allocation2 + $0x12] sm:$0x7]  ;;  %vm15581_vm8 = vmand %vm3566_vm12, %vm5163_vm6 }
 0x3f2   : > { %v14118_v28 = vpop.permute.xlu0 %14117  ;;  %13591 = vmatmul.mubr.msk.f32.vlgmr.msra.gmra.mrb[36].mxu1 %vm2350_vm4, %v15307_v6  ;;  %13730 = vmatprep.subr.bf16.mxu1 %v14219_v35  ;;  %v13719_v35 = vpack.c.bf16 %v4775_v33, %v4773_v32  ;;  %v13721_v55 = vpack.c.bf16 %v4774_v42, %v4772_v46  ;;  %v14130_v57 = vunpack.i.h.bf16 %v14128_v47  ;;  %v14129_v59 = vunpack.i.l.bf16 %v14128_v47 }
 0x3f3   : > { %v14120_v31 = vunpack.i.h.bf16 %v14118_v28  ;;  %13597 = vmatprep.mubr.msk.f32.mxu1 %vm14221_vm2, %v14217_v43  ;;  %v14119_v40 = vunpack.i.l.bf16 %v14118_v28  ;;  %vm3569_vm2 = vmor %vm3568_vm15, %vm15537_vm14 }
 0x3f4   : > { %v4938_v54 = vsel %vm3331_vm9, %v14129_v59, %v14124_v41  ;;  %vm15552_vm5 = vmor %vm3572_vm3, %vm3569_vm2 }
 0x3f5   : > { %v13731_v34 = vpack.c.bf16 %v14120_v31, %v14125_v30  ;;  %v4941_v48 = vsel %vm3331_vm9, %v14119_v40, %v14120_v31  ;;  %v4940_v61 = vsel %vm3331_vm9, %v14130_v57, %v14119_v40  ;;  %vm5166_vm9 = vsmask.f32 7946 }
 0x3f6   : > { %v13726_v9 = vpack.c.bf16 %v4941_v48, %v4939_v56  ;;  %v13728_v63 = vpack.c.bf16 %v4940_v61, %v4938_v54  ;;  %vm5167_vm11 = vmand %vm3570_vm0, %vm5166_vm9 }
 0x3f7   : > { %12223 = vmatmul.mubr.msk.f32.vlgmr.msra.gmra.mrb[14].mxu0 %vm2350_vm4, %v15267_v38  ;;  %13732 = vmatpush3.bf16.msra.mxu1 %v13731_v34  ;;  %v3508_v38 = vunpack.c.l.s4 %v14227_v50 }
 0x3f8   : > { %13715 = vmatpush1.bf16.msra.mxu0 %v13714_v36  ;;  %4680 = vmatprep.mubr.f32.mxu0 %v14217_v43 }
 0x3f9   : > { %13720 = vmatprep.subr.bf16.mxu0 %v13719_v35  ;;  %v3509_v60 = vunpack.c.0.s8 %v3508_v38 }
 0x3fa   : > { %13598 = vmatmul.mubr.msk.f32.vlgmr.msra.gmra.mrb[38].mxu1 %vm2350_vm4, %v15324_v16 }
 0x3fb   : > { %v15532_v52 = vsub.s32 %v3509_v60, %v3511_v53 }
 0x3ff   : > { %12225 = vmatmul.mubr.msk.f32.vlgmr.msra.gmra.mrb[14].mxu0 %vm2350_vm4, %v15285_v49 }
 0x400   : > { %13722 = vmatpush1.bf16.msra.mxu0 %v13721_v55  ;;  %4846 = vmatprep.mubr.f32.mxu0 %v14217_v43 }
 0x401   : > { %13727 = vmatprep.subr.bf16.mxu0 %v13726_v9 }
 0x403   : > { %v15524_v58 = vpop.permute.xlu0 %3491 }
 0x404   : > { %v3494_v44 = vadd.f32 %v15524_v58, %v15397_v10  ;;  %v3495_v49 = vadd.f32 %v15524_v58, %v15399_v11  ;;  %v3496_v62 = vadd.f32 %v15524_v58, %v15395_v0 }
 0x406   : > { %v3497_v45 = vmax.f32 %v3494_v44, 0.0  ;;  %v3498_v1 = vmax.f32 %v3495_v49, 0.0  ;;  %v3499_v2 = vmax.f32 %v3496_v62, 0.0 }
 0x407   : > { %12227 = vmatmul.mubr.msk.f32.vlgmr.msra.gmra.mrb[14].mxu0 %vm2350_vm4, %v15307_v6 }
 0x408   : > { %v3502_v11 = vpack.c.bf16 %v3499_v2, %v3499_v2  ;;  %v12192_v3 = vpack.c.bf16 %v3498_v1, %v3497_v45  ;;  %13729 = vmatpush1.bf16.msra.mxu0 %v13728_v63  ;;  %5012 = vmatprep.mubr.f32.mxu0 %v14217_v43 }
 0x40a   : > { %v3513_v0 = vrot.slane %v12192_v3, %v15532_v52  ;;  %v3520_v4 = vrot.slane %v3502_v11, %v15532_v52 }
 0x40c   : > { %v3521_v6 = vcombine.low %v3513_v0, %v3520_v4  ;;  %v3522_v5 = vcombine.high %v3513_v0, %v3520_v4 }
 0x40e   : > { %v3529_v7 = vrot.slane %v3521_v6, %v15532_v52  ;;  %v3536_v8 = vrot.slane %v3522_v5, %v15532_v52 }
 0x40f   : > { %12229 = vmatmul.mubr.msk.f32.vlgmr.msra.gmra.mrb[14].mxu0 %vm2350_vm4, %v15324_v16  ;;  %vm5161_vm4 = vsmask.f32 7938 }
 0x410   : > { %v3537_v15 = vcombine.high %v3529_v7, %v3529_v7  ;;  %v3538_v14 = vcombine.high %v3536_v8, %v3536_v8  ;;  %v3540_v17 = vunpack.i.h.s16 %v3529_v7  ;;  %v3542_v18 = vunpack.i.h.s16 %v3536_v8  ;;  %vm15576_vm7 = vmand %vm3563_vm10, %vm5161_vm4 }
 0x411   : > { %v12193_v21 = vpack.i.b16 %v3529_v7, %v3529_v7  ;;  %v12194_v22 = vpack.i.b16 %v3536_v8, %v3536_v8  ;;  %vm5165_vm10 = vmor %vm15581_vm8, %vm15576_vm7 }
 0x412   : > { %v3544_v26 = vunpack.i.h.s16 %v3537_v15  ;;  %v3546_v27 = vunpack.i.h.s16 %v3538_v14  ;;  %v3548_v28 = vpack.i.b16 %v3540_v17, %v3540_v17  ;;  %v3550_v16 = vpack.i.b16 %v3542_v18, %v3542_v18  ;;  %vm15594_vm12 = vmor %vm5167_vm11, %vm5165_vm10 }
 0x413   : > { %v12195_v30 = vpack.i.b16 %v3537_v15, %v3537_v15  ;;  %v12196_v31 = vpack.i.b16 %v3538_v14, %v3538_v14  ;;  %v3575_v32 = vsel %vm15552_vm5, %v12193_v21, %v3574_v12  ;;  %v3581_v33 = vsel %vm15552_vm5, %v12194_v22, %v3580_v13 }
 0x414   : > { %v3552_v34 = vpack.i.b16 %v3544_v26, %v3544_v26  ;;  %v3554_v36 = vpack.i.b16 %v3546_v27, %v3546_v27  ;;  %3576 = vst [vmem:[#allocation2] sm:$0x7] %v3575_v32  ;;  %v3578_v37 = vsel %vm15552_vm5, %v3548_v28, %v3577_v19  ;;  %3582 = vst [vmem:[#allocation2 + $0x6] sm:$0x7] %v3581_v33 }
 0x415   : > { %v3584_v39 = vsel %vm15552_vm5, %v3550_v16, %v3583_v20  ;;  %3579 = vst [vmem:[#allocation2 + $0x3] sm:$0x7] %v3578_v37  ;;  %v3587_v35 = vsel %vm15552_vm5, %v12195_v30, %v3586_v23  ;;  %v3593_v40 = vsel %vm15552_vm5, %v12196_v31, %v3592_v24 }
 0x416   : > { %3585 = vst [vmem:[#allocation2 + $0x9] sm:$0x7] %v3584_v39  ;;  %3588 = vst [vmem:[#allocation2 + $0xc] sm:$0x7] %v3587_v35  ;;  %v3590_v41 = vsel %vm15552_vm5, %v3552_v34, %v3589_v25  ;;  %v3596_v42 = vsel %vm15552_vm5, %v3554_v36, %v3595_v29 }
 0x417   : > { %3594 = vst [vmem:[#allocation2 + $0x12] sm:$0x7] %v3593_v40  ;;  %3591 = vst [vmem:[#allocation2 + $0xf] sm:$0x7] %v3590_v41 }
 0x418   : > { %3597 = vst [vmem:[#allocation2 + $0x15] sm:$0x7] %v3596_v42 }
 0x41b   : > { %v5169_v25 = vld [vmem:[#allocation2] sm:$0x7]  ;;  %v5175_v29 = vld [vmem:[#allocation2 + $0x6] sm:$0x7] }
 0x41c   : > { %v5172_v32 = vld [vmem:[#allocation2 + $0x3] sm:$0x7] }
 0x41d   : > { %v5178_v34 = vld [vmem:[#allocation2 + $0x9] sm:$0x7]  ;;  %v5181_v40 = vld [vmem:[#allocation2 + $0xc] sm:$0x7] }
 0x41e   : > { %v5187_v41 = vld [vmem:[#allocation2 + $0x12] sm:$0x7] }
 0x4ad   : > { %v4117_v46 = vpop.f32.mrb[26].mxu1 }
 0x4ae   : > { %v13557_v47 = vpop.f32.mrb[27].mxu1 }
 0x4b1   : > { %v4258_v48 = vpop.f32.mrb[28].mxu1 }
 0x4b2   : > { %v4259_v50 = vadd.f32 %v4258_v48, %v4117_v46  ;;  %v13564_v38 = vpop.f32.mrb[29].mxu1  ;;  %v5184_v46 = vld [vmem:[#allocation2 + $0xf] sm:$0x7]  ;;  %v5190_v48 = vld [vmem:[#allocation2 + $0x15] sm:$0x7] }
 0x4b5   : > { %v4421_v51 = vpop.f32.mrb[30].mxu1 }
 0x4b6   : > { %v4427_v55 = vadd.f32 %v4421_v51, %v4259_v50  ;;  %v13571_v56 = vpop.f32.mrb[31].mxu1 }
 0x4b9   : > { %v4587_v57 = vpop.f32.mrb[32].mxu1 }
 0x4ba   : > { %v4593_v59 = vadd.f32 %v4587_v57, %v4427_v55  ;;  %v13578_v9 = vpop.f32.mrb[33].mxu1 }
 0x4c1   : > { %v4753_v60 = vpop.f32.mrb[34].mxu1 }
 0x4c2   : > { %v4759_v53 = vadd.f32 %v4753_v60, %v4593_v59  ;;  %v13585_v54 = vpop.f32.mrb[35].mxu1 }
 0x4c5   : > { %v4919_v61 = vpop.f32.mrb[36].mxu1 }
 0x4c6   : > { %v4925_v44 = vadd.f32 %v4919_v61, %v4759_v53  ;;  %v13592_v49 = vpop.f32.mrb[37].mxu1 }
 0x4cd   : > { %v5085_v62 = vpop.f32.mrb[38].mxu1 }
 0x4ce   : > { %v5091_v63 = vadd.f32 %v5085_v62, %v4925_v44  ;;  %v13599_v45 = vpop.f32.mrb[39].mxu1 }
 0x4d0   : > { %v5094_v1 = vadd.f32 %v5091_v63, %v15524_v58 }
 0x4d2   : > { %v5097_v2 = vmax.f32 %v5094_v1, 0.0 }
 0x4d4   : > { %v5100_v6 = vpack.c.bf16 %v5097_v2, %v5097_v2 }
 0x4d6   : > { %v5118_v12 = vrot.slane %v5100_v6, %v15532_v52 }
 0x4e2   : > { %v5014_v10 = vpop.f32.mrb[14].mxu0 }
 0x4e3   : > { %v5092_v11 = vadd.f32 %v5014_v10, %v15524_v58  ;;  %v5016_v3 = vpop.f32.mrb[15].mxu0 }
 0x4e4   : > { %v5093_v0 = vadd.f32 %v5016_v3, %v15524_v58 }
 0x4e5   : > { %v5095_v4 = vmax.f32 %v5092_v11, 0.0 }
 0x4e6   : > { %v5096_v5 = vmax.f32 %v5093_v0, 0.0 }
 0x4e8   : > { %v12231_v7 = vpack.c.bf16 %v5096_v5, %v5095_v4 }
 0x4ea   : > { %v5111_v58 = vrot.slane %v12231_v7, %v15532_v52 }
 0x4ec   : > { %v5119_v13 = vcombine.low %v5111_v58, %v5118_v12  ;;  %v5120_v15 = vcombine.high %v5111_v58, %v5118_v12 }
 0x4ee   : > { %v5127_v14 = vrot.slane %v5119_v13, %v15532_v52  ;;  %v5134_v17 = vrot.slane %v5120_v15, %v15532_v52 }
 0x4f0   : > { %v5135_v18 = vcombine.high %v5127_v14, %v5127_v14  ;;  %v5136_v19 = vcombine.high %v5134_v17, %v5134_v17  ;;  %v5138_v20 = vunpack.i.h.s16 %v5127_v14  ;;  %v5140_v21 = vunpack.i.h.s16 %v5134_v17 }
 0x4f1   : > { %v12232_v23 = vpack.i.b16 %v5127_v14, %v5127_v14  ;;  %v12233_v24 = vpack.i.b16 %v5134_v17, %v5134_v17 }
 0x4f2   : > { %v5142_v26 = vunpack.i.h.s16 %v5135_v18  ;;  %v5144_v27 = vunpack.i.h.s16 %v5136_v19  ;;  %v5146_v28 = vpack.i.b16 %v5138_v20, %v5138_v20  ;;  %v5148_v16 = vpack.i.b16 %v5140_v21, %v5140_v21 }
 0x4f3   : > { %v12234_v30 = vpack.i.b16 %v5135_v18, %v5135_v18  ;;  %v12235_v31 = vpack.i.b16 %v5136_v19, %v5136_v19  ;;  %v5170_v52 = vsel %vm15594_vm12, %v12232_v23, %v5169_v25  ;;  %v5176_v33 = vsel %vm15594_vm12, %v12233_v24, %v5175_v29 }
 0x4f4   : > { %v5150_v36 = vpack.i.b16 %v5142_v26, %v5142_v26  ;;  %v5152_v37 = vpack.i.b16 %v5144_v27, %v5144_v27  ;;  %5171 = vst [vmem:[#allocation2] sm:$0x7] %v5170_v52  ;;  %v5173_v39 = vsel %vm15594_vm12, %v5146_v28, %v5172_v32  ;;  %5177 = vst [vmem:[#allocation2 + $0x6] sm:$0x7] %v5176_v33 }
 0x4f5   : > { %v5179_v35 = vsel %vm15594_vm12, %v5148_v16, %v5178_v34  ;;  %5174 = vst [vmem:[#allocation2 + $0x3] sm:$0x7] %v5173_v39  ;;  %v5182_v42 = vsel %vm15594_vm12, %v12234_v30, %v5181_v40  ;;  %v5188_v47 = vsel %vm15594_vm12, %v12235_v31, %v5187_v41 }
 0x4f6   : > { %5180 = vst [vmem:[#allocation2 + $0x9] sm:$0x7] %v5179_v35  ;;  %5183 = vst [vmem:[#allocation2 + $0xc] sm:$0x7] %v5182_v42  ;;  %v5185_v50 = vsel %vm15594_vm12, %v5150_v36, %v5184_v46  ;;  %v5191_v38 = vsel %vm15594_vm12, %v5152_v37, %v5190_v48 }
 0x4f7   : > { %5189 = vst [vmem:[#allocation2 + $0x12] sm:$0x7] %v5188_v47  ;;  %5186 = vst [vmem:[#allocation2 + $0xf] sm:$0x7] %v5185_v50 }
 0x4f8   : > { %5192 = vst [vmem:[#allocation2 + $0x15] sm:$0x7] %v5191_v38 }
 0x4f9 PF: > { %v12236_v51 = vld [vmem:[%s15079_s18 + $0x168] sm:$0xff]  ;;  %v12237_v55 = vld [vmem:[%s15079_s18 + $0x170] sm:$0xff]  ;;  %v12238_v56 = vld [vmem:[%s15079_s18 + $0x178] sm:$0xff]  ;;  %vm5947_vm13 = vcmask 1041408   ;;  %vm5943_vm14 = vcmask 818176   ;;  %p13359_p11 = scmp.ne.s32.totalorder %s14315_s24, 1 }
 0x4fa   : > { %v5377_v57 = vunpack.c.l.s8.bf16 %v12236_v51  ;;  %v5379_v59 = vunpack.c.l.s8.bf16 %v12237_v55  ;;  %v5378_v9 = vunpack.c.h.s8.bf16 %v12236_v51  ;;  %v5380_v60 = vunpack.c.h.s8.bf16 %v12237_v55  ;;  %v12239_v53 = vld [vmem:[%s15079_s18 + $0x180] sm:$0xff]  ;;  %v12240_v62 = vld [vmem:[%s15079_s18 + $0x188] sm:$0xff]  ;;  %v12241_v63 = vld [vmem:[%s15079_s18 + $0x190] sm:$0xff] }
 0x4fb   : > { %v5381_v54 = vunpack.c.l.s8.bf16 %v12238_v56  ;;  %v5383_v61 = vunpack.c.l.s8.bf16 %v12239_v53  ;;  %v5382_v44 = vunpack.c.h.s8.bf16 %v12238_v56  ;;  %v5384_v49 = vunpack.c.h.s8.bf16 %v12239_v53  ;;  %v12242_v11 = vld [vmem:[%s15079_s18 + $0x198] sm:$0xff]  ;;  %v12243_v3 = vld [vmem:[%s15079_s18 + $0x1a0] sm:$0xff]  ;;  %v12244_v19 = vld [vmem:[%s15079_s18 + $0x1a8] sm:$0xff] }
 0x4fc   : > { %v12283_v45 = vcombine.high %v5377_v57, %v5379_v59  ;;  %v12285_v1 = vcombine.high %v5378_v9, %v5380_v60  ;;  %v12282_v2 = vcombine.low %v5377_v57, %v5379_v59  ;;  %v12284_v10 = vcombine.low %v5378_v9, %v5380_v60  ;;  %v12245_v20 = vld [vmem:[%s15079_s18 + $0x1b0] sm:$0xff]  ;;  %v12246_v25 = vld [vmem:[%s15079_s18 + $0x1b8] sm:$0xff]  ;;  %v12247_v29 = vld [vmem:[%s15079_s18 + $0x1c0] sm:$0xff] }
 0x4fd   : > { %v12287_v0 = vcombine.high %v5381_v54, %v5383_v61  ;;  %v12289_v4 = vcombine.high %v5382_v44, %v5384_v49  ;;  %v5385_v6 = vunpack.c.l.s8.bf16 %v12240_v62  ;;  %v5387_v5 = vunpack.c.l.s8.bf16 %v12241_v63  ;;  %v12248_v39 = vld [vmem:[%s15079_s18 + $0x1c8] sm:$0xff]  ;;  %v12249_v35 = vld [vmem:[%s15079_s18 + $0x1d0] sm:$0xff]  ;;  %v12250_v51 = vld [vmem:[%s15079_s18 + $0x1d8] sm:$0xff] }
 0x4fe   : > { %5960 = vmatprep.subr.bf16.mxu0 %v12283_v45  ;;  %6042 = vmatprep.subr.bf16.mxu1 %v12285_v1  ;;  %v5386_v7 = vunpack.c.h.s8.bf16 %v12240_v62  ;;  %v5388_v8 = vunpack.c.h.s8.bf16 %v12241_v63  ;;  %v12286_v43 = vcombine.low %v5381_v54, %v5383_v61  ;;  %v12288_v12 = vcombine.low %v5382_v44, %v5384_v49  ;;  %v12251_v55 = vld [vmem:[%s15079_s18 + $0x1e0] sm:$0xff]  ;;  %v12252_v44 = vld [vmem:[%s15079_s18 + $0x1e8] sm:$0xff]  ;;  %v12253_v49 = vld [vmem:[%s15079_s18 + $0x1f0] sm:$0xff] }
 0x4ff   : > { %5961 = vmatpush1.bf16.msra.mxu0 %v12282_v2  ;;  %6043 = vmatpush1.bf16.msra.mxu1 %v12284_v10  ;;  %v5389_v58 = vunpack.c.l.s8.bf16 %v12242_v11  ;;  %v5391_v13 = vunpack.c.l.s8.bf16 %v12243_v3  ;;  %v12291_v15 = vcombine.high %v5385_v6, %v5387_v5  ;;  %v5390_v17 = vunpack.c.h.s8.bf16 %v12242_v11  ;;  %v12254_v62 = vld [vmem:[%s15079_s18 + $0x1f8] sm:$0xff]  ;;  %v12255_v63 = vld [vmem:[%s15079_s18 + $0x200] sm:$0xff] }
 0x500   : > { %5962 = vmatprep.subr.bf16.mxu0 %v12287_v0  ;;  %6044 = vmatprep.subr.bf16.mxu1 %v12289_v4  ;;  %v12293_v14 = vcombine.high %v5386_v7, %v5388_v8  ;;  %v5392_v18 = vunpack.c.h.s8.bf16 %v12243_v3  ;;  %v12290_v21 = vcombine.low %v5385_v6, %v5387_v5  ;;  %v12292_v22 = vcombine.low %v5386_v7, %v5388_v8  ;;  %v15634_v6 = vld.sshfl [vmem:[#allocation2 + $0x3] sm:$0x13 pattern:$0x75316420] }
 0x501   : > { %v12295_v23 = vcombine.high %v5389_v58, %v5391_v13  ;;  %v5393_v24 = vunpack.c.l.s8.bf16 %v12244_v19  ;;  %v5395_v27 = vunpack.c.l.s8.bf16 %v12245_v20  ;;  %v5394_v28 = vunpack.c.h.s8.bf16 %v12244_v19  ;;  %v12256_v8 = vld [vmem:[%s15079_s18 + $0x208] sm:$0xff] }
 0x502   : > { %v12297_v26 = vcombine.high %v5390_v17, %v5392_v18  ;;  %v5396_v16 = vunpack.c.h.s8.bf16 %v12245_v20  ;;  %v12294_v30 = vcombine.low %v5389_v58, %v5391_v13  ;;  %v12296_v31 = vcombine.low %v5390_v17, %v5392_v18  ;;  %v12257_v20 = vld [vmem:[%s15079_s18 + $0x210] sm:$0xff] }
 0x503   : > { %5963 = vmatpush1.bf16.msra.mxu0 %v12286_v43  ;;  %6045 = vmatpush1.bf16.msra.mxu1 %v12288_v12  ;;  %v5397_v52 = vunpack.c.l.s8.bf16 %v12246_v25  ;;  %v5399_v32 = vunpack.c.l.s8.bf16 %v12247_v29  ;;  %v12299_v33 = vcombine.high %v5393_v24, %v5395_v27  ;;  %v5398_v36 = vunpack.c.h.s8.bf16 %v12246_v25 }
 0x504   : > { %5964 = vmatprep.subr.bf16.mxu0 %v12291_v15  ;;  %6046 = vmatprep.subr.bf16.mxu1 %v12293_v14  ;;  %v12301_v34 = vcombine.high %v5394_v28, %v5396_v16  ;;  %v5400_v37 = vunpack.c.h.s8.bf16 %v12247_v29  ;;  %v12298_v40 = vcombine.low %v5393_v24, %v5395_v27  ;;  %v12300_v41 = vcombine.low %v5394_v28, %v5396_v16 }
 0x505   : > { %v12303_v42 = vcombine.high %v5397_v52, %v5399_v32  ;;  %v5401_v46 = vunpack.c.l.s8.bf16 %v12248_v39  ;;  %v5403_v48 = vunpack.c.l.s8.bf16 %v12249_v35  ;;  %v5402_v50 = vunpack.c.h.s8.bf16 %v12248_v39 }
 0x506   : > { %v12305_v47 = vcombine.high %v5398_v36, %v5400_v37  ;;  %v5404_v38 = vunpack.c.h.s8.bf16 %v12249_v35  ;;  %v12302_v56 = vcombine.low %v5397_v52, %v5399_v32  ;;  %v12304_v57 = vcombine.low %v5398_v36, %v5400_v37 }
 0x507   : > { %5965 = vmatpush1.bf16.msra.mxu0 %v12290_v21  ;;  %6047 = vmatpush1.bf16.msra.mxu1 %v12292_v22  ;;  %v5405_v59 = vunpack.c.l.s8.bf16 %v12250_v51  ;;  %v5407_v9 = vunpack.c.l.s8.bf16 %v12251_v55  ;;  %v12307_v60 = vcombine.high %v5401_v46, %v5403_v48  ;;  %v5406_v54 = vunpack.c.h.s8.bf16 %v12250_v51  ;;  %v12258_v22 = vld [vmem:[%s15079_s18 + $0x218] sm:$0xff] }
 0x508   : > { %5966 = vmatprep.subr.bf16.mxu0 %v12295_v23  ;;  %6048 = vmatprep.subr.bf16.mxu1 %v12297_v26  ;;  %v12309_v53 = vcombine.high %v5402_v50, %v5404_v38  ;;  %v5408_v61 = vunpack.c.h.s8.bf16 %v12251_v55  ;;  %v12306_v45 = vcombine.low %v5401_v46, %v5403_v48  ;;  %v12308_v1 = vcombine.low %v5402_v50, %v5404_v38  ;;  %v12259_v23 = vld [vmem:[%s15079_s18 + $0x220] sm:$0xff]  ;;  %v12262_v48 = vld [vmem:[%s15079_s18 + $0x238] sm:$0xff] }
 0x509   : > { %v12311_v2 = vcombine.high %v5405_v59, %v5407_v9  ;;  %v5409_v10 = vunpack.c.l.s8.bf16 %v12252_v44  ;;  %v5411_v3 = vunpack.c.l.s8.bf16 %v12253_v49  ;;  %v5410_v0 = vunpack.c.h.s8.bf16 %v12252_v44  ;;  %v12263_v50 = vld [vmem:[%s15079_s18 + $0x240] sm:$0xff] }
 0x50a   : > { %v12313_v11 = vcombine.high %v5406_v54, %v5408_v61  ;;  %v5412_v4 = vunpack.c.h.s8.bf16 %v12253_v49  ;;  %v12310_v5 = vcombine.low %v5405_v59, %v5407_v9  ;;  %v12312_v7 = vcombine.low %v5406_v54, %v5408_v61 }
 0x50b   : > { %5967 = vmatpush1.bf16.msra.mxu0 %v12294_v30  ;;  %6049 = vmatpush1.bf16.msra.mxu1 %v12296_v31  ;;  %v5479_v43 = vlaneseq  ;;  %v5413_v12 = vunpack.c.l.s8.bf16 %v12254_v62  ;;  %v5415_v58 = vunpack.c.l.s8.bf16 %v12255_v63  ;;  %v5414_v13 = vunpack.c.h.s8.bf16 %v12254_v62 }
 0x50c   : > { %5968 = vmatprep.subr.bf16.mxu0 %v12299_v33  ;;  %6050 = vmatprep.subr.bf16.mxu1 %v12301_v34  ;;  %v5416_v15 = vunpack.c.h.s8.bf16 %v12255_v63  ;;  %v12315_v14 = vcombine.high %v5409_v10, %v5411_v3  ;;  %v12317_v17 = vcombine.high %v5410_v0, %v5412_v4  ;;  %v14228_v18 = vmov 1966171168   ;;  %v12260_v33 = vld [vmem:[%s15079_s18 + $0x228] sm:$0xff] }
 0x50d   : > { %v5477_v19 = vunpack.c.l.s4 %v14228_v18  ;;  %v12314_v21 = vcombine.low %v5409_v10, %v5411_v3  ;;  %v5475_v24 = vcombine.high %v15634_v6, %v15634_v6  ;;  %v15642_v27 = vshrl.u32 %v5479_v43, 7  ;;  %v12266_v10 = vld [vmem:[%s15079_s18 + $0x258] sm:$0xff] }
 0x50e   : > { %v12316_v28 = vcombine.low %v5410_v0, %v5412_v4  ;;  %v12319_v16 = vcombine.high %v5413_v12, %v5415_v58  ;;  %v12321_v25 = vcombine.high %v5414_v13, %v5416_v15  ;;  %v5417_v29 = vunpack.c.l.s8.bf16 %v12256_v8 }
 0x50f   : > { %5969 = vmatpush1.bf16.msra.mxu0 %v12298_v40  ;;  %6051 = vmatpush1.bf16.msra.mxu1 %v12300_v41  ;;  %v5478_v26 = vunpack.c.0.s8 %v5477_v19  ;;  %v5419_v30 = vunpack.c.l.s8.bf16 %v12257_v20  ;;  %v5418_v31 = vunpack.c.h.s8.bf16 %v12256_v8  ;;  %v5420_v52 = vunpack.c.h.s8.bf16 %v12257_v20 }
 0x510   : > { %5970 = vmatprep.subr.bf16.mxu0 %v12303_v42  ;;  %6052 = vmatprep.subr.bf16.mxu1 %v12305_v47  ;;  %v12318_v36 = vcombine.low %v5413_v12, %v5415_v58  ;;  %v12320_v37 = vcombine.low %v5414_v13, %v5416_v15  ;;  %v5421_v39 = vunpack.c.l.s8.bf16 %v12258_v22  ;;  %v5423_v35 = vunpack.c.l.s8.bf16 %v12259_v23  ;;  %v12261_v47 = vld [vmem:[%s15079_s18 + $0x230] sm:$0xff] }
 0x511   : > { %v15645_v32 = vsub.s32 %v5478_v26, %v15642_v27  ;;  %v12323_v40 = vcombine.high %v5417_v29, %v5419_v30  ;;  %v12325_v41 = vcombine.high %v5418_v31, %v5420_v52  ;;  %v5422_v42 = vunpack.c.h.s8.bf16 %v12258_v22  ;;  %v12269_v22 = vld [vmem:[%s15079_s18 + $0x270] sm:$0xff] }
 0x512   : > { %v5424_v46 = vunpack.c.h.s8.bf16 %v12259_v23  ;;  %v12322_v38 = vcombine.low %v5417_v29, %v5419_v30  ;;  %v12324_v51 = vcombine.low %v5418_v31, %v5420_v52  ;;  %v12327_v55 = vcombine.high %v5421_v39, %v5423_v35  ;;  %v12270_v31 = vld [vmem:[%s15079_s18 + $0x278] sm:$0xff]  ;;  %v12271_v52 = vld [vmem:[%s15079_s18 + $0x280] sm:$0xff] }
 0x513   : > { %5971 = vmatpush1.bf16.msra.mxu0 %v12302_v56  ;;  %6053 = vmatpush1.bf16.msra.mxu1 %v12304_v57  ;;  %v5489_v34 = vrot.slane %v5475_v24, %v15645_v32  ;;  %v5425_v56 = vunpack.c.l.s8.bf16 %v12260_v33  ;;  %v5427_v59 = vunpack.c.l.s8.bf16 %v12261_v47  ;;  %v5426_v9 = vunpack.c.h.s8.bf16 %v12260_v33 }
 0x514   : > { %5972 = vmatprep.subr.bf16.mxu0 %v12307_v60  ;;  %6054 = vmatprep.subr.bf16.mxu1 %v12309_v53  ;;  %v12329_v57 = vcombine.high %v5422_v42, %v5424_v46  ;;  %v5428_v60 = vunpack.c.h.s8.bf16 %v12261_v47  ;;  %v12326_v53 = vcombine.low %v5421_v39, %v5423_v35  ;;  %v12328_v54 = vcombine.low %v5422_v42, %v5424_v46  ;;  %v12272_v42 = vld [vmem:[%s15079_s18 + $0x288] sm:$0xff]  ;;  %v12273_v46 = vld [vmem:[%s15079_s18 + $0x290] sm:$0xff] }
 0x515   : > { %5992 = vmatprep.mubr.bf16.mxu0 %v5489_v34  ;;  %6074 = vmatprep.mubr.bf16.mxu1 %v5489_v34  ;;  %v5429_v61 = vunpack.c.l.s8.bf16 %v12262_v48  ;;  %v5431_v44 = vunpack.c.l.s8.bf16 %v12263_v50  ;;  %v12331_v49 = vcombine.high %v5425_v56, %v5427_v59  ;;  %v5430_v63 = vunpack.c.h.s8.bf16 %v12262_v48 }
 0x516   : > { %v12333_v62 = vcombine.high %v5426_v9, %v5428_v60  ;;  %v12332_v3 = vcombine.low %v5426_v9, %v5428_v60  ;;  %v5437_v15 = vunpack.c.l.s8.bf16 %v12266_v10  ;;  %v5444_v30 = vunpack.c.h.s8.bf16 %v12269_v22  ;;  %v12274_v9 = vld [vmem:[%s15079_s18 + $0x298] sm:$0xff]  ;;  %v12275_v60 = vld [vmem:[%s15079_s18 + $0x2a0] sm:$0xff] }
 0x517   : > { %5973 = vmatpush1.bf16.msra.mxu0 %v12306_v45  ;;  %6055 = vmatpush1.bf16.msra.mxu1 %v12308_v1  ;;  %v5432_v45 = vunpack.c.h.s8.bf16 %v12263_v50  ;;  %v12264_v1 = vld [vmem:[%s15079_s18 + $0x248] sm:$0xff]  ;;  %v12335_v0 = vcombine.high %v5429_v61, %v5431_v44  ;;  %v12334_v58 = vcombine.low %v5429_v61, %v5431_v44  ;;  %v15664_v47 = vrot.slane %v15634_v6, %v15645_v32 }
 0x518   : > { %5974 = vmatprep.subr.bf16.mxu0 %v12311_v2  ;;  %6056 = vmatprep.subr.bf16.mxu1 %v12313_v11  ;;  %v12265_v2 = vld [vmem:[%s15079_s18 + $0x250] sm:$0xff]  ;;  %v12330_v11 = vcombine.low %v5425_v56, %v5427_v59  ;;  %v5433_v4 = vunpack.c.l.s8.bf16 %v12264_v1  ;;  %v5434_v43 = vunpack.c.h.s8.bf16 %v12264_v1  ;;  %v5452_v59 = vunpack.c.h.s8.bf16 %v12273_v46 }
 0x519   : > { %v5435_v8 = vunpack.c.l.s8.bf16 %v12265_v2  ;;  %v5436_v12 = vunpack.c.h.s8.bf16 %v12265_v2  ;;  %v12336_v13 = vcombine.low %v5430_v63, %v5432_v45  ;;  %v5453_v61 = vunpack.c.l.s8.bf16 %v12274_v9  ;;  %v12277_v1 = vld [vmem:[%s15079_s18 + $0x2b0] sm:$0xff] }
 0x51a   : > { %v14229_v2 = vmov 0   ;;  %vm14231_vm15 = vmmov (!%p13359_p11), 0  }
 0x51b   : > { %5975 = vmatpush1.bf16.msra.mxu0 %v12310_v5  ;;  %6057 = vmatpush1.bf16.msra.mxu1 %v12312_v7  ;;  %v12267_v5 = vld [vmem:[%s15079_s18 + $0x260] sm:$0xff]  ;;  %v12337_v7 = vcombine.high %v5430_v63, %v5432_v45  ;;  %v12339_v19 = vcombine.high %v5433_v4, %v5435_v8  ;;  %v12341_v20 = vcombine.high %v5434_v43, %v5436_v12  ;;  %v5456_v63 = vunpack.c.h.s8.bf16 %v12275_v60  ;;  %v12276_v45 = vld [vmem:[%s15079_s18 + $0x2a8] sm:$0xff] }
 0x51c   : > { %5976 = vmatprep.subr.bf16.mxu0 %v12315_v14  ;;  %6058 = vmatprep.subr.bf16.mxu1 %v12317_v17  ;;  %v5439_v14 = vunpack.c.l.s8.bf16 %v12267_v5  ;;  %v5438_v17 = vunpack.c.h.s8.bf16 %v12266_v10  ;;  %v5440_v18 = vunpack.c.h.s8.bf16 %v12267_v5  ;;  %v12338_v23 = vcombine.low %v5433_v4, %v5435_v8 }
 0x51d   : > { %v12340_v24 = vcombine.low %v5434_v43, %v5436_v12  ;;  %v5460_v8 = vunpack.c.h.s8.bf16 %v12277_v1  ;;  %v12278_v43 = vld [vmem:[%s15079_s18 + $0x2b8] sm:$0xff]  ;;  %v12279_v12 = vld [vmem:[%s15079_s18 + $0x2c0] sm:$0xff] }
 0x51e   : > { %v12343_v26 = vcombine.high %v5437_v15, %v5439_v14  ;;  %v12342_v33 = vcombine.low %v5437_v15, %v5439_v14  ;;  %v12344_v34 = vcombine.low %v5438_v17, %v5440_v18  ;;  %v5461_v14 = vunpack.c.l.s8.bf16 %v12278_v43 }
 0x51f   : > { %5977 = vmatpush1.bf16.msra.mxu0 %v12314_v21  ;;  %6059 = vmatpush1.bf16.msra.mxu1 %v12316_v28  ;;  %v12268_v21 = vld [vmem:[%s15079_s18 + $0x268] sm:$0xff]  ;;  %v12345_v28 = vcombine.high %v5438_v17, %v5440_v18  ;;  %v5463_v18 = vunpack.c.l.s8.bf16 %v12279_v12 }
 0x520   : > { %5978 = vmatprep.subr.bf16.mxu0 %v12319_v16  ;;  %6060 = vmatprep.subr.bf16.mxu1 %v12321_v25  ;;  %v5441_v16 = vunpack.c.l.s8.bf16 %v12268_v21  ;;  %v5443_v25 = vunpack.c.l.s8.bf16 %v12269_v22  ;;  %v5442_v29 = vunpack.c.h.s8.bf16 %v12268_v21  ;;  %v12280_v21 = vld [vmem:[%s15079_s18 + $0x2c8] sm:$0x55] }
 0x522   : > { %v12347_v39 = vcombine.high %v5441_v16, %v5443_v25  ;;  %v12349_v35 = vcombine.high %v5442_v29, %v5444_v30  ;;  %v12346_v48 = vcombine.low %v5441_v16, %v5443_v25  ;;  %v12348_v50 = vcombine.low %v5442_v29, %v5444_v30  ;;  %v5194_v25 = vld [vmem:[%s15079_s18] sm:$0xff]  ;;  %v5195_v29 = vld [vmem:[%s15079_s18 + $0x8] sm:$0xff] }
 0x523   : > { %5979 = vmatpush1.bf16.msra.mxu0 %v12318_v36  ;;  %6061 = vmatpush1.bf16.msra.mxu1 %v12320_v37  ;;  %v5445_v36 = vunpack.c.l.s8.bf16 %v12270_v31  ;;  %v5447_v37 = vunpack.c.l.s8.bf16 %v12271_v52  ;;  %v12366_v30 = vcombine.low %v5461_v14, %v5463_v18 }
 0x524   : > { %5980 = vmatprep.subr.bf16.mxu0 %v12323_v40  ;;  %6062 = vmatprep.subr.bf16.mxu1 %v12325_v41  ;;  %v5446_v40 = vunpack.c.h.s8.bf16 %v12270_v31  ;;  %v5448_v41 = vunpack.c.h.s8.bf16 %v12271_v52 }
 0x525   : > { %v12350_v6 = vcombine.low %v5445_v36, %v5447_v37 }
 0x526   : > { %v12353_v56 = vcombine.high %v5446_v40, %v5448_v41 }
 0x527   : > { %5981 = vmatpush1.bf16.msra.mxu0 %v12322_v38  ;;  %6063 = vmatpush1.bf16.msra.mxu1 %v12324_v51  ;;  %v5449_v38 = vunpack.c.l.s8.bf16 %v12272_v42  ;;  %v5451_v51 = vunpack.c.l.s8.bf16 %v12273_v46  ;;  %v15681_v46 = vld.sshfl [vmem:[#allocation2] sm:$0x13 pattern:$0x75316420] }
 0x528   : > { %5982 = vmatprep.subr.bf16.mxu0 %v12327_v55  ;;  %6064 = vmatprep.subr.bf16.mxu1 %v12329_v57  ;;  %v12351_v55 = vcombine.high %v5445_v36, %v5447_v37  ;;  %v5450_v57 = vunpack.c.h.s8.bf16 %v12272_v42  ;;  %v5239_v36 = vunpack.c.l.s8.bf16 %v5194_v25  ;;  %v5197_v42 = vld [vmem:[%s15079_s18 + $0x18] sm:$0xff] }
 0x529   : > { %v12354_v10 = vcombine.low %v5449_v38, %v5451_v51 }
 0x52a   : > { %v12357_v44 = vcombine.high %v5450_v57, %v5452_v59 }
 0x52b   : > { %5983 = vmatpush1.bf16.msra.mxu0 %v12326_v53  ;;  %6065 = vmatpush1.bf16.msra.mxu1 %v12328_v54  ;;  %v12352_v53 = vcombine.low %v5446_v40, %v5448_v41  ;;  %v12355_v54 = vcombine.high %v5449_v38, %v5451_v51  ;;  %v5242_v40 = vunpack.c.h.s8.bf16 %v5195_v29  ;;  %v5196_v41 = vld [vmem:[%s15079_s18 + $0x10] sm:$0xff]  ;;  %v5245_v51 = vunpack.c.l.s8.bf16 %v5197_v42 }
 0x52c   : > { %5984 = vmatprep.subr.bf16.mxu0 %v12331_v49  ;;  %6066 = vmatprep.subr.bf16.mxu1 %v12333_v62  ;;  %v5455_v49 = vunpack.c.l.s8.bf16 %v12275_v60  ;;  %v5454_v62 = vunpack.c.h.s8.bf16 %v12274_v9  ;;  %v5243_v38 = vunpack.c.l.s8.bf16 %v5196_v41  ;;  %v5198_v9 = vld [vmem:[%s15079_s18 + $0x20] sm:$0xff]  ;;  %v5199_v60 = vld [vmem:[%s15079_s18 + $0x28] sm:$0xff] }
 0x52e   : > { %v12359_v4 = vcombine.high %v5453_v61, %v5455_v49  ;;  %v12361_v5 = vcombine.high %v5454_v62, %v5456_v63 }
 0x52f   : > { %5985 = vmatpush1.bf16.msra.mxu0 %v12330_v11  ;;  %6067 = vmatpush1.bf16.msra.mxu1 %v12332_v3  ;;  %v12356_v11 = vcombine.low %v5450_v57, %v5452_v59  ;;  %v5457_v3 = vunpack.c.l.s8.bf16 %v12276_v45  ;;  %v5244_v57 = vunpack.c.h.s8.bf16 %v5196_v41  ;;  %v5246_v59 = vunpack.c.h.s8.bf16 %v5197_v42 }
 0x530   : > { %5986 = vmatprep.subr.bf16.mxu0 %v12335_v0  ;;  %6068 = vmatprep.subr.bf16.mxu1 %v12337_v7  ;;  %v5459_v0 = vunpack.c.l.s8.bf16 %v12277_v1  ;;  %v5458_v7 = vunpack.c.h.s8.bf16 %v12276_v45  ;;  %v5248_v45 = vunpack.c.h.s8.bf16 %v5198_v9  ;;  %v5250_v1 = vunpack.c.h.s8.bf16 %v5199_v60 }
 0x532   : > { %v12363_v15 = vcombine.high %v5457_v3, %v5459_v0  ;;  %v12365_v17 = vcombine.high %v5458_v7, %v5460_v8  ;;  %v12362_v22 = vcombine.low %v5457_v3, %v5459_v0  ;;  %v12385_v0 = vcombine.low %v5244_v57, %v5246_v59 }
 0x533   : > { %5987 = vmatpush1.bf16.msra.mxu0 %v12334_v58  ;;  %6069 = vmatpush1.bf16.msra.mxu1 %v12336_v13  ;;  %v12358_v58 = vcombine.low %v5453_v61, %v5455_v49  ;;  %v12360_v13 = vcombine.low %v5454_v62, %v5456_v63  ;;  %v5247_v49 = vunpack.c.l.s8.bf16 %v5198_v9  ;;  %v12386_v62 = vcombine.high %v5244_v57, %v5246_v59 }
 0x534   : > { %5988 = vmatprep.subr.bf16.mxu0 %v12339_v19  ;;  %6070 = vmatprep.subr.bf16.mxu1 %v12341_v20  ;;  %v5462_v19 = vunpack.c.h.s8.bf16 %v12278_v43  ;;  %v5464_v20 = vunpack.c.h.s8.bf16 %v12279_v12  ;;  %v5249_v63 = vunpack.c.l.s8.bf16 %v5199_v60 }
 0x536   : > { %v12369_v16 = vcombine.high %v5462_v19, %v5464_v20  ;;  %v12368_v31 = vcombine.low %v5462_v19, %v5464_v20 }
 0x537   : > { %5989 = vmatpush1.bf16.msra.mxu0 %v12338_v23  ;;  %6071 = vmatpush1.bf16.msra.mxu1 %v12340_v24  ;;  %v12364_v23 = vcombine.low %v5458_v7, %v5460_v8  ;;  %v5465_v24 = vunpack.c.l.s8.bf16 %v12280_v21  ;;  %v12388_v7 = vcombine.high %v5247_v49, %v5249_v63  ;;  %v12390_v8 = vcombine.high %v5248_v45, %v5250_v1 }
 0x538   : > { %5990 = vmatprep.subr.bf16.mxu0 %v12343_v26  ;;  %6072 = vmatprep.subr.bf16.mxu1 %v12345_v28  ;;  %v5466_v26 = vunpack.c.h.s8.bf16 %v12280_v21  ;;  %v12367_v28 = vcombine.high %v5461_v14, %v5463_v18  ;;  %v12389_v14 = vcombine.low %v5248_v45, %v5250_v1 }
 0x539   : > { %v12371_v52 = vcombine.high %v5465_v24, %v5465_v24 }
 0x53a   : > { %v12373_v37 = vcombine.high %v5466_v26, %v5466_v26 }
 0x53b   : > { %5991 = vmatpush1.bf16.msra.mxu0 %v12342_v33  ;;  %6073 = vmatpush1.bf16.msra.mxu1 %v12344_v34  ;;  %v12370_v33 = vcombine.low %v5465_v24, %v5465_v24  ;;  %v12372_v34 = vcombine.low %v5466_v26, %v5466_v26  ;;  %v5205_v24 = vld [vmem:[%s15079_s18 + $0x58] sm:$0xff] }
 0x53c   : > { %6001 = vmatprep.subr.bf16.mxu0 %v12347_v39  ;;  %6083 = vmatprep.subr.bf16.mxu1 %v12349_v35  ;;  %v5241_v39 = vunpack.c.l.s8.bf16 %v5195_v29  ;;  %v5240_v35 = vunpack.c.h.s8.bf16 %v5194_v25  ;;  %v5261_v25 = vunpack.c.l.s8.bf16 %v5205_v24 }
 0x53e   : > { %5993 = vmatmul.mubr.bf16.vlgmr.msra.gmra.mrb[0].mxu0 %v15664_v47  ;;  %6075 = vmatmul.mubr.bf16.vlgmr.msra.gmra.mrb[0].mxu1 %v15664_v47  ;;  %v12381_v61 = vcombine.low %v5240_v35, %v5242_v40 }
 0x53f   : > { %6002 = vmatpush1.bf16.msra.mxu0 %v12346_v48  ;;  %6084 = vmatpush1.bf16.msra.mxu1 %v12348_v50  ;;  %v5949_v48 = vsel %vm5947_vm13, %v12370_v33, 0  ;;  %v5955_v50 = vsel %vm5947_vm13, %v12372_v34, 0  ;;  %v5206_v33 = vld [vmem:[%s15079_s18 + $0x60] sm:$0xff]  ;;  %v5207_v34 = vld [vmem:[%s15079_s18 + $0x68] sm:$0xff] }
 0x540   : > { %6003 = vmatprep.subr.bf16.mxu0 %v12351_v55  ;;  %6085 = vmatprep.subr.bf16.mxu1 %v12353_v56  ;;  %v12380_v55 = vcombine.high %v5239_v36, %v5241_v39  ;;  %v12382_v56 = vcombine.high %v5240_v35, %v5242_v40  ;;  %v5263_v35 = vunpack.c.l.s8.bf16 %v5206_v33  ;;  %v5265_v41 = vunpack.c.l.s8.bf16 %v5207_v34 }
 0x541   : > { %6033 = vmatprep.mubr.bf16.mxu0 %v14229_v2  ;;  %6115 = vmatprep.mubr.bf16.mxu1 %v14229_v2  ;;  %v5264_v42 = vunpack.c.h.s8.bf16 %v5206_v33  ;;  %v5218_v33 = vld [vmem:[%s15079_s18 + $0xc0] sm:$0xff] }
 0x542   : > { %v12404_v59 = vcombine.high %v5263_v35, %v5265_v41 }
 0x543   : > { %6004 = vmatpush1.bf16.msra.mxu0 %v12350_v6  ;;  %6086 = vmatpush1.bf16.msra.mxu1 %v12352_v53  ;;  %v6132_v6 = vcombine.high %v15681_v46, %v15681_v46  ;;  %v5490_v53 = vcombine.high %v15664_v47, %v15664_v47  ;;  %v12383_v47 = vcombine.low %v5243_v38, %v5245_v51 }
 0x544   : > { %6005 = vmatprep.subr.bf16.mxu0 %v12355_v54  ;;  %6087 = vmatprep.subr.bf16.mxu1 %v12357_v44  ;;  %v12379_v54 = vcombine.low %v5239_v36, %v5241_v39  ;;  %v12384_v44 = vcombine.high %v5243_v38, %v5245_v51  ;;  %v5209_v38 = vld [vmem:[%s15079_s18 + $0x78] sm:$0xff] }
 0x545   : > { %v6146_v3 = vrot.slane %v6132_v6, %v15645_v32  ;;  %v5269_v57 = vunpack.c.l.s8.bf16 %v5209_v38  ;;  %v5270_v6 = vunpack.c.h.s8.bf16 %v5209_v38  ;;  %v5221_v38 = vld [vmem:[%s15079_s18 + $0xd8] sm:$0xff] }
 0x547   : > { %6006 = vmatpush1.bf16.msra.mxu0 %v12354_v10  ;;  %6088 = vmatpush1.bf16.msra.mxu1 %v12356_v11  ;;  %v5200_v10 = vld [vmem:[%s15079_s18 + $0x30] sm:$0xff]  ;;  %v5201_v11 = vld [vmem:[%s15079_s18 + $0x38] sm:$0xff] }
 0x548   : > { %6007 = vmatprep.subr.bf16.mxu0 %v12359_v4  ;;  %6089 = vmatprep.subr.bf16.mxu1 %v12361_v5  ;;  %v5251_v4 = vunpack.c.l.s8.bf16 %v5200_v10  ;;  %v5253_v5 = vunpack.c.l.s8.bf16 %v5201_v11  ;;  %v5252_v43 = vunpack.c.h.s8.bf16 %v5200_v10  ;;  %v5254_v12 = vunpack.c.h.s8.bf16 %v5201_v11  ;;  %v5212_v11 = vld [vmem:[%s15079_s18 + $0x90] sm:$0xff] }
 0x54a   : > { %v12394_v19 = vcombine.high %v5252_v43, %v5254_v12  ;;  %v12391_v26 = vcombine.low %v5251_v4, %v5253_v5 }
 0x54b   : > { %6008 = vmatpush1.bf16.msra.mxu0 %v12358_v58  ;;  %6090 = vmatpush1.bf16.msra.mxu1 %v12360_v13  ;;  %v5202_v58 = vld [vmem:[%s15079_s18 + $0x40] sm:$0xff]  ;;  %v5203_v13 = vld [vmem:[%s15079_s18 + $0x48] sm:$0xff] }
 0x54c   : > { %6009 = vmatprep.subr.bf16.mxu0 %v12363_v15  ;;  %6091 = vmatprep.subr.bf16.mxu1 %v12365_v17  ;;  %v12387_v15 = vcombine.low %v5247_v49, %v5249_v63  ;;  %v12392_v17 = vcombine.high %v5251_v4, %v5253_v5  ;;  %v5255_v18 = vunpack.c.l.s8.bf16 %v5202_v58  ;;  %v5257_v20 = vunpack.c.l.s8.bf16 %v5203_v13 }
 0x54d   : > { %v5256_v21 = vunpack.c.h.s8.bf16 %v5202_v58  ;;  %v5275_v4 = vunpack.c.l.s8.bf16 %v5212_v11  ;;  %v5214_v58 = vld [vmem:[%s15079_s18 + $0xa0] sm:$0xff] }
 0x54e   : > { %v12396_v29 = vcombine.high %v5255_v18, %v5257_v20  ;;  %v12395_v36 = vcombine.low %v5255_v18, %v5257_v20  ;;  %v5279_v18 = vunpack.c.l.s8.bf16 %v5214_v58 }
 0x54f   : > { %6010 = vmatpush1.bf16.msra.mxu0 %v12362_v22  ;;  %6092 = vmatpush1.bf16.msra.mxu1 %v12364_v23  ;;  %v5258_v22 = vunpack.c.h.s8.bf16 %v5203_v13  ;;  %v5204_v23 = vld [vmem:[%s15079_s18 + $0x50] sm:$0xff]  ;;  %v5215_v13 = vld [vmem:[%s15079_s18 + $0xa8] sm:$0xff] }
 0x550   : > { %6011 = vmatprep.subr.bf16.mxu0 %v12367_v28  ;;  %6093 = vmatprep.subr.bf16.mxu1 %v12369_v16  ;;  %v12393_v28 = vcombine.low %v5252_v43, %v5254_v12  ;;  %v5259_v16 = vunpack.c.l.s8.bf16 %v5204_v23  ;;  %v5276_v43 = vunpack.c.h.s8.bf16 %v5212_v11  ;;  %v5281_v20 = vunpack.c.l.s8.bf16 %v5215_v13  ;;  %v5224_v11 = vld [vmem:[%s15079_s18 + $0xf0] sm:$0xff] }
 0x552   : > { %v12400_v39 = vcombine.high %v5259_v16, %v5261_v25  ;;  %v12399_v51 = vcombine.low %v5259_v16, %v5261_v25 }
 0x553   : > { %6012 = vmatpush1.bf16.msra.mxu0 %v12366_v30  ;;  %6094 = vmatpush1.bf16.msra.mxu1 %v12368_v31  ;;  %v12398_v30 = vcombine.high %v5256_v21, %v5258_v22  ;;  %v5260_v31 = vunpack.c.h.s8.bf16 %v5204_v23  ;;  %v5216_v23 = vld [vmem:[%s15079_s18 + $0xb0] sm:$0xff] }
 0x554   : > { %12374 = vmatprep.subr.msk.bf16.mxu0 %vm5947_vm13, %v12371_v52  ;;  %12376 = vmatprep.subr.msk.bf16.mxu1 %vm5947_vm13, %v12373_v37  ;;  %v5262_v52 = vunpack.c.h.s8.bf16 %v5205_v24  ;;  %v12397_v37 = vcombine.low %v5256_v21, %v5258_v22  ;;  %v5280_v21 = vunpack.c.h.s8.bf16 %v5214_v58  ;;  %v5282_v22 = vunpack.c.h.s8.bf16 %v5215_v13  ;;  %v5217_v24 = vld [vmem:[%s15079_s18 + $0xb8] sm:$0xff]  ;;  %v5226_v58 = vld [vmem:[%s15079_s18 + $0x100] sm:$0xff]  ;;  %v5227_v13 = vld [vmem:[%s15079_s18 + $0x108] sm:$0xff] }
 0x555   : > { %v5283_v16 = vunpack.c.l.s8.bf16 %v5216_v23  ;;  %v5285_v25 = vunpack.c.l.s8.bf16 %v5217_v24 }
 0x556   : > { %v12402_v40 = vcombine.high %v5260_v31, %v5262_v52 }
 0x557   : > { %6014 = vmatpush1.bf16.msra.mxu0 %v5949_v48  ;;  %6096 = vmatpush1.bf16.msra.mxu1 %v5955_v50  ;;  %v5266_v48 = vunpack.c.h.s8.bf16 %v5207_v34  ;;  %v5208_v50 = vld [vmem:[%s15079_s18 + $0x70] sm:$0xff]  ;;  %v5219_v34 = vld [vmem:[%s15079_s18 + $0xc8] sm:$0xff] }
 0x558   : > { %6615 = vmatprep.subr.bf16.mxu0 %v12380_v55  ;;  %6697 = vmatprep.subr.bf16.mxu1 %v12382_v56  ;;  %v12401_v55 = vcombine.low %v5260_v31, %v5262_v52  ;;  %v5267_v56 = vunpack.c.l.s8.bf16 %v5208_v50  ;;  %v5268_v60 = vunpack.c.h.s8.bf16 %v5208_v50  ;;  %v5284_v31 = vunpack.c.h.s8.bf16 %v5216_v23  ;;  %v5220_v50 = vld [vmem:[%s15079_s18 + $0xd0] sm:$0xff] }
 0x559   : > { %v12406_v9 = vcombine.high %v5264_v42, %v5266_v48  ;;  %v5286_v52 = vunpack.c.h.s8.bf16 %v5217_v24  ;;  %v5228_v23 = vld [vmem:[%s15079_s18 + $0x110] sm:$0xff]  ;;  %v5229_v24 = vld [vmem:[%s15079_s18 + $0x118] sm:$0xff] }
 0x55a   : > { %12375 = vmatmul.mubr.msk.bf16.vlgmr.msra.gmra.mrb[0].mxu0 %vm5943_vm14, %v5490_v53  ;;  %12377 = vmatmul.mubr.msk.bf16.vlgmr.msra.gmra.mrb[0].mxu1 %vm5943_vm14, %v5490_v53  ;;  %v5210_v53 = vld [vmem:[%s15079_s18 + $0x80] sm:$0xff]  ;;  %v12408_v49 = vcombine.high %v5267_v56, %v5269_v57  ;;  %v12410_v63 = vcombine.high %v5268_v60, %v5270_v6 }
 0x55b   : > { %6616 = vmatpush1.bf16.msra.mxu0 %v12379_v54  ;;  %6698 = vmatpush1.bf16.msra.mxu1 %v12381_v61  ;;  %v5211_v54 = vld [vmem:[%s15079_s18 + $0x88] sm:$0xff]  ;;  %v12403_v61 = vcombine.low %v5263_v35, %v5265_v41  ;;  %v5272_v1 = vunpack.c.h.s8.bf16 %v5210_v53  ;;  %v5287_v35 = vunpack.c.l.s8.bf16 %v5218_v33  ;;  %v5289_v41 = vunpack.c.l.s8.bf16 %v5219_v34 }
 0x55c   : > { %6617 = vmatprep.subr.bf16.mxu0 %v12384_v44  ;;  %6699 = vmatprep.subr.bf16.mxu1 %v12386_v62  ;;  %v12405_v44 = vcombine.low %v5264_v42, %v5266_v48  ;;  %v5271_v62 = vunpack.c.l.s8.bf16 %v5210_v53  ;;  %v5273_v45 = vunpack.c.l.s8.bf16 %v5211_v54  ;;  %v5274_v10 = vunpack.c.h.s8.bf16 %v5211_v54  ;;  %v5222_v53 = vld [vmem:[%s15079_s18 + $0xe0] sm:$0xff]  ;;  %v5223_v54 = vld [vmem:[%s15079_s18 + $0xe8] sm:$0xff] }
 0x55d   : > { %6647 = vmatprep.mubr.bf16.mxu0 %v6146_v3  ;;  %6729 = vmatprep.mubr.bf16.mxu1 %v6146_v3  ;;  %v5213_v3 = vld [vmem:[%s15079_s18 + $0x98] sm:$0xff]  ;;  %v5288_v42 = vunpack.c.h.s8.bf16 %v5218_v33  ;;  %v5290_v48 = vunpack.c.h.s8.bf16 %v5219_v34  ;;  %v5230_v33 = vld [vmem:[%s15079_s18 + $0x120] sm:$0xff]  ;;  %v5231_v34 = vld [vmem:[%s15079_s18 + $0x128] sm:$0xff] }
 0x55e   : > { %v5277_v5 = vunpack.c.l.s8.bf16 %v5213_v3  ;;  %v5278_v12 = vunpack.c.h.s8.bf16 %v5213_v3  ;;  %v5225_v3 = vld [vmem:[%s15079_s18 + $0xf8] sm:$0xff] }
 0x55f   : > { %6618 = vmatpush1.bf16.msra.mxu0 %v12383_v47  ;;  %6700 = vmatpush1.bf16.msra.mxu1 %v12385_v0  ;;  %v12407_v47 = vcombine.low %v5267_v56, %v5269_v57  ;;  %v12409_v0 = vcombine.low %v5268_v60, %v5270_v6  ;;  %v5291_v56 = vunpack.c.l.s8.bf16 %v5220_v50  ;;  %v5293_v57 = vunpack.c.l.s8.bf16 %v5221_v38 }
 0x560   : > { %6619 = vmatprep.subr.bf16.mxu0 %v12388_v7  ;;  %6701 = vmatprep.subr.bf16.mxu1 %v12390_v8  ;;  %v12412_v7 = vcombine.high %v5271_v62, %v5273_v45  ;;  %v12414_v8 = vcombine.high %v5272_v1, %v5274_v10  ;;  %v5292_v60 = vunpack.c.h.s8.bf16 %v5220_v50  ;;  %v5294_v6 = vunpack.c.h.s8.bf16 %v5221_v38  ;;  %v5232_v38 = vld [vmem:[%s15079_s18 + $0x130] sm:$0xff] }
 0x561   : > { %v5314_v50 = vunpack.c.h.s8.bf16 %v5231_v34 }
 0x563   : > { %6620 = vmatpush1.bf16.msra.mxu0 %v12387_v15  ;;  %6702 = vmatpush1.bf16.msra.mxu1 %v12389_v14  ;;  %v12411_v15 = vcombine.low %v5271_v62, %v5273_v45  ;;  %v12413_v14 = vcombine.low %v5272_v1, %v5274_v10  ;;  %v5295_v62 = vunpack.c.l.s8.bf16 %v5222_v53  ;;  %v5297_v45 = vunpack.c.l.s8.bf16 %v5223_v54 }
 0x564   : > { %6621 = vmatprep.subr.bf16.mxu0 %v12392_v17  ;;  %6703 = vmatprep.subr.bf16.mxu1 %v12394_v19  ;;  %v12416_v17 = vcombine.high %v5275_v4, %v5277_v5  ;;  %v12418_v19 = vcombine.high %v5276_v43, %v5278_v12  ;;  %v5296_v1 = vunpack.c.h.s8.bf16 %v5222_v53  ;;  %v5298_v10 = vunpack.c.h.s8.bf16 %v5223_v54  ;;  %v5234_v53 = vld [vmem:[%s15079_s18 + $0x140] sm:$0xff]  ;;  %v5235_v54 = vld [vmem:[%s15079_s18 + $0x148] sm:$0xff] }
 0x567   : > { %6622 = vmatpush1.bf16.msra.mxu0 %v12391_v26  ;;  %6704 = vmatpush1.bf16.msra.mxu1 %v12393_v28  ;;  %v12415_v26 = vcombine.low %v5275_v4, %v5277_v5  ;;  %v12417_v28 = vcombine.low %v5276_v43, %v5278_v12  ;;  %v5299_v4 = vunpack.c.l.s8.bf16 %v5224_v11  ;;  %v5301_v5 = vunpack.c.l.s8.bf16 %v5225_v3 }
 0x568   : > { %6623 = vmatprep.subr.bf16.mxu0 %v12396_v29  ;;  %6705 = vmatprep.subr.bf16.mxu1 %v12398_v30  ;;  %v12420_v29 = vcombine.high %v5279_v18, %v5281_v20  ;;  %v12422_v30 = vcombine.high %v5280_v21, %v5282_v22  ;;  %v5300_v43 = vunpack.c.h.s8.bf16 %v5224_v11  ;;  %v5302_v12 = vunpack.c.h.s8.bf16 %v5225_v3  ;;  %v5236_v11 = vld [vmem:[%s15079_s18 + $0x150] sm:$0xff]  ;;  %v5237_v3 = vld [vmem:[%s15079_s18 + $0x158] sm:$0xff] }
 0x56b   : > { %6624 = vmatpush1.bf16.msra.mxu0 %v12395_v36  ;;  %6706 = vmatpush1.bf16.msra.mxu1 %v12397_v37  ;;  %v12419_v36 = vcombine.low %v5279_v18, %v5281_v20  ;;  %v12421_v37 = vcombine.low %v5280_v21, %v5282_v22  ;;  %v5305_v18 = vunpack.c.l.s8.bf16 %v5227_v13  ;;  %v12442_v20 = vcombine.high %v5300_v43, %v5302_v12 }
 0x56c   : > { %6625 = vmatprep.subr.bf16.mxu0 %v12400_v39  ;;  %6707 = vmatprep.subr.bf16.mxu1 %v12402_v40  ;;  %v12424_v39 = vcombine.high %v5283_v16, %v5285_v25  ;;  %v12426_v40 = vcombine.high %v5284_v31, %v5286_v52  ;;  %v5304_v21 = vunpack.c.h.s8.bf16 %v5226_v58  ;;  %v5306_v22 = vunpack.c.h.s8.bf16 %v5227_v13 }
 0x56f   : > { %6626 = vmatpush1.bf16.msra.mxu0 %v12399_v51  ;;  %6708 = vmatpush1.bf16.msra.mxu1 %v12401_v55  ;;  %v12423_v51 = vcombine.low %v5283_v16, %v5285_v25  ;;  %v12425_v55 = vcombine.low %v5284_v31, %v5286_v52  ;;  %v5307_v25 = vunpack.c.l.s8.bf16 %v5228_v23  ;;  %v5308_v31 = vunpack.c.h.s8.bf16 %v5228_v23 }
 0x570   : > { %6627 = vmatprep.subr.bf16.mxu0 %v12404_v59  ;;  %6709 = vmatprep.subr.bf16.mxu1 %v12406_v9  ;;  %v12428_v59 = vcombine.high %v5287_v35, %v5289_v41  ;;  %v12430_v9 = vcombine.high %v5288_v42, %v5290_v48  ;;  %v5310_v52 = vunpack.c.h.s8.bf16 %v5229_v24 }
 0x573   : > { %6628 = vmatpush1.bf16.msra.mxu0 %v12403_v61  ;;  %6710 = vmatpush1.bf16.msra.mxu1 %v12405_v44  ;;  %v12427_v61 = vcombine.low %v5287_v35, %v5289_v41  ;;  %v12429_v44 = vcombine.low %v5288_v42, %v5290_v48  ;;  %v5311_v35 = vunpack.c.l.s8.bf16 %v5230_v33  ;;  %v12450_v42 = vcombine.high %v5308_v31, %v5310_v52 }
 0x574   : > { %6629 = vmatprep.subr.bf16.mxu0 %v12408_v49  ;;  %6711 = vmatprep.subr.bf16.mxu1 %v12410_v63  ;;  %v12432_v49 = vcombine.high %v5291_v56, %v5293_v57  ;;  %v12434_v63 = vcombine.high %v5292_v60, %v5294_v6  ;;  %v5312_v48 = vunpack.c.h.s8.bf16 %v5230_v33  ;;  %v12478_v33 = vld [vmem:[%s15079_s18 + $0x2e8] sm:$0xff] }
 0x577   : > { %6630 = vmatpush1.bf16.msra.mxu0 %v12407_v47  ;;  %6712 = vmatpush1.bf16.msra.mxu1 %v12409_v0  ;;  %v12431_v47 = vcombine.low %v5291_v56, %v5293_v57  ;;  %v12433_v0 = vcombine.low %v5292_v60, %v5294_v6  ;;  %v5315_v56 = vunpack.c.l.s8.bf16 %v5232_v38  ;;  %v5316_v60 = vunpack.c.h.s8.bf16 %v5232_v38  ;;  %v12479_v38 = vld [vmem:[%s15079_s18 + $0x2f0] sm:$0xff] }
 0x578   : > { %6631 = vmatprep.subr.bf16.mxu0 %v12412_v7  ;;  %6713 = vmatprep.subr.bf16.mxu1 %v12414_v8  ;;  %v12436_v7 = vcombine.high %v5295_v62, %v5297_v45  ;;  %v12438_v8 = vcombine.high %v5296_v1, %v5298_v10 }
 0x57b   : > { %6632 = vmatpush1.bf16.msra.mxu0 %v12411_v15  ;;  %6714 = vmatpush1.bf16.msra.mxu1 %v12413_v14  ;;  %v12435_v15 = vcombine.low %v5295_v62, %v5297_v45  ;;  %v12437_v14 = vcombine.low %v5296_v1, %v5298_v10  ;;  %v5319_v62 = vunpack.c.l.s8.bf16 %v5234_v53  ;;  %v5321_v45 = vunpack.c.l.s8.bf16 %v5235_v54 }
 0x57c   : > { %6633 = vmatprep.subr.bf16.mxu0 %v12416_v17  ;;  %6715 = vmatprep.subr.bf16.mxu1 %v12418_v19  ;;  %v5303_v17 = vunpack.c.l.s8.bf16 %v5226_v58  ;;  %v12440_v19 = vcombine.high %v5299_v4, %v5301_v5  ;;  %v5320_v1 = vunpack.c.h.s8.bf16 %v5234_v53  ;;  %v5322_v10 = vunpack.c.h.s8.bf16 %v5235_v54  ;;  %v5238_v58 = vld [vmem:[%s15079_s18 + $0x160] sm:$0x55] }
 0x57d   : > { %v12459_v13 = vcombine.low %v5319_v62, %v5321_v45 }
 0x57e   : > { %v12444_v16 = vcombine.high %v5303_v17, %v5305_v18 }
 0x57f   : > { %6634 = vmatpush1.bf16.msra.mxu0 %v12415_v26  ;;  %6716 = vmatpush1.bf16.msra.mxu1 %v12417_v28  ;;  %v12439_v26 = vcombine.low %v5299_v4, %v5301_v5  ;;  %v12441_v28 = vcombine.low %v5300_v43, %v5302_v12  ;;  %v5323_v4 = vunpack.c.l.s8.bf16 %v5236_v11  ;;  %v5325_v5 = vunpack.c.l.s8.bf16 %v5237_v3 }
 0x580   : > { %6635 = vmatprep.subr.bf16.mxu0 %v12420_v29  ;;  %6717 = vmatprep.subr.bf16.mxu1 %v12422_v30  ;;  %v12446_v29 = vcombine.high %v5304_v21, %v5306_v22  ;;  %v5309_v30 = vunpack.c.l.s8.bf16 %v5229_v24  ;;  %v5324_v43 = vunpack.c.h.s8.bf16 %v5236_v11  ;;  %v5326_v12 = vunpack.c.h.s8.bf16 %v5237_v3 }
 0x582   : > { %v12448_v41 = vcombine.high %v5307_v25, %v5309_v30 }
 0x583   : > { %6636 = vmatpush1.bf16.msra.mxu0 %v12419_v36  ;;  %6718 = vmatpush1.bf16.msra.mxu1 %v12421_v37  ;;  %v15730_v36 = vrot.slane %v15681_v46, %v15645_v32  ;;  %v12443_v37 = vcombine.low %v5303_v17, %v5305_v18  ;;  %v12447_v46 = vcombine.low %v5307_v25, %v5309_v30  ;;  %v12475_v17 = vld [vmem:[%s15079_s18 + $0x2d0] sm:$0xff]  ;;  %v12476_v18 = vld [vmem:[%s15079_s18 + $0x2d8] sm:$0xff] }
 0x584   : > { %6637 = vmatprep.subr.bf16.mxu0 %v12424_v39  ;;  %6719 = vmatprep.subr.bf16.mxu1 %v12426_v40  ;;  %v12445_v39 = vcombine.low %v5304_v21, %v5306_v22  ;;  %v5313_v40 = vunpack.c.l.s8.bf16 %v5231_v34  ;;  %v5328_v21 = vunpack.c.h.s8.bf16 %v5238_v58  ;;  %v12463_v22 = vcombine.low %v5323_v4, %v5325_v5  ;;  %v15747_v34 = vld.sshfl [vmem:[#allocation2 + $0x6] sm:$0x13 pattern:$0x75316420] }
 0x585   : > { %v6827_v23 = vunpack.c.l.s8.bf16 %v12475_v17  ;;  %v6829_v24 = vunpack.c.l.s8.bf16 %v12476_v18  ;;  %v6830_v25 = vunpack.c.h.s8.bf16 %v12476_v18 }
 0x586   : > { %v12470_v30 = vcombine.high %v5328_v21, %v5328_v21 }
 0x587   : > { %6638 = vmatpush1.bf16.msra.mxu0 %v12423_v51  ;;  %6720 = vmatpush1.bf16.msra.mxu1 %v12425_v55  ;;  %v5233_v51 = vld [vmem:[%s15079_s18 + $0x138] sm:$0xff]  ;;  %v12449_v55 = vcombine.low %v5308_v31, %v5310_v52  ;;  %v12469_v31 = vcombine.low %v5328_v21, %v5328_v21  ;;  %v12477_v52 = vld [vmem:[%s15079_s18 + $0x2e0] sm:$0xff] }
 0x588   : > { %6639 = vmatprep.subr.bf16.mxu0 %v12428_v59  ;;  %6721 = vmatprep.subr.bf16.mxu1 %v12430_v9  ;;  %v5317_v57 = vunpack.c.l.s8.bf16 %v5233_v51  ;;  %v12452_v59 = vcombine.high %v5311_v35, %v5313_v40  ;;  %v12454_v9 = vcombine.high %v5312_v48, %v5314_v50  ;;  %v5318_v6 = vunpack.c.h.s8.bf16 %v5233_v51  ;;  %v12480_v51 = vld [vmem:[%s15079_s18 + $0x2f8] sm:$0xff] }
 0x58b   : > { %6640 = vmatpush1.bf16.msra.mxu0 %v12427_v61  ;;  %6722 = vmatpush1.bf16.msra.mxu1 %v12429_v44  ;;  %v12451_v61 = vcombine.low %v5311_v35, %v5313_v40  ;;  %v12453_v44 = vcombine.low %v5312_v48, %v5314_v50  ;;  %v6831_v40 = vunpack.c.l.s8.bf16 %v12477_v52  ;;  %v6832_v48 = vunpack.c.h.s8.bf16 %v12477_v52 }
 0x58c   : > { %6641 = vmatprep.subr.bf16.mxu0 %v12432_v49  ;;  %6723 = vmatprep.subr.bf16.mxu1 %v12434_v63  ;;  %v12456_v49 = vcombine.high %v5315_v56, %v5317_v57  ;;  %v12458_v63 = vcombine.high %v5316_v60, %v5318_v6  ;;  %v6834_v50 = vunpack.c.h.s8.bf16 %v12478_v33 }
 0x58e   : > { %v12528_v54 = vcombine.high %v6832_v48, %v6834_v50 }
 0x58f   : > { %6642 = vmatpush1.bf16.msra.mxu0 %v12431_v47  ;;  %6724 = vmatpush1.bf16.msra.mxu1 %v12433_v0  ;;  %v12455_v47 = vcombine.low %v5315_v56, %v5317_v57  ;;  %v12457_v0 = vcombine.low %v5316_v60, %v5318_v6  ;;  %v12521_v56 = vcombine.low %v6827_v23, %v6829_v24  ;;  %v6836_v60 = vunpack.c.h.s8.bf16 %v12479_v38 }
 0x590   : > { %6643 = vmatprep.subr.bf16.mxu0 %v12436_v7  ;;  %6725 = vmatprep.subr.bf16.mxu1 %v12438_v8  ;;  %v12460_v7 = vcombine.high %v5319_v62, %v5321_v45  ;;  %v12462_v8 = vcombine.high %v5320_v1, %v5322_v10  ;;  %v6838_v6 = vunpack.c.h.s8.bf16 %v12480_v51  ;;  %v12527_v62 = vcombine.low %v6832_v48, %v6834_v50 }
 0x592   : > { %v12532_v45 = vcombine.high %v6836_v60, %v6838_v6 }
 0x593   : > { %6644 = vmatpush1.bf16.msra.mxu0 %v12435_v15  ;;  %6726 = vmatpush1.bf16.msra.mxu1 %v12437_v14  ;;  %v12461_v15 = vcombine.low %v5320_v1, %v5322_v10  ;;  %v5327_v14 = vunpack.c.l.s8.bf16 %v5238_v58 }
 0x594   : > { %6645 = vmatprep.subr.bf16.mxu0 %v12440_v19  ;;  %6727 = vmatprep.subr.bf16.mxu1 %v12442_v20  ;;  %v12464_v19 = vcombine.high %v5323_v4, %v5325_v5  ;;  %v12466_v20 = vcombine.high %v5324_v43, %v5326_v12  ;;  %v12531_v5 = vcombine.low %v6836_v60, %v6838_v6 }
 0x597   : > { %6646 = vmatpush1.bf16.msra.mxu0 %v12439_v26  ;;  %6728 = vmatpush1.bf16.msra.mxu1 %v12441_v28  ;;  %v12465_v26 = vcombine.low %v5324_v43, %v5326_v12  ;;  %v12467_v28 = vcombine.low %v5327_v14, %v5327_v14 }
 0x598   : > { %6656 = vmatprep.subr.bf16.mxu0 %v12444_v16  ;;  %6738 = vmatprep.subr.bf16.mxu1 %v12446_v29  ;;  %v6828_v16 = vunpack.c.h.s8.bf16 %v12475_v17  ;;  %v12468_v29 = vcombine.high %v5327_v14, %v5327_v14  ;;  %v12486_v14 = vld [vmem:[%s15079_s18 + $0x328] sm:$0xff] }
 0x59a   : > { %6648 = vmatmul.mubr.bf16.vlgmr.msra.gmra.mrb[0].mxu0 %v15730_v36  ;;  %6730 = vmatmul.mubr.bf16.vlgmr.msra.gmra.mrb[0].mxu1 %v15730_v36  ;;  %v12524_v35 = vcombine.high %v6828_v16, %v6830_v25  ;;  %v12523_v57 = vcombine.low %v6828_v16, %v6830_v25 }
 0x59b   : > { %6657 = vmatpush1.bf16.msra.mxu0 %v12443_v37  ;;  %6739 = vmatpush1.bf16.msra.mxu1 %v12445_v39  ;;  %v6604_v37 = vsel %vm5947_vm13, %v12467_v28, 0  ;;  %v12522_v39 = vcombine.high %v6827_v23, %v6829_v24  ;;  %v6850_v24 = vunpack.c.h.s8.bf16 %v12486_v14  ;;  %v12488_v28 = vld [vmem:[%s15079_s18 + $0x338] sm:$0xff] }
 0x59c   : > { %6658 = vmatprep.subr.bf16.mxu0 %v12448_v41  ;;  %6740 = vmatprep.subr.bf16.mxu1 %v12450_v42  ;;  %v6610_v41 = vsel %vm5947_vm13, %v12469_v31, 0  ;;  %v6833_v42 = vunpack.c.l.s8.bf16 %v12478_v33  ;;  %v6854_v52 = vunpack.c.h.s8.bf16 %v12488_v28 }
 0x59d   : > { %6688 = vmatprep.mubr.bf16.mxu0 %v14229_v2  ;;  %6770 = vmatprep.mubr.bf16.mxu1 %v14229_v2 }
 0x59e   : > { %v12526_v53 = vcombine.high %v6831_v40, %v6833_v42 }
 0x59f   : > { %6659 = vmatpush1.bf16.msra.mxu0 %v12447_v46  ;;  %6741 = vmatpush1.bf16.msra.mxu1 %v12449_v55  ;;  %v6925_v46 = vcombine.high %v15747_v34, %v15747_v34  ;;  %v6147_v55 = vcombine.high %v15730_v36, %v15730_v36  ;;  %v12525_v36 = vcombine.low %v6831_v40, %v6833_v42 }
 0x5a0   : > { %6660 = vmatprep.subr.bf16.mxu0 %v12452_v59  ;;  %6742 = vmatprep.subr.bf16.mxu1 %v12454_v9  ;;  %v6835_v59 = vunpack.c.l.s8.bf16 %v12479_v38  ;;  %v6837_v9 = vunpack.c.l.s8.bf16 %v12480_v51 }
 0x5a2   : > { %v12529_v4 = vcombine.low %v6835_v59, %v6837_v9 }
 0x5a3   : > { %6661 = vmatpush1.bf16.msra.mxu0 %v12451_v61  ;;  %6743 = vmatpush1.bf16.msra.mxu1 %v12453_v44  ;;  %v12481_v61 = vld [vmem:[%s15079_s18 + $0x300] sm:$0xff]  ;;  %v12482_v44 = vld [vmem:[%s15079_s18 + $0x308] sm:$0xff] }
 0x5a4   : > { %6662 = vmatprep.subr.bf16.mxu0 %v12456_v49  ;;  %6744 = vmatprep.subr.bf16.mxu1 %v12458_v63  ;;  %v6939_v49 = vrot.slane %v6925_v46, %v15645_v32  ;;  %v12530_v63 = vcombine.high %v6835_v59, %v6837_v9  ;;  %v6839_v1 = vunpack.c.l.s8.bf16 %v12481_v61  ;;  %v6841_v10 = vunpack.c.l.s8.bf16 %v12482_v44 }
 0x5a5   : > { %v6840_v11 = vunpack.c.h.s8.bf16 %v12481_v61  ;;  %v6842_v3 = vunpack.c.h.s8.bf16 %v12482_v44  ;;  %v12493_v44 = vld [vmem:[%s15079_s18 + $0x360] sm:$0xff] }
 0x5a6   : > { %v12534_v58 = vcombine.high %v6839_v1, %v6841_v10  ;;  %v12533_v17 = vcombine.low %v6839_v1, %v6841_v10  ;;  %v6863_v1 = vunpack.c.l.s8.bf16 %v12493_v44 }
 0x5a7   : > { %6663 = vmatpush1.bf16.msra.mxu0 %v12455_v47  ;;  %6745 = vmatpush1.bf16.msra.mxu1 %v12457_v0  ;;  %v12483_v47 = vld [vmem:[%s15079_s18 + $0x310] sm:$0xff]  ;;  %v12484_v0 = vld [vmem:[%s15079_s18 + $0x318] sm:$0xff]  ;;  %v12535_v18 = vcombine.low %v6840_v11, %v6842_v3 }
 0x5a8   : > { %6664 = vmatprep.subr.bf16.mxu0 %v12460_v7  ;;  %6746 = vmatprep.subr.bf16.mxu1 %v12462_v8  ;;  %v6843_v7 = vunpack.c.l.s8.bf16 %v12483_v47  ;;  %v6845_v8 = vunpack.c.l.s8.bf16 %v12484_v0  ;;  %v6844_v43 = vunpack.c.h.s8.bf16 %v12483_v47  ;;  %v6846_v12 = vunpack.c.h.s8.bf16 %v12484_v0  ;;  %v12495_v47 = vld [vmem:[%s15079_s18 + $0x370] sm:$0xff]  ;;  %v12496_v0 = vld [vmem:[%s15079_s18 + $0x378] sm:$0xff] }
 0x5aa   : > { %v12537_v16 = vcombine.low %v6843_v7, %v6845_v8  ;;  %v12539_v25 = vcombine.low %v6844_v43, %v6846_v12 }
 0x5ab   : > { %6665 = vmatpush1.bf16.msra.mxu0 %v12459_v13  ;;  %6747 = vmatpush1.bf16.msra.mxu1 %v12461_v15  ;;  %v12536_v13 = vcombine.high %v6840_v11, %v6842_v3  ;;  %v12485_v15 = vld [vmem:[%s15079_s18 + $0x320] sm:$0xff]  ;;  %v6864_v11 = vunpack.c.h.s8.bf16 %v12493_v44 }
 0x5ac   : > { %6666 = vmatprep.subr.bf16.mxu0 %v12464_v19  ;;  %6748 = vmatprep.subr.bf16.mxu1 %v12466_v20  ;;  %v12538_v19 = vcombine.high %v6843_v7, %v6845_v8  ;;  %v12540_v20 = vcombine.high %v6844_v43, %v6846_v12  ;;  %v6847_v21 = vunpack.c.l.s8.bf16 %v12485_v15  ;;  %v6848_v23 = vunpack.c.h.s8.bf16 %v12485_v15  ;;  %v12497_v15 = vld [vmem:[%s15079_s18 + $0x380] sm:$0xff] }
 0x5ad   : > { %v6867_v7 = vunpack.c.l.s8.bf16 %v12495_v47  ;;  %v6869_v8 = vunpack.c.l.s8.bf16 %v12496_v0  ;;  %v6868_v43 = vunpack.c.h.s8.bf16 %v12495_v47  ;;  %v6870_v12 = vunpack.c.h.s8.bf16 %v12496_v0  ;;  %v12505_v44 = vld [vmem:[%s15079_s18 + $0x3c0] sm:$0xff]  ;;  %v12507_v47 = vld [vmem:[%s15079_s18 + $0x3d0] sm:$0xff]  ;;  %v12508_v0 = vld [vmem:[%s15079_s18 + $0x3d8] sm:$0xff] }
 0x5af   : > { %6667 = vmatpush1.bf16.msra.mxu0 %v12463_v22  ;;  %6749 = vmatpush1.bf16.msra.mxu1 %v12465_v26  ;;  %v6849_v22 = vunpack.c.l.s8.bf16 %v12486_v14  ;;  %v12487_v26 = vld [vmem:[%s15079_s18 + $0x330] sm:$0xff]  ;;  %v12498_v14 = vld [vmem:[%s15079_s18 + $0x388] sm:$0xff] }
 0x5b0   : > { %12471 = vmatprep.subr.msk.bf16.mxu0 %vm5947_vm13, %v12468_v29  ;;  %12473 = vmatprep.subr.msk.bf16.mxu1 %vm5947_vm13, %v12470_v30  ;;  %v6851_v29 = vunpack.c.l.s8.bf16 %v12487_v26  ;;  %v6853_v30 = vunpack.c.l.s8.bf16 %v12488_v28  ;;  %v6852_v31 = vunpack.c.h.s8.bf16 %v12487_v26  ;;  %v12499_v26 = vld [vmem:[%s15079_s18 + $0x390] sm:$0xff]  ;;  %v12500_v28 = vld [vmem:[%s15079_s18 + $0x398] sm:$0xff] }
 0x5b1   : > { %v12542_v33 = vcombine.high %v6847_v21, %v6849_v22  ;;  %v12541_v40 = vcombine.low %v6847_v21, %v6849_v22  ;;  %v6871_v21 = vunpack.c.l.s8.bf16 %v12497_v15  ;;  %v6873_v22 = vunpack.c.l.s8.bf16 %v12498_v14 }
 0x5b2   : > { %v12546_v42 = vcombine.high %v6851_v29, %v6853_v30  ;;  %v12548_v48 = vcombine.high %v6852_v31, %v6854_v52  ;;  %v12547_v59 = vcombine.low %v6852_v31, %v6854_v52  ;;  %v6876_v31 = vunpack.c.h.s8.bf16 %v12499_v26 }
 0x5b3   : > { %6669 = vmatpush1.bf16.msra.mxu0 %v6604_v37  ;;  %6751 = vmatpush1.bf16.msra.mxu1 %v6610_v41  ;;  %v12544_v37 = vcombine.high %v6848_v23, %v6850_v24  ;;  %v12543_v41 = vcombine.low %v6848_v23, %v6850_v24  ;;  %v6872_v23 = vunpack.c.h.s8.bf16 %v12497_v15  ;;  %v6874_v24 = vunpack.c.h.s8.bf16 %v12498_v14  ;;  %v12509_v15 = vld [vmem:[%s15079_s18 + $0x3e0] sm:$0xff]  ;;  %v12510_v14 = vld [vmem:[%s15079_s18 + $0x3e8] sm:$0xff] }
 0x5b4   : > { %7408 = vmatprep.subr.bf16.mxu0 %v12522_v39  ;;  %7490 = vmatprep.subr.bf16.mxu1 %v12524_v35  ;;  %v12489_v39 = vld [vmem:[%s15079_s18 + $0x340] sm:$0xff]  ;;  %v12490_v35 = vld [vmem:[%s15079_s18 + $0x348] sm:$0xff]  ;;  %v6878_v52 = vunpack.c.h.s8.bf16 %v12500_v28 }
 0x5b5   : > { %v6855_v50 = vunpack.c.l.s8.bf16 %v12489_v39  ;;  %v6857_v38 = vunpack.c.l.s8.bf16 %v12490_v35  ;;  %v6856_v51 = vunpack.c.h.s8.bf16 %v12489_v39  ;;  %v6858_v46 = vunpack.c.h.s8.bf16 %v12490_v35  ;;  %v12501_v39 = vld [vmem:[%s15079_s18 + $0x3a0] sm:$0xff]  ;;  %v12502_v35 = vld [vmem:[%s15079_s18 + $0x3a8] sm:$0xff] }
 0x5b6   : > { %12472 = vmatmul.mubr.msk.bf16.vlgmr.msra.gmra.mrb[0].mxu0 %vm5943_vm14, %v6147_v55  ;;  %12474 = vmatmul.mubr.msk.bf16.vlgmr.msra.gmra.mrb[0].mxu1 %vm5943_vm14, %v6147_v55  ;;  %v12491_v55 = vld [vmem:[%s15079_s18 + $0x350] sm:$0xff] }
 0x5b7   : > { %7409 = vmatpush1.bf16.msra.mxu0 %v12521_v56  ;;  %7491 = vmatpush1.bf16.msra.mxu1 %v12523_v57  ;;  %v12492_v56 = vld [vmem:[%s15079_s18 + $0x358] sm:$0xff]  ;;  %v12545_v57 = vcombine.low %v6851_v29, %v6853_v30  ;;  %v6859_v9 = vunpack.c.l.s8.bf16 %v12491_v55  ;;  %v6860_v6 = vunpack.c.h.s8.bf16 %v12491_v55  ;;  %v12552_v61 = vcombine.high %v6856_v51, %v6858_v46  ;;  %v12503_v55 = vld [vmem:[%s15079_s18 + $0x3b0] sm:$0xff] }
 0x5b8   : > { %7410 = vmatprep.subr.bf16.mxu0 %v12526_v53  ;;  %7492 = vmatprep.subr.bf16.mxu1 %v12528_v54  ;;  %v6861_v60 = vunpack.c.l.s8.bf16 %v12492_v56  ;;  %v6862_v53 = vunpack.c.h.s8.bf16 %v12492_v56  ;;  %v12550_v54 = vcombine.high %v6855_v50, %v6857_v38  ;;  %v6875_v29 = vunpack.c.l.s8.bf16 %v12499_v26  ;;  %v12504_v56 = vld [vmem:[%s15079_s18 + $0x3b8] sm:$0xff]  ;;  %v12511_v26 = vld [vmem:[%s15079_s18 + $0x3f0] sm:$0xff] }
 0x5b9   : > { %7440 = vmatprep.mubr.bf16.mxu0 %v6939_v49  ;;  %7522 = vmatprep.mubr.bf16.mxu1 %v6939_v49  ;;  %v12494_v49 = vld [vmem:[%s15079_s18 + $0x368] sm:$0xff]  ;;  %v6877_v30 = vunpack.c.l.s8.bf16 %v12500_v28  ;;  %v12512_v28 = vld [vmem:[%s15079_s18 + $0x3f8] sm:$0xff] }
 0x5ba   : > { %v6865_v10 = vunpack.c.l.s8.bf16 %v12494_v49  ;;  %v6866_v3 = vunpack.c.h.s8.bf16 %v12494_v49  ;;  %v12506_v49 = vld [vmem:[%s15079_s18 + $0x3c8] sm:$0xff] }
 0x5bb   : > { %7411 = vmatpush1.bf16.msra.mxu0 %v12525_v36  ;;  %7493 = vmatpush1.bf16.msra.mxu1 %v12527_v62  ;;  %v12549_v36 = vcombine.low %v6855_v50, %v6857_v38  ;;  %v12551_v62 = vcombine.low %v6856_v51, %v6858_v46  ;;  %v6879_v50 = vunpack.c.l.s8.bf16 %v12501_v39  ;;  %v6881_v38 = vunpack.c.l.s8.bf16 %v12502_v35 }
 0x5bc   : > { %7412 = vmatprep.subr.bf16.mxu0 %v12530_v63  ;;  %7494 = vmatprep.subr.bf16.mxu1 %v12532_v45  ;;  %v12554_v63 = vcombine.high %v6859_v9, %v6861_v60  ;;  %v12556_v45 = vcombine.high %v6860_v6, %v6862_v53  ;;  %v6880_v51 = vunpack.c.h.s8.bf16 %v12501_v39  ;;  %v6882_v46 = vunpack.c.h.s8.bf16 %v12502_v35  ;;  %v12513_v35 = vld [vmem:[%s15079_s18 + $0x400] sm:$0xff] }
 0x5bd   : > { %v6902_v39 = vunpack.c.h.s8.bf16 %v12512_v28 }
 0x5bf   : > { %7413 = vmatpush1.bf16.msra.mxu0 %v12529_v4  ;;  %7495 = vmatpush1.bf16.msra.mxu1 %v12531_v5  ;;  %v12553_v4 = vcombine.low %v6859_v9, %v6861_v60  ;;  %v12555_v5 = vcombine.low %v6860_v6, %v6862_v53  ;;  %v6883_v9 = vunpack.c.l.s8.bf16 %v12503_v55  ;;  %v6885_v60 = vunpack.c.l.s8.bf16 %v12504_v56 }
 0x5c0   : > { %7414 = vmatprep.subr.bf16.mxu0 %v12534_v58  ;;  %7496 = vmatprep.subr.bf16.mxu1 %v12536_v13  ;;  %v12558_v58 = vcombine.high %v6863_v1, %v6865_v10  ;;  %v12560_v13 = vcombine.high %v6864_v11, %v6866_v3  ;;  %v6884_v6 = vunpack.c.h.s8.bf16 %v12503_v55  ;;  %v6886_v53 = vunpack.c.h.s8.bf16 %v12504_v56  ;;  %v12515_v55 = vld [vmem:[%s15079_s18 + $0x410] sm:$0xff]  ;;  %v12516_v56 = vld [vmem:[%s15079_s18 + $0x418] sm:$0xff] }
 0x5c3   : > { %7415 = vmatpush1.bf16.msra.mxu0 %v12533_v17  ;;  %7497 = vmatpush1.bf16.msra.mxu1 %v12535_v18  ;;  %v12557_v17 = vcombine.low %v6863_v1, %v6865_v10  ;;  %v12559_v18 = vcombine.low %v6864_v11, %v6866_v3  ;;  %v6887_v1 = vunpack.c.l.s8.bf16 %v12505_v44  ;;  %v6889_v10 = vunpack.c.l.s8.bf16 %v12506_v49 }
 0x5c4   : > { %7416 = vmatprep.subr.bf16.mxu0 %v12538_v19  ;;  %7498 = vmatprep.subr.bf16.mxu1 %v12540_v20  ;;  %v12562_v19 = vcombine.high %v6867_v7, %v6869_v8  ;;  %v12564_v20 = vcombine.high %v6868_v43, %v6870_v12  ;;  %v6888_v11 = vunpack.c.h.s8.bf16 %v12505_v44  ;;  %v6890_v3 = vunpack.c.h.s8.bf16 %v12506_v49  ;;  %v12517_v44 = vld [vmem:[%s15079_s18 + $0x420] sm:$0xff]  ;;  %v12518_v49 = vld [vmem:[%s15079_s18 + $0x428] sm:$0xff] }
 0x5c7   : > { %7417 = vmatpush1.bf16.msra.mxu0 %v12537_v16  ;;  %7499 = vmatpush1.bf16.msra.mxu1 %v12539_v25  ;;  %v12561_v16 = vcombine.low %v6867_v7, %v6869_v8  ;;  %v12563_v25 = vcombine.low %v6868_v43, %v6870_v12  ;;  %v6891_v7 = vunpack.c.l.s8.bf16 %v12507_v47  ;;  %v6893_v8 = vunpack.c.l.s8.bf16 %v12508_v0 }
 0x5c8   : > { %7418 = vmatprep.subr.bf16.mxu0 %v12542_v33  ;;  %7500 = vmatprep.subr.bf16.mxu1 %v12544_v37  ;;  %v12566_v33 = vcombine.high %v6871_v21, %v6873_v22  ;;  %v12568_v37 = vcombine.high %v6872_v23, %v6874_v24  ;;  %v12582_v43 = vcombine.high %v6887_v1, %v6889_v10 }
 0x5c9   : > { %v12584_v12 = vcombine.high %v6888_v11, %v6890_v3 }
 0x5cb   : > { %7419 = vmatpush1.bf16.msra.mxu0 %v12541_v40  ;;  %7501 = vmatpush1.bf16.msra.mxu1 %v12543_v41  ;;  %v12565_v40 = vcombine.low %v6871_v21, %v6873_v22  ;;  %v12567_v41 = vcombine.low %v6872_v23, %v6874_v24  ;;  %v6897_v22 = vunpack.c.l.s8.bf16 %v12510_v14  ;;  %v6896_v23 = vunpack.c.h.s8.bf16 %v12509_v15 }
 0x5cc   : > { %7420 = vmatprep.subr.bf16.mxu0 %v12546_v42  ;;  %7502 = vmatprep.subr.bf16.mxu1 %v12548_v48  ;;  %v12570_v42 = vcombine.high %v6875_v29, %v6877_v30  ;;  %v12572_v48 = vcombine.high %v6876_v31, %v6878_v52  ;;  %v6898_v24 = vunpack.c.h.s8.bf16 %v12510_v14 }
 0x5cf   : > { %7421 = vmatpush1.bf16.msra.mxu0 %v12545_v57  ;;  %7503 = vmatpush1.bf16.msra.mxu1 %v12547_v59  ;;  %v12569_v57 = vcombine.low %v6875_v29, %v6877_v30  ;;  %v12571_v59 = vcombine.low %v6876_v31, %v6878_v52  ;;  %v6899_v30 = vunpack.c.l.s8.bf16 %v12511_v26  ;;  %v6901_v31 = vunpack.c.l.s8.bf16 %v12512_v28  ;;  %v15813_v28 = vld.sshfl [vmem:[#allocation2 + $0x9] sm:$0x13 pattern:$0x75316420] }
 0x5d0   : > { %7422 = vmatprep.subr.bf16.mxu0 %v12550_v54  ;;  %7504 = vmatprep.subr.bf16.mxu1 %v12552_v61  ;;  %v12574_v54 = vcombine.high %v6879_v50, %v6881_v38  ;;  %v12576_v61 = vcombine.high %v6880_v51, %v6882_v46 }
 0x5d3   : > { %7423 = vmatpush1.bf16.msra.mxu0 %v12549_v36  ;;  %7505 = vmatpush1.bf16.msra.mxu1 %v12551_v62  ;;  %v12573_v36 = vcombine.low %v6879_v50, %v6881_v38  ;;  %v12575_v62 = vcombine.low %v6880_v51, %v6882_v46  ;;  %v6904_v51 = vunpack.c.h.s8.bf16 %v12513_v35 }
 0x5d4   : > { %7424 = vmatprep.subr.bf16.mxu0 %v12554_v63  ;;  %7506 = vmatprep.subr.bf16.mxu1 %v12556_v45  ;;  %v12578_v63 = vcombine.high %v6883_v9, %v6885_v60  ;;  %v12580_v45 = vcombine.high %v6884_v6, %v6886_v53 }
 0x5d7   : > { %7425 = vmatpush1.bf16.msra.mxu0 %v12553_v4  ;;  %7507 = vmatpush1.bf16.msra.mxu1 %v12555_v5  ;;  %v12577_v4 = vcombine.low %v6883_v9, %v6885_v60  ;;  %v12579_v5 = vcombine.low %v6884_v6, %v6886_v53  ;;  %v6907_v9 = vunpack.c.l.s8.bf16 %v12515_v55  ;;  %v6909_v60 = vunpack.c.l.s8.bf16 %v12516_v56 }
 0x5d8   : > { %7426 = vmatprep.subr.bf16.mxu0 %v12558_v58  ;;  %7508 = vmatprep.subr.bf16.mxu1 %v12560_v13  ;;  %v6892_v58 = vunpack.c.h.s8.bf16 %v12507_v47  ;;  %v6894_v13 = vunpack.c.h.s8.bf16 %v12508_v0  ;;  %v6908_v6 = vunpack.c.h.s8.bf16 %v12515_v55  ;;  %v6910_v53 = vunpack.c.h.s8.bf16 %v12516_v56 }
 0x5d9   : > { %v6914_v47 = vunpack.c.h.s8.bf16 %v12518_v49 }
 0x5da   : > { %v12588_v21 = vcombine.high %v6892_v58, %v6894_v13  ;;  %v12587_v29 = vcombine.low %v6892_v58, %v6894_v13  ;;  %v12618_v58 = vld [vmem:[%s15079_s18 + $0x440] sm:$0xff] }
 0x5db   : > { %7427 = vmatpush1.bf16.msra.mxu0 %v12557_v17  ;;  %7509 = vmatpush1.bf16.msra.mxu1 %v12559_v18  ;;  %v12581_v17 = vcombine.low %v6887_v1, %v6889_v10  ;;  %v12583_v18 = vcombine.low %v6888_v11, %v6890_v3  ;;  %v12519_v1 = vld [vmem:[%s15079_s18 + $0x430] sm:$0x55]  ;;  %v6911_v10 = vunpack.c.l.s8.bf16 %v12517_v44  ;;  %v6913_v11 = vunpack.c.l.s8.bf16 %v12518_v49 }
 0x5dc   : > { %7428 = vmatprep.subr.bf16.mxu0 %v12562_v19  ;;  %7510 = vmatprep.subr.bf16.mxu1 %v12564_v20  ;;  %v12586_v19 = vcombine.high %v6891_v7, %v6893_v8  ;;  %v6895_v20 = vunpack.c.l.s8.bf16 %v12509_v15  ;;  %v6912_v3 = vunpack.c.h.s8.bf16 %v12517_v44  ;;  %v6915_v0 = vunpack.c.l.s8.bf16 %v12519_v1 }
 0x5dd   : > { %v12605_v13 = vcombine.low %v6911_v10, %v6913_v11 }
 0x5de   : > { %v12590_v52 = vcombine.high %v6895_v20, %v6897_v22  ;;  %v12607_v15 = vcombine.low %v6912_v3, %v6914_v47  ;;  %v12609_v14 = vcombine.low %v6915_v0, %v6915_v0 }
 0x5df   : > { %7429 = vmatpush1.bf16.msra.mxu0 %v12561_v16  ;;  %7511 = vmatpush1.bf16.msra.mxu1 %v12563_v25  ;;  %v15796_v16 = vrot.slane %v15747_v34, %v15645_v32  ;;  %v12585_v25 = vcombine.low %v6891_v7, %v6893_v8  ;;  %v12589_v34 = vcombine.low %v6895_v20, %v6897_v22 }
 0x5e0   : > { %7430 = vmatprep.subr.bf16.mxu0 %v12566_v33  ;;  %7512 = vmatprep.subr.bf16.mxu1 %v12568_v37  ;;  %v12592_v33 = vcombine.high %v6896_v23, %v6898_v24  ;;  %v6900_v37 = vunpack.c.h.s8.bf16 %v12511_v26  ;;  %v12603_v7 = vcombine.low %v6908_v6, %v6910_v53  ;;  %v12606_v8 = vcombine.high %v6911_v10, %v6913_v11  ;;  %v12620_v26 = vld [vmem:[%s15079_s18 + $0x450] sm:$0xff] }
 0x5e1   : > { %v12610_v22 = vcombine.high %v6915_v0, %v6915_v0 }
 0x5e2   : > { %v12596_v50 = vcombine.high %v6900_v37, %v6902_v39 }
 0x5e3   : > { %7431 = vmatpush1.bf16.msra.mxu0 %v12565_v40  ;;  %7513 = vmatpush1.bf16.msra.mxu1 %v12567_v41  ;;  %v12514_v40 = vld [vmem:[%s15079_s18 + $0x408] sm:$0xff]  ;;  %v12591_v41 = vcombine.low %v6896_v23, %v6898_v24 }
 0x5e4   : > { %7432 = vmatprep.subr.bf16.mxu0 %v12570_v42  ;;  %7514 = vmatprep.subr.bf16.mxu1 %v12572_v48  ;;  %v12594_v42 = vcombine.high %v6899_v30, %v6901_v31  ;;  %v6903_v48 = vunpack.c.l.s8.bf16 %v12513_v35  ;;  %v6905_v38 = vunpack.c.l.s8.bf16 %v12514_v40  ;;  %v6906_v46 = vunpack.c.h.s8.bf16 %v12514_v40  ;;  %v12619_v24 = vld [vmem:[%s15079_s18 + $0x448] sm:$0xff]  ;;  %v12621_v35 = vld [vmem:[%s15079_s18 + $0x458] sm:$0xff]  ;;  %v12622_v40 = vld [vmem:[%s15079_s18 + $0x460] sm:$0xff] }
 0x5e7   : > { %7433 = vmatpush1.bf16.msra.mxu0 %v12569_v57  ;;  %7515 = vmatpush1.bf16.msra.mxu1 %v12571_v59  ;;  %v12593_v57 = vcombine.low %v6899_v30, %v6901_v31  ;;  %v12595_v59 = vcombine.low %v6900_v37, %v6902_v39  ;;  %v7629_v37 = vunpack.c.h.s8.bf16 %v12619_v24  ;;  %v7631_v39 = vunpack.c.h.s8.bf16 %v12620_v26 }
 0x5e8   : > { %7434 = vmatprep.subr.bf16.mxu0 %v12574_v54  ;;  %7516 = vmatprep.subr.bf16.mxu1 %v12576_v61  ;;  %v12598_v54 = vcombine.high %v6903_v48, %v6905_v38  ;;  %v12600_v61 = vcombine.high %v6904_v51, %v6906_v46 }
 0x5e9   : > { %v12670_v56 = vcombine.high %v7629_v37, %v7631_v39 }
 0x5eb   : > { %7435 = vmatpush1.bf16.msra.mxu0 %v12573_v36  ;;  %7517 = vmatpush1.bf16.msra.mxu1 %v12575_v62  ;;  %v12597_v36 = vcombine.low %v6903_v48, %v6905_v38  ;;  %v12599_v62 = vcombine.low %v6904_v51, %v6906_v46  ;;  %v7634_v38 = vunpack.c.l.s8.bf16 %v12622_v40  ;;  %v7633_v51 = vunpack.c.h.s8.bf16 %v12621_v35 }
 0x5ec   : > { %7436 = vmatprep.subr.bf16.mxu0 %v12578_v63  ;;  %7518 = vmatprep.subr.bf16.mxu1 %v12580_v45  ;;  %v12602_v63 = vcombine.high %v6907_v9, %v6909_v60  ;;  %v12604_v45 = vcombine.high %v6908_v6, %v6910_v53  ;;  %v7635_v46 = vunpack.c.h.s8.bf16 %v12622_v40 }
 0x5ee   : > { %v12674_v53 = vcombine.high %v7633_v51, %v7635_v46 }
 0x5ef   : > { %7437 = vmatpush1.bf16.msra.mxu0 %v12577_v4  ;;  %7519 = vmatpush1.bf16.msra.mxu1 %v12579_v5  ;;  %v6916_v4 = vunpack.c.h.s8.bf16 %v12519_v1  ;;  %v12601_v5 = vcombine.low %v6907_v9, %v6909_v60  ;;  %v12669_v60 = vcombine.low %v7629_v37, %v7631_v39 }
 0x5f0   : > { %7438 = vmatprep.subr.bf16.mxu0 %v12582_v43  ;;  %7520 = vmatprep.subr.bf16.mxu1 %v12584_v12  ;;  %v12608_v43 = vcombine.high %v6912_v3, %v6914_v47  ;;  %v12617_v12 = vld [vmem:[%s15079_s18 + $0x438] sm:$0xff] }
 0x5f1   : > { %v7625_v20 = vunpack.c.h.s8.bf16 %v12617_v12  ;;  %v12612_v23 = vcombine.high %v6916_v4, %v6916_v4 }
 0x5f3   : > { %7439 = vmatpush1.bf16.msra.mxu0 %v12581_v17  ;;  %7521 = vmatpush1.bf16.msra.mxu1 %v12583_v18  ;;  %v12611_v17 = vcombine.low %v6916_v4, %v6916_v4  ;;  %v7624_v18 = vunpack.c.l.s8.bf16 %v12617_v12  ;;  %v12627_v4 = vld [vmem:[%s15079_s18 + $0x488] sm:$0xff] }
 0x5f4   : > { %7449 = vmatprep.subr.bf16.mxu0 %v12586_v19  ;;  %7531 = vmatprep.subr.bf16.mxu1 %v12588_v21  ;;  %v7626_v19 = vunpack.c.l.s8.bf16 %v12618_v58  ;;  %v7627_v21 = vunpack.c.h.s8.bf16 %v12618_v58  ;;  %v7644_v58 = vunpack.c.l.s8.bf16 %v12627_v4 }
 0x5f6   : > { %7441 = vmatmul.mubr.bf16.vlgmr.msra.gmra.mrb[0].mxu0 %v15796_v16  ;;  %7523 = vmatmul.mubr.bf16.vlgmr.msra.gmra.mrb[0].mxu1 %v15796_v16  ;;  %v12664_v30 = vcombine.high %v7624_v18, %v7626_v19  ;;  %v12666_v31 = vcombine.high %v7625_v20, %v7627_v21  ;;  %v12665_v48 = vcombine.low %v7625_v20, %v7627_v21 }
 0x5f7   : > { %7450 = vmatpush1.bf16.msra.mxu0 %v12585_v25  ;;  %7532 = vmatpush1.bf16.msra.mxu1 %v12587_v29  ;;  %v7397_v25 = vsel %vm5947_vm13, %v12609_v14, 0  ;;  %v7403_v29 = vsel %vm5947_vm13, %v12611_v17, 0  ;;  %v12629_v17 = vld [vmem:[%s15079_s18 + $0x498] sm:$0xff] }
 0x5f8   : > { %7451 = vmatprep.subr.bf16.mxu0 %v12590_v52  ;;  %7533 = vmatprep.subr.bf16.mxu1 %v12592_v33  ;;  %v7628_v52 = vunpack.c.l.s8.bf16 %v12619_v24  ;;  %v7630_v33 = vunpack.c.l.s8.bf16 %v12620_v26  ;;  %v7648_v21 = vunpack.c.l.s8.bf16 %v12629_v17 }
 0x5f9   : > { %7481 = vmatprep.mubr.bf16.mxu0 %v14229_v2  ;;  %7563 = vmatprep.mubr.bf16.mxu1 %v14229_v2 }
 0x5fa   : > { %v12668_v55 = vcombine.high %v7628_v52, %v7630_v33 }
 0x5fb   : > { %7452 = vmatpush1.bf16.msra.mxu0 %v12589_v34  ;;  %7534 = vmatpush1.bf16.msra.mxu1 %v12591_v41  ;;  %v7722_v34 = vcombine.high %v15813_v28, %v15813_v28  ;;  %v6940_v41 = vcombine.high %v15796_v16, %v15796_v16  ;;  %v12667_v16 = vcombine.low %v7628_v52, %v7630_v33 }
 0x5fc   : > { %7453 = vmatprep.subr.bf16.mxu0 %v12594_v42  ;;  %7535 = vmatprep.subr.bf16.mxu1 %v12596_v50  ;;  %v12663_v42 = vcombine.low %v7624_v18, %v7626_v19  ;;  %v7632_v50 = vunpack.c.l.s8.bf16 %v12621_v35  ;;  %v12630_v18 = vld [vmem:[%s15079_s18 + $0x4a0] sm:$0xff] }
 0x5fd   : > { %v7736_v9 = vrot.slane %v7722_v34, %v15645_v32  ;;  %v7651_v24 = vunpack.c.h.s8.bf16 %v12630_v18 }
 0x5fe   : > { %v12672_v6 = vcombine.high %v7632_v50, %v7634_v38 }
 0x5ff   : > { %7454 = vmatpush1.bf16.msra.mxu0 %v12593_v57  ;;  %7536 = vmatpush1.bf16.msra.mxu1 %v12595_v59  ;;  %v12623_v57 = vld [vmem:[%s15079_s18 + $0x468] sm:$0xff]  ;;  %v12624_v59 = vld [vmem:[%s15079_s18 + $0x470] sm:$0xff] }
 0x600   : > { %7455 = vmatprep.subr.bf16.mxu0 %v12598_v54  ;;  %7537 = vmatprep.subr.bf16.mxu1 %v12600_v61  ;;  %v7636_v54 = vunpack.c.l.s8.bf16 %v12623_v57  ;;  %v7638_v61 = vunpack.c.l.s8.bf16 %v12624_v59  ;;  %v7637_v44 = vunpack.c.h.s8.bf16 %v12623_v57  ;;  %v7639_v49 = vunpack.c.h.s8.bf16 %v12624_v59  ;;  %v12635_v59 = vld [vmem:[%s15079_s18 + $0x4c8] sm:$0xff] }
 0x602   : > { %v12676_v47 = vcombine.high %v7636_v54, %v7638_v61  ;;  %v12678_v0 = vcombine.high %v7637_v44, %v7639_v49 }
 0x603   : > { %7456 = vmatpush1.bf16.msra.mxu0 %v12597_v36  ;;  %7538 = vmatpush1.bf16.msra.mxu1 %v12599_v62  ;;  %v12625_v36 = vld [vmem:[%s15079_s18 + $0x478] sm:$0xff]  ;;  %v12626_v62 = vld [vmem:[%s15079_s18 + $0x480] sm:$0xff] }
 0x604   : > { %7457 = vmatprep.subr.bf16.mxu0 %v12602_v63  ;;  %7539 = vmatprep.subr.bf16.mxu1 %v12604_v45  ;;  %v12671_v63 = vcombine.low %v7632_v50, %v7634_v38  ;;  %v12673_v45 = vcombine.low %v7633_v51, %v7635_v46  ;;  %v7640_v1 = vunpack.c.l.s8.bf16 %v12625_v36  ;;  %v7642_v10 = vunpack.c.l.s8.bf16 %v12626_v62 }
 0x605   : > { %v7641_v11 = vunpack.c.h.s8.bf16 %v12625_v36  ;;  %v7643_v3 = vunpack.c.h.s8.bf16 %v12626_v62  ;;  %v12637_v36 = vld [vmem:[%s15079_s18 + $0x4d8] sm:$0xff]  ;;  %v12638_v62 = vld [vmem:[%s15079_s18 + $0x4e0] sm:$0xff] }
 0x606   : > { %v12679_v19 = vcombine.low %v7640_v1, %v7642_v10 }
 0x607   : > { %7458 = vmatpush1.bf16.msra.mxu0 %v12601_v5  ;;  %7540 = vmatpush1.bf16.msra.mxu1 %v12603_v7  ;;  %v12628_v5 = vld [vmem:[%s15079_s18 + $0x490] sm:$0xff]  ;;  %v12675_v7 = vcombine.low %v7636_v54, %v7638_v61  ;;  %v12682_v12 = vcombine.high %v7641_v11, %v7643_v3  ;;  %v12681_v20 = vcombine.low %v7641_v11, %v7643_v3  ;;  %v7660_v54 = vunpack.c.l.s8.bf16 %v12635_v59 }
 0x608   : > { %7459 = vmatprep.subr.bf16.mxu0 %v12606_v8  ;;  %7541 = vmatprep.subr.bf16.mxu1 %v12608_v43  ;;  %v12677_v8 = vcombine.low %v7637_v44, %v7639_v49  ;;  %v12680_v43 = vcombine.high %v7640_v1, %v7642_v10  ;;  %v7647_v14 = vunpack.c.h.s8.bf16 %v12628_v5  ;;  %v7661_v44 = vunpack.c.h.s8.bf16 %v12635_v59  ;;  %v12647_v59 = vld [vmem:[%s15079_s18 + $0x528] sm:$0xff] }
 0x609   : > { %v7664_v1 = vunpack.c.l.s8.bf16 %v12637_v36  ;;  %v7666_v10 = vunpack.c.l.s8.bf16 %v12638_v62  ;;  %v7665_v11 = vunpack.c.h.s8.bf16 %v12637_v36  ;;  %v7667_v3 = vunpack.c.h.s8.bf16 %v12638_v62  ;;  %v12649_v36 = vld [vmem:[%s15079_s18 + $0x538] sm:$0xff]  ;;  %v12650_v62 = vld [vmem:[%s15079_s18 + $0x540] sm:$0xff] }
 0x60b   : > { %7460 = vmatpush1.bf16.msra.mxu0 %v12605_v13  ;;  %7542 = vmatpush1.bf16.msra.mxu1 %v12607_v15  ;;  %v7646_v13 = vunpack.c.l.s8.bf16 %v12628_v5  ;;  %v7645_v15 = vunpack.c.h.s8.bf16 %v12627_v4  ;;  %v12639_v4 = vld [vmem:[%s15079_s18 + $0x4e8] sm:$0xff]  ;;  %v12640_v5 = vld [vmem:[%s15079_s18 + $0x4f0] sm:$0xff] }
 0x60c   : > { %12613 = vmatprep.subr.msk.bf16.mxu0 %vm5947_vm13, %v12610_v22  ;;  %12615 = vmatprep.subr.msk.bf16.mxu1 %vm5947_vm13, %v12612_v23  ;;  %v7650_v22 = vunpack.c.l.s8.bf16 %v12630_v18  ;;  %v7649_v23 = vunpack.c.h.s8.bf16 %v12629_v17  ;;  %v12641_v17 = vld [vmem:[%s15079_s18 + $0x4f8] sm:$0xff]  ;;  %v12642_v18 = vld [vmem:[%s15079_s18 + $0x500] sm:$0xff] }
 0x60d   : > { %v12684_v26 = vcombine.high %v7644_v58, %v7646_v13  ;;  %v12685_v52 = vcombine.low %v7645_v15, %v7647_v14 }
 0x60e   : > { %v12688_v33 = vcombine.high %v7648_v21, %v7650_v22  ;;  %v12690_v37 = vcombine.high %v7649_v23, %v7651_v24  ;;  %v12689_v50 = vcombine.low %v7649_v23, %v7651_v24  ;;  %v7673_v23 = vunpack.c.h.s8.bf16 %v12641_v17 }
 0x60f   : > { %7462 = vmatpush1.bf16.msra.mxu0 %v7397_v25  ;;  %7544 = vmatpush1.bf16.msra.mxu1 %v7403_v29  ;;  %v12686_v25 = vcombine.high %v7645_v15, %v7647_v14  ;;  %v12631_v29 = vld [vmem:[%s15079_s18 + $0x4a8] sm:$0xff]  ;;  %v7669_v15 = vunpack.c.h.s8.bf16 %v12639_v4  ;;  %v7671_v14 = vunpack.c.h.s8.bf16 %v12640_v5  ;;  %v7675_v24 = vunpack.c.h.s8.bf16 %v12642_v18 }
 0x610   : > { %8205 = vmatprep.subr.bf16.mxu0 %v12664_v30  ;;  %8287 = vmatprep.subr.bf16.mxu1 %v12666_v31  ;;  %v12632_v30 = vld [vmem:[%s15079_s18 + $0x4b0] sm:$0xff]  ;;  %v12683_v31 = vcombine.low %v7644_v58, %v7646_v13  ;;  %v7652_v39 = vunpack.c.l.s8.bf16 %v12631_v29  ;;  %v7653_v40 = vunpack.c.h.s8.bf16 %v12631_v29  ;;  %v7668_v58 = vunpack.c.l.s8.bf16 %v12639_v4  ;;  %v12643_v29 = vld [vmem:[%s15079_s18 + $0x508] sm:$0xff] }
 0x611   : > { %v7654_v35 = vunpack.c.l.s8.bf16 %v12632_v30  ;;  %v7655_v34 = vunpack.c.h.s8.bf16 %v12632_v30  ;;  %v7670_v13 = vunpack.c.l.s8.bf16 %v12640_v5  ;;  %v12644_v30 = vld [vmem:[%s15079_s18 + $0x510] sm:$0xff]  ;;  %v12651_v4 = vld [vmem:[%s15079_s18 + $0x548] sm:$0xff] }
 0x612   : > { %12614 = vmatmul.mubr.msk.bf16.vlgmr.msra.gmra.mrb[0].mxu0 %vm5943_vm14, %v6940_v41  ;;  %12616 = vmatmul.mubr.msk.bf16.vlgmr.msra.gmra.mrb[0].mxu1 %vm5943_vm14, %v6940_v41  ;;  %v12633_v41 = vld [vmem:[%s15079_s18 + $0x4b8] sm:$0xff]  ;;  %v12652_v5 = vld [vmem:[%s15079_s18 + $0x550] sm:$0xff] }
 0x613   : > { %8206 = vmatpush1.bf16.msra.mxu0 %v12663_v42  ;;  %8288 = vmatpush1.bf16.msra.mxu1 %v12665_v48  ;;  %v12634_v42 = vld [vmem:[%s15079_s18 + $0x4c0] sm:$0xff]  ;;  %v12687_v48 = vcombine.low %v7648_v21, %v7650_v22  ;;  %v7656_v38 = vunpack.c.l.s8.bf16 %v12633_v41  ;;  %v7657_v46 = vunpack.c.h.s8.bf16 %v12633_v41  ;;  %v12694_v57 = vcombine.high %v7653_v40, %v7655_v34  ;;  %v12645_v41 = vld [vmem:[%s15079_s18 + $0x518] sm:$0xff] }
 0x614   : > { %8207 = vmatprep.subr.bf16.mxu0 %v12668_v55  ;;  %8289 = vmatprep.subr.bf16.mxu1 %v12670_v56  ;;  %v7658_v51 = vunpack.c.l.s8.bf16 %v12634_v42  ;;  %v7659_v55 = vunpack.c.h.s8.bf16 %v12634_v42  ;;  %v12692_v56 = vcombine.high %v7652_v39, %v7654_v35  ;;  %v7672_v21 = vunpack.c.l.s8.bf16 %v12641_v17  ;;  %v12646_v42 = vld [vmem:[%s15079_s18 + $0x520] sm:$0xff]  ;;  %v12653_v17 = vld [vmem:[%s15079_s18 + $0x558] sm:$0xff] }
 0x615   : > { %8237 = vmatprep.mubr.bf16.mxu0 %v7736_v9  ;;  %8319 = vmatprep.mubr.bf16.mxu1 %v7736_v9  ;;  %v12636_v9 = vld [vmem:[%s15079_s18 + $0x4d0] sm:$0xff]  ;;  %v7674_v22 = vunpack.c.l.s8.bf16 %v12642_v18  ;;  %v12654_v18 = vld [vmem:[%s15079_s18 + $0x560] sm:$0xff] }
 0x616   : > { %v7662_v61 = vunpack.c.l.s8.bf16 %v12636_v9  ;;  %v7663_v49 = vunpack.c.h.s8.bf16 %v12636_v9  ;;  %v12648_v9 = vld [vmem:[%s15079_s18 + $0x530] sm:$0xff] }
 0x617   : > { %8208 = vmatpush1.bf16.msra.mxu0 %v12667_v16  ;;  %8290 = vmatpush1.bf16.msra.mxu1 %v12669_v60  ;;  %v12691_v16 = vcombine.low %v7652_v39, %v7654_v35  ;;  %v12693_v60 = vcombine.low %v7653_v40, %v7655_v34  ;;  %v7676_v39 = vunpack.c.l.s8.bf16 %v12643_v29  ;;  %v7678_v35 = vunpack.c.l.s8.bf16 %v12644_v30 }
 0x618   : > { %8209 = vmatprep.subr.bf16.mxu0 %v12672_v6  ;;  %8291 = vmatprep.subr.bf16.mxu1 %v12674_v53  ;;  %v12696_v6 = vcombine.high %v7656_v38, %v7658_v51  ;;  %v12698_v53 = vcombine.high %v7657_v46, %v7659_v55  ;;  %v7677_v40 = vunpack.c.h.s8.bf16 %v12643_v29  ;;  %v7679_v34 = vunpack.c.h.s8.bf16 %v12644_v30  ;;  %v12655_v30 = vld [vmem:[%s15079_s18 + $0x568] sm:$0xff] }
 0x61b   : > { %8210 = vmatpush1.bf16.msra.mxu0 %v12671_v63  ;;  %8292 = vmatpush1.bf16.msra.mxu1 %v12673_v45  ;;  %v12695_v63 = vcombine.low %v7656_v38, %v7658_v51  ;;  %v12697_v45 = vcombine.low %v7657_v46, %v7659_v55  ;;  %v7680_v38 = vunpack.c.l.s8.bf16 %v12645_v41  ;;  %v7682_v51 = vunpack.c.l.s8.bf16 %v12646_v42 }
 0x61c   : > { %8211 = vmatprep.subr.bf16.mxu0 %v12676_v47  ;;  %8293 = vmatprep.subr.bf16.mxu1 %v12678_v0  ;;  %v12700_v47 = vcombine.high %v7660_v54, %v7662_v61  ;;  %v12702_v0 = vcombine.high %v7661_v44, %v7663_v49  ;;  %v7681_v46 = vunpack.c.h.s8.bf16 %v12645_v41  ;;  %v7683_v55 = vunpack.c.h.s8.bf16 %v12646_v42  ;;  %v12657_v41 = vld [vmem:[%s15079_s18 + $0x578] sm:$0xff]  ;;  %v12658_v42 = vld [vmem:[%s15079_s18 + $0x580] sm:$0xff] }
 0x61f   : > { %8212 = vmatpush1.bf16.msra.mxu0 %v12675_v7  ;;  %8294 = vmatpush1.bf16.msra.mxu1 %v12677_v8  ;;  %v12699_v7 = vcombine.low %v7660_v54, %v7662_v61  ;;  %v12701_v8 = vcombine.low %v7661_v44, %v7663_v49  ;;  %v7684_v54 = vunpack.c.l.s8.bf16 %v12647_v59  ;;  %v7686_v61 = vunpack.c.l.s8.bf16 %v12648_v9 }
 0x620   : > { %8213 = vmatprep.subr.bf16.mxu0 %v12680_v43  ;;  %8295 = vmatprep.subr.bf16.mxu1 %v12682_v12  ;;  %v12704_v43 = vcombine.high %v7664_v1, %v7666_v10  ;;  %v12706_v12 = vcombine.high %v7665_v11, %v7667_v3  ;;  %v7685_v44 = vunpack.c.h.s8.bf16 %v12647_v59  ;;  %v7687_v49 = vunpack.c.h.s8.bf16 %v12648_v9  ;;  %v12659_v59 = vld [vmem:[%s15079_s18 + $0x588] sm:$0xff]  ;;  %v12660_v9 = vld [vmem:[%s15079_s18 + $0x590] sm:$0xff] }
 0x623   : > { %8214 = vmatpush1.bf16.msra.mxu0 %v12679_v19  ;;  %8296 = vmatpush1.bf16.msra.mxu1 %v12681_v20  ;;  %v12703_v19 = vcombine.low %v7664_v1, %v7666_v10  ;;  %v12705_v20 = vcombine.low %v7665_v11, %v7667_v3  ;;  %v7688_v1 = vunpack.c.l.s8.bf16 %v12649_v36  ;;  %v7690_v10 = vunpack.c.l.s8.bf16 %v12650_v62 }
 0x624   : > { %8215 = vmatprep.subr.bf16.mxu0 %v12684_v26  ;;  %8297 = vmatprep.subr.bf16.mxu1 %v12686_v25  ;;  %v12708_v26 = vcombine.high %v7668_v58, %v7670_v13  ;;  %v12710_v25 = vcombine.high %v7669_v15, %v7671_v14  ;;  %v7689_v11 = vunpack.c.h.s8.bf16 %v12649_v36  ;;  %v7691_v3 = vunpack.c.h.s8.bf16 %v12650_v62 }
 0x625   : > { %v7711_v36 = vunpack.c.h.s8.bf16 %v12660_v9 }
 0x627   : > { %8216 = vmatpush1.bf16.msra.mxu0 %v12683_v31  ;;  %8298 = vmatpush1.bf16.msra.mxu1 %v12685_v52  ;;  %v12707_v31 = vcombine.low %v7668_v58, %v7670_v13  ;;  %v12709_v52 = vcombine.low %v7669_v15, %v7671_v14  ;;  %v7692_v58 = vunpack.c.l.s8.bf16 %v12651_v4  ;;  %v7694_v13 = vunpack.c.l.s8.bf16 %v12652_v5 }
 0x628   : > { %8217 = vmatprep.subr.bf16.mxu0 %v12688_v33  ;;  %8299 = vmatprep.subr.bf16.mxu1 %v12690_v37  ;;  %v12712_v33 = vcombine.high %v7672_v21, %v7674_v22  ;;  %v12714_v37 = vcombine.high %v7673_v23, %v7675_v24  ;;  %v7693_v15 = vunpack.c.h.s8.bf16 %v12651_v4  ;;  %v7695_v14 = vunpack.c.h.s8.bf16 %v12652_v5 }
 0x62a   : > { %v12734_v29 = vcombine.high %v7693_v15, %v7695_v14 }
 0x62b   : > { %8218 = vmatpush1.bf16.msra.mxu0 %v12687_v48  ;;  %8300 = vmatpush1.bf16.msra.mxu1 %v12689_v50  ;;  %v12711_v48 = vcombine.low %v7672_v21, %v7674_v22  ;;  %v12713_v50 = vcombine.low %v7673_v23, %v7675_v24  ;;  %v12729_v21 = vcombine.low %v7689_v11, %v7691_v3  ;;  %v7696_v22 = vunpack.c.l.s8.bf16 %v12653_v17 }
 0x62c   : > { %8219 = vmatprep.subr.bf16.mxu0 %v12692_v56  ;;  %8301 = vmatprep.subr.bf16.mxu1 %v12694_v57  ;;  %v12716_v56 = vcombine.high %v7676_v39, %v7678_v35  ;;  %v12718_v57 = vcombine.high %v7677_v40, %v7679_v34  ;;  %v7698_v23 = vunpack.c.l.s8.bf16 %v12654_v18  ;;  %v7697_v24 = vunpack.c.h.s8.bf16 %v12653_v17  ;;  %v12762_v17 = vld [vmem:[%s15079_s18 + $0x5b8] sm:$0xff] }
 0x62f   : > { %8220 = vmatpush1.bf16.msra.mxu0 %v12691_v16  ;;  %8302 = vmatpush1.bf16.msra.mxu1 %v12693_v60  ;;  %v12715_v16 = vcombine.low %v7676_v39, %v7678_v35  ;;  %v12717_v60 = vcombine.low %v7677_v40, %v7679_v34  ;;  %v7700_v39 = vunpack.c.l.s8.bf16 %v12655_v30  ;;  %v7701_v40 = vunpack.c.h.s8.bf16 %v12655_v30  ;;  %v12763_v30 = vld [vmem:[%s15079_s18 + $0x5c0] sm:$0xff] }
 0x630   : > { %8221 = vmatprep.subr.bf16.mxu0 %v12696_v6  ;;  %8303 = vmatprep.subr.bf16.mxu1 %v12698_v53  ;;  %v12720_v6 = vcombine.high %v7680_v38, %v7682_v51  ;;  %v12722_v53 = vcombine.high %v7681_v46, %v7683_v55 }
 0x633   : > { %8222 = vmatpush1.bf16.msra.mxu0 %v12695_v63  ;;  %8304 = vmatpush1.bf16.msra.mxu1 %v12697_v45  ;;  %v12719_v63 = vcombine.low %v7680_v38, %v7682_v51  ;;  %v12721_v45 = vcombine.low %v7681_v46, %v7683_v55  ;;  %v7704_v38 = vunpack.c.l.s8.bf16 %v12657_v41  ;;  %v7706_v51 = vunpack.c.l.s8.bf16 %v12658_v42 }
 0x634   : > { %8223 = vmatprep.subr.bf16.mxu0 %v12700_v47  ;;  %8305 = vmatprep.subr.bf16.mxu1 %v12702_v0  ;;  %v12724_v47 = vcombine.high %v7684_v54, %v7686_v61  ;;  %v12726_v0 = vcombine.high %v7685_v44, %v7687_v49  ;;  %v7705_v46 = vunpack.c.h.s8.bf16 %v12657_v41  ;;  %v7707_v55 = vunpack.c.h.s8.bf16 %v12658_v42 }
 0x637   : > { %8224 = vmatpush1.bf16.msra.mxu0 %v12699_v7  ;;  %8306 = vmatpush1.bf16.msra.mxu1 %v12701_v8  ;;  %v12723_v7 = vcombine.low %v7684_v54, %v7686_v61  ;;  %v12725_v8 = vcombine.low %v7685_v44, %v7687_v49  ;;  %v12661_v54 = vld [vmem:[%s15079_s18 + $0x598] sm:$0x55]  ;;  %v7708_v61 = vunpack.c.l.s8.bf16 %v12659_v59  ;;  %v7710_v44 = vunpack.c.l.s8.bf16 %v12660_v9 }
 0x638   : > { %8225 = vmatprep.subr.bf16.mxu0 %v12704_v43  ;;  %8307 = vmatprep.subr.bf16.mxu1 %v12706_v12  ;;  %v12728_v43 = vcombine.high %v7688_v1, %v7690_v10  ;;  %v12730_v12 = vcombine.high %v7689_v11, %v7691_v3  ;;  %v7709_v49 = vunpack.c.h.s8.bf16 %v12659_v59  ;;  %v7712_v62 = vunpack.c.l.s8.bf16 %v12661_v54  ;;  %v12759_v3 = vld [vmem:[%s15079_s18 + $0x5a0] sm:$0xff] }
 0x63a   : > { %v12750_v11 = vcombine.high %v7709_v49, %v7711_v36  ;;  %v12749_v4 = vcombine.low %v7709_v49, %v7711_v36  ;;  %v12751_v5 = vcombine.low %v7712_v62, %v7712_v62 }
 0x63b   : > { %8226 = vmatpush1.bf16.msra.mxu0 %v12703_v19  ;;  %8308 = vmatpush1.bf16.msra.mxu1 %v12705_v20  ;;  %v15862_v19 = vrot.slane %v15813_v28, %v15645_v32  ;;  %v12727_v20 = vcombine.low %v7688_v1, %v7690_v10  ;;  %v12731_v28 = vcombine.low %v7692_v58, %v7694_v13 }
 0x63c   : > { %8227 = vmatprep.subr.bf16.mxu0 %v12708_v26  ;;  %8309 = vmatprep.subr.bf16.mxu1 %v12710_v25  ;;  %v7699_v26 = vunpack.c.h.s8.bf16 %v12654_v18  ;;  %v12732_v25 = vcombine.high %v7692_v58, %v7694_v13  ;;  %v12745_v1 = vcombine.low %v7705_v46, %v7707_v55  ;;  %v12748_v10 = vcombine.high %v7708_v61, %v7710_v44  ;;  %v15879_v18 = vld.sshfl [vmem:[#allocation2 + $0xc] sm:$0x13 pattern:$0x75316420] }
 0x63d   : > { %v12752_v13 = vcombine.high %v7712_v62, %v7712_v62 }
 0x63f   : > { %8228 = vmatpush1.bf16.msra.mxu0 %v12707_v31  ;;  %8310 = vmatpush1.bf16.msra.mxu1 %v12709_v52  ;;  %v12656_v31 = vld [vmem:[%s15079_s18 + $0x570] sm:$0xff]  ;;  %v12733_v52 = vcombine.low %v7693_v15, %v7695_v14 }
 0x640   : > { %8229 = vmatprep.subr.bf16.mxu0 %v12712_v33  ;;  %8311 = vmatprep.subr.bf16.mxu1 %v12714_v37  ;;  %v12736_v33 = vcombine.high %v7696_v22, %v7698_v23  ;;  %v12738_v37 = vcombine.high %v7697_v24, %v7699_v26  ;;  %v7702_v35 = vunpack.c.l.s8.bf16 %v12656_v31  ;;  %v7703_v34 = vunpack.c.h.s8.bf16 %v12656_v31  ;;  %v12761_v14 = vld [vmem:[%s15079_s18 + $0x5b0] sm:$0xff]  ;;  %v12764_v31 = vld [vmem:[%s15079_s18 + $0x5c8] sm:$0xff] }
 0x643   : > { %8230 = vmatpush1.bf16.msra.mxu0 %v12711_v48  ;;  %8312 = vmatpush1.bf16.msra.mxu1 %v12713_v50  ;;  %v12735_v48 = vcombine.low %v7696_v22, %v7698_v23  ;;  %v12737_v50 = vcombine.low %v7697_v24, %v7699_v26  ;;  %v8425_v24 = vunpack.c.l.s8.bf16 %v12761_v14  ;;  %v8427_v26 = vunpack.c.l.s8.bf16 %v12762_v17 }
 0x644   : > { %8231 = vmatprep.subr.bf16.mxu0 %v12716_v56  ;;  %8313 = vmatprep.subr.bf16.mxu1 %v12718_v57  ;;  %v12740_v56 = vcombine.high %v7700_v39, %v7702_v35  ;;  %v12742_v57 = vcombine.high %v7701_v40, %v7703_v34 }
 0x645   : > { %v12810_v41 = vcombine.high %v8425_v24, %v8427_v26 }
 0x647   : > { %8232 = vmatpush1.bf16.msra.mxu0 %v12715_v16  ;;  %8314 = vmatpush1.bf16.msra.mxu1 %v12717_v60  ;;  %v12739_v16 = vcombine.low %v7700_v39, %v7702_v35  ;;  %v12741_v60 = vcombine.low %v7701_v40, %v7703_v34  ;;  %v8429_v39 = vunpack.c.l.s8.bf16 %v12763_v30  ;;  %v8431_v35 = vunpack.c.l.s8.bf16 %v12764_v31 }
 0x648   : > { %8233 = vmatprep.subr.bf16.mxu0 %v12720_v6  ;;  %8315 = vmatprep.subr.bf16.mxu1 %v12722_v53  ;;  %v12744_v6 = vcombine.high %v7704_v38, %v7706_v51  ;;  %v12746_v53 = vcombine.high %v7705_v46, %v7707_v55  ;;  %v8430_v40 = vunpack.c.h.s8.bf16 %v12763_v30  ;;  %v8432_v34 = vunpack.c.h.s8.bf16 %v12764_v31 }
 0x649   : > { %v12814_v46 = vcombine.high %v8429_v39, %v8431_v35 }
 0x64a   : > { %v12816_v55 = vcombine.high %v8430_v40, %v8432_v34 }
 0x64b   : > { %8234 = vmatpush1.bf16.msra.mxu0 %v12719_v63  ;;  %8316 = vmatpush1.bf16.msra.mxu1 %v12721_v45  ;;  %v7713_v63 = vunpack.c.h.s8.bf16 %v12661_v54  ;;  %v12743_v45 = vcombine.low %v7704_v38, %v7706_v51 }
 0x64c   : > { %8235 = vmatprep.subr.bf16.mxu0 %v12724_v47  ;;  %8317 = vmatprep.subr.bf16.mxu1 %v12726_v0  ;;  %v12760_v47 = vld [vmem:[%s15079_s18 + $0x5a8] sm:$0xff]  ;;  %v12747_v0 = vcombine.low %v7708_v61, %v7710_v44 }
 0x64d   : > { %v8424_v58 = vunpack.c.h.s8.bf16 %v12760_v47  ;;  %v12754_v15 = vcombine.high %v7713_v63, %v7713_v63 }
 0x64f   : > { %8236 = vmatpush1.bf16.msra.mxu0 %v12723_v7  ;;  %8318 = vmatpush1.bf16.msra.mxu1 %v12725_v8  ;;  %v12753_v7 = vcombine.low %v7713_v63, %v7713_v63  ;;  %v8421_v8 = vunpack.c.l.s8.bf16 %v12759_v3  ;;  %v12769_v63 = vld [vmem:[%s15079_s18 + $0x5f0] sm:$0xff] }
 0x650   : > { %8246 = vmatprep.subr.bf16.mxu0 %v12728_v43  ;;  %8328 = vmatprep.subr.bf16.mxu1 %v12730_v12  ;;  %v8423_v43 = vunpack.c.l.s8.bf16 %v12760_v47  ;;  %v8422_v12 = vunpack.c.h.s8.bf16 %v12759_v3  ;;  %v8441_v47 = vunpack.c.l.s8.bf16 %v12769_v63 }
 0x652   : > { %8238 = vmatmul.mubr.bf16.vlgmr.msra.gmra.mrb[0].mxu0 %v15862_v19  ;;  %8320 = vmatmul.mubr.bf16.vlgmr.msra.gmra.mrb[0].mxu1 %v15862_v19  ;;  %v12806_v22 = vcombine.high %v8421_v8, %v8423_v43  ;;  %v12808_v23 = vcombine.high %v8422_v12, %v8424_v58 }
 0x653   : > { %8247 = vmatpush1.bf16.msra.mxu0 %v12727_v20  ;;  %8329 = vmatpush1.bf16.msra.mxu1 %v12729_v21  ;;  %v8194_v20 = vsel %vm5947_vm13, %v12751_v5, 0  ;;  %v8200_v21 = vsel %vm5947_vm13, %v12753_v7, 0  ;;  %v12771_v7 = vld [vmem:[%s15079_s18 + $0x600] sm:$0xff] }
 0x654   : > { %8248 = vmatprep.subr.bf16.mxu0 %v12732_v25  ;;  %8330 = vmatprep.subr.bf16.mxu1 %v12734_v29  ;;  %v8426_v25 = vunpack.c.h.s8.bf16 %v12761_v14  ;;  %v8428_v29 = vunpack.c.h.s8.bf16 %v12762_v17 }
 0x655   : > { %8278 = vmatprep.mubr.bf16.mxu0 %v14229_v2  ;;  %8360 = vmatprep.mubr.bf16.mxu1 %v14229_v2 }
 0x656   : > { %v12812_v42 = vcombine.high %v8426_v25, %v8428_v29  ;;  %v12811_v51 = vcombine.low %v8426_v25, %v8428_v29 }
 0x657   : > { %8249 = vmatpush1.bf16.msra.mxu0 %v12731_v28  ;;  %8331 = vmatpush1.bf16.msra.mxu1 %v12733_v52  ;;  %v8519_v28 = vcombine.high %v15879_v18, %v15879_v18  ;;  %v7737_v52 = vcombine.high %v15862_v19, %v15862_v19  ;;  %v12809_v19 = vcombine.low %v8425_v24, %v8427_v26 }
 0x658   : > { %8250 = vmatprep.subr.bf16.mxu0 %v12736_v33  ;;  %8332 = vmatprep.subr.bf16.mxu1 %v12738_v37  ;;  %v12805_v33 = vcombine.low %v8421_v8, %v8423_v43  ;;  %v12807_v37 = vcombine.low %v8422_v12, %v8424_v58  ;;  %v12772_v8 = vld [vmem:[%s15079_s18 + $0x608] sm:$0xff]  ;;  %v8445_v58 = vunpack.c.l.s8.bf16 %v12771_v7 }
 0x659   : > { %v8533_v38 = vrot.slane %v8519_v28, %v15645_v32  ;;  %v8448_v14 = vunpack.c.h.s8.bf16 %v12772_v8 }
 0x65b   : > { %8251 = vmatpush1.bf16.msra.mxu0 %v12735_v48  ;;  %8333 = vmatpush1.bf16.msra.mxu1 %v12737_v50  ;;  %v12765_v48 = vld [vmem:[%s15079_s18 + $0x5d0] sm:$0xff]  ;;  %v12766_v50 = vld [vmem:[%s15079_s18 + $0x5d8] sm:$0xff] }
 0x65c   : > { %8252 = vmatprep.subr.bf16.mxu0 %v12740_v56  ;;  %8334 = vmatprep.subr.bf16.mxu1 %v12742_v57  ;;  %v8433_v56 = vunpack.c.l.s8.bf16 %v12765_v48  ;;  %v8435_v57 = vunpack.c.l.s8.bf16 %v12766_v50  ;;  %v8434_v59 = vunpack.c.h.s8.bf16 %v12765_v48  ;;  %v8436_v9 = vunpack.c.h.s8.bf16 %v12766_v50  ;;  %v12777_v50 = vld [vmem:[%s15079_s18 + $0x630] sm:$0xff] }
 0x65e   : > { %v12818_v36 = vcombine.high %v8433_v56, %v8435_v57  ;;  %v12820_v62 = vcombine.high %v8434_v59, %v8436_v9 }
 0x65f   : > { %8253 = vmatpush1.bf16.msra.mxu0 %v12739_v16  ;;  %8335 = vmatpush1.bf16.msra.mxu1 %v12741_v60  ;;  %v12767_v16 = vld [vmem:[%s15079_s18 + $0x5e0] sm:$0xff]  ;;  %v12768_v60 = vld [vmem:[%s15079_s18 + $0x5e8] sm:$0xff] }
 0x660   : > { %8254 = vmatprep.subr.bf16.mxu0 %v12744_v6  ;;  %8336 = vmatprep.subr.bf16.mxu1 %v12746_v53  ;;  %v12813_v6 = vcombine.low %v8429_v39, %v8431_v35  ;;  %v12815_v53 = vcombine.low %v8430_v40, %v8432_v34  ;;  %v8437_v54 = vunpack.c.l.s8.bf16 %v12767_v16  ;;  %v8439_v61 = vunpack.c.l.s8.bf16 %v12768_v60 }
 0x661   : > { %v8438_v44 = vunpack.c.h.s8.bf16 %v12767_v16  ;;  %v8440_v49 = vunpack.c.h.s8.bf16 %v12768_v60  ;;  %v12779_v16 = vld [vmem:[%s15079_s18 + $0x640] sm:$0xff]  ;;  %v12780_v60 = vld [vmem:[%s15079_s18 + $0x648] sm:$0xff] }
 0x662   : > { %v12821_v43 = vcombine.low %v8437_v54, %v8439_v61 }
 0x663   : > { %8255 = vmatpush1.bf16.msra.mxu0 %v12743_v45  ;;  %8337 = vmatpush1.bf16.msra.mxu1 %v12745_v1  ;;  %v12770_v45 = vld [vmem:[%s15079_s18 + $0x5f8] sm:$0xff]  ;;  %v12817_v1 = vcombine.low %v8433_v56, %v8435_v57  ;;  %v12824_v3 = vcombine.high %v8438_v44, %v8440_v49  ;;  %v12823_v12 = vcombine.low %v8438_v44, %v8440_v49  ;;  %v8457_v56 = vunpack.c.l.s8.bf16 %v12777_v50 }
 0x664   : > { %8256 = vmatprep.subr.bf16.mxu0 %v12748_v10  ;;  %8338 = vmatprep.subr.bf16.mxu1 %v12750_v11  ;;  %v12819_v10 = vcombine.low %v8434_v59, %v8436_v9  ;;  %v12822_v11 = vcombine.high %v8437_v54, %v8439_v61  ;;  %v8444_v5 = vunpack.c.h.s8.bf16 %v12770_v45  ;;  %v8458_v59 = vunpack.c.h.s8.bf16 %v12777_v50  ;;  %v12789_v50 = vld [vmem:[%s15079_s18 + $0x690] sm:$0xff] }
 0x665   : > { %v8461_v54 = vunpack.c.l.s8.bf16 %v12779_v16  ;;  %v8463_v61 = vunpack.c.l.s8.bf16 %v12780_v60  ;;  %v8462_v44 = vunpack.c.h.s8.bf16 %v12779_v16  ;;  %v8464_v49 = vunpack.c.h.s8.bf16 %v12780_v60  ;;  %v12791_v16 = vld [vmem:[%s15079_s18 + $0x6a0] sm:$0xff]  ;;  %v12792_v60 = vld [vmem:[%s15079_s18 + $0x6a8] sm:$0xff] }
 0x667   : > { %8257 = vmatpush1.bf16.msra.mxu0 %v12747_v0  ;;  %8339 = vmatpush1.bf16.msra.mxu1 %v12749_v4  ;;  %v8443_v0 = vunpack.c.l.s8.bf16 %v12770_v45  ;;  %v8442_v4 = vunpack.c.h.s8.bf16 %v12769_v63  ;;  %v12781_v63 = vld [vmem:[%s15079_s18 + $0x650] sm:$0xff]  ;;  %v12782_v45 = vld [vmem:[%s15079_s18 + $0x658] sm:$0xff] }
 0x668   : > { %12755 = vmatprep.subr.msk.bf16.mxu0 %vm5947_vm13, %v12752_v13  ;;  %12757 = vmatprep.subr.msk.bf16.mxu1 %vm5947_vm13, %v12754_v15  ;;  %v8447_v13 = vunpack.c.l.s8.bf16 %v12772_v8  ;;  %v8446_v15 = vunpack.c.h.s8.bf16 %v12771_v7  ;;  %v12783_v7 = vld [vmem:[%s15079_s18 + $0x660] sm:$0xff]  ;;  %v12784_v8 = vld [vmem:[%s15079_s18 + $0x668] sm:$0xff] }
 0x669   : > { %v12826_v17 = vcombine.high %v8441_v47, %v8443_v0  ;;  %v12827_v24 = vcombine.low %v8442_v4, %v8444_v5 }
 0x66a   : > { %v12830_v26 = vcombine.high %v8445_v58, %v8447_v13  ;;  %v12832_v25 = vcombine.high %v8446_v15, %v8448_v14  ;;  %v12831_v39 = vcombine.low %v8446_v15, %v8448_v14  ;;  %v8470_v15 = vunpack.c.h.s8.bf16 %v12783_v7 }
 0x66b   : > { %8259 = vmatpush1.bf16.msra.mxu0 %v8194_v20  ;;  %8341 = vmatpush1.bf16.msra.mxu1 %v8200_v21  ;;  %v12828_v20 = vcombine.high %v8442_v4, %v8444_v5  ;;  %v12773_v21 = vld [vmem:[%s15079_s18 + $0x610] sm:$0xff]  ;;  %v8466_v4 = vunpack.c.h.s8.bf16 %v12781_v63  ;;  %v8468_v5 = vunpack.c.h.s8.bf16 %v12782_v45  ;;  %v8472_v14 = vunpack.c.h.s8.bf16 %v12784_v8 }
 0x66c   : > { %9002 = vmatprep.subr.bf16.mxu0 %v12806_v22  ;;  %9084 = vmatprep.subr.bf16.mxu1 %v12808_v23  ;;  %v12774_v22 = vld [vmem:[%s15079_s18 + $0x618] sm:$0xff]  ;;  %v12825_v23 = vcombine.low %v8441_v47, %v8443_v0  ;;  %v8449_v29 = vunpack.c.l.s8.bf16 %v12773_v21  ;;  %v8450_v31 = vunpack.c.h.s8.bf16 %v12773_v21  ;;  %v8465_v47 = vunpack.c.l.s8.bf16 %v12781_v63  ;;  %v12785_v21 = vld [vmem:[%s15079_s18 + $0x670] sm:$0xff] }
 0x66d   : > { %v8451_v30 = vunpack.c.l.s8.bf16 %v12774_v22  ;;  %v8452_v28 = vunpack.c.h.s8.bf16 %v12774_v22  ;;  %v8467_v0 = vunpack.c.l.s8.bf16 %v12782_v45  ;;  %v12786_v22 = vld [vmem:[%s15079_s18 + $0x678] sm:$0xff]  ;;  %v12793_v63 = vld [vmem:[%s15079_s18 + $0x6b0] sm:$0xff] }
 0x66e   : > { %12756 = vmatmul.mubr.msk.bf16.vlgmr.msra.gmra.mrb[0].mxu0 %vm5943_vm14, %v7737_v52  ;;  %12758 = vmatmul.mubr.msk.bf16.vlgmr.msra.gmra.mrb[0].mxu1 %vm5943_vm14, %v7737_v52  ;;  %v12775_v52 = vld [vmem:[%s15079_s18 + $0x620] sm:$0xff]  ;;  %v12794_v45 = vld [vmem:[%s15079_s18 + $0x6b8] sm:$0xff] }
 0x66f   : > { %9003 = vmatpush1.bf16.msra.mxu0 %v12805_v33  ;;  %9085 = vmatpush1.bf16.msra.mxu1 %v12807_v37  ;;  %v12776_v33 = vld [vmem:[%s15079_s18 + $0x628] sm:$0xff]  ;;  %v12829_v37 = vcombine.low %v8445_v58, %v8447_v13  ;;  %v8453_v35 = vunpack.c.l.s8.bf16 %v12775_v52  ;;  %v8454_v34 = vunpack.c.h.s8.bf16 %v12775_v52  ;;  %v12836_v48 = vcombine.high %v8450_v31, %v8452_v28  ;;  %v12787_v52 = vld [vmem:[%s15079_s18 + $0x680] sm:$0xff] }
 0x670   : > { %9004 = vmatprep.subr.bf16.mxu0 %v12810_v41  ;;  %9086 = vmatprep.subr.bf16.mxu1 %v12812_v42  ;;  %v8455_v40 = vunpack.c.l.s8.bf16 %v12776_v33  ;;  %v8456_v41 = vunpack.c.h.s8.bf16 %v12776_v33  ;;  %v12834_v42 = vcombine.high %v8449_v29, %v8451_v30  ;;  %v8469_v58 = vunpack.c.l.s8.bf16 %v12783_v7  ;;  %v12788_v33 = vld [vmem:[%s15079_s18 + $0x688] sm:$0xff]  ;;  %v12795_v7 = vld [vmem:[%s15079_s18 + $0x6c0] sm:$0xff] }
 0x671   : > { %9034 = vmatprep.mubr.bf16.mxu0 %v8533_v38  ;;  %9116 = vmatprep.mubr.bf16.mxu1 %v8533_v38  ;;  %v12778_v38 = vld [vmem:[%s15079_s18 + $0x638] sm:$0xff]  ;;  %v8471_v13 = vunpack.c.l.s8.bf16 %v12784_v8  ;;  %v12796_v8 = vld [vmem:[%s15079_s18 + $0x6c8] sm:$0xff] }
 0x672   : > { %v8459_v57 = vunpack.c.l.s8.bf16 %v12778_v38  ;;  %v8460_v9 = vunpack.c.h.s8.bf16 %v12778_v38  ;;  %v12790_v38 = vld [vmem:[%s15079_s18 + $0x698] sm:$0xff] }
 0x673   : > { %9005 = vmatpush1.bf16.msra.mxu0 %v12809_v19  ;;  %9087 = vmatpush1.bf16.msra.mxu1 %v12811_v51  ;;  %v12833_v19 = vcombine.low %v8449_v29, %v8451_v30  ;;  %v12835_v51 = vcombine.low %v8450_v31, %v8452_v28  ;;  %v8473_v29 = vunpack.c.l.s8.bf16 %v12785_v21  ;;  %v8475_v30 = vunpack.c.l.s8.bf16 %v12786_v22 }
 0x674   : > { %9006 = vmatprep.subr.bf16.mxu0 %v12814_v46  ;;  %9088 = vmatprep.subr.bf16.mxu1 %v12816_v55  ;;  %v12838_v46 = vcombine.high %v8453_v35, %v8455_v40  ;;  %v12840_v55 = vcombine.high %v8454_v34, %v8456_v41  ;;  %v8474_v31 = vunpack.c.h.s8.bf16 %v12785_v21  ;;  %v8476_v28 = vunpack.c.h.s8.bf16 %v12786_v22  ;;  %v12797_v22 = vld [vmem:[%s15079_s18 + $0x6d0] sm:$0xff] }
 0x677   : > { %9007 = vmatpush1.bf16.msra.mxu0 %v12813_v6  ;;  %9089 = vmatpush1.bf16.msra.mxu1 %v12815_v53  ;;  %v12837_v6 = vcombine.low %v8453_v35, %v8455_v40  ;;  %v12839_v53 = vcombine.low %v8454_v34, %v8456_v41  ;;  %v8477_v35 = vunpack.c.l.s8.bf16 %v12787_v52  ;;  %v8479_v40 = vunpack.c.l.s8.bf16 %v12788_v33 }
 0x678   : > { %9008 = vmatprep.subr.bf16.mxu0 %v12818_v36  ;;  %9090 = vmatprep.subr.bf16.mxu1 %v12820_v62  ;;  %v12842_v36 = vcombine.high %v8457_v56, %v8459_v57  ;;  %v12844_v62 = vcombine.high %v8458_v59, %v8460_v9  ;;  %v8478_v34 = vunpack.c.h.s8.bf16 %v12787_v52  ;;  %v8480_v41 = vunpack.c.h.s8.bf16 %v12788_v33  ;;  %v12799_v52 = vld [vmem:[%s15079_s18 + $0x6e0] sm:$0xff]  ;;  %v12800_v33 = vld [vmem:[%s15079_s18 + $0x6e8] sm:$0xff] }
 0x67b   : > { %9009 = vmatpush1.bf16.msra.mxu0 %v12817_v1  ;;  %9091 = vmatpush1.bf16.msra.mxu1 %v12819_v10  ;;  %v12841_v1 = vcombine.low %v8457_v56, %v8459_v57  ;;  %v12843_v10 = vcombine.low %v8458_v59, %v8460_v9  ;;  %v8481_v56 = vunpack.c.l.s8.bf16 %v12789_v50  ;;  %v8483_v57 = vunpack.c.l.s8.bf16 %v12790_v38 }
 0x67c   : > { %9010 = vmatprep.subr.bf16.mxu0 %v12822_v11  ;;  %9092 = vmatprep.subr.bf16.mxu1 %v12824_v3  ;;  %v12846_v11 = vcombine.high %v8461_v54, %v8463_v61  ;;  %v12848_v3 = vcombine.high %v8462_v44, %v8464_v49  ;;  %v8482_v59 = vunpack.c.h.s8.bf16 %v12789_v50  ;;  %v8484_v9 = vunpack.c.h.s8.bf16 %v12790_v38  ;;  %v12801_v50 = vld [vmem:[%s15079_s18 + $0x6f0] sm:$0xff]  ;;  %v12802_v38 = vld [vmem:[%s15079_s18 + $0x6f8] sm:$0xff] }
 0x67f   : > { %9011 = vmatpush1.bf16.msra.mxu0 %v12821_v43  ;;  %9093 = vmatpush1.bf16.msra.mxu1 %v12823_v12  ;;  %v12845_v43 = vcombine.low %v8461_v54, %v8463_v61  ;;  %v12847_v12 = vcombine.low %v8462_v44, %v8464_v49  ;;  %v8485_v54 = vunpack.c.l.s8.bf16 %v12791_v16  ;;  %v8487_v61 = vunpack.c.l.s8.bf16 %v12792_v60 }
 0x680   : > { %9012 = vmatprep.subr.bf16.mxu0 %v12826_v17  ;;  %9094 = vmatprep.subr.bf16.mxu1 %v12828_v20  ;;  %v12850_v17 = vcombine.high %v8465_v47, %v8467_v0  ;;  %v12852_v20 = vcombine.high %v8466_v4, %v8468_v5  ;;  %v8486_v44 = vunpack.c.h.s8.bf16 %v12791_v16  ;;  %v8488_v49 = vunpack.c.h.s8.bf16 %v12792_v60 }
 0x681   : > { %v8508_v16 = vunpack.c.h.s8.bf16 %v12802_v38 }
 0x683   : > { %9013 = vmatpush1.bf16.msra.mxu0 %v12825_v23  ;;  %9095 = vmatpush1.bf16.msra.mxu1 %v12827_v24  ;;  %v12849_v23 = vcombine.low %v8465_v47, %v8467_v0  ;;  %v12851_v24 = vcombine.low %v8466_v4, %v8468_v5  ;;  %v8489_v47 = vunpack.c.l.s8.bf16 %v12793_v63  ;;  %v8491_v0 = vunpack.c.l.s8.bf16 %v12794_v45 }
 0x684   : > { %9014 = vmatprep.subr.bf16.mxu0 %v12830_v26  ;;  %9096 = vmatprep.subr.bf16.mxu1 %v12832_v25  ;;  %v12854_v26 = vcombine.high %v8469_v58, %v8471_v13  ;;  %v12856_v25 = vcombine.high %v8470_v15, %v8472_v14  ;;  %v8490_v4 = vunpack.c.h.s8.bf16 %v12793_v63  ;;  %v8492_v5 = vunpack.c.h.s8.bf16 %v12794_v45 }
 0x686   : > { %v12876_v21 = vcombine.high %v8490_v4, %v8492_v5 }
 0x687   : > { %9015 = vmatpush1.bf16.msra.mxu0 %v12829_v37  ;;  %9097 = vmatpush1.bf16.msra.mxu1 %v12831_v39  ;;  %v12853_v37 = vcombine.low %v8469_v58, %v8471_v13  ;;  %v12855_v39 = vcombine.low %v8470_v15, %v8472_v14  ;;  %v12871_v58 = vcombine.low %v8486_v44, %v8488_v49  ;;  %v8493_v13 = vunpack.c.l.s8.bf16 %v12795_v7 }
 0x688   : > { %9016 = vmatprep.subr.bf16.mxu0 %v12834_v42  ;;  %9098 = vmatprep.subr.bf16.mxu1 %v12836_v48  ;;  %v12858_v42 = vcombine.high %v8473_v29, %v8475_v30  ;;  %v12860_v48 = vcombine.high %v8474_v31, %v8476_v28  ;;  %v8495_v15 = vunpack.c.l.s8.bf16 %v12796_v8  ;;  %v8494_v14 = vunpack.c.h.s8.bf16 %v12795_v7  ;;  %v12904_v7 = vld [vmem:[%s15079_s18 + $0x720] sm:$0xff] }
 0x68b   : > { %9017 = vmatpush1.bf16.msra.mxu0 %v12833_v19  ;;  %9099 = vmatpush1.bf16.msra.mxu1 %v12835_v51  ;;  %v12857_v19 = vcombine.low %v8473_v29, %v8475_v30  ;;  %v12859_v51 = vcombine.low %v8474_v31, %v8476_v28  ;;  %v8497_v29 = vunpack.c.l.s8.bf16 %v12797_v22  ;;  %v8498_v31 = vunpack.c.h.s8.bf16 %v12797_v22  ;;  %v12905_v22 = vld [vmem:[%s15079_s18 + $0x728] sm:$0xff] }
 0x68c   : > { %9018 = vmatprep.subr.bf16.mxu0 %v12838_v46  ;;  %9100 = vmatprep.subr.bf16.mxu1 %v12840_v55  ;;  %v12862_v46 = vcombine.high %v8477_v35, %v8479_v40  ;;  %v12864_v55 = vcombine.high %v8478_v34, %v8480_v41 }
 0x68f   : > { %9019 = vmatpush1.bf16.msra.mxu0 %v12837_v6  ;;  %9101 = vmatpush1.bf16.msra.mxu1 %v12839_v53  ;;  %v12861_v6 = vcombine.low %v8477_v35, %v8479_v40  ;;  %v12863_v53 = vcombine.low %v8478_v34, %v8480_v41  ;;  %v8501_v35 = vunpack.c.l.s8.bf16 %v12799_v52  ;;  %v8503_v40 = vunpack.c.l.s8.bf16 %v12800_v33 }
 0x690   : > { %9020 = vmatprep.subr.bf16.mxu0 %v12842_v36  ;;  %9102 = vmatprep.subr.bf16.mxu1 %v12844_v62  ;;  %v12866_v36 = vcombine.high %v8481_v56, %v8483_v57  ;;  %v12868_v62 = vcombine.high %v8482_v59, %v8484_v9  ;;  %v8502_v34 = vunpack.c.h.s8.bf16 %v12799_v52  ;;  %v8504_v41 = vunpack.c.h.s8.bf16 %v12800_v33 }
 0x693   : > { %9021 = vmatpush1.bf16.msra.mxu0 %v12841_v1  ;;  %9103 = vmatpush1.bf16.msra.mxu1 %v12843_v10  ;;  %v12865_v1 = vcombine.low %v8481_v56, %v8483_v57  ;;  %v12867_v10 = vcombine.low %v8482_v59, %v8484_v9  ;;  %v12803_v56 = vld [vmem:[%s15079_s18 + $0x700] sm:$0x55]  ;;  %v8505_v57 = vunpack.c.l.s8.bf16 %v12801_v50  ;;  %v8507_v59 = vunpack.c.l.s8.bf16 %v12802_v38 }
 0x694   : > { %9022 = vmatprep.subr.bf16.mxu0 %v12846_v11  ;;  %9104 = vmatprep.subr.bf16.mxu1 %v12848_v3  ;;  %v12870_v11 = vcombine.high %v8485_v54, %v8487_v61  ;;  %v12872_v3 = vcombine.high %v8486_v44, %v8488_v49  ;;  %v8506_v9 = vunpack.c.h.s8.bf16 %v12801_v50  ;;  %v8509_v60 = vunpack.c.l.s8.bf16 %v12803_v56  ;;  %v12901_v49 = vld [vmem:[%s15079_s18 + $0x708] sm:$0xff] }
 0x696   : > { %v12892_v44 = vcombine.high %v8506_v9, %v8508_v16  ;;  %v12891_v63 = vcombine.low %v8506_v9, %v8508_v16  ;;  %v12893_v45 = vcombine.low %v8509_v60, %v8509_v60 }
 0x697   : > { %9023 = vmatpush1.bf16.msra.mxu0 %v12845_v43  ;;  %9105 = vmatpush1.bf16.msra.mxu1 %v12847_v12  ;;  %v15928_v43 = vrot.slane %v15879_v18, %v15645_v32  ;;  %v12869_v12 = vcombine.low %v8485_v54, %v8487_v61  ;;  %v12873_v18 = vcombine.low %v8489_v47, %v8491_v0 }
 0x698   : > { %9024 = vmatprep.subr.bf16.mxu0 %v12850_v17  ;;  %9106 = vmatprep.subr.bf16.mxu1 %v12852_v20  ;;  %v8496_v17 = vunpack.c.h.s8.bf16 %v12796_v8  ;;  %v12874_v20 = vcombine.high %v8489_v47, %v8491_v0  ;;  %v12887_v54 = vcombine.low %v8502_v34, %v8504_v41  ;;  %v12890_v61 = vcombine.high %v8505_v57, %v8507_v59  ;;  %v15945_v8 = vld.sshfl [vmem:[#allocation2 + $0xf] sm:$0x13 pattern:$0x75316420] }
 0x699   : > { %v12894_v0 = vcombine.high %v8509_v60, %v8509_v60 }
 0x69b   : > { %9025 = vmatpush1.bf16.msra.mxu0 %v12849_v23  ;;  %9107 = vmatpush1.bf16.msra.mxu1 %v12851_v24  ;;  %v12798_v23 = vld [vmem:[%s15079_s18 + $0x6d8] sm:$0xff]  ;;  %v12875_v24 = vcombine.low %v8490_v4, %v8492_v5 }
 0x69c   : > { %9026 = vmatprep.subr.bf16.mxu0 %v12854_v26  ;;  %9108 = vmatprep.subr.bf16.mxu1 %v12856_v25  ;;  %v12878_v26 = vcombine.high %v8493_v13, %v8495_v15  ;;  %v12880_v25 = vcombine.high %v8494_v14, %v8496_v17  ;;  %v8499_v30 = vunpack.c.l.s8.bf16 %v12798_v23  ;;  %v8500_v28 = vunpack.c.h.s8.bf16 %v12798_v23  ;;  %v12903_v5 = vld [vmem:[%s15079_s18 + $0x718] sm:$0xff]  ;;  %v12906_v23 = vld [vmem:[%s15079_s18 + $0x730] sm:$0xff] }
 0x69f   : > { %9027 = vmatpush1.bf16.msra.mxu0 %v12853_v37  ;;  %9109 = vmatpush1.bf16.msra.mxu1 %v12855_v39  ;;  %v12877_v37 = vcombine.low %v8493_v13, %v8495_v15  ;;  %v12879_v39 = vcombine.low %v8494_v14, %v8496_v17  ;;  %v9222_v14 = vunpack.c.l.s8.bf16 %v12903_v5  ;;  %v9224_v17 = vunpack.c.l.s8.bf16 %v12904_v7 }
 0x6a0   : > { %9028 = vmatprep.subr.bf16.mxu0 %v12858_v42  ;;  %9110 = vmatprep.subr.bf16.mxu1 %v12860_v48  ;;  %v12882_v42 = vcombine.high %v8497_v29, %v8499_v30  ;;  %v12884_v48 = vcombine.high %v8498_v31, %v8500_v28 }
 0x6a1   : > { %v12952_v52 = vcombine.high %v9222_v14, %v9224_v17 }
 0x6a3   : > { %9029 = vmatpush1.bf16.msra.mxu0 %v12857_v19  ;;  %9111 = vmatpush1.bf16.msra.mxu1 %v12859_v51  ;;  %v12881_v19 = vcombine.low %v8497_v29, %v8499_v30  ;;  %v12883_v51 = vcombine.low %v8498_v31, %v8500_v28  ;;  %v9226_v29 = vunpack.c.l.s8.bf16 %v12905_v22  ;;  %v9228_v30 = vunpack.c.l.s8.bf16 %v12906_v23 }
 0x6a4   : > { %9030 = vmatprep.subr.bf16.mxu0 %v12862_v46  ;;  %9112 = vmatprep.subr.bf16.mxu1 %v12864_v55  ;;  %v12886_v46 = vcombine.high %v8501_v35, %v8503_v40  ;;  %v12888_v55 = vcombine.high %v8502_v34, %v8504_v41  ;;  %v9227_v31 = vunpack.c.h.s8.bf16 %v12905_v22  ;;  %v9229_v28 = vunpack.c.h.s8.bf16 %v12906_v23 }
 0x6a5   : > { %v12956_v34 = vcombine.high %v9226_v29, %v9228_v30 }
 0x6a6   : > { %v12958_v41 = vcombine.high %v9227_v31, %v9229_v28 }
 0x6a7   : > { %9031 = vmatpush1.bf16.msra.mxu0 %v12861_v6  ;;  %9113 = vmatpush1.bf16.msra.mxu1 %v12863_v53  ;;  %v8510_v6 = vunpack.c.h.s8.bf16 %v12803_v56  ;;  %v12885_v53 = vcombine.low %v8501_v35, %v8503_v40 }
 0x6a8   : > { %9032 = vmatprep.subr.bf16.mxu0 %v12866_v36  ;;  %9114 = vmatprep.subr.bf16.mxu1 %v12868_v62  ;;  %v12902_v36 = vld [vmem:[%s15079_s18 + $0x710] sm:$0xff]  ;;  %v12889_v62 = vcombine.low %v8505_v57, %v8507_v59 }
 0x6a9   : > { %v9221_v47 = vunpack.c.h.s8.bf16 %v12902_v36  ;;  %v12896_v4 = vcombine.high %v8510_v6, %v8510_v6 }
 0x6ab   : > { %9033 = vmatpush1.bf16.msra.mxu0 %v12865_v1  ;;  %9115 = vmatpush1.bf16.msra.mxu1 %v12867_v10  ;;  %v12895_v1 = vcombine.low %v8510_v6, %v8510_v6  ;;  %v9218_v10 = vunpack.c.l.s8.bf16 %v12901_v49  ;;  %v12911_v6 = vld [vmem:[%s15079_s18 + $0x758] sm:$0xff] }
 0x6ac   : > { %9043 = vmatprep.subr.bf16.mxu0 %v12870_v11  ;;  %9125 = vmatprep.subr.bf16.mxu1 %v12872_v3  ;;  %v9220_v11 = vunpack.c.l.s8.bf16 %v12902_v36  ;;  %v9219_v3 = vunpack.c.h.s8.bf16 %v12901_v49  ;;  %v9238_v36 = vunpack.c.l.s8.bf16 %v12911_v6 }
 0x6ae   : > { %9035 = vmatmul.mubr.bf16.vlgmr.msra.gmra.mrb[0].mxu0 %v15928_v43  ;;  %9117 = vmatmul.mubr.bf16.vlgmr.msra.gmra.mrb[0].mxu1 %v15928_v43  ;;  %v12948_v13 = vcombine.high %v9218_v10, %v9220_v11  ;;  %v12950_v15 = vcombine.high %v9219_v3, %v9221_v47 }
 0x6af   : > { %9044 = vmatpush1.bf16.msra.mxu0 %v12869_v12  ;;  %9126 = vmatpush1.bf16.msra.mxu1 %v12871_v58  ;;  %v8991_v12 = vsel %vm5947_vm13, %v12893_v45, 0  ;;  %v8997_v58 = vsel %vm5947_vm13, %v12895_v1, 0  ;;  %v12913_v1 = vld [vmem:[%s15079_s18 + $0x768] sm:$0xff] }
 0x6b0   : > { %9045 = vmatprep.subr.bf16.mxu0 %v12874_v20  ;;  %9127 = vmatprep.subr.bf16.mxu1 %v12876_v21  ;;  %v9223_v20 = vunpack.c.h.s8.bf16 %v12903_v5  ;;  %v9225_v21 = vunpack.c.h.s8.bf16 %v12904_v7 }
 0x6b1   : > { %9075 = vmatprep.mubr.bf16.mxu0 %v14229_v2  ;;  %9157 = vmatprep.mubr.bf16.mxu1 %v14229_v2 }
 0x6b2   : > { %v12954_v33 = vcombine.high %v9223_v20, %v9225_v21  ;;  %v12953_v40 = vcombine.low %v9223_v20, %v9225_v21 }
 0x6b3   : > { %9046 = vmatpush1.bf16.msra.mxu0 %v12873_v18  ;;  %9128 = vmatpush1.bf16.msra.mxu1 %v12875_v24  ;;  %v9316_v18 = vcombine.high %v15945_v8, %v15945_v8  ;;  %v8534_v24 = vcombine.high %v15928_v43, %v15928_v43  ;;  %v12951_v43 = vcombine.low %v9222_v14, %v9224_v17 }
 0x6b4   : > { %9047 = vmatprep.subr.bf16.mxu0 %v12878_v26  ;;  %9129 = vmatprep.subr.bf16.mxu1 %v12880_v25  ;;  %v12947_v26 = vcombine.low %v9218_v10, %v9220_v11  ;;  %v12949_v25 = vcombine.low %v9219_v3, %v9221_v47  ;;  %v12914_v10 = vld [vmem:[%s15079_s18 + $0x770] sm:$0xff]  ;;  %v9242_v47 = vunpack.c.l.s8.bf16 %v12913_v1 }
 0x6b5   : > { %v9330_v35 = vrot.slane %v9316_v18, %v15645_v32  ;;  %v9245_v5 = vunpack.c.h.s8.bf16 %v12914_v10 }
 0x6b7   : > { %9048 = vmatpush1.bf16.msra.mxu0 %v12877_v37  ;;  %9130 = vmatpush1.bf16.msra.mxu1 %v12879_v39  ;;  %v12907_v37 = vld [vmem:[%s15079_s18 + $0x738] sm:$0xff]  ;;  %v12908_v39 = vld [vmem:[%s15079_s18 + $0x740] sm:$0xff] }
 0x6b8   : > { %9049 = vmatprep.subr.bf16.mxu0 %v12882_v42  ;;  %9131 = vmatprep.subr.bf16.mxu1 %v12884_v48  ;;  %v9230_v42 = vunpack.c.l.s8.bf16 %v12907_v37  ;;  %v9232_v48 = vunpack.c.l.s8.bf16 %v12908_v39  ;;  %v9231_v50 = vunpack.c.h.s8.bf16 %v12907_v37  ;;  %v9233_v38 = vunpack.c.h.s8.bf16 %v12908_v39  ;;  %v12919_v39 = vld [vmem:[%s15079_s18 + $0x798] sm:$0xff] }
 0x6ba   : > { %v12960_v16 = vcombine.high %v9230_v42, %v9232_v48  ;;  %v12962_v60 = vcombine.high %v9231_v50, %v9233_v38 }
 0x6bb   : > { %9050 = vmatpush1.bf16.msra.mxu0 %v12881_v19  ;;  %9132 = vmatpush1.bf16.msra.mxu1 %v12883_v51  ;;  %v12909_v19 = vld [vmem:[%s15079_s18 + $0x748] sm:$0xff]  ;;  %v12910_v51 = vld [vmem:[%s15079_s18 + $0x750] sm:$0xff] }
 0x6bc   : > { %9051 = vmatprep.subr.bf16.mxu0 %v12886_v46  ;;  %9133 = vmatprep.subr.bf16.mxu1 %v12888_v55  ;;  %v12955_v46 = vcombine.low %v9226_v29, %v9228_v30  ;;  %v12957_v55 = vcombine.low %v9227_v31, %v9229_v28  ;;  %v9234_v56 = vunpack.c.l.s8.bf16 %v12909_v19  ;;  %v9236_v57 = vunpack.c.l.s8.bf16 %v12910_v51 }
 0x6bd   : > { %v9235_v59 = vunpack.c.h.s8.bf16 %v12909_v19  ;;  %v9237_v9 = vunpack.c.h.s8.bf16 %v12910_v51  ;;  %v12921_v19 = vld [vmem:[%s15079_s18 + $0x7a8] sm:$0xff]  ;;  %v12922_v51 = vld [vmem:[%s15079_s18 + $0x7b0] sm:$0xff] }
 0x6be   : > { %v12963_v11 = vcombine.low %v9234_v56, %v9236_v57 }
 0x6bf   : > { %9052 = vmatpush1.bf16.msra.mxu0 %v12885_v53  ;;  %9134 = vmatpush1.bf16.msra.mxu1 %v12887_v54  ;;  %v12912_v53 = vld [vmem:[%s15079_s18 + $0x760] sm:$0xff]  ;;  %v12959_v54 = vcombine.low %v9230_v42, %v9232_v48  ;;  %v12966_v49 = vcombine.high %v9235_v59, %v9237_v9  ;;  %v12965_v3 = vcombine.low %v9235_v59, %v9237_v9  ;;  %v9254_v42 = vunpack.c.l.s8.bf16 %v12919_v39 }
 0x6c0   : > { %9053 = vmatprep.subr.bf16.mxu0 %v12890_v61  ;;  %9135 = vmatprep.subr.bf16.mxu1 %v12892_v44  ;;  %v12961_v61 = vcombine.low %v9231_v50, %v9233_v38  ;;  %v12964_v44 = vcombine.high %v9234_v56, %v9236_v57  ;;  %v9241_v45 = vunpack.c.h.s8.bf16 %v12912_v53  ;;  %v9255_v50 = vunpack.c.h.s8.bf16 %v12919_v39  ;;  %v12931_v39 = vld [vmem:[%s15079_s18 + $0x7f8] sm:$0xff] }
 0x6c1   : > { %v9258_v56 = vunpack.c.l.s8.bf16 %v12921_v19  ;;  %v9260_v57 = vunpack.c.l.s8.bf16 %v12922_v51  ;;  %v9259_v59 = vunpack.c.h.s8.bf16 %v12921_v19  ;;  %v9261_v9 = vunpack.c.h.s8.bf16 %v12922_v51  ;;  %v12933_v19 = vld [vmem:[%s15079_s18 + $0x808] sm:$0xff]  ;;  %v12934_v51 = vld [vmem:[%s15079_s18 + $0x810] sm:$0xff] }
 0x6c3   : > { %9054 = vmatpush1.bf16.msra.mxu0 %v12889_v62  ;;  %9136 = vmatpush1.bf16.msra.mxu1 %v12891_v63  ;;  %v9240_v62 = vunpack.c.l.s8.bf16 %v12912_v53  ;;  %v9239_v63 = vunpack.c.h.s8.bf16 %v12911_v6  ;;  %v12923_v6 = vld [vmem:[%s15079_s18 + $0x7b8] sm:$0xff]  ;;  %v12924_v53 = vld [vmem:[%s15079_s18 + $0x7c0] sm:$0xff] }
 0x6c4   : > { %12897 = vmatprep.subr.msk.bf16.mxu0 %vm5947_vm13, %v12894_v0  ;;  %12899 = vmatprep.subr.msk.bf16.mxu1 %vm5947_vm13, %v12896_v4  ;;  %v9244_v0 = vunpack.c.l.s8.bf16 %v12914_v10  ;;  %v9243_v4 = vunpack.c.h.s8.bf16 %v12913_v1  ;;  %v12925_v1 = vld [vmem:[%s15079_s18 + $0x7c8] sm:$0xff]  ;;  %v12926_v10 = vld [vmem:[%s15079_s18 + $0x7d0] sm:$0xff] }
 0x6c5   : > { %v12968_v7 = vcombine.high %v9238_v36, %v9240_v62  ;;  %v12969_v14 = vcombine.low %v9239_v63, %v9241_v45 }
 0x6c6   : > { %v12972_v17 = vcombine.high %v9242_v47, %v9244_v0  ;;  %v12974_v20 = vcombine.high %v9243_v4, %v9245_v5  ;;  %v12973_v29 = vcombine.low %v9243_v4, %v9245_v5  ;;  %v9267_v4 = vunpack.c.h.s8.bf16 %v12925_v1 }
 0x6c7   : > { %9056 = vmatpush1.bf16.msra.mxu0 %v8991_v12  ;;  %9138 = vmatpush1.bf16.msra.mxu1 %v8997_v58  ;;  %v12970_v12 = vcombine.high %v9239_v63, %v9241_v45  ;;  %v12915_v58 = vld [vmem:[%s15079_s18 + $0x778] sm:$0xff]  ;;  %v9263_v63 = vunpack.c.h.s8.bf16 %v12923_v6  ;;  %v9265_v45 = vunpack.c.h.s8.bf16 %v12924_v53  ;;  %v9269_v5 = vunpack.c.h.s8.bf16 %v12926_v10 }
 0x6c8   : > { %9799 = vmatprep.subr.bf16.mxu0 %v12948_v13  ;;  %9881 = vmatprep.subr.bf16.mxu1 %v12950_v15  ;;  %v12916_v13 = vld [vmem:[%s15079_s18 + $0x780] sm:$0xff]  ;;  %v12967_v15 = vcombine.low %v9238_v36, %v9240_v62  ;;  %v9246_v21 = vunpack.c.l.s8.bf16 %v12915_v58  ;;  %v9247_v23 = vunpack.c.h.s8.bf16 %v12915_v58  ;;  %v9262_v36 = vunpack.c.l.s8.bf16 %v12923_v6  ;;  %v12927_v58 = vld [vmem:[%s15079_s18 + $0x7d8] sm:$0xff] }
 0x6c9   : > { %v9248_v22 = vunpack.c.l.s8.bf16 %v12916_v13  ;;  %v9249_v18 = vunpack.c.h.s8.bf16 %v12916_v13  ;;  %v9264_v62 = vunpack.c.l.s8.bf16 %v12924_v53  ;;  %v12928_v13 = vld [vmem:[%s15079_s18 + $0x7e0] sm:$0xff]  ;;  %v12935_v6 = vld [vmem:[%s15079_s18 + $0x818] sm:$0xff] }
 0x6ca   : > { %12898 = vmatmul.mubr.msk.bf16.vlgmr.msra.gmra.mrb[0].mxu0 %vm5943_vm14, %v8534_v24  ;;  %12900 = vmatmul.mubr.msk.bf16.vlgmr.msra.gmra.mrb[0].mxu1 %vm5943_vm14, %v8534_v24  ;;  %v12917_v24 = vld [vmem:[%s15079_s18 + $0x788] sm:$0xff]  ;;  %v12936_v53 = vld [vmem:[%s15079_s18 + $0x820] sm:$0xff] }
 0x6cb   : > { %9800 = vmatpush1.bf16.msra.mxu0 %v12947_v26  ;;  %9882 = vmatpush1.bf16.msra.mxu1 %v12949_v25  ;;  %v12918_v26 = vld [vmem:[%s15079_s18 + $0x790] sm:$0xff]  ;;  %v12971_v25 = vcombine.low %v9242_v47, %v9244_v0  ;;  %v9250_v30 = vunpack.c.l.s8.bf16 %v12917_v24  ;;  %v9251_v28 = vunpack.c.h.s8.bf16 %v12917_v24  ;;  %v12978_v37 = vcombine.high %v9247_v23, %v9249_v18  ;;  %v12929_v24 = vld [vmem:[%s15079_s18 + $0x7e8] sm:$0xff] }
 0x6cc   : > { %9801 = vmatprep.subr.bf16.mxu0 %v12952_v52  ;;  %9883 = vmatprep.subr.bf16.mxu1 %v12954_v33  ;;  %v9252_v31 = vunpack.c.l.s8.bf16 %v12918_v26  ;;  %v9253_v52 = vunpack.c.h.s8.bf16 %v12918_v26  ;;  %v12976_v33 = vcombine.high %v9246_v21, %v9248_v22  ;;  %v9266_v47 = vunpack.c.l.s8.bf16 %v12925_v1  ;;  %v12930_v26 = vld [vmem:[%s15079_s18 + $0x7f0] sm:$0xff]  ;;  %v12937_v1 = vld [vmem:[%s15079_s18 + $0x828] sm:$0xff] }
 0x6cd   : > { %9831 = vmatprep.mubr.bf16.mxu0 %v9330_v35  ;;  %9913 = vmatprep.mubr.bf16.mxu1 %v9330_v35  ;;  %v12920_v35 = vld [vmem:[%s15079_s18 + $0x7a0] sm:$0xff]  ;;  %v9268_v0 = vunpack.c.l.s8.bf16 %v12926_v10  ;;  %v12938_v10 = vld [vmem:[%s15079_s18 + $0x830] sm:$0xff] }
 0x6ce   : > { %v9256_v48 = vunpack.c.l.s8.bf16 %v12920_v35  ;;  %v9257_v38 = vunpack.c.h.s8.bf16 %v12920_v35  ;;  %v12932_v35 = vld [vmem:[%s15079_s18 + $0x800] sm:$0xff] }
 0x6cf   : > { %9802 = vmatpush1.bf16.msra.mxu0 %v12951_v43  ;;  %9884 = vmatpush1.bf16.msra.mxu1 %v12953_v40  ;;  %v12975_v43 = vcombine.low %v9246_v21, %v9248_v22  ;;  %v12977_v40 = vcombine.low %v9247_v23, %v9249_v18  ;;  %v9270_v21 = vunpack.c.l.s8.bf16 %v12927_v58  ;;  %v9272_v22 = vunpack.c.l.s8.bf16 %v12928_v13 }
 0x6d0   : > { %9803 = vmatprep.subr.bf16.mxu0 %v12956_v34  ;;  %9885 = vmatprep.subr.bf16.mxu1 %v12958_v41  ;;  %v12980_v34 = vcombine.high %v9250_v30, %v9252_v31  ;;  %v12982_v41 = vcombine.high %v9251_v28, %v9253_v52  ;;  %v9271_v23 = vunpack.c.h.s8.bf16 %v12927_v58  ;;  %v9273_v18 = vunpack.c.h.s8.bf16 %v12928_v13  ;;  %v12939_v13 = vld [vmem:[%s15079_s18 + $0x838] sm:$0xff] }
 0x6d3   : > { %9804 = vmatpush1.bf16.msra.mxu0 %v12955_v46  ;;  %9886 = vmatpush1.bf16.msra.mxu1 %v12957_v55  ;;  %v12979_v46 = vcombine.low %v9250_v30, %v9252_v31  ;;  %v12981_v55 = vcombine.low %v9251_v28, %v9253_v52  ;;  %v9274_v30 = vunpack.c.l.s8.bf16 %v12929_v24  ;;  %v9276_v31 = vunpack.c.l.s8.bf16 %v12930_v26 }
 0x6d4   : > { %9805 = vmatprep.subr.bf16.mxu0 %v12960_v16  ;;  %9887 = vmatprep.subr.bf16.mxu1 %v12962_v60  ;;  %v12984_v16 = vcombine.high %v9254_v42, %v9256_v48  ;;  %v12986_v60 = vcombine.high %v9255_v50, %v9257_v38  ;;  %v9275_v28 = vunpack.c.h.s8.bf16 %v12929_v24  ;;  %v9277_v52 = vunpack.c.h.s8.bf16 %v12930_v26  ;;  %v12941_v24 = vld [vmem:[%s15079_s18 + $0x848] sm:$0xff]  ;;  %v12942_v26 = vld [vmem:[%s15079_s18 + $0x850] sm:$0xff] }
 0x6d7   : > { %9806 = vmatpush1.bf16.msra.mxu0 %v12959_v54  ;;  %9888 = vmatpush1.bf16.msra.mxu1 %v12961_v61  ;;  %v12983_v54 = vcombine.low %v9254_v42, %v9256_v48  ;;  %v12985_v61 = vcombine.low %v9255_v50, %v9257_v38  ;;  %v9278_v42 = vunpack.c.l.s8.bf16 %v12931_v39  ;;  %v9280_v48 = vunpack.c.l.s8.bf16 %v12932_v35 }
 0x6d8   : > { %9807 = vmatprep.subr.bf16.mxu0 %v12964_v44  ;;  %9889 = vmatprep.subr.bf16.mxu1 %v12966_v49  ;;  %v12988_v44 = vcombine.high %v9258_v56, %v9260_v57  ;;  %v12990_v49 = vcombine.high %v9259_v59, %v9261_v9  ;;  %v9279_v50 = vunpack.c.h.s8.bf16 %v12931_v39  ;;  %v9281_v38 = vunpack.c.h.s8.bf16 %v12932_v35  ;;  %v12943_v39 = vld [vmem:[%s15079_s18 + $0x858] sm:$0xff]  ;;  %v12944_v35 = vld [vmem:[%s15079_s18 + $0x860] sm:$0xff] }
 0x6db   : > { %9808 = vmatpush1.bf16.msra.mxu0 %v12963_v11  ;;  %9890 = vmatpush1.bf16.msra.mxu1 %v12965_v3  ;;  %v12987_v11 = vcombine.low %v9258_v56, %v9260_v57  ;;  %v12989_v3 = vcombine.low %v9259_v59, %v9261_v9  ;;  %v9282_v56 = vunpack.c.l.s8.bf16 %v12933_v19  ;;  %v9284_v57 = vunpack.c.l.s8.bf16 %v12934_v51 }
 0x6dc   : > { %9809 = vmatprep.subr.bf16.mxu0 %v12968_v7  ;;  %9891 = vmatprep.subr.bf16.mxu1 %v12970_v12  ;;  %v12992_v7 = vcombine.high %v9262_v36, %v9264_v62  ;;  %v12994_v12 = vcombine.high %v9263_v63, %v9265_v45  ;;  %v9283_v59 = vunpack.c.h.s8.bf16 %v12933_v19  ;;  %v9285_v9 = vunpack.c.h.s8.bf16 %v12934_v51 }
 0x6dd   : > { %v9305_v19 = vunpack.c.h.s8.bf16 %v12944_v35 }
 0x6df   : > { %9810 = vmatpush1.bf16.msra.mxu0 %v12967_v15  ;;  %9892 = vmatpush1.bf16.msra.mxu1 %v12969_v14  ;;  %v12991_v15 = vcombine.low %v9262_v36, %v9264_v62  ;;  %v12993_v14 = vcombine.low %v9263_v63, %v9265_v45  ;;  %v9286_v36 = vunpack.c.l.s8.bf16 %v12935_v6  ;;  %v9288_v62 = vunpack.c.l.s8.bf16 %v12936_v53 }
 0x6e0   : > { %9811 = vmatprep.subr.bf16.mxu0 %v12972_v17  ;;  %9893 = vmatprep.subr.bf16.mxu1 %v12974_v20  ;;  %v12996_v17 = vcombine.high %v9266_v47, %v9268_v0  ;;  %v12998_v20 = vcombine.high %v9267_v4, %v9269_v5  ;;  %v9287_v63 = vunpack.c.h.s8.bf16 %v12935_v6  ;;  %v9289_v45 = vunpack.c.h.s8.bf16 %v12936_v53 }
 0x6e2   : > { %v13018_v58 = vcombine.high %v9287_v63, %v9289_v45 }
 0x6e3   : > { %9812 = vmatpush1.bf16.msra.mxu0 %v12971_v25  ;;  %9894 = vmatpush1.bf16.msra.mxu1 %v12973_v29  ;;  %v12995_v25 = vcombine.low %v9266_v47, %v9268_v0  ;;  %v12997_v29 = vcombine.low %v9267_v4, %v9269_v5  ;;  %v13013_v47 = vcombine.low %v9283_v59, %v9285_v9  ;;  %v9290_v0 = vunpack.c.l.s8.bf16 %v12937_v1 }
 0x6e4   : > { %9813 = vmatprep.subr.bf16.mxu0 %v12976_v33  ;;  %9895 = vmatprep.subr.bf16.mxu1 %v12978_v37  ;;  %v13000_v33 = vcombine.high %v9270_v21, %v9272_v22  ;;  %v13002_v37 = vcombine.high %v9271_v23, %v9273_v18  ;;  %v9292_v4 = vunpack.c.l.s8.bf16 %v12938_v10  ;;  %v9291_v5 = vunpack.c.h.s8.bf16 %v12937_v1  ;;  %v13046_v1 = vld [vmem:[%s15079_s18 + $0x888] sm:$0xff] }
 0x6e7   : > { %9814 = vmatpush1.bf16.msra.mxu0 %v12975_v43  ;;  %9896 = vmatpush1.bf16.msra.mxu1 %v12977_v40  ;;  %v12999_v43 = vcombine.low %v9270_v21, %v9272_v22  ;;  %v13001_v40 = vcombine.low %v9271_v23, %v9273_v18  ;;  %v9294_v21 = vunpack.c.l.s8.bf16 %v12939_v13  ;;  %v9295_v23 = vunpack.c.h.s8.bf16 %v12939_v13  ;;  %v13047_v13 = vld [vmem:[%s15079_s18 + $0x890] sm:$0xff] }
 0x6e8   : > { %9815 = vmatprep.subr.bf16.mxu0 %v12980_v34  ;;  %9897 = vmatprep.subr.bf16.mxu1 %v12982_v41  ;;  %v13004_v34 = vcombine.high %v9274_v30, %v9276_v31  ;;  %v13006_v41 = vcombine.high %v9275_v28, %v9277_v52 }
 0x6eb   : > { %9816 = vmatpush1.bf16.msra.mxu0 %v12979_v46  ;;  %9898 = vmatpush1.bf16.msra.mxu1 %v12981_v55  ;;  %v13003_v46 = vcombine.low %v9274_v30, %v9276_v31  ;;  %v13005_v55 = vcombine.low %v9275_v28, %v9277_v52  ;;  %v9298_v30 = vunpack.c.l.s8.bf16 %v12941_v24  ;;  %v9300_v31 = vunpack.c.l.s8.bf16 %v12942_v26 }
 0x6ec   : > { %9817 = vmatprep.subr.bf16.mxu0 %v12984_v16  ;;  %9899 = vmatprep.subr.bf16.mxu1 %v12986_v60  ;;  %v13008_v16 = vcombine.high %v9278_v42, %v9280_v48  ;;  %v13010_v60 = vcombine.high %v9279_v50, %v9281_v38  ;;  %v9299_v28 = vunpack.c.h.s8.bf16 %v12941_v24  ;;  %v9301_v52 = vunpack.c.h.s8.bf16 %v12942_v26 }
 0x6ef   : > { %9818 = vmatpush1.bf16.msra.mxu0 %v12983_v54  ;;  %9900 = vmatpush1.bf16.msra.mxu1 %v12985_v61  ;;  %v13007_v54 = vcombine.low %v9278_v42, %v9280_v48  ;;  %v13009_v61 = vcombine.low %v9279_v50, %v9281_v38  ;;  %v12945_v42 = vld [vmem:[%s15079_s18 + $0x868] sm:$0x55]  ;;  %v9302_v48 = vunpack.c.l.s8.bf16 %v12943_v39  ;;  %v9304_v50 = vunpack.c.l.s8.bf16 %v12944_v35 }
 0x6f0   : > { %9819 = vmatprep.subr.bf16.mxu0 %v12988_v44  ;;  %9901 = vmatprep.subr.bf16.mxu1 %v12990_v49  ;;  %v13012_v44 = vcombine.high %v9282_v56, %v9284_v57  ;;  %v13014_v49 = vcombine.high %v9283_v59, %v9285_v9  ;;  %v9303_v38 = vunpack.c.h.s8.bf16 %v12943_v39  ;;  %v9306_v51 = vunpack.c.l.s8.bf16 %v12945_v42  ;;  %v13043_v9 = vld [vmem:[%s15079_s18 + $0x870] sm:$0xff] }
 0x6f2   : > { %v13034_v59 = vcombine.high %v9303_v38, %v9305_v19  ;;  %v13033_v6 = vcombine.low %v9303_v38, %v9305_v19  ;;  %v13035_v53 = vcombine.low %v9306_v51, %v9306_v51 }
 0x6f3   : > { %9820 = vmatpush1.bf16.msra.mxu0 %v12987_v11  ;;  %9902 = vmatpush1.bf16.msra.mxu1 %v12989_v3  ;;  %v15994_v11 = vrot.slane %v15945_v8, %v15645_v32  ;;  %v13011_v3 = vcombine.low %v9282_v56, %v9284_v57  ;;  %v13015_v8 = vcombine.low %v9286_v36, %v9288_v62 }
 0x6f4   : > { %9821 = vmatprep.subr.bf16.mxu0 %v12992_v7  ;;  %9903 = vmatprep.subr.bf16.mxu1 %v12994_v12  ;;  %v9293_v7 = vunpack.c.h.s8.bf16 %v12938_v10  ;;  %v13016_v12 = vcombine.high %v9286_v36, %v9288_v62  ;;  %v13029_v56 = vcombine.low %v9299_v28, %v9301_v52  ;;  %v13032_v57 = vcombine.high %v9302_v48, %v9304_v50  ;;  %v16011_v10 = vld.sshfl [vmem:[#allocation2 + $0x12] sm:$0x13 pattern:$0x75316420] }
 0x6f5   : > { %v13036_v62 = vcombine.high %v9306_v51, %v9306_v51 }
 0x6f7   : > { %9822 = vmatpush1.bf16.msra.mxu0 %v12991_v15  ;;  %9904 = vmatpush1.bf16.msra.mxu1 %v12993_v14  ;;  %v12940_v15 = vld [vmem:[%s15079_s18 + $0x840] sm:$0xff]  ;;  %v13017_v14 = vcombine.low %v9287_v63, %v9289_v45 }
 0x6f8   : > { %9823 = vmatprep.subr.bf16.mxu0 %v12996_v17  ;;  %9905 = vmatprep.subr.bf16.mxu1 %v12998_v20  ;;  %v13020_v17 = vcombine.high %v9290_v0, %v9292_v4  ;;  %v13022_v20 = vcombine.high %v9291_v5, %v9293_v7  ;;  %v9296_v22 = vunpack.c.l.s8.bf16 %v12940_v15  ;;  %v9297_v18 = vunpack.c.h.s8.bf16 %v12940_v15  ;;  %v13045_v45 = vld [vmem:[%s15079_s18 + $0x880] sm:$0xff]  ;;  %v13048_v15 = vld [vmem:[%s15079_s18 + $0x898] sm:$0xff] }
 0x6fb   : > { %9824 = vmatpush1.bf16.msra.mxu0 %v12995_v25  ;;  %9906 = vmatpush1.bf16.msra.mxu1 %v12997_v29  ;;  %v13019_v25 = vcombine.low %v9290_v0, %v9292_v4  ;;  %v13021_v29 = vcombine.low %v9291_v5, %v9293_v7  ;;  %v10019_v5 = vunpack.c.l.s8.bf16 %v13045_v45  ;;  %v10021_v7 = vunpack.c.l.s8.bf16 %v13046_v1 }
 0x6fc   : > { %9825 = vmatprep.subr.bf16.mxu0 %v13000_v33  ;;  %9907 = vmatprep.subr.bf16.mxu1 %v13002_v37  ;;  %v13024_v33 = vcombine.high %v9294_v21, %v9296_v22  ;;  %v13026_v37 = vcombine.high %v9295_v23, %v9297_v18 }
 0x6fd   : > { %v13094_v24 = vcombine.high %v10019_v5, %v10021_v7 }
 0x6ff   : > { %9826 = vmatpush1.bf16.msra.mxu0 %v12999_v43  ;;  %9908 = vmatpush1.bf16.msra.mxu1 %v13001_v40  ;;  %v13023_v43 = vcombine.low %v9294_v21, %v9296_v22  ;;  %v13025_v40 = vcombine.low %v9295_v23, %v9297_v18  ;;  %v10023_v21 = vunpack.c.l.s8.bf16 %v13047_v13  ;;  %v10025_v22 = vunpack.c.l.s8.bf16 %v13048_v15 }
 0x700   : > { %9827 = vmatprep.subr.bf16.mxu0 %v13004_v34  ;;  %9909 = vmatprep.subr.bf16.mxu1 %v13006_v41  ;;  %v13028_v34 = vcombine.high %v9298_v30, %v9300_v31  ;;  %v13030_v41 = vcombine.high %v9299_v28, %v9301_v52  ;;  %v10024_v23 = vunpack.c.h.s8.bf16 %v13047_v13  ;;  %v10026_v18 = vunpack.c.h.s8.bf16 %v13048_v15 }
 0x701   : > { %v13098_v28 = vcombine.high %v10023_v21, %v10025_v22 }
 0x702   : > { %v13100_v52 = vcombine.high %v10024_v23, %v10026_v18 }
 0x703   : > { %9828 = vmatpush1.bf16.msra.mxu0 %v13003_v46  ;;  %9910 = vmatpush1.bf16.msra.mxu1 %v13005_v55  ;;  %v9307_v46 = vunpack.c.h.s8.bf16 %v12945_v42  ;;  %v13027_v55 = vcombine.low %v9298_v30, %v9300_v31 }
 0x704   : > { %9829 = vmatprep.subr.bf16.mxu0 %v13008_v16  ;;  %9911 = vmatprep.subr.bf16.mxu1 %v13010_v60  ;;  %v13044_v16 = vld [vmem:[%s15079_s18 + $0x878] sm:$0xff]  ;;  %v13031_v60 = vcombine.low %v9302_v48, %v9304_v50 }
 0x705   : > { %v10018_v36 = vunpack.c.h.s8.bf16 %v13044_v16  ;;  %v13038_v63 = vcombine.high %v9307_v46, %v9307_v46 }
 0x707   : > { %9830 = vmatpush1.bf16.msra.mxu0 %v13007_v54  ;;  %9912 = vmatpush1.bf16.msra.mxu1 %v13009_v61  ;;  %v13037_v54 = vcombine.low %v9307_v46, %v9307_v46  ;;  %v10015_v61 = vunpack.c.l.s8.bf16 %v13043_v9  ;;  %v13053_v46 = vld [vmem:[%s15079_s18 + $0x8c0] sm:$0xff] }
 0x708   : > { %9840 = vmatprep.subr.bf16.mxu0 %v13012_v44  ;;  %9922 = vmatprep.subr.bf16.mxu1 %v13014_v49  ;;  %v10017_v44 = vunpack.c.l.s8.bf16 %v13044_v16  ;;  %v10016_v49 = vunpack.c.h.s8.bf16 %v13043_v9  ;;  %v10035_v16 = vunpack.c.l.s8.bf16 %v13053_v46 }
 0x70a   : > { %9832 = vmatmul.mubr.bf16.vlgmr.msra.gmra.mrb[0].mxu0 %v15994_v11  ;;  %9914 = vmatmul.mubr.bf16.vlgmr.msra.gmra.mrb[0].mxu1 %v15994_v11  ;;  %v13090_v0 = vcombine.high %v10015_v61, %v10017_v44  ;;  %v13092_v4 = vcombine.high %v10016_v49, %v10018_v36 }
 0x70b   : > { %9841 = vmatpush1.bf16.msra.mxu0 %v13011_v3  ;;  %9923 = vmatpush1.bf16.msra.mxu1 %v13013_v47  ;;  %v9788_v3 = vsel %vm5947_vm13, %v13035_v53, 0  ;;  %v9794_v47 = vsel %vm5947_vm13, %v13037_v54, 0  ;;  %v13055_v54 = vld [vmem:[%s15079_s18 + $0x8d0] sm:$0xff] }
 0x70c   : > { %9842 = vmatprep.subr.bf16.mxu0 %v13016_v12  ;;  %9924 = vmatprep.subr.bf16.mxu1 %v13018_v58  ;;  %v10020_v12 = vunpack.c.h.s8.bf16 %v13045_v45  ;;  %v10022_v58 = vunpack.c.h.s8.bf16 %v13046_v1 }
 0x70d   : > { %9872 = vmatprep.mubr.bf16.mxu0 %v14229_v2  ;;  %9954 = vmatprep.mubr.bf16.mxu1 %v14229_v2 }
 0x70e   : > { %v13096_v26 = vcombine.high %v10020_v12, %v10022_v58  ;;  %v13095_v31 = vcombine.low %v10020_v12, %v10022_v58 }
 0x70f   : > { %9843 = vmatpush1.bf16.msra.mxu0 %v13015_v8  ;;  %9925 = vmatpush1.bf16.msra.mxu1 %v13017_v14  ;;  %v10113_v8 = vcombine.high %v16011_v10, %v16011_v10  ;;  %v9331_v14 = vcombine.high %v15994_v11, %v15994_v11  ;;  %v13093_v11 = vcombine.low %v10019_v5, %v10021_v7 }
 0x710   : > { %9844 = vmatprep.subr.bf16.mxu0 %v13020_v17  ;;  %9926 = vmatprep.subr.bf16.mxu1 %v13022_v20  ;;  %v13089_v17 = vcombine.low %v10015_v61, %v10017_v44  ;;  %v13091_v20 = vcombine.low %v10016_v49, %v10018_v36  ;;  %v13056_v61 = vld [vmem:[%s15079_s18 + $0x8d8] sm:$0xff]  ;;  %v10039_v36 = vunpack.c.l.s8.bf16 %v13055_v54 }
 0x711   : > { %v10127_v30 = vrot.slane %v10113_v8, %v15645_v32  ;;  %v10042_v45 = vunpack.c.h.s8.bf16 %v13056_v61 }
 0x713   : > { %9845 = vmatpush1.bf16.msra.mxu0 %v13019_v25  ;;  %9927 = vmatpush1.bf16.msra.mxu1 %v13021_v29  ;;  %v13049_v25 = vld [vmem:[%s15079_s18 + $0x8a0] sm:$0xff]  ;;  %v13050_v29 = vld [vmem:[%s15079_s18 + $0x8a8] sm:$0xff] }
 0x714   : > { %9846 = vmatprep.subr.bf16.mxu0 %v13024_v33  ;;  %9928 = vmatprep.subr.bf16.mxu1 %v13026_v37  ;;  %v10027_v33 = vunpack.c.l.s8.bf16 %v13049_v25  ;;  %v10029_v37 = vunpack.c.l.s8.bf16 %v13050_v29  ;;  %v10028_v39 = vunpack.c.h.s8.bf16 %v13049_v25  ;;  %v10030_v35 = vunpack.c.h.s8.bf16 %v13050_v29  ;;  %v13061_v29 = vld [vmem:[%s15079_s18 + $0x900] sm:$0xff] }
 0x716   : > { %v13102_v19 = vcombine.high %v10027_v33, %v10029_v37  ;;  %v13104_v51 = vcombine.high %v10028_v39, %v10030_v35 }
 0x717   : > { %9847 = vmatpush1.bf16.msra.mxu0 %v13023_v43  ;;  %9929 = vmatpush1.bf16.msra.mxu1 %v13025_v40  ;;  %v13051_v43 = vld [vmem:[%s15079_s18 + $0x8b0] sm:$0xff]  ;;  %v13052_v40 = vld [vmem:[%s15079_s18 + $0x8b8] sm:$0xff] }
 0x718   : > { %9848 = vmatprep.subr.bf16.mxu0 %v13028_v34  ;;  %9930 = vmatprep.subr.bf16.mxu1 %v13030_v41  ;;  %v13097_v34 = vcombine.low %v10023_v21, %v10025_v22  ;;  %v13099_v41 = vcombine.low %v10024_v23, %v10026_v18  ;;  %v10031_v42 = vunpack.c.l.s8.bf16 %v13051_v43  ;;  %v10033_v48 = vunpack.c.l.s8.bf16 %v13052_v40 }
 0x719   : > { %v10032_v50 = vunpack.c.h.s8.bf16 %v13051_v43  ;;  %v10034_v38 = vunpack.c.h.s8.bf16 %v13052_v40  ;;  %v13063_v43 = vld [vmem:[%s15079_s18 + $0x910] sm:$0xff]  ;;  %v13064_v40 = vld [vmem:[%s15079_s18 + $0x918] sm:$0xff] }
 0x71a   : > { %v13105_v44 = vcombine.low %v10031_v42, %v10033_v48 }
 0x71b   : > { %9849 = vmatpush1.bf16.msra.mxu0 %v13027_v55  ;;  %9931 = vmatpush1.bf16.msra.mxu1 %v13029_v56  ;;  %v13054_v55 = vld [vmem:[%s15079_s18 + $0x8c8] sm:$0xff]  ;;  %v13101_v56 = vcombine.low %v10027_v33, %v10029_v37  ;;  %v13108_v9 = vcombine.high %v10032_v50, %v10034_v38  ;;  %v13107_v49 = vcombine.low %v10032_v50, %v10034_v38  ;;  %v10051_v33 = vunpack.c.l.s8.bf16 %v13061_v29 }
 0x71c   : > { %9850 = vmatprep.subr.bf16.mxu0 %v13032_v57  ;;  %9932 = vmatprep.subr.bf16.mxu1 %v13034_v59  ;;  %v13103_v57 = vcombine.low %v10028_v39, %v10030_v35  ;;  %v13106_v59 = vcombine.high %v10031_v42, %v10033_v48  ;;  %v10038_v53 = vunpack.c.h.s8.bf16 %v13054_v55  ;;  %v10052_v39 = vunpack.c.h.s8.bf16 %v13061_v29  ;;  %v13073_v29 = vld [vmem:[%s15079_s18 + $0x960] sm:$0xff] }
 0x71d   : > { %v10055_v42 = vunpack.c.l.s8.bf16 %v13063_v43  ;;  %v10057_v48 = vunpack.c.l.s8.bf16 %v13064_v40  ;;  %v10056_v50 = vunpack.c.h.s8.bf16 %v13063_v43  ;;  %v10058_v38 = vunpack.c.h.s8.bf16 %v13064_v40  ;;  %v13075_v43 = vld [vmem:[%s15079_s18 + $0x970] sm:$0xff]  ;;  %v13076_v40 = vld [vmem:[%s15079_s18 + $0x978] sm:$0xff] }
 0x71f   : > { %9851 = vmatpush1.bf16.msra.mxu0 %v13031_v60  ;;  %9933 = vmatpush1.bf16.msra.mxu1 %v13033_v6  ;;  %v10037_v60 = vunpack.c.l.s8.bf16 %v13054_v55  ;;  %v10036_v6 = vunpack.c.h.s8.bf16 %v13053_v46  ;;  %v13065_v46 = vld [vmem:[%s15079_s18 + $0x920] sm:$0xff]  ;;  %v13066_v55 = vld [vmem:[%s15079_s18 + $0x928] sm:$0xff] }
 0x720   : > { %13039 = vmatprep.subr.msk.bf16.mxu0 %vm5947_vm13, %v13036_v62  ;;  %13041 = vmatprep.subr.msk.bf16.mxu1 %vm5947_vm13, %v13038_v63  ;;  %v10041_v62 = vunpack.c.l.s8.bf16 %v13056_v61  ;;  %v10040_v63 = vunpack.c.h.s8.bf16 %v13055_v54  ;;  %v13067_v54 = vld [vmem:[%s15079_s18 + $0x930] sm:$0xff]  ;;  %v13068_v61 = vld [vmem:[%s15079_s18 + $0x938] sm:$0xff] }
 0x721   : > { %v13110_v1 = vcombine.high %v10035_v16, %v10037_v60  ;;  %v13111_v5 = vcombine.low %v10036_v6, %v10038_v53 }
 0x722   : > { %v13114_v7 = vcombine.high %v10039_v36, %v10041_v62  ;;  %v13116_v12 = vcombine.high %v10040_v63, %v10042_v45  ;;  %v13115_v21 = vcombine.low %v10040_v63, %v10042_v45  ;;  %v10064_v63 = vunpack.c.h.s8.bf16 %v13067_v54 }
 0x723   : > { %9853 = vmatpush1.bf16.msra.mxu0 %v9788_v3  ;;  %9935 = vmatpush1.bf16.msra.mxu1 %v9794_v47  ;;  %v13112_v3 = vcombine.high %v10036_v6, %v10038_v53  ;;  %v13057_v47 = vld [vmem:[%s15079_s18 + $0x8e0] sm:$0xff]  ;;  %v10060_v6 = vunpack.c.h.s8.bf16 %v13065_v46  ;;  %v10062_v53 = vunpack.c.h.s8.bf16 %v13066_v55  ;;  %v10066_v45 = vunpack.c.h.s8.bf16 %v13068_v61 }
 0x724   : > { %10596 = vmatprep.subr.bf16.mxu0 %v13090_v0  ;;  %10678 = vmatprep.subr.bf16.mxu1 %v13092_v4  ;;  %v13058_v0 = vld [vmem:[%s15079_s18 + $0x8e8] sm:$0xff]  ;;  %v13109_v4 = vcombine.low %v10035_v16, %v10037_v60  ;;  %v10043_v58 = vunpack.c.l.s8.bf16 %v13057_v47  ;;  %v10044_v15 = vunpack.c.h.s8.bf16 %v13057_v47  ;;  %v10059_v16 = vunpack.c.l.s8.bf16 %v13065_v46  ;;  %v13069_v47 = vld [vmem:[%s15079_s18 + $0x940] sm:$0xff] }
 0x725   : > { %v10045_v13 = vunpack.c.l.s8.bf16 %v13058_v0  ;;  %v10046_v8 = vunpack.c.h.s8.bf16 %v13058_v0  ;;  %v10061_v60 = vunpack.c.l.s8.bf16 %v13066_v55  ;;  %v13070_v0 = vld [vmem:[%s15079_s18 + $0x948] sm:$0xff]  ;;  %v13077_v46 = vld [vmem:[%s15079_s18 + $0x980] sm:$0xff] }
 0x726   : > { %13040 = vmatmul.mubr.msk.bf16.vlgmr.msra.gmra.mrb[0].mxu0 %vm5943_vm14, %v9331_v14  ;;  %13042 = vmatmul.mubr.msk.bf16.vlgmr.msra.gmra.mrb[0].mxu1 %vm5943_vm14, %v9331_v14  ;;  %v13059_v14 = vld [vmem:[%s15079_s18 + $0x8f0] sm:$0xff]  ;;  %v13078_v55 = vld [vmem:[%s15079_s18 + $0x988] sm:$0xff] }
 0x727   : > { %10597 = vmatpush1.bf16.msra.mxu0 %v13089_v17  ;;  %10679 = vmatpush1.bf16.msra.mxu1 %v13091_v20  ;;  %v13060_v17 = vld [vmem:[%s15079_s18 + $0x8f8] sm:$0xff]  ;;  %v13113_v20 = vcombine.low %v10039_v36, %v10041_v62  ;;  %v10047_v22 = vunpack.c.l.s8.bf16 %v13059_v14  ;;  %v10048_v18 = vunpack.c.h.s8.bf16 %v13059_v14  ;;  %v13120_v25 = vcombine.high %v10044_v15, %v10046_v8  ;;  %v13071_v14 = vld [vmem:[%s15079_s18 + $0x950] sm:$0xff] }
 0x728   : > { %10598 = vmatprep.subr.bf16.mxu0 %v13094_v24  ;;  %10680 = vmatprep.subr.bf16.mxu1 %v13096_v26  ;;  %v10049_v23 = vunpack.c.l.s8.bf16 %v13060_v17  ;;  %v10050_v24 = vunpack.c.h.s8.bf16 %v13060_v17  ;;  %v13118_v26 = vcombine.high %v10043_v58, %v10045_v13  ;;  %v10063_v36 = vunpack.c.l.s8.bf16 %v13067_v54  ;;  %v13072_v17 = vld [vmem:[%s15079_s18 + $0x958] sm:$0xff]  ;;  %v13079_v54 = vld [vmem:[%s15079_s18 + $0x990] sm:$0xff] }
 0x729   : > { %10628 = vmatprep.mubr.bf16.mxu0 %v10127_v30  ;;  %10710 = vmatprep.mubr.bf16.mxu1 %v10127_v30  ;;  %v13062_v30 = vld [vmem:[%s15079_s18 + $0x908] sm:$0xff]  ;;  %v10065_v62 = vunpack.c.l.s8.bf16 %v13068_v61  ;;  %v13080_v61 = vld [vmem:[%s15079_s18 + $0x998] sm:$0xff] }
 0x72a   : > { %v10053_v37 = vunpack.c.l.s8.bf16 %v13062_v30  ;;  %v10054_v35 = vunpack.c.h.s8.bf16 %v13062_v30  ;;  %v13074_v30 = vld [vmem:[%s15079_s18 + $0x968] sm:$0xff] }
 0x72b   : > { %10599 = vmatpush1.bf16.msra.mxu0 %v13093_v11  ;;  %10681 = vmatpush1.bf16.msra.mxu1 %v13095_v31  ;;  %v13117_v11 = vcombine.low %v10043_v58, %v10045_v13  ;;  %v13119_v31 = vcombine.low %v10044_v15, %v10046_v8  ;;  %v10067_v58 = vunpack.c.l.s8.bf16 %v13069_v47  ;;  %v10069_v13 = vunpack.c.l.s8.bf16 %v13070_v0 }
 0x72c   : > { %10600 = vmatprep.subr.bf16.mxu0 %v13098_v28  ;;  %10682 = vmatprep.subr.bf16.mxu1 %v13100_v52  ;;  %v13122_v28 = vcombine.high %v10047_v22, %v10049_v23  ;;  %v13124_v52 = vcombine.high %v10048_v18, %v10050_v24  ;;  %v10068_v15 = vunpack.c.h.s8.bf16 %v13069_v47  ;;  %v10070_v8 = vunpack.c.h.s8.bf16 %v13070_v0  ;;  %v13081_v0 = vld [vmem:[%s15079_s18 + $0x9a0] sm:$0xff] }
 0x72f   : > { %10601 = vmatpush1.bf16.msra.mxu0 %v13097_v34  ;;  %10683 = vmatpush1.bf16.msra.mxu1 %v13099_v41  ;;  %v13121_v34 = vcombine.low %v10047_v22, %v10049_v23  ;;  %v13123_v41 = vcombine.low %v10048_v18, %v10050_v24  ;;  %v10071_v22 = vunpack.c.l.s8.bf16 %v13071_v14  ;;  %v10073_v23 = vunpack.c.l.s8.bf16 %v13072_v17 }
 0x730   : > { %10602 = vmatprep.subr.bf16.mxu0 %v13102_v19  ;;  %10684 = vmatprep.subr.bf16.mxu1 %v13104_v51  ;;  %v13126_v19 = vcombine.high %v10051_v33, %v10053_v37  ;;  %v13128_v51 = vcombine.high %v10052_v39, %v10054_v35  ;;  %v10072_v18 = vunpack.c.h.s8.bf16 %v13071_v14  ;;  %v10074_v24 = vunpack.c.h.s8.bf16 %v13072_v17  ;;  %v13083_v14 = vld [vmem:[%s15079_s18 + $0x9b0] sm:$0xff]  ;;  %v13084_v17 = vld [vmem:[%s15079_s18 + $0x9b8] sm:$0xff] }
 0x733   : > { %10603 = vmatpush1.bf16.msra.mxu0 %v13101_v56  ;;  %10685 = vmatpush1.bf16.msra.mxu1 %v13103_v57  ;;  %v13125_v56 = vcombine.low %v10051_v33, %v10053_v37  ;;  %v13127_v57 = vcombine.low %v10052_v39, %v10054_v35  ;;  %v10075_v33 = vunpack.c.l.s8.bf16 %v13073_v29  ;;  %v10077_v37 = vunpack.c.l.s8.bf16 %v13074_v30 }
 0x734   : > { %10604 = vmatprep.subr.bf16.mxu0 %v13106_v59  ;;  %10686 = vmatprep.subr.bf16.mxu1 %v13108_v9  ;;  %v13130_v59 = vcombine.high %v10055_v42, %v10057_v48  ;;  %v13132_v9 = vcombine.high %v10056_v50, %v10058_v38  ;;  %v10076_v39 = vunpack.c.h.s8.bf16 %v13073_v29  ;;  %v10078_v35 = vunpack.c.h.s8.bf16 %v13074_v30  ;;  %v13085_v29 = vld [vmem:[%s15079_s18 + $0x9c0] sm:$0xff]  ;;  %v13086_v30 = vld [vmem:[%s15079_s18 + $0x9c8] sm:$0xff] }
 0x737   : > { %10605 = vmatpush1.bf16.msra.mxu0 %v13105_v44  ;;  %10687 = vmatpush1.bf16.msra.mxu1 %v13107_v49  ;;  %v13129_v44 = vcombine.low %v10055_v42, %v10057_v48  ;;  %v13131_v49 = vcombine.low %v10056_v50, %v10058_v38  ;;  %v10079_v42 = vunpack.c.l.s8.bf16 %v13075_v43  ;;  %v10081_v48 = vunpack.c.l.s8.bf16 %v13076_v40 }
 0x738   : > { %10606 = vmatprep.subr.bf16.mxu0 %v13110_v1  ;;  %10688 = vmatprep.subr.bf16.mxu1 %v13112_v3  ;;  %v13134_v1 = vcombine.high %v10059_v16, %v10061_v60  ;;  %v13136_v3 = vcombine.high %v10060_v6, %v10062_v53  ;;  %v10080_v50 = vunpack.c.h.s8.bf16 %v13075_v43  ;;  %v10082_v38 = vunpack.c.h.s8.bf16 %v13076_v40 }
 0x739   : > { %v10102_v43 = vunpack.c.h.s8.bf16 %v13086_v30 }
 0x73b   : > { %10607 = vmatpush1.bf16.msra.mxu0 %v13109_v4  ;;  %10689 = vmatpush1.bf16.msra.mxu1 %v13111_v5  ;;  %v13133_v4 = vcombine.low %v10059_v16, %v10061_v60  ;;  %v13135_v5 = vcombine.low %v10060_v6, %v10062_v53  ;;  %v10083_v16 = vunpack.c.l.s8.bf16 %v13077_v46  ;;  %v10085_v60 = vunpack.c.l.s8.bf16 %v13078_v55 }
 0x73c   : > { %10608 = vmatprep.subr.bf16.mxu0 %v13114_v7  ;;  %10690 = vmatprep.subr.bf16.mxu1 %v13116_v12  ;;  %v13138_v7 = vcombine.high %v10063_v36, %v10065_v62  ;;  %v13140_v12 = vcombine.high %v10064_v63, %v10066_v45  ;;  %v10084_v6 = vunpack.c.h.s8.bf16 %v13077_v46  ;;  %v10086_v53 = vunpack.c.h.s8.bf16 %v13078_v55 }
 0x73e   : > { %v13160_v47 = vcombine.high %v10084_v6, %v10086_v53 }
 0x73f   : > { %10609 = vmatpush1.bf16.msra.mxu0 %v13113_v20  ;;  %10691 = vmatpush1.bf16.msra.mxu1 %v13115_v21  ;;  %v13137_v20 = vcombine.low %v10063_v36, %v10065_v62  ;;  %v13139_v21 = vcombine.low %v10064_v63, %v10066_v45  ;;  %v13155_v36 = vcombine.low %v10080_v50, %v10082_v38  ;;  %v10087_v62 = vunpack.c.l.s8.bf16 %v13079_v54 }
 0x740   : > { %10610 = vmatprep.subr.bf16.mxu0 %v13118_v26  ;;  %10692 = vmatprep.subr.bf16.mxu1 %v13120_v25  ;;  %v13142_v26 = vcombine.high %v10067_v58, %v10069_v13  ;;  %v13144_v25 = vcombine.high %v10068_v15, %v10070_v8  ;;  %v10089_v63 = vunpack.c.l.s8.bf16 %v13080_v61  ;;  %v10088_v45 = vunpack.c.h.s8.bf16 %v13079_v54  ;;  %v13188_v54 = vld [vmem:[%s15079_s18 + $0x9f0] sm:$0xff] }
 0x743   : > { %10611 = vmatpush1.bf16.msra.mxu0 %v13117_v11  ;;  %10693 = vmatpush1.bf16.msra.mxu1 %v13119_v31  ;;  %v13141_v11 = vcombine.low %v10067_v58, %v10069_v13  ;;  %v13143_v31 = vcombine.low %v10068_v15, %v10070_v8  ;;  %v10091_v58 = vunpack.c.l.s8.bf16 %v13081_v0  ;;  %v10092_v15 = vunpack.c.h.s8.bf16 %v13081_v0  ;;  %v13189_v0 = vld [vmem:[%s15079_s18 + $0x9f8] sm:$0xff] }
 0x744   : > { %10612 = vmatprep.subr.bf16.mxu0 %v13122_v28  ;;  %10694 = vmatprep.subr.bf16.mxu1 %v13124_v52  ;;  %v13146_v28 = vcombine.high %v10071_v22, %v10073_v23  ;;  %v13148_v52 = vcombine.high %v10072_v18, %v10074_v24 }
 0x747   : > { %10613 = vmatpush1.bf16.msra.mxu0 %v13121_v34  ;;  %10695 = vmatpush1.bf16.msra.mxu1 %v13123_v41  ;;  %v13145_v34 = vcombine.low %v10071_v22, %v10073_v23  ;;  %v13147_v41 = vcombine.low %v10072_v18, %v10074_v24  ;;  %v10095_v22 = vunpack.c.l.s8.bf16 %v13083_v14  ;;  %v10097_v23 = vunpack.c.l.s8.bf16 %v13084_v17 }
 0x748   : > { %10614 = vmatprep.subr.bf16.mxu0 %v13126_v19  ;;  %10696 = vmatprep.subr.bf16.mxu1 %v13128_v51  ;;  %v13150_v19 = vcombine.high %v10075_v33, %v10077_v37  ;;  %v13152_v51 = vcombine.high %v10076_v39, %v10078_v35  ;;  %v10096_v18 = vunpack.c.h.s8.bf16 %v13083_v14  ;;  %v10098_v24 = vunpack.c.h.s8.bf16 %v13084_v17 }
 0x74b   : > { %10615 = vmatpush1.bf16.msra.mxu0 %v13125_v56  ;;  %10697 = vmatpush1.bf16.msra.mxu1 %v13127_v57  ;;  %v13149_v56 = vcombine.low %v10075_v33, %v10077_v37  ;;  %v13151_v57 = vcombine.low %v10076_v39, %v10078_v35  ;;  %v13087_v33 = vld [vmem:[%s15079_s18 + $0x9d0] sm:$0x55]  ;;  %v10099_v37 = vunpack.c.l.s8.bf16 %v13085_v29  ;;  %v10101_v39 = vunpack.c.l.s8.bf16 %v13086_v30 }
 0x74c   : > { %10616 = vmatprep.subr.bf16.mxu0 %v13130_v59  ;;  %10698 = vmatprep.subr.bf16.mxu1 %v13132_v9  ;;  %v13154_v59 = vcombine.high %v10079_v42, %v10081_v48  ;;  %v13156_v9 = vcombine.high %v10080_v50, %v10082_v38  ;;  %v10100_v35 = vunpack.c.h.s8.bf16 %v13085_v29  ;;  %v10103_v40 = vunpack.c.l.s8.bf16 %v13087_v33  ;;  %v13185_v38 = vld [vmem:[%s15079_s18 + $0x9d8] sm:$0xff] }
 0x74e   : > { %v13176_v50 = vcombine.high %v10100_v35, %v10102_v43  ;;  %v13175_v46 = vcombine.low %v10100_v35, %v10102_v43  ;;  %v13177_v55 = vcombine.low %v10103_v40, %v10103_v40 }
 0x74f   : > { %10617 = vmatpush1.bf16.msra.mxu0 %v13129_v44  ;;  %10699 = vmatpush1.bf16.msra.mxu1 %v13131_v49  ;;  %v16060_v44 = vrot.slane %v16011_v10, %v15645_v32  ;;  %v13153_v49 = vcombine.low %v10079_v42, %v10081_v48  ;;  %v13157_v10 = vcombine.low %v10083_v16, %v10085_v60 }
 0x750   : > { %10618 = vmatprep.subr.bf16.mxu0 %v13134_v1  ;;  %10700 = vmatprep.subr.bf16.mxu1 %v13136_v3  ;;  %v10090_v1 = vunpack.c.h.s8.bf16 %v13080_v61  ;;  %v13158_v3 = vcombine.high %v10083_v16, %v10085_v60  ;;  %v13171_v42 = vcombine.low %v10096_v18, %v10098_v24  ;;  %v13174_v48 = vcombine.high %v10099_v37, %v10101_v39  ;;  %v16077_v61 = vld.sshfl [vmem:[#allocation2 + $0x15] sm:$0x13 pattern:$0x75316420] }
 0x751   : > { %v13178_v60 = vcombine.high %v10103_v40, %v10103_v40 }
 0x753   : > { %10619 = vmatpush1.bf16.msra.mxu0 %v13133_v4  ;;  %10701 = vmatpush1.bf16.msra.mxu1 %v13135_v5  ;;  %v13082_v4 = vld [vmem:[%s15079_s18 + $0x9a8] sm:$0xff]  ;;  %v13159_v5 = vcombine.low %v10084_v6, %v10086_v53 }
 0x754   : > { %10620 = vmatprep.subr.bf16.mxu0 %v13138_v7  ;;  %10702 = vmatprep.subr.bf16.mxu1 %v13140_v12  ;;  %v13162_v7 = vcombine.high %v10087_v62, %v10089_v63  ;;  %v13164_v12 = vcombine.high %v10088_v45, %v10090_v1  ;;  %v10093_v13 = vunpack.c.l.s8.bf16 %v13082_v4  ;;  %v10094_v8 = vunpack.c.h.s8.bf16 %v13082_v4  ;;  %v13187_v53 = vld [vmem:[%s15079_s18 + $0x9e8] sm:$0xff]  ;;  %v13190_v4 = vld [vmem:[%s15079_s18 + $0xa00] sm:$0xff] }
 0x757   : > { %10621 = vmatpush1.bf16.msra.mxu0 %v13137_v20  ;;  %10703 = vmatpush1.bf16.msra.mxu1 %v13139_v21  ;;  %v13161_v20 = vcombine.low %v10087_v62, %v10089_v63  ;;  %v13163_v21 = vcombine.low %v10088_v45, %v10090_v1  ;;  %v10816_v45 = vunpack.c.l.s8.bf16 %v13187_v53  ;;  %v10818_v1 = vunpack.c.l.s8.bf16 %v13188_v54 }
 0x758   : > { %10622 = vmatprep.subr.bf16.mxu0 %v13142_v26  ;;  %10704 = vmatprep.subr.bf16.mxu1 %v13144_v25  ;;  %v13166_v26 = vcombine.high %v10091_v58, %v10093_v13  ;;  %v13168_v25 = vcombine.high %v10092_v15, %v10094_v8 }
 0x759   : > { %v13236_v14 = vcombine.high %v10816_v45, %v10818_v1 }
 0x75b   : > { %10623 = vmatpush1.bf16.msra.mxu0 %v13141_v11  ;;  %10705 = vmatpush1.bf16.msra.mxu1 %v13143_v31  ;;  %v13165_v11 = vcombine.low %v10091_v58, %v10093_v13  ;;  %v13167_v31 = vcombine.low %v10092_v15, %v10094_v8  ;;  %v10820_v58 = vunpack.c.l.s8.bf16 %v13189_v0  ;;  %v10822_v13 = vunpack.c.l.s8.bf16 %v13190_v4 }
 0x75c   : > { %10624 = vmatprep.subr.bf16.mxu0 %v13146_v28  ;;  %10706 = vmatprep.subr.bf16.mxu1 %v13148_v52  ;;  %v13170_v28 = vcombine.high %v10095_v22, %v10097_v23  ;;  %v13172_v52 = vcombine.high %v10096_v18, %v10098_v24  ;;  %v10821_v15 = vunpack.c.h.s8.bf16 %v13189_v0  ;;  %v10823_v8 = vunpack.c.h.s8.bf16 %v13190_v4 }
 0x75d   : > { %v13240_v18 = vcombine.high %v10820_v58, %v10822_v13 }
 0x75e   : > { %v13242_v24 = vcombine.high %v10821_v15, %v10823_v8 }
 0x75f   : > { %10625 = vmatpush1.bf16.msra.mxu0 %v13145_v34  ;;  %10707 = vmatpush1.bf16.msra.mxu1 %v13147_v41  ;;  %v10104_v34 = vunpack.c.h.s8.bf16 %v13087_v33  ;;  %v13169_v41 = vcombine.low %v10095_v22, %v10097_v23 }
 0x760   : > { %10626 = vmatprep.subr.bf16.mxu0 %v13150_v19  ;;  %10708 = vmatprep.subr.bf16.mxu1 %v13152_v51  ;;  %v13186_v19 = vld [vmem:[%s15079_s18 + $0x9e0] sm:$0xff]  ;;  %v13173_v51 = vcombine.low %v10099_v37, %v10101_v39 }
 0x761   : > { %v10815_v16 = vunpack.c.h.s8.bf16 %v13186_v19  ;;  %v13180_v6 = vcombine.high %v10104_v34, %v10104_v34 }
 0x763   : > { %10627 = vmatpush1.bf16.msra.mxu0 %v13149_v56  ;;  %10709 = vmatpush1.bf16.msra.mxu1 %v13151_v57  ;;  %v13179_v56 = vcombine.low %v10104_v34, %v10104_v34  ;;  %v10812_v57 = vunpack.c.l.s8.bf16 %v13185_v38  ;;  %v13195_v34 = vld [vmem:[%s15079_s18 + $0xa28] sm:$0xff] }
 0x764   : > { %10637 = vmatprep.subr.bf16.mxu0 %v13154_v59  ;;  %10719 = vmatprep.subr.bf16.mxu1 %v13156_v9  ;;  %v10814_v59 = vunpack.c.l.s8.bf16 %v13186_v19  ;;  %v10813_v9 = vunpack.c.h.s8.bf16 %v13185_v38  ;;  %v10832_v19 = vunpack.c.l.s8.bf16 %v13195_v34 }
 0x766   : > { %10629 = vmatmul.mubr.bf16.vlgmr.msra.gmra.mrb[0].mxu0 %v16060_v44  ;;  %10711 = vmatmul.mubr.bf16.vlgmr.msra.gmra.mrb[0].mxu1 %v16060_v44  ;;  %v13232_v62 = vcombine.high %v10812_v57, %v10814_v59  ;;  %v13234_v63 = vcombine.high %v10813_v9, %v10815_v16 }
 0x767   : > { %10638 = vmatpush1.bf16.msra.mxu0 %v13153_v49  ;;  %10720 = vmatpush1.bf16.msra.mxu1 %v13155_v36  ;;  %v10585_v49 = vsel %vm5947_vm13, %v13177_v55, 0  ;;  %v10591_v36 = vsel %vm5947_vm13, %v13179_v56, 0  ;;  %v13197_v56 = vld [vmem:[%s15079_s18 + $0xa38] sm:$0xff] }
 0x768   : > { %10639 = vmatprep.subr.bf16.mxu0 %v13158_v3  ;;  %10721 = vmatprep.subr.bf16.mxu1 %v13160_v47  ;;  %v10817_v3 = vunpack.c.h.s8.bf16 %v13187_v53  ;;  %v10819_v47 = vunpack.c.h.s8.bf16 %v13188_v54 }
 0x769   : > { %10669 = vmatprep.mubr.bf16.mxu0 %v14229_v2  ;;  %10751 = vmatprep.mubr.bf16.mxu1 %v14229_v2 }
 0x76a   : > { %v13238_v17 = vcombine.high %v10817_v3, %v10819_v47  ;;  %v13237_v23 = vcombine.low %v10817_v3, %v10819_v47 }
 0x76b   : > { %10640 = vmatpush1.bf16.msra.mxu0 %v13157_v10  ;;  %10722 = vmatpush1.bf16.msra.mxu1 %v13159_v5  ;;  %v10910_v10 = vcombine.high %v16077_v61, %v16077_v61  ;;  %v10128_v5 = vcombine.high %v16060_v44, %v16060_v44  ;;  %v13235_v44 = vcombine.low %v10816_v45, %v10818_v1 }
 0x76c   : > { %10641 = vmatprep.subr.bf16.mxu0 %v13162_v7  ;;  %10723 = vmatprep.subr.bf16.mxu1 %v13164_v12  ;;  %v13231_v7 = vcombine.low %v10812_v57, %v10814_v59  ;;  %v13233_v12 = vcombine.low %v10813_v9, %v10815_v16  ;;  %v13198_v57 = vld [vmem:[%s15079_s18 + $0xa40] sm:$0xff]  ;;  %v10836_v16 = vunpack.c.l.s8.bf16 %v13197_v56 }
 0x76d   : > { %v10924_v22 = vrot.slane %v10910_v10, %v15645_v32  ;;  %v10839_v53 = vunpack.c.h.s8.bf16 %v13198_v57 }
 0x76f   : > { %10642 = vmatpush1.bf16.msra.mxu0 %v13161_v20  ;;  %10724 = vmatpush1.bf16.msra.mxu1 %v13163_v21  ;;  %v13191_v20 = vld [vmem:[%s15079_s18 + $0xa08] sm:$0xff]  ;;  %v13192_v21 = vld [vmem:[%s15079_s18 + $0xa10] sm:$0xff] }
 0x770   : > { %10643 = vmatprep.subr.bf16.mxu0 %v13166_v26  ;;  %10725 = vmatprep.subr.bf16.mxu1 %v13168_v25  ;;  %v10824_v26 = vunpack.c.l.s8.bf16 %v13191_v20  ;;  %v10826_v25 = vunpack.c.l.s8.bf16 %v13192_v21  ;;  %v10825_v29 = vunpack.c.h.s8.bf16 %v13191_v20  ;;  %v10827_v30 = vunpack.c.h.s8.bf16 %v13192_v21  ;;  %v13203_v21 = vld [vmem:[%s15079_s18 + $0xa68] sm:$0xff] }
 0x772   : > { %v13244_v43 = vcombine.high %v10824_v26, %v10826_v25  ;;  %v13246_v40 = vcombine.high %v10825_v29, %v10827_v30 }
 0x773   : > { %10644 = vmatpush1.bf16.msra.mxu0 %v13165_v11  ;;  %10726 = vmatpush1.bf16.msra.mxu1 %v13167_v31  ;;  %v13193_v11 = vld [vmem:[%s15079_s18 + $0xa18] sm:$0xff]  ;;  %v13194_v31 = vld [vmem:[%s15079_s18 + $0xa20] sm:$0xff] }
 0x774   : > { %10645 = vmatprep.subr.bf16.mxu0 %v13170_v28  ;;  %10727 = vmatprep.subr.bf16.mxu1 %v13172_v52  ;;  %v13239_v28 = vcombine.low %v10820_v58, %v10822_v13  ;;  %v13241_v52 = vcombine.low %v10821_v15, %v10823_v8  ;;  %v10828_v33 = vunpack.c.l.s8.bf16 %v13193_v11  ;;  %v10830_v37 = vunpack.c.l.s8.bf16 %v13194_v31 }
 0x775   : > { %v10829_v39 = vunpack.c.h.s8.bf16 %v13193_v11  ;;  %v10831_v35 = vunpack.c.h.s8.bf16 %v13194_v31  ;;  %v13205_v11 = vld [vmem:[%s15079_s18 + $0xa78] sm:$0xff]  ;;  %v13206_v31 = vld [vmem:[%s15079_s18 + $0xa80] sm:$0xff] }
 0x776   : > { %v13247_v59 = vcombine.low %v10828_v33, %v10830_v37 }
 0x777   : > { %10646 = vmatpush1.bf16.msra.mxu0 %v13169_v41  ;;  %10728 = vmatpush1.bf16.msra.mxu1 %v13171_v42  ;;  %v13196_v41 = vld [vmem:[%s15079_s18 + $0xa30] sm:$0xff]  ;;  %v13243_v42 = vcombine.low %v10824_v26, %v10826_v25  ;;  %v13250_v38 = vcombine.high %v10829_v39, %v10831_v35  ;;  %v13249_v9 = vcombine.low %v10829_v39, %v10831_v35  ;;  %v10848_v26 = vunpack.c.l.s8.bf16 %v13203_v21 }
 0x778   : > { %10647 = vmatprep.subr.bf16.mxu0 %v13174_v48  ;;  %10729 = vmatprep.subr.bf16.mxu1 %v13176_v50  ;;  %v13245_v48 = vcombine.low %v10825_v29, %v10827_v30  ;;  %v13248_v50 = vcombine.high %v10828_v33, %v10830_v37  ;;  %v10835_v55 = vunpack.c.h.s8.bf16 %v13196_v41  ;;  %v10849_v29 = vunpack.c.h.s8.bf16 %v13203_v21  ;;  %v13215_v21 = vld [vmem:[%s15079_s18 + $0xac8] sm:$0xff] }
 0x779   : > { %v10852_v33 = vunpack.c.l.s8.bf16 %v13205_v11  ;;  %v10854_v37 = vunpack.c.l.s8.bf16 %v13206_v31  ;;  %v10853_v39 = vunpack.c.h.s8.bf16 %v13205_v11  ;;  %v10855_v35 = vunpack.c.h.s8.bf16 %v13206_v31  ;;  %v13217_v11 = vld [vmem:[%s15079_s18 + $0xad8] sm:$0xff]  ;;  %v13218_v31 = vld [vmem:[%s15079_s18 + $0xae0] sm:$0xff] }
 0x77b   : > { %10648 = vmatpush1.bf16.msra.mxu0 %v13173_v51  ;;  %10730 = vmatpush1.bf16.msra.mxu1 %v13175_v46  ;;  %v10834_v51 = vunpack.c.l.s8.bf16 %v13196_v41  ;;  %v10833_v46 = vunpack.c.h.s8.bf16 %v13195_v34  ;;  %v13207_v34 = vld [vmem:[%s15079_s18 + $0xa88] sm:$0xff]  ;;  %v13208_v41 = vld [vmem:[%s15079_s18 + $0xa90] sm:$0xff] }
 0x77c   : > { %13181 = vmatprep.subr.msk.bf16.mxu0 %vm5947_vm13, %v13178_v60  ;;  %13183 = vmatprep.subr.msk.bf16.mxu1 %vm5947_vm13, %v13180_v6  ;;  %v10838_v60 = vunpack.c.l.s8.bf16 %v13198_v57  ;;  %v10837_v6 = vunpack.c.h.s8.bf16 %v13197_v56  ;;  %v13209_v56 = vld [vmem:[%s15079_s18 + $0xa98] sm:$0xff]  ;;  %v13210_v57 = vld [vmem:[%s15079_s18 + $0xaa0] sm:$0xff] }
 0x77d   : > { %v13252_v54 = vcombine.high %v10832_v19, %v10834_v51  ;;  %v13253_v45 = vcombine.low %v10833_v46, %v10835_v55 }
 0x77e   : > { %v13256_v1 = vcombine.high %v10836_v16, %v10838_v60  ;;  %v13258_v3 = vcombine.high %v10837_v6, %v10839_v53  ;;  %v13257_v58 = vcombine.low %v10837_v6, %v10839_v53  ;;  %v10861_v6 = vunpack.c.h.s8.bf16 %v13209_v56 }
 0x77f   : > { %10650 = vmatpush1.bf16.msra.mxu0 %v10585_v49  ;;  %10732 = vmatpush1.bf16.msra.mxu1 %v10591_v36  ;;  %v13254_v49 = vcombine.high %v10833_v46, %v10835_v55  ;;  %v13199_v36 = vld [vmem:[%s15079_s18 + $0xa48] sm:$0xff]  ;;  %v10857_v46 = vunpack.c.h.s8.bf16 %v13207_v34  ;;  %v10859_v55 = vunpack.c.h.s8.bf16 %v13208_v41  ;;  %v10863_v53 = vunpack.c.h.s8.bf16 %v13210_v57 }
 0x780   : > { %11393 = vmatprep.subr.bf16.mxu0 %v13232_v62  ;;  %11475 = vmatprep.subr.bf16.mxu1 %v13234_v63  ;;  %v13200_v62 = vld [vmem:[%s15079_s18 + $0xa50] sm:$0xff]  ;;  %v13251_v63 = vcombine.low %v10832_v19, %v10834_v51  ;;  %v10840_v47 = vunpack.c.l.s8.bf16 %v13199_v36  ;;  %v10841_v4 = vunpack.c.h.s8.bf16 %v13199_v36  ;;  %v10856_v19 = vunpack.c.l.s8.bf16 %v13207_v34  ;;  %v13211_v36 = vld [vmem:[%s15079_s18 + $0xaa8] sm:$0xff] }
 0x781   : > { %v10842_v0 = vunpack.c.l.s8.bf16 %v13200_v62  ;;  %v10843_v10 = vunpack.c.h.s8.bf16 %v13200_v62  ;;  %v10858_v51 = vunpack.c.l.s8.bf16 %v13208_v41  ;;  %v13212_v62 = vld [vmem:[%s15079_s18 + $0xab0] sm:$0xff]  ;;  %v13219_v34 = vld [vmem:[%s15079_s18 + $0xae8] sm:$0xff] }
 0x782   : > { %13182 = vmatmul.mubr.msk.bf16.vlgmr.msra.gmra.mrb[0].mxu0 %vm5943_vm14, %v10128_v5  ;;  %13184 = vmatmul.mubr.msk.bf16.vlgmr.msra.gmra.mrb[0].mxu1 %vm5943_vm14, %v10128_v5  ;;  %v13201_v5 = vld [vmem:[%s15079_s18 + $0xa58] sm:$0xff]  ;;  %v13220_v41 = vld [vmem:[%s15079_s18 + $0xaf0] sm:$0xff] }
 0x783   : > { %11394 = vmatpush1.bf16.msra.mxu0 %v13231_v7  ;;  %11476 = vmatpush1.bf16.msra.mxu1 %v13233_v12  ;;  %v13202_v7 = vld [vmem:[%s15079_s18 + $0xa60] sm:$0xff]  ;;  %v13255_v12 = vcombine.low %v10836_v16, %v10838_v60  ;;  %v10844_v13 = vunpack.c.l.s8.bf16 %v13201_v5  ;;  %v10845_v8 = vunpack.c.h.s8.bf16 %v13201_v5  ;;  %v13262_v20 = vcombine.high %v10841_v4, %v10843_v10  ;;  %v13213_v5 = vld [vmem:[%s15079_s18 + $0xab8] sm:$0xff] }
 0x784   : > { %11395 = vmatprep.subr.bf16.mxu0 %v13236_v14  ;;  %11477 = vmatprep.subr.bf16.mxu1 %v13238_v17  ;;  %v10846_v15 = vunpack.c.l.s8.bf16 %v13202_v7  ;;  %v10847_v14 = vunpack.c.h.s8.bf16 %v13202_v7  ;;  %v13260_v17 = vcombine.high %v10840_v47, %v10842_v0  ;;  %v10860_v16 = vunpack.c.l.s8.bf16 %v13209_v56  ;;  %v13214_v7 = vld [vmem:[%s15079_s18 + $0xac0] sm:$0xff]  ;;  %v13221_v56 = vld [vmem:[%s15079_s18 + $0xaf8] sm:$0xff] }
 0x785   : > { %11425 = vmatprep.mubr.bf16.mxu0 %v10924_v22  ;;  %11507 = vmatprep.mubr.bf16.mxu1 %v10924_v22  ;;  %v13204_v22 = vld [vmem:[%s15079_s18 + $0xa70] sm:$0xff]  ;;  %v10862_v60 = vunpack.c.l.s8.bf16 %v13210_v57  ;;  %v13222_v57 = vld [vmem:[%s15079_s18 + $0xb00] sm:$0xff] }
 0x786   : > { %v10850_v25 = vunpack.c.l.s8.bf16 %v13204_v22  ;;  %v10851_v30 = vunpack.c.h.s8.bf16 %v13204_v22  ;;  %v13216_v22 = vld [vmem:[%s15079_s18 + $0xad0] sm:$0xff] }
 0x787   : > { %11396 = vmatpush1.bf16.msra.mxu0 %v13235_v44  ;;  %11478 = vmatpush1.bf16.msra.mxu1 %v13237_v23  ;;  %v13259_v44 = vcombine.low %v10840_v47, %v10842_v0  ;;  %v13261_v23 = vcombine.low %v10841_v4, %v10843_v10  ;;  %v10864_v47 = vunpack.c.l.s8.bf16 %v13211_v36  ;;  %v10866_v0 = vunpack.c.l.s8.bf16 %v13212_v62 }
 0x788   : > { %11397 = vmatprep.subr.bf16.mxu0 %v13240_v18  ;;  %11479 = vmatprep.subr.bf16.mxu1 %v13242_v24  ;;  %v13264_v18 = vcombine.high %v10844_v13, %v10846_v15  ;;  %v13266_v24 = vcombine.high %v10845_v8, %v10847_v14  ;;  %v10865_v4 = vunpack.c.h.s8.bf16 %v13211_v36  ;;  %v10867_v10 = vunpack.c.h.s8.bf16 %v13212_v62  ;;  %v13223_v62 = vld [vmem:[%s15079_s18 + $0xb08] sm:$0xff] }
 0x78b   : > { %11398 = vmatpush1.bf16.msra.mxu0 %v13239_v28  ;;  %11480 = vmatpush1.bf16.msra.mxu1 %v13241_v52  ;;  %v13263_v28 = vcombine.low %v10844_v13, %v10846_v15  ;;  %v13265_v52 = vcombine.low %v10845_v8, %v10847_v14  ;;  %v10868_v13 = vunpack.c.l.s8.bf16 %v13213_v5  ;;  %v10870_v15 = vunpack.c.l.s8.bf16 %v13214_v7 }
 0x78c   : > { %11399 = vmatprep.subr.bf16.mxu0 %v13244_v43  ;;  %11481 = vmatprep.subr.bf16.mxu1 %v13246_v40  ;;  %v13268_v43 = vcombine.high %v10848_v26, %v10850_v25  ;;  %v13270_v40 = vcombine.high %v10849_v29, %v10851_v30  ;;  %v10869_v8 = vunpack.c.h.s8.bf16 %v13213_v5  ;;  %v10871_v14 = vunpack.c.h.s8.bf16 %v13214_v7  ;;  %v13226_v5 = vld [vmem:[%s15079_s18 + $0xb20] sm:$0xff] }
 0x78f   : > { %11400 = vmatpush1.bf16.msra.mxu0 %v13243_v42  ;;  %11482 = vmatpush1.bf16.msra.mxu1 %v13245_v48  ;;  %v13267_v42 = vcombine.low %v10848_v26, %v10850_v25  ;;  %v13269_v48 = vcombine.low %v10849_v29, %v10851_v30  ;;  %v10872_v26 = vunpack.c.l.s8.bf16 %v13215_v21  ;;  %v10874_v25 = vunpack.c.l.s8.bf16 %v13216_v22 }
 0x790   : > { %11401 = vmatprep.subr.bf16.mxu0 %v13248_v50  ;;  %11483 = vmatprep.subr.bf16.mxu1 %v13250_v38  ;;  %v13272_v50 = vcombine.high %v10852_v33, %v10854_v37  ;;  %v13274_v38 = vcombine.high %v10853_v39, %v10855_v35  ;;  %v10873_v29 = vunpack.c.h.s8.bf16 %v13215_v21  ;;  %v10875_v30 = vunpack.c.h.s8.bf16 %v13216_v22  ;;  %v13228_v21 = vld [vmem:[%s15079_s18 + $0xb30] sm:$0xff] }
 0x793   : > { %11402 = vmatpush1.bf16.msra.mxu0 %v13247_v59  ;;  %11484 = vmatpush1.bf16.msra.mxu1 %v13249_v9  ;;  %v13271_v59 = vcombine.low %v10852_v33, %v10854_v37  ;;  %v13273_v9 = vcombine.low %v10853_v39, %v10855_v35  ;;  %v10876_v33 = vunpack.c.l.s8.bf16 %v13217_v11  ;;  %v10878_v37 = vunpack.c.l.s8.bf16 %v13218_v31 }
 0x794   : > { %11403 = vmatprep.subr.bf16.mxu0 %v13252_v54  ;;  %11485 = vmatprep.subr.bf16.mxu1 %v13254_v49  ;;  %v13276_v54 = vcombine.high %v10856_v19, %v10858_v51  ;;  %v13278_v49 = vcombine.high %v10857_v46, %v10859_v55  ;;  %v10877_v39 = vunpack.c.h.s8.bf16 %v13217_v11  ;;  %v10879_v35 = vunpack.c.h.s8.bf16 %v13218_v31 }
 0x797   : > { %11404 = vmatpush1.bf16.msra.mxu0 %v13251_v63  ;;  %11486 = vmatpush1.bf16.msra.mxu1 %v13253_v45  ;;  %v13275_v63 = vcombine.low %v10856_v19, %v10858_v51  ;;  %v13277_v45 = vcombine.low %v10857_v46, %v10859_v55  ;;  %v10880_v19 = vunpack.c.l.s8.bf16 %v13219_v34  ;;  %v10882_v51 = vunpack.c.l.s8.bf16 %v13220_v41 }
 0x798   : > { %11405 = vmatprep.subr.bf16.mxu0 %v13256_v1  ;;  %11487 = vmatprep.subr.bf16.mxu1 %v13258_v3  ;;  %v13280_v1 = vcombine.high %v10860_v16, %v10862_v60  ;;  %v13282_v3 = vcombine.high %v10861_v6, %v10863_v53  ;;  %v10881_v46 = vunpack.c.h.s8.bf16 %v13219_v34  ;;  %v10883_v55 = vunpack.c.h.s8.bf16 %v13220_v41 }
 0x79a   : > { %v13302_v36 = vcombine.high %v10881_v46, %v10883_v55 }
 0x79b   : > { %11406 = vmatpush1.bf16.msra.mxu0 %v13255_v12  ;;  %11488 = vmatpush1.bf16.msra.mxu1 %v13257_v58  ;;  %v13279_v12 = vcombine.low %v10860_v16, %v10862_v60  ;;  %v13281_v58 = vcombine.low %v10861_v6, %v10863_v53  ;;  %v13297_v16 = vcombine.low %v10877_v39, %v10879_v35  ;;  %v10884_v60 = vunpack.c.l.s8.bf16 %v13221_v56 }
 0x79c   : > { %11407 = vmatprep.subr.bf16.mxu0 %v13260_v17  ;;  %11489 = vmatprep.subr.bf16.mxu1 %v13262_v20  ;;  %v13284_v17 = vcombine.high %v10864_v47, %v10866_v0  ;;  %v13286_v20 = vcombine.high %v10865_v4, %v10867_v10  ;;  %v10886_v6 = vunpack.c.l.s8.bf16 %v13222_v57  ;;  %v10885_v53 = vunpack.c.h.s8.bf16 %v13221_v56  ;;  %v14137_v56 = vld [vmem:[%s15077_s17 + $0x8] sm:$0xff]  }
 0x79e   : > { %v13303_v7 = vcombine.low %v10884_v60, %v10886_v6 }
 0x79f   : > { %11408 = vmatpush1.bf16.msra.mxu0 %v13259_v44  ;;  %11490 = vmatpush1.bf16.msra.mxu1 %v13261_v23  ;;  %v13283_v44 = vcombine.low %v10864_v47, %v10866_v0  ;;  %v13285_v23 = vcombine.low %v10865_v4, %v10867_v10  ;;  %v10889_v0 = vunpack.c.h.s8.bf16 %v13223_v62  ;;  %v13225_v10 = vld [vmem:[%s15079_s18 + $0xb18] sm:$0xff] }
 0x7a0   : > { %11409 = vmatprep.subr.bf16.mxu0 %v13264_v18  ;;  %11491 = vmatprep.subr.bf16.mxu1 %v13266_v24  ;;  %v13288_v18 = vcombine.high %v10868_v13, %v10870_v15  ;;  %v13290_v24 = vcombine.high %v10869_v8, %v10871_v14 }
 0x7a3   : > { %11410 = vmatpush1.bf16.msra.mxu0 %v13263_v28  ;;  %11492 = vmatpush1.bf16.msra.mxu1 %v13265_v52  ;;  %v13287_v28 = vcombine.low %v10868_v13, %v10870_v15  ;;  %v13289_v52 = vcombine.low %v10869_v8, %v10871_v14  ;;  %v10894_v13 = vunpack.c.l.s8.bf16 %v13226_v5  ;;  %v10893_v15 = vunpack.c.h.s8.bf16 %v13225_v10 }
 0x7a4   : > { %11411 = vmatprep.subr.bf16.mxu0 %v13268_v43  ;;  %11493 = vmatprep.subr.bf16.mxu1 %v13270_v40  ;;  %v13292_v43 = vcombine.high %v10872_v26, %v10874_v25  ;;  %v13294_v40 = vcombine.high %v10873_v29, %v10875_v30  ;;  %v10895_v8 = vunpack.c.h.s8.bf16 %v13226_v5  ;;  %v14159_v5 = vld [vmem:[%s15077_s17 + $0x78] sm:$0xff]  }
 0x7a6   : > { %v13313_v11 = vcombine.low %v10893_v15, %v10895_v8 }
 0x7a7   : > { %11412 = vmatpush1.bf16.msra.mxu0 %v13267_v42  ;;  %11494 = vmatpush1.bf16.msra.mxu1 %v13269_v48  ;;  %v13291_v42 = vcombine.low %v10872_v26, %v10874_v25  ;;  %v13293_v48 = vcombine.low %v10873_v29, %v10875_v30  ;;  %v10899_v25 = vunpack.c.h.s8.bf16 %v13228_v21  ;;  %v13229_v29 = vld [vmem:[%s15079_s18 + $0xb38] sm:$0x55] }
 0x7a8   : > { %11413 = vmatprep.subr.bf16.mxu0 %v13272_v50  ;;  %11495 = vmatprep.subr.bf16.mxu1 %v13274_v38  ;;  %v13296_v50 = vcombine.high %v10876_v33, %v10878_v37  ;;  %v13298_v38 = vcombine.high %v10877_v39, %v10879_v35  ;;  %v10900_v31 = vunpack.c.l.s8.bf16 %v13229_v29 }
 0x7aa   : > { %v13320_v35 = vcombine.high %v10900_v31, %v10900_v31 }
 0x7ab   : > { %11414 = vmatpush1.bf16.msra.mxu0 %v13271_v59  ;;  %11496 = vmatpush1.bf16.msra.mxu1 %v13273_v9  ;;  %v16126_v59 = vrot.slane %v16077_v61, %v15645_v32  ;;  %v13295_v9 = vcombine.low %v10876_v33, %v10878_v37  ;;  %v13299_v32 = vcombine.low %v10880_v19, %v10882_v51  ;;  %v10901_v33 = vunpack.c.h.s8.bf16 %v13229_v29 }
 0x7ac   : > { %11415 = vmatprep.subr.bf16.mxu0 %v13276_v54  ;;  %11497 = vmatprep.subr.bf16.mxu1 %v13278_v49  ;;  %v10887_v54 = vunpack.c.h.s8.bf16 %v13222_v57  ;;  %v13300_v49 = vcombine.high %v10880_v19, %v10882_v51  ;;  %v13301_v61 = vcombine.low %v10881_v46, %v10883_v55  ;;  %v14133_v19 = vld [vmem:[%s15077_s17] sm:$0xff]   ;;  %v14135_v46 = vld [vmem:[%s15077_s17 + $0x48] sm:$0xff]  }
 0x7ad   : > { %v13321_v34 = vcombine.low %v10901_v33, %v10901_v33  ;;  %v14134_v51 = vld [vmem:[%s15077_s17 + $0x80] sm:$0xff]   ;;  %v14136_v55 = vld [vmem:[%s15077_s17 + $0xc8] sm:$0xff]  }
 0x7ae   : > { %v14138_v57 = vld [vmem:[%s15077_s17 + $0x88] sm:$0xff]  }
 0x7af   : > { %11416 = vmatpush1.bf16.msra.mxu0 %v13275_v63  ;;  %11498 = vmatpush1.bf16.msra.mxu1 %v13277_v45  ;;  %v13224_v63 = vld [vmem:[%s15079_s18 + $0xb10] sm:$0xff]  ;;  %v13304_v45 = vcombine.high %v10884_v60, %v10886_v6  ;;  %v14143_v6 = vld [vmem:[%s15077_s17 + $0x58] sm:$0xff]  }
 0x7b0   : > { %11417 = vmatprep.subr.bf16.mxu0 %v13280_v1  ;;  %11499 = vmatprep.subr.bf16.mxu1 %v13282_v3  ;;  %v13306_v1 = vcombine.high %v10885_v53, %v10887_v54  ;;  %v10888_v3 = vunpack.c.l.s8.bf16 %v13223_v62  ;;  %v10890_v47 = vunpack.c.l.s8.bf16 %v13224_v63  ;;  %v10891_v4 = vunpack.c.h.s8.bf16 %v13224_v63  ;;  %v14142_v60 = vld [vmem:[%s15077_s17 + $0x90] sm:$0xff]   ;;  %v14148_v62 = vld [vmem:[%s15077_s17 + $0xe0] sm:$0xff]  }
 0x7b1   : > { %v14149_v63 = vld [vmem:[%s15077_s17 + $0x20] sm:$0xff]  }
 0x7b2   : > { %v13308_v14 = vcombine.high %v10888_v3, %v10890_v47  ;;  %v13307_v22 = vcombine.low %v10888_v3, %v10890_v47  ;;  %v14154_v3 = vld [vmem:[%s15077_s17 + $0xa8] sm:$0xff]   ;;  %v14155_v47 = vld [vmem:[%s15077_s17 + $0x70] sm:$0xff]  }
 0x7b3   : > { %11418 = vmatpush1.bf16.msra.mxu0 %v13279_v12  ;;  %11500 = vmatpush1.bf16.msra.mxu1 %v13281_v58  ;;  %v13305_v12 = vcombine.low %v10885_v53, %v10887_v54  ;;  %v10892_v58 = vunpack.c.l.s8.bf16 %v13225_v10  ;;  %v14144_v53 = vld [vmem:[%s15077_s17 + $0xd8] sm:$0xff]   ;;  %v14158_v10 = vld [vmem:[%s15077_s17 + $0xb0] sm:$0xff]  }
 0x7b4   : > { %11419 = vmatprep.subr.bf16.mxu0 %v13284_v17  ;;  %11501 = vmatprep.subr.bf16.mxu1 %v13286_v20  ;;  %v13310_v17 = vcombine.high %v10889_v0, %v10891_v4  ;;  %v13227_v20 = vld [vmem:[%s15079_s18 + $0xb28] sm:$0xff]  ;;  %v14145_v54 = vld [vmem:[%s15077_s17 + $0x18] sm:$0xff]  }
 0x7b5   : > { %v10897_v26 = vunpack.c.h.s8.bf16 %v13227_v20  ;;  %v13311_v30 = vcombine.low %v10892_v58, %v10894_v13 }
 0x7b7   : > { %11420 = vmatpush1.bf16.msra.mxu0 %v13283_v44  ;;  %11502 = vmatpush1.bf16.msra.mxu1 %v13285_v23  ;;  %v13309_v44 = vcombine.low %v10889_v0, %v10891_v4  ;;  %v13314_v23 = vcombine.high %v10893_v15, %v10895_v8  ;;  %v13317_v39 = vcombine.low %v10897_v26, %v10899_v25  ;;  %v14156_v0 = vld [vmem:[%s15077_s17 + $0xf0] sm:$0xff]   ;;  %v11573_v15 = vsub.s32 2, %v15642_v27  ;;  %v11561_v8 = vld [vmem:[%s1919_s23] sm:$0xf] }
 0x7b8   : > { %11421 = vmatprep.subr.bf16.mxu0 %v13288_v18  ;;  %11503 = vmatprep.subr.bf16.mxu1 %v13290_v24  ;;  %v10896_v18 = vunpack.c.l.s8.bf16 %v13227_v20  ;;  %v10898_v24 = vunpack.c.l.s8.bf16 %v13228_v21  ;;  %v14157_v4 = vld [vmem:[%s15077_s17 + $0x30] sm:$0xff]  }
 0x7ba   : > { %v13315_v37 = vcombine.low %v10896_v18, %v10898_v24 }
 0x7bb   : > { %11422 = vmatpush1.bf16.msra.mxu0 %v13287_v28  ;;  %11504 = vmatpush1.bf16.msra.mxu1 %v13289_v52  ;;  %v13316_v28 = vcombine.high %v10896_v18, %v10898_v24  ;;  %v13318_v52 = vcombine.high %v10897_v26, %v10899_v25 }
 0x7bc   : > { %11423 = vmatprep.subr.bf16.mxu0 %v13292_v43  ;;  %11505 = vmatprep.subr.bf16.mxu1 %v13294_v40  ;;  %v13322_v43 = vcombine.high %v10901_v33, %v10901_v33  ;;  %v13319_v40 = vcombine.low %v10900_v31, %v10900_v31 }
 0x7be   : > { %v11382_v41 = vsel %vm5947_vm13, %v13319_v40, 0 }
 0x7bf   : > { %11424 = vmatpush1.bf16.msra.mxu0 %v13291_v42  ;;  %11506 = vmatpush1.bf16.msra.mxu1 %v13293_v48  ;;  %v11388_v42 = vsel %vm5947_vm13, %v13321_v34, 0  ;;  %v14131_v48 = vld [vmem:[%s15077_s17 + $0x40] sm:$0xff]  }
 0x7c0   : > { %11434 = vmatprep.subr.bf16.mxu0 %v13296_v50  ;;  %11516 = vmatprep.subr.bf16.mxu1 %v13298_v38  ;;  %v14132_v50 = vld [vmem:[%s15077_s17 + $0xc0] sm:$0xff]   ;;  %v10925_v38 = vcombine.high %v16126_v59, %v16126_v59 }
 0x7c2   : > { %11426 = vmatmul.mubr.bf16.vlgmr.msra.gmra.mrb[0].mxu0 %v16126_v59  ;;  %11508 = vmatmul.mubr.bf16.vlgmr.msra.gmra.mrb[0].mxu1 %v16126_v59  ;;  %v14139_v59 = vld [vmem:[%s15077_s17 + $0x50] sm:$0xff]  }
 0x7c3   : > { %11435 = vmatpush1.bf16.msra.mxu0 %v13295_v9  ;;  %11517 = vmatpush1.bf16.msra.mxu1 %v13297_v16  ;;  %v14140_v9 = vld [vmem:[%s15077_s17 + $0xd0] sm:$0xff]  }
 0x7c4   : > { %11436 = vmatprep.subr.bf16.mxu0 %v13300_v49  ;;  %11518 = vmatprep.subr.bf16.mxu1 %v13302_v36  ;;  %v14141_v16 = vld [vmem:[%s15077_s17 + $0x10] sm:$0xff]   ;;  %v14146_v49 = vld [vmem:[%s15077_s17 + $0x98] sm:$0xff]   ;;  %v14147_v36 = vld [vmem:[%s15077_s17 + $0x60] sm:$0xff]  }
 0x7c5   : > { %11466 = vmatprep.mubr.bf16.mxu0 %v14229_v2  ;;  %11548 = vmatprep.mubr.bf16.mxu1 %v14229_v2  ;;  %v13312_v2 = vcombine.high %v10892_v58, %v10894_v13  ;;  %v14162_v58 = vld [vmem:[%s15077_s17 + $0xb8] sm:$0xff]   ;;  %v11565_v13 = vsub.s32 0, %v15642_v27 }
 0x7c7   : > { %11437 = vmatpush1.bf16.msra.mxu0 %v13299_v32  ;;  %11519 = vmatpush1.bf16.msra.mxu1 %v13301_v61  ;;  %v14150_v32 = vld [vmem:[%s15077_s17 + $0xa0] sm:$0xff]   ;;  %v14151_v61 = vld [vmem:[%s15077_s17 + $0x68] sm:$0xff]   ;;  %v11566_v21 = vrot.slane %v11561_v8, %v11565_v13 }
 0x7c8   : > { %11438 = vmatprep.subr.bf16.mxu0 %v13304_v45  ;;  %11520 = vmatprep.subr.bf16.mxu1 %v13306_v1  ;;  %v14152_v45 = vld [vmem:[%s15077_s17 + $0xe8] sm:$0xff]  }
 0x7c9   : > { %v14153_v1 = vld [vmem:[%s15077_s17 + $0x28] sm:$0xff]  }
 0x7cb   : > { %11439 = vmatpush1.bf16.msra.mxu0 %v13303_v7  ;;  %11521 = vmatpush1.bf16.msra.mxu1 %v13305_v12  ;;  %v14160_v7 = vld [vmem:[%s15077_s17 + $0xf8] sm:$0xff]  }
 0x7cc   : > { %11440 = vmatprep.subr.bf16.mxu0 %v13308_v14  ;;  %11522 = vmatprep.subr.bf16.mxu1 %v13310_v17  ;;  %v14161_v12 = vld [vmem:[%s15077_s17 + $0x38] sm:$0xff]   ;;  %v11569_v14 = vsub.s32 1, %v15642_v27  ;;  %v11577_v17 = vsub.s32 3, %v15642_v27  ;;  %s16307_s17 = scalar_lea.vmem %s16288_s7, %s16313_s19 }
 0x7cd   : > { %v11587_v20 = vld [vmem:[%s16307_s17] sm:$0xf] }
 0x7ce   : > { %v11600_v18 = vrot.slane %v11587_v20, %v11573_v15  ;;  %v11596_v25 = vrot.slane %v11587_v20, %v11569_v14  ;;  %v11604_v29 = vrot.slane %v11587_v20, %v11577_v17 }
 0x7cf   : > { %11441 = vmatpush1.bf16.msra.mxu0 %v13307_v22  ;;  %11523 = vmatpush1.bf16.msra.mxu1 %v13309_v44  ;;  %v11574_v22 = vrot.slane %v11561_v8, %v11573_v15  ;;  %v11570_v44 = vrot.slane %v11561_v8, %v11569_v14  ;;  %v11982_v15 = vld [vmem:[%s16291_s10 + $0x40] sm:$0xff] (!%p13359_p11) }
 0x7d0   : > { %11442 = vmatprep.subr.bf16.mxu0 %v13312_v2  ;;  %11524 = vmatprep.subr.bf16.mxu1 %v13314_v23  ;;  %v11578_v2 = vrot.slane %v11561_v8, %v11577_v17  ;;  %v11592_v23 = vrot.slane %v11587_v20, %v11565_v13  ;;  %v11983_v8 = vld [vmem:[%s16291_s10 + $0x48] sm:$0xff] (!%p13359_p11)  ;;  %v11984_v17 = vld [vmem:[%s16291_s10 + $0x50] sm:$0xff] (!%p13359_p11)  ;;  %v11985_v20 = vld [vmem:[%s16291_s10 + $0x58] sm:$0xff] (!%p13359_p11) }
 0x7d1   : > { %v13746_v14 = vpack.c.bf16 (!%p13359_p11), %v11983_v8, %v11982_v15 }
 0x7d3   : > { %11443 = vmatpush1.bf16.msra.mxu0 %v13311_v30  ;;  %11525 = vmatpush1.bf16.msra.mxu1 %v13313_v11 }
 0x7d4   : > { %11444 = vmatprep.subr.bf16.mxu0 %v13316_v28  ;;  %11526 = vmatprep.subr.bf16.mxu1 %v13318_v52 }
 0x7d7   : > { %11445 = vmatpush1.bf16.msra.mxu0 %v13315_v37  ;;  %11527 = vmatpush1.bf16.msra.mxu1 %v13317_v39 }
 0x7d8   : > { %13323 = vmatprep.subr.msk.bf16.mxu0 %vm5947_vm13, %v13320_v35  ;;  %13325 = vmatprep.subr.msk.bf16.mxu1 %vm5947_vm13, %v13322_v43 }
 0x7db   : > { %11447 = vmatpush1.bf16.msra.mxu0 %v11382_v41  ;;  %11529 = vmatpush1.bf16.msra.mxu1 %v11388_v42 }
 0x7dc   : > { %13421 = vmatprep.subr.bf16.mxu0 %v14131_v48  ;;  %13443 = vmatprep.subr.bf16.mxu1 %v14132_v50 }
 0x7de   : > { %13324 = vmatmul.mubr.msk.bf16.vlgmr.msra.gmra.mrb[0].mxu0 %vm5943_vm14, %v10925_v38  ;;  %13326 = vmatmul.mubr.msk.bf16.vlgmr.msra.gmra.mrb[0].mxu1 %vm5943_vm14, %v10925_v38 }
 0x7df   : > { %13422 = vmatpush3.bf16.msra.mxu0 %v14133_v19  ;;  %13444 = vmatpush3.bf16.msra.mxu1 %v14134_v51 }
 0x7e0   : > { %13423 = vmatprep.subr.bf16.mxu0 %v14135_v46  ;;  %13445 = vmatprep.subr.bf16.mxu1 %v14136_v55 }
 0x7e3   : > { %13424 = vmatpush3.bf16.msra.mxu0 %v14137_v56  ;;  %13446 = vmatpush3.bf16.msra.mxu1 %v14138_v57 }
 0x7e4   : > { %13425 = vmatprep.subr.bf16.mxu0 %v14139_v59  ;;  %13447 = vmatprep.subr.bf16.mxu1 %v14140_v9 }
 0x7e7   : > { %13426 = vmatpush3.bf16.msra.mxu0 %v14141_v16  ;;  %13448 = vmatpush3.bf16.msra.mxu1 %v14142_v60 }
 0x7e8   : > { %13427 = vmatprep.subr.bf16.mxu0 %v14143_v6  ;;  %13449 = vmatprep.subr.bf16.mxu1 %v14144_v53 }
 0x7eb   : > { %13428 = vmatpush3.bf16.msra.mxu0 %v14145_v54  ;;  %13450 = vmatpush3.bf16.msra.mxu1 %v14146_v49  ;;  %v11617_v54 = vld [vmem:[#allocation3] sm:$0x3] }
 0x7ec   : > { %13429 = vmatprep.subr.bf16.mxu0 %v14147_v36  ;;  %13451 = vmatprep.subr.bf16.mxu1 %v14148_v62 }
 0x7ef   : > { %13430 = vmatpush3.bf16.msra.mxu0 %v14149_v63  ;;  %13452 = vmatpush3.bf16.msra.mxu1 %v14150_v32  ;;  %v11974_v32 = vld [vmem:[%s16291_s10] sm:$0xff] (!%p13359_p11) }
 0x7f0   : > { %13431 = vmatprep.subr.bf16.mxu0 %v14151_v61  ;;  %13453 = vmatprep.subr.bf16.mxu1 %v14152_v45  ;;  %v11975_v61 = vld [vmem:[%s16291_s10 + $0x8] sm:$0xff] (!%p13359_p11)  ;;  %v11976_v45 = vld [vmem:[%s16291_s10 + $0x10] sm:$0xff] (!%p13359_p11) }
 0x7f3   : > { %13432 = vmatpush3.bf16.msra.mxu0 %v14153_v1  ;;  %13454 = vmatpush3.bf16.msra.mxu1 %v14154_v3  ;;  %v14230_v1 = vmov (!%p13359_p11), 0.0|0.0   ;;  %v13734_v3 = vpack.c.bf16 (!%p13359_p11), %v11975_v61, %v11974_v32 }
 0x7f4   : > { %13433 = vmatprep.subr.bf16.mxu0 %v14155_v47  ;;  %13455 = vmatprep.subr.bf16.mxu1 %v14156_v0  ;;  %v11977_v47 = vld [vmem:[%s16291_s10 + $0x18] sm:$0xff] (!%p13359_p11)  ;;  %v14232_v0 = vmov (!%p13359_p11), 0.0  }
 0x7f7   : > { %13434 = vmatpush3.bf16.msra.mxu0 %v14157_v4  ;;  %13456 = vmatpush3.bf16.msra.mxu1 %v14158_v10  ;;  %v13737_v4 = vpack.c.bf16 (!%p13359_p11), %v11977_v47, %v11976_v45  ;;  %v11978_v10 = vld [vmem:[%s16291_s10 + $0x20] sm:$0xff] (!%p13359_p11) }
 0x7f8   : > { %13435 = vmatprep.subr.bf16.mxu0 %v14159_v5  ;;  %13457 = vmatprep.subr.bf16.mxu1 %v14160_v7  ;;  %v11979_v5 = vld [vmem:[%s16291_s10 + $0x28] sm:$0xff] (!%p13359_p11) }
 0x7f9   : > { %v13740_v7 = vpack.c.bf16 (!%p13359_p11), %v11979_v5, %v11978_v10 }
 0x7fb   : > { %13436 = vmatpush3.bf16.msra.mxu0 %v14161_v12  ;;  %13458 = vmatpush3.bf16.msra.mxu1 %v14162_v58  ;;  %v11980_v12 = vld [vmem:[%s16291_s10 + $0x30] sm:$0xff] (!%p13359_p11)  ;;  %v11981_v58 = vld [vmem:[%s16291_s10 + $0x38] sm:$0xff] (!%p13359_p11) }
 0x7fc   : > { %13733 = vmatprep.subr.bf16.mxu0 (!%p13359_p11), %v14230_v1  ;;  %v13743_v13 = vpack.c.bf16 (!%p13359_p11), %v11981_v58, %v11980_v12 }
 0x8b1   : > { %v11468_v24 = vpop.f32.mrb[0].mxu0  ;;  %v11550_v26 = vpop.f32.mrb[0].mxu1 }
 0x8b2   : > { %v11583_v30 = vmul.f32 %v11566_v21, %v11468_v24  ;;  %v11585_v11 = vmul.f32 %v11574_v22, %v11550_v26  ;;  %v11470_v31 = vpop.f32.mrb[1].mxu0  ;;  %v11552_v28 = vpop.f32.mrb[1].mxu1  ;;  %v13749_v21 = vpack.c.bf16 (!%p13359_p11), %v11985_v20, %v11984_v17  ;;  %v11986_v22 = vld [vmem:[%s16291_s10 + $0x60] sm:$0xff] (!%p13359_p11)  ;;  %v11988_v24 = vld [vmem:[%s16291_s10 + $0x70] sm:$0xff] (!%p13359_p11)  ;;  %v11989_v26 = vld [vmem:[%s16291_s10 + $0x78] sm:$0xff] (!%p13359_p11) }
 0x8b3   : > { %v11584_v27 = vmul.f32 %v11570_v44, %v11470_v31  ;;  %v11586_v52 = vmul.f32 %v11578_v2, %v11552_v28  ;;  %v11472_v33 = vpop.f32.mrb[2].mxu0  ;;  %v11554_v37 = vpop.f32.mrb[2].mxu1  ;;  %v11987_v44 = vld [vmem:[%s16291_s10 + $0x68] sm:$0xff] (!%p13359_p11) }
 0x8b4   : > { %v11609_v39 = vadd.f32 %v11592_v23, %v11583_v30  ;;  %v11611_v35 = vadd.f32 %v11600_v18, %v11585_v11  ;;  %v11473_v43 = vpop.f32.mrb[3].mxu0  ;;  %v11555_v40 = vpop.f32.mrb[3].mxu1  ;;  %v13752_v2 = vpack.c.bf16 (!%p13359_p11), %v11987_v44, %v11986_v22  ;;  %v13360_v18 = vld [vmem:[%s16290_s9] ss:$0 sm:$0xff] (!%p13359_p11) }
 0x8b5   : > { %v11610_v34 = vadd.f32 %v11596_v25, %v11584_v27  ;;  %v11612_v41 = vadd.f32 %v11604_v29, %v11586_v52  ;;  %v13755_v29 = vpack.c.bf16 (!%p13359_p11), %v11989_v26, %v11988_v24  ;;  %v13361_v11 = vld [vmem:[%s16292_s11] ss:$0 sm:$0xff] (!%p13359_p11) }
 0x8b6   : > { %v11613_v42 = vmax.f32 %v11609_v39, 0.0  ;;  %v11615_v48 = vmax.f32 %v11611_v35, 0.0 }
 0x8b7   : > { %v11614_v50 = vmax.f32 %v11610_v34, 0.0  ;;  %v11616_v38 = vmax.f32 %v11612_v41, 0.0 }
 0x8b8   : > { %v11618_v46 = vpack.c.bf16 %v11613_v42, %v11613_v42  ;;  %v11620_v55 = vpack.c.bf16 %v11615_v48, %v11615_v48 }
 0x8b9   : > { %v11619_v19 = vpack.c.bf16 %v11614_v50, %v11614_v50  ;;  %v11621_v51 = vpack.c.bf16 %v11616_v38, %v11616_v38 }
 0x8bb   : > { %11910 = vmatprep.mubr.bf16.mxu0 %v11619_v19  ;;  %11950 = vmatprep.mubr.bf16.mxu1 %v11621_v51 }
 0x8bc   : > { %11911 = vmatmul.mubr.bf16.vlgmr.msra.gmra.mrb[4].mxu0 %v11618_v46  ;;  %11951 = vmatmul.mubr.bf16.vlgmr.msra.gmra.mrb[4].mxu1 %v11620_v55 }
 0x8bd   : > { %13632 = vmatprep.mubr.msk.f32.mxu0 (!%p13359_p11), %vm14231_vm15, %v14232_v0  ;;  %13735 = vmatpush3.bf16.msra.mxu0 (!%p13359_p11), %v13734_v3 }
 0x8be   : > { %13736 = vmatprep.subr.bf16.mxu0 (!%p13359_p11), %v14230_v1 }
 0x8c1   : > { %13738 = vmatpush3.bf16.msra.mxu0 (!%p13359_p11), %v13737_v4 }
 0x8c2   : > { %13739 = vmatprep.subr.bf16.mxu0 (!%p13359_p11), %v14230_v1 }
 0x8c5   : > { %13741 = vmatpush3.bf16.msra.mxu0 (!%p13359_p11), %v13740_v7 }
 0x8c6   : > { %13742 = vmatprep.subr.bf16.mxu0 (!%p13359_p11), %v14230_v1 }
 0x8c9   : > { %13744 = vmatpush3.bf16.msra.mxu0 (!%p13359_p11), %v13743_v13 }
 0x8ca   : > { %13745 = vmatprep.subr.bf16.mxu0 (!%p13359_p11), %v14230_v1 }
 0x8cd   : > { %13747 = vmatpush3.bf16.msra.mxu0 (!%p13359_p11), %v13746_v14 }
 0x8ce   : > { %13748 = vmatprep.subr.bf16.mxu0 (!%p13359_p11), %v14230_v1 }
 0x8d1   : > { %13750 = vmatpush3.bf16.msra.mxu0 (!%p13359_p11), %v13749_v21 }
 0x8d2   : > { %13751 = vmatprep.subr.bf16.mxu0 (!%p13359_p11), %v14230_v1 }
 0x8d5   : > { %13753 = vmatpush3.bf16.msra.mxu0 (!%p13359_p11), %v13752_v2 }
 0x8d6   : > { %13754 = vmatprep.subr.bf16.mxu0 (!%p13359_p11), %v14230_v1 }
 0x8d9   : > { %13756 = vmatpush3.bf16.msra.mxu0 (!%p13359_p11), %v13755_v29 }
 0x98f   : > { %v13437_v56 = vpop.f32.mrb[4].mxu0  ;;  %v13459_v57 = vpop.f32.mrb[4].mxu1 }
 0x990   : > { %v13438_v59 = vpop.f32.mrb[5].mxu0  ;;  %v13460_v9 = vpop.f32.mrb[5].mxu1 }
 0x991   : > { %v13439_v16 = vadd.f32 %v13438_v59, %v13437_v56  ;;  %v13461_v60 = vadd.f32 %v13460_v9, %v13459_v57  ;;  %v13440_v6 = vpop.f32.mrb[6].mxu0  ;;  %v13462_v53 = vpop.f32.mrb[6].mxu1  ;;  %11963 = sbr.rel (%p13359_p11) target bundleno = 2682 (0xa7a), region = 114 }
 0x992   : > { %v13441_v49 = vpop.f32.mrb[7].mxu0  ;;  %v13463_v36 = vpop.f32.mrb[7].mxu1 }
 0x993   : > { %v11953_v62 = vadd.f32 %v13461_v60, %v13439_v16 }
 0x995   : > { %v11958_v63 = vadd.f32 %v11953_v62, %v11617_v54 }
 0x997   : > { %11959 = vst [vmem:[#allocation3] sm:$0x3] %v11958_v63 }
 0x99e   : > { %v11964_v23 = vld [vmem:[#allocation3] sm:$0x3] }
 0x99f   : > { %v11972_v25 = vadd.f32 %v13360_v18, %v11964_v23 }
 0x9a1   : > { %v11973_v30 = vmax.f32 %v11972_v25, 0.0 }
 0x9a3   : > { %13633 = vmatmul.mubr.f32.vlgmr.msra.gmra.mrb[0].mxu0 %v11973_v30 }
 0xa76   : > { %v12063_v31 = vpop.f32.mrb[0].mxu0 }
 0xa77   : > { %v12064_v28 = vadd.f32 %v13361_v11, %v12063_v31  ;;  %v13634_v27 = vpop.f32.mrb[1].mxu0 }
 0xa79   : > { %12067 = vst [vmem:[#allocation5] sm:$0x3] %v12064_v28 }
 0xa7a PF: > { %p13907_p12 = scmp.eq.s32.totalorder %s14315_s24, 1  ;;  %s14233_s26 = smov [#allocation5]  }
 0xa7b   : > { %s12075_s30 = sshll.u32 %s14233_s26, 4  ;;  %s12076_s30 = int_to_ptr.vmem [resolvable:$true] %s12075_s30 }
 0xa7c   : > { %s14163_s20 = scalar_lea.vmem %s12076_s30, 32  ;;  %p14170_p2 = scmp.lt.s32.totalorder %s12076_s30, %s12076_s30 }
 0xa7d   : > { %p14164_p13 = scmp.ne.s32.totalorder %s12076_s30, %s14163_s20  ;;  %p14171_p3 = scmp.lt.s32.totalorder %s14163_s20, %s14163_s20 }
 0xa7f   : > { %p14165_p0 = pnand %p14164_p13, %p13907_p12  ;;  %p14172_p4 = por %p14171_p3, %p14170_p2 }
 0xa81   : > { %p14166_p1 = pneg %p14165_p0 }
 0xa83   : > { %p14173_p5 = pnand %p14172_p4, %p14166_p1 }
 0xa85   : > { %14176 = shalt.err (!%p14173_p5)
}
 0xa86   : > { %s14177_s14 = scalar_lea.hbm %s16293_s12, 32 }
 0xa87   : > { %p14178_p6 = scmp.ne.s32.totalorder %s16293_s12, %s14177_s14  ;;  %p14183_p9 = scmp.lt.u32.totalorder %s14177_s14, %s16293_s12 }
 0xa89   : > { %p14179_p7 = pnand %p14178_p6, %p13907_p12 }
 0xa8b   : > { %p14180_p8 = pneg %p14179_p7 }
 0xa8d   : > { %p14185_p10 = pnand %p14183_p9, %p14180_p8 }
 0xa8f   : > { %14188 = shalt.err (!%p14185_p10)
}
 0xa90   : > { %13904 = dma.vmem_to_hbm [thread:$0]  (%p13907_p12), %s12076_s30, 32, %s16293_s12, [#allocation6]  }
 0xa91   : > { %14202 = dma.done.wait (%p13907_p12), [#allocation6], 32  }
 0xa92   : > { %14204 = vsyncadd (%p13907_p12), [#allocation6], 4294967264 }
 0xa93 PF: > { %s16308_s19 = sld [smem:[#allocation8_spill]]  ;;  %p20_p11 = scmp.ge.s32.totalorder %s14318_s25, 4  }
 0xa94   : > { %s16309_s21 = smov %s14211_s22  ;;  %s16311_s23 = smov %s14318_s25 }
 0xa95   :  { %22 = sbr.rel (!%p20_p11) target bundleno = 4 (0x4), region = 172 }
 0xa99   : > { %s16310_s22 = smov %s16308_s19 }
 0xa9c   :  { %12088 = vsyncpa [#allocation6], 1 }
 0xa9d   :  { %12090 = vsyncpa [#allocation6 + $0x1], 1 }

</bundles_post_ra>
